<compile_context>
chip_gen: v7x
topology: tpu7x:2x2x1
jax: 0.10.0
libtpu: 0.0.40
codegen_flags: <defaults>
</compile_context>

<pallas_src>
import math

import jax
import jax.numpy as jnp
from jax.experimental import pallas as pl
from jax.experimental.pallas import tpu as pltpu


# ----------------------------------------------------------------------------
# Pallas kernels
# ----------------------------------------------------------------------------
def _mm_bias_kernel(x_ref, w_ref, b_ref, o_ref):
    # (tm, K) @ (K, N) + (1, N)  -- bf16 operands, f32 accumulation.
    y = jnp.dot(x_ref[...], w_ref[...], preferred_element_type=jnp.float32)
    o_ref[...] = y + b_ref[...]


def _mm_bias_res_kernel(x_ref, w_ref, b_ref, r_ref, o_ref):
    # (tm, K) @ (K, N) + bias + residual, fused epilogue (convx6(...) + x).
    y = jnp.dot(x_ref[...], w_ref[...], preferred_element_type=jnp.float32)
    o_ref[...] = y + b_ref[...] + r_ref[...]


def _flash_attn_kernel(q_ref, k_ref, v_ref, o_ref, m_sc, l_sc, acc_sc):
    # softmax(Q K^T) V with online softmax over key tiles (grid axis 2).
    ki = pl.program_id(2)

    @pl.when(ki == 0)
    def _():
        m_sc[...] = jnp.full_like(m_sc, -jnp.inf)
        l_sc[...] = jnp.zeros_like(l_sc)
        acc_sc[...] = jnp.zeros_like(acc_sc)

    q = q_ref[0]                                    # (tq, Cq) bf16
    k = k_ref[0]                                    # (tk, Cq) bf16 (pre-folded)
    s = jax.lax.dot_general(                        # (tq, tk) f32 scores
        q, k, (((1,), (1,)), ((), ())),
        preferred_element_type=jnp.float32)

    m_prev = m_sc[...]
    m_new = jnp.maximum(m_prev, s.max(axis=-1, keepdims=True))
    alpha = jnp.exp(m_prev - m_new)
    p = jnp.exp(s - m_new)
    l_sc[...] = alpha * l_sc[...] + p.sum(axis=-1, keepdims=True)
    acc_sc[...] = alpha * acc_sc[...] + jnp.dot(
        p.astype(v_ref.dtype), v_ref[0], preferred_element_type=jnp.float32)
    m_sc[...] = m_new

    @pl.when(ki == pl.num_programs(2) - 1)
    def _():
        out = acc_sc[...] * pl.reciprocal(l_sc[...], approx=True)
        o_ref[...] = out[None].astype(o_ref.dtype)


# ----------------------------------------------------------------------------
# Pallas call wrappers
# ----------------------------------------------------------------------------
def _round_up(x, m):
    return ((x + m - 1) // m) * m


def conv1x1(x, w, b, residual=None, *, tm_cap=512):
    """(x @ w + b [+ residual]); x:(M,K) f32, w:(K,N) f32, b:(N,) f32.

    bf16 MXU operands, f32 accumulation/epilogue.  Rows are tiled with a large
    tile (cap 512) and padded to a tile multiple so the pipeline stays
    double-buffered for any M.
    """
    M, K = x.shape
    N = w.shape[1]
    tm = min(tm_cap, _round_up(M, 8))
    Mp = _round_up(M, tm)
    if Mp != M:
        x = jnp.pad(x, ((0, Mp - M), (0, 0)))
        if residual is not None:
            residual = jnp.pad(residual, ((0, Mp - M), (0, 0)))

    xb = x.astype(jnp.bfloat16)
    wb = w.astype(jnp.bfloat16)
    bb = b.reshape(1, N).astype(jnp.float32)

    in_specs = [
        pl.BlockSpec((tm, K), lambda i: (i, 0)),
        pl.BlockSpec((K, N), lambda i: (0, 0)),
        pl.BlockSpec((1, N), lambda i: (0, 0)),
    ]
    args = [xb, wb, bb]
    kernel = _mm_bias_kernel
    if residual is not None:
        in_specs.append(pl.BlockSpec((tm, N), lambda i: (i, 0)))
        args.append(residual.astype(jnp.float32))
        kernel = _mm_bias_res_kernel

    out = pl.pallas_call(
        kernel,
        out_shape=jax.ShapeDtypeStruct((Mp, N), jnp.float32),
        grid=(Mp // tm,),
        in_specs=in_specs,
        out_specs=pl.BlockSpec((tm, N), lambda i: (i, 0)),
        compiler_params=pltpu.CompilerParams(
            dimension_semantics=("parallel",)),
    )(*args)
    return out[:M] if Mp != M else out


def _flash_attention(q, k, v, *, tq_cap=128, tk_cap=128):
    """softmax(Q_rep @ K^T, axis=-1) @ V per batch.

    q:(B,M,Cq), k:(B,M,3*Cq), v:(B,M,Cv), all f32.  The reference repeats q 3x
    along channels; summing the three Cq-wide blocks of K instead is
    mathematically identical and 3x cheaper (done here in f32 before bf16 cast).
    """
    B, M, Cq = q.shape
    Cv = v.shape[-1]
    k_fold = k[..., :Cq] + k[..., Cq:2 * Cq] + k[..., 2 * Cq:]

    # TODO(synk): M not divisible by the tile cap falls back to one full-M tile
    # (legal via the full-dim BlockSpec exception) instead of a masked last tile.
    tq = tq_cap if M % tq_cap == 0 else M
    tk = tk_cap if M % tk_cap == 0 else M

    qb = q.astype(jnp.bfloat16)
    kb = k_fold.astype(jnp.bfloat16)
    vb = v.astype(jnp.bfloat16)

    return pl.pallas_call(
        _flash_attn_kernel,
        out_shape=jax.ShapeDtypeStruct((B, M, Cv), jnp.float32),
        grid_spec=pltpu.PrefetchScalarGridSpec(
            num_scalar_prefetch=0,
            grid=(B, M // tq, M // tk),
            in_specs=[
                pl.BlockSpec((1, tq, Cq), lambda b, qi, ki: (b, qi, 0)),
                pl.BlockSpec((1, tk, Cq), lambda b, qi, ki: (b, ki, 0)),
                pl.BlockSpec((1, tk, Cv), lambda b, qi, ki: (b, ki, 0)),
            ],
            out_specs=pl.BlockSpec((1, tq, Cv), lambda b, qi, ki: (b, qi, 0)),
            scratch_shapes=[
                pltpu.VMEM((tq, 1), jnp.float32),    # running max
                pltpu.VMEM((tq, 1), jnp.float32),    # running denominator
                pltpu.VMEM((tq, Cv), jnp.float32),   # output accumulator
            ],
        ),
        compiler_params=pltpu.CompilerParams(
            dimension_semantics=("parallel", "parallel", "arbitrary")),
    )(qb, kb, vb)


# ----------------------------------------------------------------------------
# Layout helpers + forward (single jit over the whole module)
# ----------------------------------------------------------------------------
def _to_mc(t):
    """NCDHW -> (N*D*H*W, C), channels lane-dense."""
    n, c, d, h, w = t.shape
    return jnp.transpose(t, (0, 2, 3, 4, 1)).reshape(n * d * h * w, c)


def _from_mc(t_mc, n, d, h, w):
    c = t_mc.shape[-1]
    return jnp.transpose(t_mc.reshape(n, d, h, w, c), (0, 4, 1, 2, 3))


@jax.jit
def _attention_forward(params, context, h0, h1, x):
    B, _, D, H, W = x.shape
    M = D * H * W

    ctx_mc = _to_mc(context)
    h0_mc = _to_mc(h0)
    h1_mc = _to_mc(h1)
    x_mc = _to_mc(x)

    # Fused convx1 / convx2 / convx5 (block-diagonal weight).
    in_cat = jnp.concatenate([ctx_mc, h0_mc, h1_mc, x_mc], axis=1)
    proj = conv1x1(in_cat, params["w_in"], params["b_in"])      # (BM, 384)
    q_mc = proj[:, 288:]                                        # convx5(x)

    # Fused convx3 / convx4 (shared input -> wide N).
    kv = conv1x1(proj[:, :288], params["w_kv"], params["b_kv"])  # (BM, 576)
    k_mc = kv[:, :288]
    v_mc = kv[:, 288:]

    # softmax(Q_rep K^T) V, flash-style.
    attn = _flash_attention(q_mc.reshape(B, M, 96),
                            k_mc.reshape(B, M, 288),
                            v_mc.reshape(B, M, 288))            # (B, M, 288)

    # convx6(...) + x with the residual fused into the matmul epilogue.
    out = conv1x1(attn.reshape(B * M, 288), params["w6"], params["b6"],
                  residual=x_mc)                                # (BM, 96)
    return _from_mc(out, B, D, H, W)


# ----------------------------------------------------------------------------
# Module wrapper (deterministic Conv3d(kernel=1)-style init)
# ----------------------------------------------------------------------------
def _conv_params(key, cin, cout):
    kw, kb = jax.random.split(key)
    bound = 1.0 / math.sqrt(cin)
    w = jax.random.uniform(kw, (cin, cout), jnp.float32, -bound, bound)
    b = jax.random.uniform(kb, (cout,), jnp.float32, -bound, bound)
    return w, b


class Attention:
    """Pallas-TPU implementation of `attention` (layers_3d.py); all convs are 1x1x1."""

    def __init__(self, rnn_size, c=1, hs=1, key=None):
        self.rnn_size = rnn_size
        key = key if key is not None else jax.random.PRNGKey(0)
        ks = jax.random.split(key, 6)
        w1, b1 = _conv_params(ks[0], rnn_size, 96 * 2)    # convx1
        w2, b2 = _conv_params(ks[1], 96 * 2, 96)          # convx2
        w3, b3 = _conv_params(ks[2], 96 * 3, 96 * 3)      # convx3
        w4, b4 = _conv_params(ks[3], 96 * 3, 96 * 3)      # convx4
        w5, b5 = _conv_params(ks[4], 96, 96)              # convx5
        w6, b6 = _conv_params(ks[5], 96 * 3, 96)          # convx6
        self.raw = dict(w1=w1, b1=b1, w2=w2, b2=b2, w3=w3, b3=b3,
                        w4=w4, b4=b4, w5=w5, b5=b5, w6=w6, b6=b6)

        # Fusion 1: convx1/convx2/convx5 -> one block-diagonal projection.
        #   [ctx | h0 | h1 | x] @ w_in = [convx1(ctx)(192) | convx2(h)(96) | convx5(x)(96)]
        kin = rnn_size + 96 * 2 + 96
        w_in = jnp.zeros((kin, 192 + 96 + 96), jnp.float32)
        w_in = w_in.at[:rnn_size, :192].set(w1)
        w_in = w_in.at[rnn_size:rnn_size + 192, 192:288].set(w2)
        w_in = w_in.at[rnn_size + 192:, 288:].set(w5)
        b_in = jnp.concatenate([b1, b2, b5])
        # Fusion 2: convx3/convx4 share an input -> concat weights along N.
        w_kv = jnp.concatenate([w3, w4], axis=1)          # (288, 576)
        b_kv = jnp.concatenate([b3, b4])
        self.params = dict(w_in=w_in, b_in=b_in, w_kv=w_kv, b_kv=b_kv,
                           w6=w6, b6=b6)

    def __call__(self, context, h_original, x):
        return _attention_forward(self.params, context,
                                  h_original[0], h_original[1], x)


# ----------------------------------------------------------------------------
# Pure-JAX f32 reference (mirrors the PyTorch forward literally)
# ----------------------------------------------------------------------------
def _reference_forward(raw, context, h_original, x):
    def conv(t, w, b):
        n, _, d, hh, ww = t.shape
        return _from_mc(_to_mc(t) @ w + b, n, d, hh, ww)

    h_cat = jnp.concatenate([h_original[0], h_original[1]], axis=1)
    c1 = conv(context, raw["w1"], raw["b1"])
    h2 = conv(h_cat, raw["w2"], raw["b2"])
    ref = jnp.concatenate([c1, h2], axis=1)
    k = conv(ref, raw["w3"], raw["b3"])
    v = conv(ref, raw["w4"], raw["b4"])
    q = conv(x, raw["w5"], raw["b5"])
    B, C, D, H, W = q.shape
    M = D * H * W
    qf = jnp.tile(jnp.transpose(q, (0, 2, 3, 4, 1)).reshape(B, M, C), (1, 1, 3))
    kf = k.reshape(B, C * 3, M)
    corr = jax.nn.softmax(jnp.einsum("bmc,bcn->bmn", qf, kf), axis=2)
    vf = jnp.transpose(v, (0, 2, 3, 4, 1)).reshape(B, M, C * 3)
    res = jnp.einsum("bmn,bnc->bmc", corr, vf)
    res = jnp.transpose(res.reshape(B, D, H, W, C * 3), (0, 4, 1, 2, 3))
    return conv(res, raw["w6"], raw["b6"]) + x


# ----------------------------------------------------------------------------
# Demo
# ----------------------------------------------------------------------------
if __name__ == "__main__":
    key = jax.random.PRNGKey(0)
    kp, kc, kh0, kh1, kx = jax.random.split(key, 5)

    B, D, H, W = 2, 4, 8, 8            # spatial tokens M = D*H*W = 256
    rnn_size = 128

    model = Attention(rnn_size, key=kp)

    context = jax.random.normal(kc, (B, rnn_size, D, H, W), jnp.float32)
    h_original = (jax.random.normal(kh0, (B, 96, D, H, W), jnp.float32),
                  jax.random.normal(kh1, (B, 96, D, H, W), jnp.float32))
    x = jax.random.normal(kx, (B, 96, D, H, W), jnp.float32)

    out = model(context, h_original, x)
    out = jax.block_until_ready(out)

    assert out.shape == (B, 96, D, H, W)
    assert bool(jnp.all(jnp.isfinite(out)))

    # Loose tolerance: Pallas path uses bf16 MXU operands + approx reciprocal.
    ref = _reference_forward(model.raw, context, h_original, x)
    max_err = float(jnp.max(jnp.abs(out - ref)))
    assert max_err < 3e-1, f"max abs error vs reference: {max_err}"

    print("KERNEL_OK")
</pallas_src>

<mosaic_0001>
module attributes {stable_mosaic.version = 11 : i64} {
  func.func @_mm_bias_kernel(%arg0: i32, %arg1: memref<512x416xbf16, #tpu.memory_space<vmem>>, %arg2: memref<416x384xbf16, #tpu.memory_space<vmem>>, %arg3: memref<1x384xf32, #tpu.memory_space<vmem>>, %arg4: memref<512x384xf32, #tpu.memory_space<vmem>>) attributes {dimension_semantics = [#tpu.dimension_semantics<parallel>], iteration_bounds = array<i64: 1>, scalar_prefetch = 0 : i64, scratch_operands = 0 : i64, tpu.core_type = #tpu.core_type<tc>, window_params = [{transform_indices = @transform_0, window_bounds = array<i64: 512, 416>}, {pipeline_mode = #tpu.pipeline_mode<synchronous>, transform_indices = @transform_1, window_bounds = array<i64: 416, 384>}, {pipeline_mode = #tpu.pipeline_mode<synchronous>, transform_indices = @transform_2, window_bounds = array<i64: 1, 384>}, {transform_indices = @transform_3, window_bounds = array<i64: 512, 384>}]} {
    %c0 = arith.constant 0 : index
    %c0_0 = arith.constant 0 : index
    %0 = vector.load %arg1[%c0, %c0_0] : memref<512x416xbf16, #tpu.memory_space<vmem>>, vector<512x416xbf16>
    %c0_1 = arith.constant 0 : index
    %c0_2 = arith.constant 0 : index
    %1 = vector.load %arg2[%c0_1, %c0_2] : memref<416x384xbf16, #tpu.memory_space<vmem>>, vector<416x384xbf16>
    %cst = arith.constant dense<0.000000e+00> : vector<512x384xf32>
    %2 = tpu.matmul %0, %1, %cst {dimension_numbers = #tpu.dot_dimension_numbers<[1], [0], [0], [1], [0, 0, 1, 1], [], []>} : vector<512x416xbf16>, vector<416x384xbf16>, vector<512x384xf32> -> vector<512x384xf32>
    %c0_3 = arith.constant 0 : index
    %c0_4 = arith.constant 0 : index
    %3 = vector.load %arg3[%c0_3, %c0_4] : memref<1x384xf32, #tpu.memory_space<vmem>>, vector<1x384xf32>
    %4 = vector.broadcast %3 : vector<1x384xf32> to vector<512x384xf32>
    %5 = arith.addf %2, %4 : vector<512x384xf32>
    %c0_5 = arith.constant 0 : index
    %c0_6 = arith.constant 0 : index
    %6 = vector.load %arg4[%c0_5, %c0_6] : memref<512x384xf32, #tpu.memory_space<vmem>>, vector<512x384xf32>
    tpu.vector_store %arg4[%c0_5, %c0_6], %5 {strides = array<i32>} : memref<512x384xf32, #tpu.memory_space<vmem>>, vector<512x384xf32>,
    return
  }
  func.func @transform_0(%arg0: i32) -> (i32, i32) {
    %c0_i32 = arith.constant 0 : i32
    %c0_i32_0 = arith.constant 0 : i32
    return %arg0, %c0_i32 : i32, i32
  }
  func.func @transform_1(%arg0: i32) -> (i32, i32) {
    %c0_i32 = arith.constant 0 : i32
    %c0_i32_0 = arith.constant 0 : i32
    %c0_i32_1 = arith.constant 0 : i32
    return %c0_i32, %c0_i32_0 : i32, i32
  }
  func.func @transform_2(%arg0: i32) -> (i32, i32) {
    %c0_i32 = arith.constant 0 : i32
    %c0_i32_0 = arith.constant 0 : i32
    %c0_i32_1 = arith.constant 0 : i32
    return %c0_i32, %c0_i32_0 : i32, i32
  }
  func.func @transform_3(%arg0: i32) -> (i32, i32) {
    %c0_i32 = arith.constant 0 : i32
    %c0_i32_0 = arith.constant 0 : i32
    return %arg0, %c0_i32 : i32, i32
  }
}

module attributes {stable_mosaic.version = 11 : i64} {
  func.func @_mm_bias_kernel(%arg0: i32, %arg1: memref<512x288xbf16, #tpu.memory_space<vmem>>, %arg2: memref<288x576xbf16, #tpu.memory_space<vmem>>, %arg3: memref<1x576xf32, #tpu.memory_space<vmem>>, %arg4: memref<512x576xf32, #tpu.memory_space<vmem>>) attributes {dimension_semantics = [#tpu.dimension_semantics<parallel>], iteration_bounds = array<i64: 1>, scalar_prefetch = 0 : i64, scratch_operands = 0 : i64, tpu.core_type = #tpu.core_type<tc>, window_params = [{transform_indices = @transform_0, window_bounds = array<i64: 512, 288>}, {pipeline_mode = #tpu.pipeline_mode<synchronous>, transform_indices = @transform_1, window_bounds = array<i64: 288, 576>}, {pipeline_mode = #tpu.pipeline_mode<synchronous>, transform_indices = @transform_2, window_bounds = array<i64: 1, 576>}, {transform_indices = @transform_3, window_bounds = array<i64: 512, 576>}]} {
    %c0 = arith.constant 0 : index
    %c0_0 = arith.constant 0 : index
    %0 = vector.load %arg1[%c0, %c0_0] : memref<512x288xbf16, #tpu.memory_space<vmem>>, vector<512x288xbf16>
    %c0_1 = arith.constant 0 : index
    %c0_2 = arith.constant 0 : index
    %1 = vector.load %arg2[%c0_1, %c0_2] : memref<288x576xbf16, #tpu.memory_space<vmem>>, vector<288x576xbf16>
    %cst = arith.constant dense<0.000000e+00> : vector<512x576xf32>
    %2 = tpu.matmul %0, %1, %cst {dimension_numbers = #tpu.dot_dimension_numbers<[1], [0], [0], [1], [0, 0, 1, 1], [], []>} : vector<512x288xbf16>, vector<288x576xbf16>, vector<512x576xf32> -> vector<512x576xf32>
    %c0_3 = arith.constant 0 : index
    %c0_4 = arith.constant 0 : index
    %3 = vector.load %arg3[%c0_3, %c0_4] : memref<1x576xf32, #tpu.memory_space<vmem>>, vector<1x576xf32>
    %4 = vector.broadcast %3 : vector<1x576xf32> to vector<512x576xf32>
    %5 = arith.addf %2, %4 : vector<512x576xf32>
    %c0_5 = arith.constant 0 : index
    %c0_6 = arith.constant 0 : index
    %6 = vector.load %arg4[%c0_5, %c0_6] : memref<512x576xf32, #tpu.memory_space<vmem>>, vector<512x576xf32>
    tpu.vector_store %arg4[%c0_5, %c0_6], %5 {strides = array<i32>} : memref<512x576xf32, #tpu.memory_space<vmem>>, vector<512x576xf32>,
    return
  }
  func.func @transform_0(%arg0: i32) -> (i32, i32) {
    %c0_i32 = arith.constant 0 : i32
    %c0_i32_0 = arith.constant 0 : i32
    return %arg0, %c0_i32 : i32, i32
  }
  func.func @transform_1(%arg0: i32) -> (i32, i32) {
    %c0_i32 = arith.constant 0 : i32
    %c0_i32_0 = arith.constant 0 : i32
    %c0_i32_1 = arith.constant 0 : i32
    return %c0_i32, %c0_i32_0 : i32, i32
  }
  func.func @transform_2(%arg0: i32) -> (i32, i32) {
    %c0_i32 = arith.constant 0 : i32
    %c0_i32_0 = arith.constant 0 : i32
    %c0_i32_1 = arith.constant 0 : i32
    return %c0_i32, %c0_i32_0 : i32, i32
  }
  func.func @transform_3(%arg0: i32) -> (i32, i32) {
    %c0_i32 = arith.constant 0 : i32
    %c0_i32_0 = arith.constant 0 : i32
    return %arg0, %c0_i32 : i32, i32
  }
}

module attributes {stable_mosaic.version = 11 : i64} {
  func.func @_flash_attn_kernel(%arg0: i32, %arg1: i32, %arg2: i32, %arg3: memref<1x128x96xbf16, #tpu.memory_space<vmem>>, %arg4: memref<1x128x96xbf16, #tpu.memory_space<vmem>>, %arg5: memref<1x128x288xbf16, #tpu.memory_space<vmem>>, %arg6: memref<1x128x288xf32, #tpu.memory_space<vmem>>, %arg7: memref<128x1xf32, #tpu.memory_space<vmem>>, %arg8: memref<128x1xf32, #tpu.memory_space<vmem>>, %arg9: memref<128x288xf32, #tpu.memory_space<vmem>>) attributes {dimension_semantics = [#tpu.dimension_semantics<parallel>, #tpu.dimension_semantics<parallel>, #tpu.dimension_semantics<arbitrary>], iteration_bounds = array<i64: 2, 2, 2>, scalar_prefetch = 0 : i64, scratch_operands = 3 : i64, tpu.core_type = #tpu.core_type<tc>, window_params = [{transform_indices = @transform_0, window_bounds = array<i64: 1, 128, 96>}, {transform_indices = @transform_1, window_bounds = array<i64: 1, 128, 96>}, {transform_indices = @transform_2, window_bounds = array<i64: 1, 128, 288>}, {transform_indices = @transform_3, window_bounds = array<i64: 1, 128, 288>}]} {
    %c0_i32 = arith.constant 0 : i32
    %0 = arith.cmpi eq, %arg2, %c0_i32 : i32
    %1 = arith.extui %0 : i1 to i32
    %c0_i32_0 = arith.constant 0 : i32
    %2 = arith.cmpi ne, %1, %c0_i32_0 : i32
    scf.if %2 {
      %cst_25 = arith.constant 0xFF800000 : f32
      %36 = vector.broadcast %cst_25 : f32 to vector<128x1xf32>
      %c0_26 = arith.constant 0 : index
      %c0_27 = arith.constant 0 : index
      %37 = vector.load %arg7[%c0_26, %c0_27] : memref<128x1xf32, #tpu.memory_space<vmem>>, vector<128x1xf32>
      tpu.vector_store %arg7[%c0_26, %c0_27], %36 {strides = array<i32>} : memref<128x1xf32, #tpu.memory_space<vmem>>, vector<128x1xf32>,
      %cst_28 = arith.constant 0.000000e+00 : f32
      %38 = vector.broadcast %cst_28 : f32 to vector<128x1xf32>
      %c0_29 = arith.constant 0 : index
      %c0_30 = arith.constant 0 : index
      %39 = vector.load %arg8[%c0_29, %c0_30] : memref<128x1xf32, #tpu.memory_space<vmem>>, vector<128x1xf32>
      tpu.vector_store %arg8[%c0_29, %c0_30], %38 {strides = array<i32>} : memref<128x1xf32, #tpu.memory_space<vmem>>, vector<128x1xf32>,
      %cst_31 = arith.constant 0.000000e+00 : f32
      %40 = vector.broadcast %cst_31 : f32 to vector<128x288xf32>
      %c0_32 = arith.constant 0 : index
      %c0_33 = arith.constant 0 : index
      %41 = vector.load %arg9[%c0_32, %c0_33] : memref<128x288xf32, #tpu.memory_space<vmem>>, vector<128x288xf32>
      tpu.vector_store %arg9[%c0_32, %c0_33], %40 {strides = array<i32>} : memref<128x288xf32, #tpu.memory_space<vmem>>, vector<128x288xf32>,
    } else {
    }
    %c0 = arith.constant 0 : index
    %c0_1 = arith.constant 0 : index
    %c0_2 = arith.constant 0 : index
    %3 = vector.load %arg3[%c0, %c0_1, %c0_2] : memref<1x128x96xbf16, #tpu.memory_space<vmem>>, vector<1x128x96xbf16>
    %4 = vector.shape_cast %3 : vector<1x128x96xbf16> to vector<128x96xbf16>
    %c0_3 = arith.constant 0 : index
    %c0_4 = arith.constant 0 : index
    %c0_5 = arith.constant 0 : index
    %5 = vector.load %arg4[%c0_3, %c0_4, %c0_5] : memref<1x128x96xbf16, #tpu.memory_space<vmem>>, vector<1x128x96xbf16>
    %6 = vector.shape_cast %5 : vector<1x128x96xbf16> to vector<128x96xbf16>
    %cst = arith.constant dense<0.000000e+00> : vector<128x128xf32>
    %7 = tpu.matmul %4, %6, %cst {dimension_numbers = #tpu.dot_dimension_numbers<[1], [1], [0], [0], [0, 0, 1, 0], [], []>} : vector<128x96xbf16>, vector<128x96xbf16>, vector<128x128xf32> -> vector<128x128xf32>
    %c0_6 = arith.constant 0 : index
    %c0_7 = arith.constant 0 : index
    %8 = vector.load %arg7[%c0_6, %c0_7] : memref<128x1xf32, #tpu.memory_space<vmem>>, vector<128x1xf32>
    %cst_8 = arith.constant dense<0xFF800000> : vector<128xf32>
    %9 = vector.multi_reduction <maximumf>, %7, %cst_8 [1] : vector<128x128xf32> to vector<128xf32>
    %10 = vector.shape_cast %9 : vector<128xf32> to vector<128x1xf32>
    %11 = arith.maximumf %8, %10 : vector<128x1xf32>
    %12 = arith.subf %8, %11 : vector<128x1xf32>
    %13 = math.exp %12 : vector<128x1xf32>
    %14 = vector.broadcast %11 : vector<128x1xf32> to vector<128x128xf32>
    %15 = arith.subf %7, %14 : vector<128x128xf32>
    %16 = math.exp %15 : vector<128x128xf32>
    %c0_9 = arith.constant 0 : index
    %c0_10 = arith.constant 0 : index
    %17 = vector.load %arg8[%c0_9, %c0_10] : memref<128x1xf32, #tpu.memory_space<vmem>>, vector<128x1xf32>
    %18 = arith.mulf %13, %17 : vector<128x1xf32>
    %cst_11 = arith.constant dense<0.000000e+00> : vector<128xf32>
    %19 = vector.multi_reduction <add>, %16, %cst_11 [1] : vector<128x128xf32> to vector<128xf32>
    %20 = vector.shape_cast %19 : vector<128xf32> to vector<128x1xf32>
    %21 = arith.addf %18, %20 : vector<128x1xf32>
    %c0_12 = arith.constant 0 : index
    %c0_13 = arith.constant 0 : index
    %22 = vector.load %arg8[%c0_12, %c0_13] : memref<128x1xf32, #tpu.memory_space<vmem>>, vector<128x1xf32>
    tpu.vector_store %arg8[%c0_12, %c0_13], %21 {strides = array<i32>} : memref<128x1xf32, #tpu.memory_space<vmem>>, vector<128x1xf32>,
    %c0_14 = arith.constant 0 : index
    %c0_15 = arith.constant 0 : index
    %23 = vector.load %arg9[%c0_14, %c0_15] : memref<128x288xf32, #tpu.memory_space<vmem>>, vector<128x288xf32>
    %24 = vector.broadcast %13 : vector<128x1xf32> to vector<128x288xf32>
    %25 = arith.mulf %24, %23 : vector<128x288xf32>
    %26 = arith.truncf %16 : vector<128x128xf32> to vector<128x128xbf16>
    %c0_16 = arith.constant 0 : index
    %c0_17 = arith.constant 0 : index
    %c0_18 = arith.constant 0 : index
    %27 = vector.load %arg5[%c0_16, %c0_17, %c0_18] : memref<1x128x288xbf16, #tpu.memory_space<vmem>>, vector<1x128x288xbf16>
    %28 = vector.shape_cast %27 : vector<1x128x288xbf16> to vector<128x288xbf16>
    %cst_19 = arith.constant dense<0.000000e+00> : vector<128x288xf32>
    %29 = tpu.matmul %26, %28, %cst_19 {dimension_numbers = #tpu.dot_dimension_numbers<[1], [0], [0], [1], [0, 0, 1, 1], [], []>} : vector<128x128xbf16>, vector<128x288xbf16>, vector<128x288xf32> -> vector<128x288xf32>
    %30 = arith.addf %25, %29 : vector<128x288xf32>
    %c0_20 = arith.constant 0 : index
    %c0_21 = arith.constant 0 : index
    %31 = vector.load %arg9[%c0_20, %c0_21] : memref<128x288xf32, #tpu.memory_space<vmem>>, vector<128x288xf32>
    tpu.vector_store %arg9[%c0_20, %c0_21], %30 {strides = array<i32>} : memref<128x288xf32, #tpu.memory_space<vmem>>, vector<128x288xf32>,
    %c0_22 = arith.constant 0 : index
    %c0_23 = arith.constant 0 : index
    %32 = vector.load %arg7[%c0_22, %c0_23] : memref<128x1xf32, #tpu.memory_space<vmem>>, vector<128x1xf32>
    tpu.vector_store %arg7[%c0_22, %c0_23], %11 {strides = array<i32>} : memref<128x1xf32, #tpu.memory_space<vmem>>, vector<128x1xf32>,
    %c1_i32 = arith.constant 1 : i32
    %33 = arith.cmpi eq, %arg2, %c1_i32 : i32
    %34 = arith.extui %33 : i1 to i32
    %c0_i32_24 = arith.constant 0 : i32
    %35 = arith.cmpi ne, %34, %c0_i32_24 : i32
    scf.if %35 {
      %c0_25 = arith.constant 0 : index
      %c0_26 = arith.constant 0 : index
      %36 = vector.load %arg9[%c0_25, %c0_26] : memref<128x288xf32, #tpu.memory_space<vmem>>, vector<128x288xf32>
      %c0_27 = arith.constant 0 : index
      %c0_28 = arith.constant 0 : index
      %37 = vector.load %arg8[%c0_27, %c0_28] : memref<128x1xf32, #tpu.memory_space<vmem>>, vector<128x1xf32>
      %38 = tpu.reciprocal %37 {approx = true} : vector<128x1xf32> -> vector<128x1xf32>
      %39 = vector.broadcast %38 : vector<128x1xf32> to vector<128x288xf32>
      %40 = arith.mulf %36, %39 : vector<128x288xf32>
      %41 = vector.shape_cast %40 : vector<128x288xf32> to vector<1x128x288xf32>
      %c0_29 = arith.constant 0 : index
      %c0_30 = arith.constant 0 : index
      %c0_31 = arith.constant 0 : index
      %42 = vector.load %arg6[%c0_29, %c0_30, %c0_31] : memref<1x128x288xf32, #tpu.memory_space<vmem>>, vector<1x128x288xf32>
      tpu.vector_store %arg6[%c0_29, %c0_30, %c0_31], %41 {strides = array<i32>} : memref<1x128x288xf32, #tpu.memory_space<vmem>>, vector<1x128x288xf32>,
    } else {
    }
    return
  }
  func.func @transform_0(%arg0: i32, %arg1: i32, %arg2: i32) -> (i32, i32, i32) {
    %c0_i32 = arith.constant 0 : i32
    %c0_i32_0 = arith.constant 0 : i32
    return %arg0, %arg1, %c0_i32 : i32, i32, i32
  }
  func.func @transform_1(%arg0: i32, %arg1: i32, %arg2: i32) -> (i32, i32, i32) {
    %c0_i32 = arith.constant 0 : i32
    %c0_i32_0 = arith.constant 0 : i32
    return %arg0, %arg2, %c0_i32 : i32, i32, i32
  }
  func.func @transform_2(%arg0: i32, %arg1: i32, %arg2: i32) -> (i32, i32, i32) {
    %c0_i32 = arith.constant 0 : i32
    %c0_i32_0 = arith.constant 0 : i32
    return %arg0, %arg2, %c0_i32 : i32, i32, i32
  }
  func.func @transform_3(%arg0: i32, %arg1: i32, %arg2: i32) -> (i32, i32, i32) {
    %c0_i32 = arith.constant 0 : i32
    %c0_i32_0 = arith.constant 0 : i32
    return %arg0, %arg1, %c0_i32 : i32, i32, i32
  }
}

module attributes {stable_mosaic.version = 11 : i64} {
  func.func @_mm_bias_res_kernel(%arg0: i32, %arg1: memref<512x288xbf16, #tpu.memory_space<vmem>>, %arg2: memref<288x96xbf16, #tpu.memory_space<vmem>>, %arg3: memref<1x96xf32, #tpu.memory_space<vmem>>, %arg4: memref<512x96xf32, #tpu.memory_space<vmem>>, %arg5: memref<512x96xf32, #tpu.memory_space<vmem>>) attributes {dimension_semantics = [#tpu.dimension_semantics<parallel>], iteration_bounds = array<i64: 1>, scalar_prefetch = 0 : i64, scratch_operands = 0 : i64, tpu.core_type = #tpu.core_type<tc>, window_params = [{transform_indices = @transform_0, window_bounds = array<i64: 512, 288>}, {pipeline_mode = #tpu.pipeline_mode<synchronous>, transform_indices = @transform_1, window_bounds = array<i64: 288, 96>}, {pipeline_mode = #tpu.pipeline_mode<synchronous>, transform_indices = @transform_2, window_bounds = array<i64: 1, 96>}, {transform_indices = @transform_3, window_bounds = array<i64: 512, 96>}, {transform_indices = @transform_4, window_bounds = array<i64: 512, 96>}]} {
    %c0 = arith.constant 0 : index
    %c0_0 = arith.constant 0 : index
    %0 = vector.load %arg1[%c0, %c0_0] : memref<512x288xbf16, #tpu.memory_space<vmem>>, vector<512x288xbf16>
    %c0_1 = arith.constant 0 : index
    %c0_2 = arith.constant 0 : index
    %1 = vector.load %arg2[%c0_1, %c0_2] : memref<288x96xbf16, #tpu.memory_space<vmem>>, vector<288x96xbf16>
    %cst = arith.constant dense<0.000000e+00> : vector<512x96xf32>
    %2 = tpu.matmul %0, %1, %cst {dimension_numbers = #tpu.dot_dimension_numbers<[1], [0], [0], [1], [0, 0, 1, 1], [], []>} : vector<512x288xbf16>, vector<288x96xbf16>, vector<512x96xf32> -> vector<512x96xf32>
    %c0_3 = arith.constant 0 : index
    %c0_4 = arith.constant 0 : index
    %3 = vector.load %arg3[%c0_3, %c0_4] : memref<1x96xf32, #tpu.memory_space<vmem>>, vector<1x96xf32>
    %4 = vector.broadcast %3 : vector<1x96xf32> to vector<512x96xf32>
    %5 = arith.addf %2, %4 : vector<512x96xf32>
    %c0_5 = arith.constant 0 : index
    %c0_6 = arith.constant 0 : index
    %6 = vector.load %arg4[%c0_5, %c0_6] : memref<512x96xf32, #tpu.memory_space<vmem>>, vector<512x96xf32>
    %7 = arith.addf %5, %6 : vector<512x96xf32>
    %c0_7 = arith.constant 0 : index
    %c0_8 = arith.constant 0 : index
    %8 = vector.load %arg5[%c0_7, %c0_8] : memref<512x96xf32, #tpu.memory_space<vmem>>, vector<512x96xf32>
    tpu.vector_store %arg5[%c0_7, %c0_8], %7 {strides = array<i32>} : memref<512x96xf32, #tpu.memory_space<vmem>>, vector<512x96xf32>,
    return
  }
  func.func @transform_0(%arg0: i32) -> (i32, i32) {
    %c0_i32 = arith.constant 0 : i32
    %c0_i32_0 = arith.constant 0 : i32
    return %arg0, %c0_i32 : i32, i32
  }
  func.func @transform_1(%arg0: i32) -> (i32, i32) {
    %c0_i32 = arith.constant 0 : i32
    %c0_i32_0 = arith.constant 0 : i32
    %c0_i32_1 = arith.constant 0 : i32
    return %c0_i32, %c0_i32_0 : i32, i32
  }
  func.func @transform_2(%arg0: i32) -> (i32, i32) {
    %c0_i32 = arith.constant 0 : i32
    %c0_i32_0 = arith.constant 0 : i32
    %c0_i32_1 = arith.constant 0 : i32
    return %c0_i32, %c0_i32_0 : i32, i32
  }
  func.func @transform_3(%arg0: i32) -> (i32, i32) {
    %c0_i32 = arith.constant 0 : i32
    %c0_i32_0 = arith.constant 0 : i32
    return %arg0, %c0_i32 : i32, i32
  }
  func.func @transform_4(%arg0: i32) -> (i32, i32) {
    %c0_i32 = arith.constant 0 : i32
    %c0_i32_0 = arith.constant 0 : i32
    return %arg0, %c0_i32 : i32, i32
  }
}

</mosaic_0001>

<bundles_post_ra>
// kernel: _attention_forward.4
= control target key start
LH: loop header
LB: loop body
LE: loop exit
PB: predicated region body
PF: predicated region fallthrough
CT: control target
= control target key end

     0   :  { %v3880_v0 = vmov 0   ;;  %vm1288_vm0 = vcmask 261120   ;;  %s5386_s1 = inlined_call_operand.vmem [shape: bf16[416,384], index: 1, kind: input, shape index: {}]   ;;  %s5387_s0 = inlined_call_operand.vmem [shape: bf16[512,416], index: 0, kind: input, shape index: {}]   ;;  %s5388_s2 = inlined_call_operand.vmem [shape: f32[1,384], index: 2, kind: input, shape index: {}]   ;;  %s5389_s3 = inlined_call_operand.vmem [shape: f32[512,384], index: 3, kind: output, shape index: {}]  }
   0x1   :  { %2091 = vmatprep.subr.bf16.mxu1 %v3880_v0  ;;  %v3584_v1 = vld [vmem:[%s5386_s1 + $0x4] ss:$12 sps:$4 sm:$0xff]   ;;  %v3586_v2 = vld [vmem:[%s5386_s1 + $0x8] ss:$12 sps:$4 sm:$0xff]   ;;  %v3587_v3 = vld [vmem:[%s5386_s1] ss:$12 sps:$4 sm:$0xff]  }
   0x2   :  { %1385 = vmatprep.subr.bf16.mxu0 %v3584_v1  ;;  %2092 = vmatpush1.bf16.msra.mxu1 %v3586_v2  ;;  %v3588_v4 = vld [vmem:[%s5386_s1 + $0x1c] ss:$12 sps:$4 sm:$0xff]   ;;  %v3590_v5 = vld [vmem:[%s5386_s1 + $0x20] ss:$12 sps:$4 sm:$0xff]   ;;  %v3591_v6 = vld [vmem:[%s5386_s1 + $0x18] ss:$12 sps:$4 sm:$0xff]  }
   0x3   :  { %1386 = vmatpush1.bf16.msra.mxu0 %v3587_v3  ;;  %2093 = vmatprep.subr.bf16.mxu1 %v3880_v0  ;;  %v3592_v7 = vld [vmem:[%s5386_s1 + $0x34] ss:$12 sps:$4 sm:$0xff]   ;;  %v3594_v8 = vld [vmem:[%s5386_s1 + $0x38] ss:$12 sps:$4 sm:$0xff]   ;;  %v3595_v9 = vld [vmem:[%s5386_s1 + $0x30] ss:$12 sps:$4 sm:$0xff]  }
   0x4   :  { %1387 = vmatprep.subr.bf16.mxu0 %v3588_v4  ;;  %v3596_v10 = vld [vmem:[%s5386_s1 + $0x4c] ss:$12 sps:$4 sm:$0xff]   ;;  %v3598_v11 = vld [vmem:[%s5386_s1 + $0x50] ss:$12 sps:$4 sm:$0xff]   ;;  %v3599_v12 = vld [vmem:[%s5386_s1 + $0x48] ss:$12 sps:$4 sm:$0xff]  }
   0x5   :  { %v3600_v13 = vld [vmem:[%s5386_s1 + $0x64] ss:$12 sps:$4 sm:$0xff]   ;;  %v3602_v14 = vld [vmem:[%s5386_s1 + $0x68] ss:$12 sps:$4 sm:$0xff]   ;;  %v3603_v15 = vld [vmem:[%s5386_s1 + $0x60] ss:$12 sps:$4 sm:$0xff]  }
   0x6   :  { %2094 = vmatpush1.bf16.msra.mxu1 %v3590_v5  ;;  %v3604_v16 = vld [vmem:[%s5386_s1 + $0x7c] ss:$12 sps:$4 sm:$0xff]   ;;  %v3606_v17 = vld [vmem:[%s5386_s1 + $0x80] ss:$12 sps:$4 sm:$0xff]   ;;  %v3607_v18 = vld [vmem:[%s5386_s1 + $0x78] ss:$12 sps:$4 sm:$0xff]  }
   0x7   :  { %1388 = vmatpush1.bf16.msra.mxu0 %v3591_v6  ;;  %2095 = vmatprep.subr.bf16.mxu1 %v3880_v0  ;;  %v3608_v19 = vld [vmem:[%s5386_s1 + $0x94] ss:$12 sps:$4 sm:$0xff]   ;;  %v3610_v20 = vld [vmem:[%s5386_s1 + $0x98] ss:$12 sps:$4 sm:$0xff]   ;;  %v3611_v21 = vld [vmem:[%s5386_s1 + $0x90] ss:$12 sps:$4 sm:$0xff]  }
   0x8   :  { %1389 = vmatprep.subr.bf16.mxu0 %v3592_v7  ;;  %v3612_v22 = vld [vmem:[%s5386_s1 + $0xac] ss:$12 sps:$4 sm:$0xff]   ;;  %v3614_v23 = vld [vmem:[%s5386_s1 + $0xb0] ss:$12 sps:$4 sm:$0xff]   ;;  %v3615_v24 = vld [vmem:[%s5386_s1 + $0xa8] ss:$12 sps:$4 sm:$0xff]  }
   0x9   :  { %v3616_v25 = vld [vmem:[%s5386_s1 + $0xc4] ss:$12 sps:$4 sm:$0xff]   ;;  %v3618_v26 = vld [vmem:[%s5386_s1 + $0xc8] ss:$12 sps:$4 sm:$0xff]   ;;  %v3619_v27 = vld [vmem:[%s5386_s1 + $0xc0] ss:$12 sps:$4 sm:$0xff]  }
   0xa   :  { %2096 = vmatpush1.bf16.msra.mxu1 %v3594_v8  ;;  %v3620_v28 = vld [vmem:[%s5386_s1 + $0xdc] ss:$12 sps:$4 sm:$0xff]   ;;  %v3622_v29 = vld [vmem:[%s5386_s1 + $0xe0] ss:$12 sps:$4 sm:$0xff]   ;;  %v3623_v30 = vld [vmem:[%s5386_s1 + $0xd8] ss:$12 sps:$4 sm:$0xff]  }
   0xb   :  { %1390 = vmatpush1.bf16.msra.mxu0 %v3595_v9  ;;  %2097 = vmatprep.subr.bf16.mxu1 %v3880_v0  ;;  %v3624_v31 = vld [vmem:[%s5386_s1 + $0xf4] ss:$12 sps:$4 sm:$0xff]   ;;  %v3626_v33 = vld [vmem:[%s5386_s1 + $0xf8] ss:$12 sps:$4 sm:$0xff]   ;;  %v3627_v34 = vld [vmem:[%s5386_s1 + $0xf0] ss:$12 sps:$4 sm:$0xff]  }
   0xc   :  { %1391 = vmatprep.subr.bf16.mxu0 %v3596_v10  ;;  %v3650_v32 = vld [vmem:[%s5387_s0 + $0x4] ss:$16 sps:$4 sm:$0xff]   ;;  %v3628_v35 = vld [vmem:[%s5386_s1 + $0x10c] ss:$12 sps:$4 sm:$0xff]   ;;  %v3630_v36 = vld [vmem:[%s5386_s1 + $0x110] ss:$12 sps:$4 sm:$0xff]  }
   0xd   :  { %2123 = vmatprep.mubr.bf16.mxu1 %v3650_v32  ;;  %1417 = vmatprep.mubr.bf16.mxu0 %v3650_v32  ;;  %v3631_v37 = vld [vmem:[%s5386_s1 + $0x108] ss:$12 sps:$4 sm:$0xff]   ;;  %v3632_v38 = vld [vmem:[%s5386_s1 + $0x124] ss:$12 sps:$4 sm:$0xff]   ;;  %v3635_v40 = vld [vmem:[%s5386_s1 + $0x120] ss:$12 sps:$4 sm:$0xff]  }
   0xe   :  { %2098 = vmatpush1.bf16.msra.mxu1 %v3598_v11  ;;  %v3634_v39 = vld [vmem:[%s5386_s1 + $0x128] ss:$12 sps:$4 sm:$0xff]   ;;  %v3638_v42 = vld [vmem:[%s5386_s1 + $0x140] ss:$12 sps:$4 sm:$0xff]   ;;  %v3639_v43 = vld [vmem:[%s5386_s1 + $0x138] ss:$12 sps:$4 sm:$0xff]  }
   0xf   :  { %1392 = vmatpush1.bf16.msra.mxu0 %v3599_v12  ;;  %2099 = vmatprep.subr.bf16.mxu1 %v3880_v0  ;;  %v3636_v41 = vld [vmem:[%s5386_s1 + $0x13c] ss:$12 sps:$4 sm:$0xff]   ;;  %v3640_v44 = vld [vmem:[%s5386_s1 + $0x154] ss:$12 sps:$4 sm:$0xff]   ;;  %v3642_v45 = vld [vmem:[%s5386_s1 + $0x158] ss:$12 sps:$4 sm:$0xff]  }
  0x10   :  { %1393 = vmatprep.subr.bf16.mxu0 %v3600_v13  ;;  %v3643_v46 = vld [vmem:[%s5386_s1 + $0x150] ss:$12 sps:$4 sm:$0xff]   ;;  %v3644_v47 = vld [vmem:[%s5386_s1 + $0x16c] ss:$12 sps:$4 sm:$0xff]   ;;  %v3647_v49 = vld [vmem:[%s5386_s1 + $0x168] ss:$12 sps:$4 sm:$0xff]  }
  0x11   :  { %v3646_v48 = vld [vmem:[%s5386_s1 + $0x170] ss:$12 sps:$4 sm:$0xff]   ;;  %v3651_v52 = vld [vmem:[%s5386_s1 + $0x180] ss:$12 sps:$4 sm:$0xff]   ;;  %v3654_v53 = vld [vmem:[%s5386_s1 + $0x188] ss:$12 sps:$4 sm:$0xff]  }
  0x12   :  { %2100 = vmatpush1.bf16.msra.mxu1 %v3602_v14  ;;  %v3653_v50 = vld [vmem:[%s5386_s1 + $0x184] ss:$12 sps:$4 sm:$0xff]   ;;  %v3666_v55 = vld [vmem:[%s5386_s1 + $0x19c] ss:$12 sps:$4 sm:$0xff]   ;;  %v3667_v56 = vld [vmem:[%s5386_s1 + $0x1a0] ss:$12 sps:$4 sm:$0xff]  }
  0x13   :  { %1394 = vmatpush1.bf16.msra.mxu0 %v3603_v15  ;;  %2101 = vmatprep.subr.bf16.mxu1 %v3880_v0  ;;  %v3648_v51 = vld [vmem:[%s5387_s0] ss:$16 sps:$4 sm:$0xff]   ;;  %v3655_v54 = vld [vmem:[%s5387_s0 + $0x24] ss:$16 sps:$4 sm:$0xff]   ;;  %v3692_v63 = vld [vmem:[%s5386_s1 + $0x1cc] ss:$12 sps:$4 sm:$0xff]  }
  0x14   :  { %1395 = vmatprep.subr.bf16.mxu0 %v3604_v16  ;;  %v3664_v57 = vld [vmem:[%s5386_s1 + $0x198] ss:$12 sps:$4 sm:$0xff]   ;;  %v3679_v58 = vld [vmem:[%s5386_s1 + $0x1b4] ss:$12 sps:$4 sm:$0xff]   ;;  %v3677_v61 = vld [vmem:[%s5386_s1 + $0x1b0] ss:$12 sps:$4 sm:$0xff]  }
  0x15   :  { %v3657_v59 = vld [vmem:[%s5387_s0 + $0x20] ss:$16 sps:$4 sm:$0xff]   ;;  %v3658_v60 = vld [vmem:[%s5387_s0 + $0x44] ss:$16 sps:$4 sm:$0xff]   ;;  %v3721_v8 = vld [vmem:[%s5386_s1 + $0x1fc] ss:$12 sps:$4 sm:$0xff]  }
  0x16   :  { %2102 = vmatpush1.bf16.msra.mxu1 %v3606_v17  ;;  %v3682_v62 = vld [vmem:[%s5386_s1 + $0x1b8] ss:$12 sps:$4 sm:$0xff]   ;;  %v3690_v1 = vld [vmem:[%s5386_s1 + $0x1c8] ss:$12 sps:$4 sm:$0xff]   ;;  %v3660_v2 = vld [vmem:[%s5387_s0 + $0x40] ss:$16 sps:$4 sm:$0xff]  }
  0x17   :  { %1396 = vmatpush1.bf16.msra.mxu0 %v3607_v18  ;;  %2103 = vmatprep.subr.bf16.mxu1 %v3880_v0  ;;  %v3696_v3 = vld [vmem:[%s5386_s1 + $0x1d0] ss:$12 sps:$4 sm:$0xff]   ;;  %v3661_v5 = vld [vmem:[%s5387_s0 + $0x64] ss:$16 sps:$4 sm:$0xff]   ;;  %v3705_v6 = vld [vmem:[%s5386_s1 + $0x1e0] ss:$12 sps:$4 sm:$0xff]  }
  0x18   :  { %1397 = vmatprep.subr.bf16.mxu0 %v3608_v19  ;;  %v3707_v4 = vld [vmem:[%s5386_s1 + $0x1e4] ss:$12 sps:$4 sm:$0xff]   ;;  %v3709_v7 = vld [vmem:[%s5386_s1 + $0x1e8] ss:$12 sps:$4 sm:$0xff]   ;;  %v3722_v11 = vld [vmem:[%s5386_s1 + $0x200] ss:$12 sps:$4 sm:$0xff]  }
  0x19   :  { %v3719_v9 = vld [vmem:[%s5386_s1 + $0x1f8] ss:$12 sps:$4 sm:$0xff]   ;;  %v3663_v10 = vld [vmem:[%s5387_s0 + $0x60] ss:$16 sps:$4 sm:$0xff]  }
  0x1a   :  { %2104 = vmatpush1.bf16.msra.mxu1 %v3610_v20  ;;  %v3668_v12 = vld [vmem:[%s5387_s0 + $0x84] ss:$16 sps:$4 sm:$0xff]   ;;  %v3732_v13 = vld [vmem:[%s5386_s1 + $0x210] ss:$12 sps:$4 sm:$0xff]  }
  0x1b   :  { %1398 = vmatpush1.bf16.msra.mxu0 %v3611_v21  ;;  %2105 = vmatprep.subr.bf16.mxu1 %v3880_v0  ;;  %v3734_v14 = vld [vmem:[%s5386_s1 + $0x214] ss:$12 sps:$4 sm:$0xff]   ;;  %v3735_v15 = vld [vmem:[%s5386_s1 + $0x218] ss:$12 sps:$4 sm:$0xff]  }
  0x1c   :  { %1399 = vmatprep.subr.bf16.mxu0 %v3612_v22  ;;  %v3670_v16 = vld [vmem:[%s5387_s0 + $0x80] ss:$16 sps:$4 sm:$0xff]   ;;  %v3671_v17 = vld [vmem:[%s5387_s0 + $0xa4] ss:$16 sps:$4 sm:$0xff]  }
  0x1d   :  { %v3673_v18 = vld [vmem:[%s5387_s0 + $0xa0] ss:$16 sps:$4 sm:$0xff]   ;;  %v3674_v19 = vld [vmem:[%s5387_s0 + $0xc4] ss:$16 sps:$4 sm:$0xff]  }
  0x1e   :  { %2106 = vmatpush1.bf16.msra.mxu1 %v3614_v23  ;;  %v3676_v20 = vld [vmem:[%s5387_s0 + $0xc0] ss:$16 sps:$4 sm:$0xff]   ;;  %v3680_v21 = vld [vmem:[%s5387_s0 + $0xe4] ss:$16 sps:$4 sm:$0xff]   ;;  %v3747_v23 = vld [vmem:[%s5386_s1 + $0x22c] ss:$12 sps:$4 sm:$0xff]  }
  0x1f   :  { %1400 = vmatpush1.bf16.msra.mxu0 %v3615_v24  ;;  %2107 = vmatprep.subr.bf16.mxu1 %v3880_v0  ;;  %v3745_v22 = vld [vmem:[%s5386_s1 + $0x228] ss:$12 sps:$4 sm:$0xff]   ;;  %v3750_v24 = vld [vmem:[%s5386_s1 + $0x230] ss:$12 sps:$4 sm:$0xff]  }
  0x20   :  { %1401 = vmatprep.subr.bf16.mxu0 %v3616_v25  ;;  %v3683_v25 = vld [vmem:[%s5387_s0 + $0xe0] ss:$16 sps:$4 sm:$0xff]  }
  0x21   :  { %v3760_v32 = vld [vmem:[%s5386_s1 + $0x244] ss:$12 sps:$4 sm:$0xff]  }
  0x22   :  { %2108 = vmatpush1.bf16.msra.mxu1 %v3618_v26  ;;  %v3684_v26 = vld [vmem:[%s5387_s0 + $0x104] ss:$16 sps:$4 sm:$0xff]  }
  0x23   :  { %1402 = vmatpush1.bf16.msra.mxu0 %v3619_v27  ;;  %2109 = vmatprep.subr.bf16.mxu1 %v3880_v0  ;;  %v3686_v27 = vld [vmem:[%s5387_s0 + $0x100] ss:$16 sps:$4 sm:$0xff]  }
  0x24   :  { %1403 = vmatprep.subr.bf16.mxu0 %v3620_v28  ;;  %v3687_v28 = vld [vmem:[%s5387_s0 + $0x124] ss:$16 sps:$4 sm:$0xff]  }
  0x26   :  { %2110 = vmatpush1.bf16.msra.mxu1 %v3622_v29  ;;  %v3689_v29 = vld [vmem:[%s5387_s0 + $0x120] ss:$16 sps:$4 sm:$0xff]  }
  0x27   :  { %1404 = vmatpush1.bf16.msra.mxu0 %v3623_v30  ;;  %2111 = vmatprep.subr.bf16.mxu1 %v3880_v0  ;;  %v3693_v30 = vld [vmem:[%s5387_s0 + $0x144] ss:$16 sps:$4 sm:$0xff]  }
  0x28   :  { %1405 = vmatprep.subr.bf16.mxu0 %v3624_v31  ;;  %v3758_v31 = vld [vmem:[%s5386_s1 + $0x240] ss:$12 sps:$4 sm:$0xff]  }
  0x2a   :  { %2112 = vmatpush1.bf16.msra.mxu1 %v3626_v33  ;;  %v3695_v33 = vld [vmem:[%s5387_s0 + $0x140] ss:$16 sps:$4 sm:$0xff]  }
  0x2b   :  { %1406 = vmatpush1.bf16.msra.mxu0 %v3627_v34  ;;  %2113 = vmatprep.subr.bf16.mxu1 %v3880_v0  ;;  %v3697_v34 = vld [vmem:[%s5387_s0 + $0x164] ss:$16 sps:$4 sm:$0xff]  }
  0x2c   :  { %1407 = vmatprep.subr.bf16.mxu0 %v3628_v35  ;;  %v3764_v35 = vld [vmem:[%s5386_s1 + $0x248] ss:$12 sps:$4 sm:$0xff]  }
  0x2e   :  { %2114 = vmatpush1.bf16.msra.mxu1 %v3630_v36  ;;  %v3699_v36 = vld [vmem:[%s5387_s0 + $0x160] ss:$16 sps:$4 sm:$0xff]  }
  0x2f   :  { %1408 = vmatpush1.bf16.msra.mxu0 %v3631_v37  ;;  %2115 = vmatprep.subr.bf16.mxu1 %v3880_v0  ;;  %v3700_v37 = vld [vmem:[%s5387_s0 + $0x184] ss:$16 sps:$4 sm:$0xff]  }
  0x30   :  { %1409 = vmatprep.subr.bf16.mxu0 %v3632_v38  ;;  %v3702_v38 = vld [vmem:[%s5387_s0 + $0x180] ss:$16 sps:$4 sm:$0xff]  }
  0x32   :  { %2116 = vmatpush1.bf16.msra.mxu1 %v3634_v39  ;;  %v3773_v39 = vld [vmem:[%s5386_s1 + $0x258] ss:$12 sps:$4 sm:$0xff]  }
  0x33   :  { %1410 = vmatpush1.bf16.msra.mxu0 %v3635_v40  ;;  %2117 = vmatprep.subr.bf16.mxu1 %v3880_v0  ;;  %v3775_v40 = vld [vmem:[%s5386_s1 + $0x25c] ss:$12 sps:$4 sm:$0xff]  }
  0x34   :  { %1411 = vmatprep.subr.bf16.mxu0 %v3636_v41  ;;  %v3708_v41 = vld [vmem:[%s5387_s0 + $0x1a0] ss:$16 sps:$4 sm:$0xff]  }
  0x36   :  { %2118 = vmatpush1.bf16.msra.mxu1 %v3638_v42  ;;  %v3710_v42 = vld [vmem:[%s5387_s0 + $0x1c4] ss:$16 sps:$4 sm:$0xff]  }
  0x37   :  { %1412 = vmatpush1.bf16.msra.mxu0 %v3639_v43  ;;  %2119 = vmatprep.subr.bf16.mxu1 %v3880_v0  ;;  %v3777_v43 = vld [vmem:[%s5386_s1 + $0x260] ss:$12 sps:$4 sm:$0xff]  }
  0x38   :  { %1413 = vmatprep.subr.bf16.mxu0 %v3640_v44  ;;  %v3712_v44 = vld [vmem:[%s5387_s0 + $0x1c0] ss:$16 sps:$4 sm:$0xff]  }
  0x3a   :  { %2120 = vmatpush1.bf16.msra.mxu1 %v3642_v45  ;;  %v3713_v45 = vld [vmem:[%s5387_s0 + $0x1e4] ss:$16 sps:$4 sm:$0xff]  }
  0x3b   :  { %1414 = vmatpush1.bf16.msra.mxu0 %v3643_v46  ;;  %2121 = vmatprep.subr.bf16.mxu1 %v3880_v0  ;;  %v3715_v46 = vld [vmem:[%s5387_s0 + $0x1e0] ss:$16 sps:$4 sm:$0xff]  }
  0x3c   :  { %1415 = vmatprep.subr.bf16.mxu0 %v3644_v47  ;;  %v3716_v47 = vld [vmem:[%s5387_s0 + $0x204] ss:$16 sps:$4 sm:$0xff]  }
  0x3e   :  { %2122 = vmatpush1.bf16.msra.mxu1 %v3646_v48  ;;  %v3718_v48 = vld [vmem:[%s5387_s0 + $0x200] ss:$16 sps:$4 sm:$0xff]  }
  0x3f   :  { %1416 = vmatpush1.bf16.msra.mxu0 %v3647_v49  ;;  %2380 = vmatprep.subr.bf16.mxu1 %v3880_v0  ;;  %v3723_v49 = vld [vmem:[%s5387_s0 + $0x224] ss:$16 sps:$4 sm:$0xff]  }
  0x40   :  { %1738 = vmatprep.subr.bf16.mxu0 %v3653_v50  ;;  %v3725_v50 = vld [vmem:[%s5387_s0 + $0x220] ss:$16 sps:$4 sm:$0xff]  }
  0x41   :  { %2124 = vmatmul.mubr.bf16.vlgmr.msra.gmra.mrb[0].mxu1 %v3648_v51 }
  0x42   :  { %1418 = vmatmul.mubr.bf16.vlgmr.msra.gmra.mrb[0].mxu0 %v3648_v51  ;;  %2381 = vmatpush1.bf16.msra.mxu1 %v3654_v53  ;;  %v3726_v51 = vld [vmem:[%s5387_s0 + $0x244] ss:$16 sps:$4 sm:$0xff]  }
  0x43   :  { %1739 = vmatpush1.bf16.msra.mxu0 %v3651_v52  ;;  %2131 = vmatprep.mubr.bf16.mxu1 %v3655_v54  ;;  %v3728_v52 = vld [vmem:[%s5387_s0 + $0x240] ss:$16 sps:$4 sm:$0xff]   ;;  %v3729_v53 = vld [vmem:[%s5387_s0 + $0x264] ss:$16 sps:$4 sm:$0xff]  }
  0x44   :  { %1427 = vmatprep.mubr.bf16.mxu0 %v3655_v54  ;;  %1740 = vmatprep.subr.bf16.mxu0 %v3666_v55  ;;  %v3731_v54 = vld [vmem:[%s5387_s0 + $0x260] ss:$16 sps:$4 sm:$0xff]   ;;  %v3736_v55 = vld [vmem:[%s5387_s0 + $0x284] ss:$16 sps:$4 sm:$0xff]  }
  0x45   :  { %2382 = vmatprep.subr.bf16.mxu1 %v3880_v0 }
  0x46   :  { %2383 = vmatpush1.bf16.msra.mxu1 %v3667_v56  ;;  %v3738_v56 = vld [vmem:[%s5387_s0 + $0x280] ss:$16 sps:$4 sm:$0xff]  }
  0x47   :  { %1741 = vmatpush1.bf16.msra.mxu0 %v3664_v57  ;;  %2384 = vmatprep.subr.bf16.mxu1 %v3880_v0  ;;  %v3739_v57 = vld [vmem:[%s5387_s0 + $0x2a4] ss:$16 sps:$4 sm:$0xff]  }
  0x48   :  { %1742 = vmatprep.subr.bf16.mxu0 %v3679_v58  ;;  %v3741_v58 = vld [vmem:[%s5387_s0 + $0x2a0] ss:$16 sps:$4 sm:$0xff]  }
  0x49   :  { %2132 = vmatmul.mubr.bf16.gmra.mrb[4].mxu1 %v3657_v59 }
  0x4a   :  { %1428 = vmatmul.mubr.bf16.gmra.mrb[4].mxu0 %v3657_v59  ;;  %2139 = vmatprep.mubr.bf16.mxu1 %v3658_v60  ;;  %v3742_v59 = vld [vmem:[%s5387_s0 + $0x2c4] ss:$16 sps:$4 sm:$0xff]  }
  0x4b   :  { %1437 = vmatprep.mubr.bf16.mxu0 %v3658_v60  ;;  %1743 = vmatpush1.bf16.msra.mxu0 %v3677_v61  ;;  %v3744_v60 = vld [vmem:[%s5387_s0 + $0x2c0] ss:$16 sps:$4 sm:$0xff]   ;;  %v3748_v61 = vld [vmem:[%s5387_s0 + $0x2e4] ss:$16 sps:$4 sm:$0xff]  }
  0x4c   :  { %2385 = vmatpush1.bf16.msra.mxu1 %v3682_v62  ;;  %1744 = vmatprep.subr.bf16.mxu0 %v3692_v63  ;;  %v3751_v62 = vld [vmem:[%s5387_s0 + $0x2e0] ss:$16 sps:$4 sm:$0xff]   ;;  %v3752_v63 = vld [vmem:[%s5387_s0 + $0x304] ss:$16 sps:$4 sm:$0xff]  }
  0x4d   :  { %2386 = vmatprep.subr.bf16.mxu1 %v3880_v0 }
  0x4f   :  { %1745 = vmatpush1.bf16.msra.mxu0 %v3690_v1  ;;  %v3754_v1 = vld [vmem:[%s5387_s0 + $0x300] ss:$16 sps:$4 sm:$0xff]  }
  0x50   :  { %2387 = vmatpush1.bf16.msra.mxu1 %v3696_v3  ;;  %1746 = vmatprep.subr.bf16.mxu0 %v3707_v4  ;;  %v3757_v3 = vld [vmem:[%s5387_s0 + $0x320] ss:$16 sps:$4 sm:$0xff]   ;;  %v3761_v4 = vld [vmem:[%s5387_s0 + $0x344] ss:$16 sps:$4 sm:$0xff]  }
  0x51   :  { %2140 = vmatmul.mubr.bf16.gmra.mrb[8].mxu1 %v3660_v2  ;;  %2388 = vmatprep.subr.bf16.mxu1 %v3880_v0 }
  0x52   :  { %1438 = vmatmul.mubr.bf16.gmra.mrb[8].mxu0 %v3660_v2  ;;  %2147 = vmatprep.mubr.bf16.mxu1 %v3661_v5  ;;  %v3755_v2 = vld [vmem:[%s5387_s0 + $0x324] ss:$16 sps:$4 sm:$0xff]  }
  0x53   :  { %1447 = vmatprep.mubr.bf16.mxu0 %v3661_v5  ;;  %1747 = vmatpush1.bf16.msra.mxu0 %v3705_v6  ;;  %v3763_v5 = vld [vmem:[%s5387_s0 + $0x340] ss:$16 sps:$4 sm:$0xff]   ;;  %v3765_v6 = vld [vmem:[%s5387_s0 + $0x364] ss:$16 sps:$4 sm:$0xff]  }
  0x54   :  { %2389 = vmatpush1.bf16.msra.mxu1 %v3709_v7  ;;  %1748 = vmatprep.subr.bf16.mxu0 %v3721_v8  ;;  %v3767_v7 = vld [vmem:[%s5387_s0 + $0x360] ss:$16 sps:$4 sm:$0xff]   ;;  %v3768_v8 = vld [vmem:[%s5387_s0 + $0x384] ss:$16 sps:$4 sm:$0xff]  }
  0x55   :  { %2390 = vmatprep.subr.bf16.mxu1 %v3880_v0 }
  0x57   :  { %1749 = vmatpush1.bf16.msra.mxu0 %v3719_v9  ;;  %v3770_v9 = vld [vmem:[%s5387_s0 + $0x380] ss:$16 sps:$4 sm:$0xff]  }
  0x58   :  { %2391 = vmatpush1.bf16.msra.mxu1 %v3722_v11  ;;  %1750 = vmatprep.subr.bf16.mxu0 %v3734_v14  ;;  %v3776_v11 = vld [vmem:[%s5387_s0 + $0x3a0] ss:$16 sps:$4 sm:$0xff]   ;;  %v3781_v14 = vld [vmem:[%s5387_s0 + $0x3e4] ss:$16 sps:$4 sm:$0xff]  }
  0x59   :  { %2148 = vmatmul.mubr.bf16.gmra.mrb[12].mxu1 %v3663_v10  ;;  %2392 = vmatprep.subr.bf16.mxu1 %v3880_v0 }
  0x5a   :  { %1448 = vmatmul.mubr.bf16.gmra.mrb[12].mxu0 %v3663_v10  ;;  %2155 = vmatprep.mubr.bf16.mxu1 %v3668_v12  ;;  %v3771_v10 = vld [vmem:[%s5387_s0 + $0x3a4] ss:$16 sps:$4 sm:$0xff]  }
  0x5b   :  { %1457 = vmatprep.mubr.bf16.mxu0 %v3668_v12  ;;  %1751 = vmatpush1.bf16.msra.mxu0 %v3732_v13  ;;  %v3778_v12 = vld [vmem:[%s5387_s0 + $0x3c4] ss:$16 sps:$4 sm:$0xff]   ;;  %v3780_v13 = vld [vmem:[%s5387_s0 + $0x3c0] ss:$16 sps:$4 sm:$0xff]  }
  0x5c   :  { %2393 = vmatpush1.bf16.msra.mxu1 %v3735_v15  ;;  %1752 = vmatprep.subr.bf16.mxu0 %v3747_v23  ;;  %v3783_v15 = vld [vmem:[%s5387_s0 + $0x3e0] ss:$16 sps:$4 sm:$0xff]   ;;  %v3795_v23 = vld [vmem:[%s5387_s0 + $0x68] ss:$16 sps:$4 sm:$0xff]  }
  0x5d   :  { %2394 = vmatprep.subr.bf16.mxu1 %v3880_v0 }
  0x5f   :  { %1753 = vmatpush1.bf16.msra.mxu0 %v3745_v22  ;;  %v3793_v22 = vld [vmem:[%s5387_s0 + $0x6c] ss:$16 sps:$4 sm:$0xff]  }
  0x60   :  { %2395 = vmatpush1.bf16.msra.mxu1 %v3750_v24  ;;  %1754 = vmatprep.subr.bf16.mxu0 %v3760_v32  ;;  %v3796_v24 = vld [vmem:[%s5387_s0 + $0x8c] ss:$16 sps:$4 sm:$0xff]  }
  0x61   :  { %2156 = vmatmul.mubr.bf16.gmra.mrb[16].mxu1 %v3670_v16  ;;  %2396 = vmatprep.subr.bf16.mxu1 %v3880_v0  ;;  %v3808_v32 = vld [vmem:[%s5387_s0 + $0x10c] ss:$16 sps:$4 sm:$0xff]  }
  0x62   :  { %1458 = vmatmul.mubr.bf16.gmra.mrb[16].mxu0 %v3670_v16  ;;  %2163 = vmatprep.mubr.bf16.mxu1 %v3671_v17  ;;  %v3786_v16 = vld [vmem:[%s5387_s0 + $0xc] ss:$16 sps:$4 sm:$0xff]  }
  0x63   :  { %1467 = vmatprep.mubr.bf16.mxu0 %v3671_v17  ;;  %1755 = vmatpush1.bf16.msra.mxu0 %v3758_v31  ;;  %v3784_v17 = vld [vmem:[%s5387_s0 + $0x8] ss:$16 sps:$4 sm:$0xff]  }
  0x64   :  { %2397 = vmatpush1.bf16.msra.mxu1 %v3764_v35  ;;  %1756 = vmatprep.subr.bf16.mxu0 %v3775_v40  ;;  %v3807_v31 = vld [vmem:[%s5387_s0 + $0xe8] ss:$16 sps:$4 sm:$0xff]  }
  0x65   :  { %2398 = vmatprep.subr.bf16.mxu1 %v3880_v0  ;;  %v3703_v0 = vld [vmem:[%s5387_s0 + $0x1a4] ss:$16 sps:$4 sm:$0xff]   ;;  %v3813_v35 = vld [vmem:[%s5387_s0 + $0x128] ss:$16 sps:$4 sm:$0xff]  }
  0x66   :  { %v3822_v40 = vld [vmem:[%s5387_s0 + $0x188] ss:$16 sps:$4 sm:$0xff]  }
  0x67   :  { %1757 = vmatpush1.bf16.msra.mxu0 %v3773_v39  ;;  %v3820_v39 = vld [vmem:[%s5387_s0 + $0x18c] ss:$16 sps:$4 sm:$0xff]  }
  0x68   :  { %2399 = vmatpush1.bf16.msra.mxu1 %v3777_v43  ;;  %v3826_v43 = vld [vmem:[%s5387_s0 + $0x1cc] ss:$16 sps:$4 sm:$0xff]  }
  0x69   :  { %2164 = vmatmul.mubr.bf16.gmra.mrb[20].mxu1 %v3673_v18 }
  0x6a   :  { %1468 = vmatmul.mubr.bf16.gmra.mrb[20].mxu0 %v3673_v18  ;;  %2171 = vmatprep.mubr.bf16.mxu1 %v3674_v19  ;;  %v3787_v18 = vld [vmem:[%s5387_s0 + $0x2c] ss:$16 sps:$4 sm:$0xff]  }
  0x6b   :  { %1477 = vmatprep.mubr.bf16.mxu0 %v3674_v19  ;;  %v3789_v19 = vld [vmem:[%s5387_s0 + $0x28] ss:$16 sps:$4 sm:$0xff]  }
  0x71   :  { %2172 = vmatmul.mubr.bf16.gmra.mrb[24].mxu1 %v3676_v20 }
  0x72   :  { %1478 = vmatmul.mubr.bf16.gmra.mrb[24].mxu0 %v3676_v20  ;;  %2179 = vmatprep.mubr.bf16.mxu1 %v3680_v21  ;;  %v3790_v20 = vld [vmem:[%s5387_s0 + $0x4c] ss:$16 sps:$4 sm:$0xff]  }
  0x73   :  { %1487 = vmatprep.mubr.bf16.mxu0 %v3680_v21  ;;  %v3792_v21 = vld [vmem:[%s5387_s0 + $0x48] ss:$16 sps:$4 sm:$0xff]  }
  0x79   :  { %2180 = vmatmul.mubr.bf16.gmra.mrb[28].mxu1 %v3683_v25 }
  0x7a   :  { %1488 = vmatmul.mubr.bf16.gmra.mrb[28].mxu0 %v3683_v25  ;;  %2187 = vmatprep.mubr.bf16.mxu1 %v3684_v26  ;;  %v3798_v25 = vld [vmem:[%s5387_s0 + $0x88] ss:$16 sps:$4 sm:$0xff]  }
  0x7b   :  { %1497 = vmatprep.mubr.bf16.mxu0 %v3684_v26  ;;  %v3799_v26 = vld [vmem:[%s5387_s0 + $0xac] ss:$16 sps:$4 sm:$0xff]  }
  0x81   :  { %2188 = vmatmul.mubr.bf16.gmra.mrb[32].mxu1 %v3686_v27 }
  0x82   :  { %1498 = vmatmul.mubr.bf16.gmra.mrb[32].mxu0 %v3686_v27  ;;  %2195 = vmatprep.mubr.bf16.mxu1 %v3687_v28  ;;  %v3801_v27 = vld [vmem:[%s5387_s0 + $0xa8] ss:$16 sps:$4 sm:$0xff]  }
  0x83   :  { %1507 = vmatprep.mubr.bf16.mxu0 %v3687_v28  ;;  %v3802_v28 = vld [vmem:[%s5387_s0 + $0xcc] ss:$16 sps:$4 sm:$0xff]  }
  0x89   :  { %2196 = vmatmul.mubr.bf16.gmra.mrb[36].mxu1 %v3689_v29 }
  0x8a   :  { %1508 = vmatmul.mubr.bf16.gmra.mrb[36].mxu0 %v3689_v29  ;;  %2203 = vmatprep.mubr.bf16.mxu1 %v3693_v30  ;;  %v3804_v29 = vld [vmem:[%s5387_s0 + $0xc8] ss:$16 sps:$4 sm:$0xff]  }
  0x8b   :  { %1517 = vmatprep.mubr.bf16.mxu0 %v3693_v30  ;;  %v3805_v30 = vld [vmem:[%s5387_s0 + $0xec] ss:$16 sps:$4 sm:$0xff]  }
  0x91   :  { %2204 = vmatmul.mubr.bf16.gmra.mrb[40].mxu1 %v3695_v33 }
  0x92   :  { %1518 = vmatmul.mubr.bf16.gmra.mrb[40].mxu0 %v3695_v33  ;;  %2211 = vmatprep.mubr.bf16.mxu1 %v3697_v34  ;;  %v3810_v33 = vld [vmem:[%s5387_s0 + $0x108] ss:$16 sps:$4 sm:$0xff]  }
  0x93   :  { %1527 = vmatprep.mubr.bf16.mxu0 %v3697_v34  ;;  %v3811_v34 = vld [vmem:[%s5387_s0 + $0x12c] ss:$16 sps:$4 sm:$0xff]  }
  0x99   :  { %2212 = vmatmul.mubr.bf16.gmra.mrb[44].mxu1 %v3699_v36 }
  0x9a   :  { %1528 = vmatmul.mubr.bf16.gmra.mrb[44].mxu0 %v3699_v36  ;;  %2219 = vmatprep.mubr.bf16.mxu1 %v3700_v37  ;;  %v3814_v36 = vld [vmem:[%s5387_s0 + $0x14c] ss:$16 sps:$4 sm:$0xff]  }
  0x9b   :  { %1537 = vmatprep.mubr.bf16.mxu0 %v3700_v37  ;;  %v3816_v37 = vld [vmem:[%s5387_s0 + $0x148] ss:$16 sps:$4 sm:$0xff]  }
  0xa1   :  { %2220 = vmatmul.mubr.bf16.gmra.mrb[48].mxu1 %v3702_v38 }
  0xa2   :  { %1538 = vmatmul.mubr.bf16.gmra.mrb[48].mxu0 %v3702_v38  ;;  %2227 = vmatprep.mubr.bf16.mxu1 %v3703_v0  ;;  %v3817_v38 = vld [vmem:[%s5387_s0 + $0x16c] ss:$16 sps:$4 sm:$0xff]  }
  0xa3   :  { %1547 = vmatprep.mubr.bf16.mxu0 %v3703_v0  ;;  %v3819_v0 = vld [vmem:[%s5387_s0 + $0x168] ss:$16 sps:$4 sm:$0xff]  }
  0xa9   :  { %2228 = vmatmul.mubr.bf16.gmra.mrb[52].mxu1 %v3708_v41 }
  0xaa   :  { %1548 = vmatmul.mubr.bf16.gmra.mrb[52].mxu0 %v3708_v41  ;;  %2235 = vmatprep.mubr.bf16.mxu1 %v3710_v42  ;;  %v3823_v41 = vld [vmem:[%s5387_s0 + $0x1ac] ss:$16 sps:$4 sm:$0xff]  }
  0xab   :  { %1557 = vmatprep.mubr.bf16.mxu0 %v3710_v42  ;;  %v3825_v42 = vld [vmem:[%s5387_s0 + $0x1a8] ss:$16 sps:$4 sm:$0xff]  }
  0xb1   :  { %2236 = vmatmul.mubr.bf16.gmra.mrb[56].mxu1 %v3712_v44 }
  0xb2   :  { %1558 = vmatmul.mubr.bf16.gmra.mrb[56].mxu0 %v3712_v44  ;;  %2243 = vmatprep.mubr.bf16.mxu1 %v3713_v45  ;;  %v3828_v44 = vld [vmem:[%s5387_s0 + $0x1c8] ss:$16 sps:$4 sm:$0xff]  }
  0xb3   :  { %1567 = vmatprep.mubr.bf16.mxu0 %v3713_v45  ;;  %v3829_v45 = vld [vmem:[%s5387_s0 + $0x1ec] ss:$16 sps:$4 sm:$0xff]  }
  0xb9   :  { %2244 = vmatmul.mubr.bf16.gmra.mrb[60].mxu1 %v3715_v46 }
  0xba   :  { %1568 = vmatmul.mubr.bf16.gmra.mrb[60].mxu0 %v3715_v46  ;;  %2251 = vmatprep.mubr.bf16.mxu1 %v3716_v47  ;;  %v3831_v46 = vld [vmem:[%s5387_s0 + $0x1e8] ss:$16 sps:$4 sm:$0xff]  }
  0xbb   :  { %1577 = vmatprep.mubr.bf16.mxu0 %v3716_v47  ;;  %v3832_v47 = vld [vmem:[%s5387_s0 + $0x20c] ss:$16 sps:$4 sm:$0xff]  }
  0xc1   :  { %2252 = vmatmul.mubr.bf16.gmra.mrb[64].mxu1 %v3718_v48 }
  0xc2   :  { %1578 = vmatmul.mubr.bf16.gmra.mrb[64].mxu0 %v3718_v48  ;;  %2259 = vmatprep.mubr.bf16.mxu1 %v3723_v49  ;;  %v3834_v48 = vld [vmem:[%s5387_s0 + $0x208] ss:$16 sps:$4 sm:$0xff]  }
  0xc3   :  { %1587 = vmatprep.mubr.bf16.mxu0 %v3723_v49  ;;  %v3835_v49 = vld [vmem:[%s5387_s0 + $0x22c] ss:$16 sps:$4 sm:$0xff]  }
  0xc9   :  { %2260 = vmatmul.mubr.bf16.gmra.mrb[68].mxu1 %v3725_v50 }
  0xca   :  { %1588 = vmatmul.mubr.bf16.gmra.mrb[68].mxu0 %v3725_v50  ;;  %2267 = vmatprep.mubr.bf16.mxu1 %v3726_v51  ;;  %v3837_v50 = vld [vmem:[%s5387_s0 + $0x228] ss:$16 sps:$4 sm:$0xff]  }
  0xcb   :  { %1597 = vmatprep.mubr.bf16.mxu0 %v3726_v51  ;;  %v3838_v51 = vld [vmem:[%s5387_s0 + $0x24c] ss:$16 sps:$4 sm:$0xff]  }
  0xd1   :  { %2268 = vmatmul.mubr.bf16.gmra.mrb[72].mxu1 %v3728_v52 }
  0xd2   :  { %1598 = vmatmul.mubr.bf16.gmra.mrb[72].mxu0 %v3728_v52  ;;  %2275 = vmatprep.mubr.bf16.mxu1 %v3729_v53  ;;  %v3840_v52 = vld [vmem:[%s5387_s0 + $0x248] ss:$16 sps:$4 sm:$0xff]  }
  0xd3   :  { %1607 = vmatprep.mubr.bf16.mxu0 %v3729_v53  ;;  %v3841_v53 = vld [vmem:[%s5387_s0 + $0x26c] ss:$16 sps:$4 sm:$0xff]  }
  0xd9   :  { %2276 = vmatmul.mubr.bf16.gmra.mrb[76].mxu1 %v3731_v54 }
  0xda   :  { %1608 = vmatmul.mubr.bf16.gmra.mrb[76].mxu0 %v3731_v54  ;;  %2283 = vmatprep.mubr.bf16.mxu1 %v3736_v55  ;;  %v3843_v54 = vld [vmem:[%s5387_s0 + $0x268] ss:$16 sps:$4 sm:$0xff]  }
  0xdb   :  { %1617 = vmatprep.mubr.bf16.mxu0 %v3736_v55  ;;  %v3844_v55 = vld [vmem:[%s5387_s0 + $0x28c] ss:$16 sps:$4 sm:$0xff]  }
  0xe1   :  { %2284 = vmatmul.mubr.bf16.gmra.mrb[80].mxu1 %v3738_v56 }
  0xe2   :  { %1618 = vmatmul.mubr.bf16.gmra.mrb[80].mxu0 %v3738_v56  ;;  %2291 = vmatprep.mubr.bf16.mxu1 %v3739_v57  ;;  %v3846_v56 = vld [vmem:[%s5387_s0 + $0x288] ss:$16 sps:$4 sm:$0xff]  }
  0xe3   :  { %1627 = vmatprep.mubr.bf16.mxu0 %v3739_v57  ;;  %v3847_v57 = vld [vmem:[%s5387_s0 + $0x2ac] ss:$16 sps:$4 sm:$0xff]  }
  0xe9   :  { %2292 = vmatmul.mubr.bf16.gmra.mrb[84].mxu1 %v3741_v58 }
  0xea   :  { %1628 = vmatmul.mubr.bf16.gmra.mrb[84].mxu0 %v3741_v58  ;;  %2299 = vmatprep.mubr.bf16.mxu1 %v3742_v59  ;;  %v3849_v58 = vld [vmem:[%s5387_s0 + $0x2a8] ss:$16 sps:$4 sm:$0xff]  }
  0xeb   :  { %1637 = vmatprep.mubr.bf16.mxu0 %v3742_v59  ;;  %v3850_v59 = vld [vmem:[%s5387_s0 + $0x2cc] ss:$16 sps:$4 sm:$0xff]  }
  0xf1   :  { %2300 = vmatmul.mubr.bf16.gmra.mrb[88].mxu1 %v3744_v60 }
  0xf2   :  { %1638 = vmatmul.mubr.bf16.gmra.mrb[88].mxu0 %v3744_v60  ;;  %2307 = vmatprep.mubr.bf16.mxu1 %v3748_v61  ;;  %v3852_v60 = vld [vmem:[%s5387_s0 + $0x2c8] ss:$16 sps:$4 sm:$0xff]  }
  0xf3   :  { %1647 = vmatprep.mubr.bf16.mxu0 %v3748_v61  ;;  %v3853_v61 = vld [vmem:[%s5387_s0 + $0x2ec] ss:$16 sps:$4 sm:$0xff]  }
  0xf9   :  { %2308 = vmatmul.mubr.bf16.gmra.mrb[92].mxu1 %v3751_v62 }
  0xfa   :  { %1648 = vmatmul.mubr.bf16.gmra.mrb[92].mxu0 %v3751_v62  ;;  %2315 = vmatprep.mubr.bf16.mxu1 %v3752_v63  ;;  %v3855_v62 = vld [vmem:[%s5387_s0 + $0x2e8] ss:$16 sps:$4 sm:$0xff]  }
  0xfb   :  { %1657 = vmatprep.mubr.bf16.mxu0 %v3752_v63  ;;  %v3856_v63 = vld [vmem:[%s5387_s0 + $0x30c] ss:$16 sps:$4 sm:$0xff]  }
 0x101   :  { %2316 = vmatmul.mubr.bf16.gmra.mrb[96].mxu1 %v3754_v1 }
 0x102   :  { %1658 = vmatmul.mubr.bf16.gmra.mrb[96].mxu0 %v3754_v1  ;;  %2323 = vmatprep.mubr.bf16.mxu1 %v3755_v2  ;;  %v3858_v1 = vld [vmem:[%s5387_s0 + $0x308] ss:$16 sps:$4 sm:$0xff]  }
 0x103   :  { %1667 = vmatprep.mubr.bf16.mxu0 %v3755_v2  ;;  %v3859_v2 = vld [vmem:[%s5387_s0 + $0x32c] ss:$16 sps:$4 sm:$0xff]  }
 0x109   :  { %2324 = vmatmul.mubr.bf16.gmra.mrb[100].mxu1 %v3757_v3 }
 0x10a   :  { %1668 = vmatmul.mubr.bf16.gmra.mrb[100].mxu0 %v3757_v3  ;;  %2331 = vmatprep.mubr.bf16.mxu1 %v3761_v4  ;;  %v3861_v3 = vld [vmem:[%s5387_s0 + $0x328] ss:$16 sps:$4 sm:$0xff]  }
 0x10b   :  { %1677 = vmatprep.mubr.bf16.mxu0 %v3761_v4  ;;  %v249_v4 = vlaneseq }
 0x111   :  { %2332 = vmatmul.mubr.bf16.gmra.mrb[104].mxu1 %v3763_v5 }
 0x112   :  { %1678 = vmatmul.mubr.bf16.gmra.mrb[104].mxu0 %v3763_v5  ;;  %2339 = vmatprep.mubr.bf16.mxu1 %v3765_v6  ;;  %v3862_v5 = vld [vmem:[%s5387_s0 + $0x34c] ss:$16 sps:$4 sm:$0xff]  }
 0x113   :  { %1687 = vmatprep.mubr.bf16.mxu0 %v3765_v6  ;;  %v250_v6 = vshrl.u32 %v249_v4, 7  ;;  %v3876_v4 = vld [vmem:[%s5387_s0 + $0x3c8] ss:$16 sps:$4 sm:$0xff]  }
 0x119   :  { %2340 = vmatmul.mubr.bf16.gmra.mrb[108].mxu1 %v3767_v7 }
 0x11a   :  { %1688 = vmatmul.mubr.bf16.gmra.mrb[108].mxu0 %v3767_v7  ;;  %2347 = vmatprep.mubr.bf16.mxu1 %v3768_v8  ;;  %v3864_v7 = vld [vmem:[%s5387_s0 + $0x348] ss:$16 sps:$4 sm:$0xff]  }
 0x11b   :  { %1697 = vmatprep.mubr.bf16.mxu0 %v3768_v8  ;;  %v259_v8 = vsub.s32 2, %v250_v6 }
 0x121   :  { %2348 = vmatmul.mubr.bf16.gmra.mrb[112].mxu1 %v3770_v9 }
 0x122   :  { %1698 = vmatmul.mubr.bf16.gmra.mrb[112].mxu0 %v3770_v9  ;;  %2355 = vmatprep.mubr.bf16.mxu1 %v3771_v10  ;;  %v247_v9 = vld [vmem:[%s5388_s2] sm:$0x7] }
 0x123   :  { %1707 = vmatprep.mubr.bf16.mxu0 %v3771_v10  ;;  %v251_v10 = vsub.s32 0, %v250_v6 }
 0x129   :  { %2356 = vmatmul.mubr.bf16.gmra.mrb[116].mxu1 %v3776_v11 }
 0x12a   :  { %1708 = vmatmul.mubr.bf16.gmra.mrb[116].mxu0 %v3776_v11  ;;  %2363 = vmatprep.mubr.bf16.mxu1 %v3778_v12  ;;  %v3865_v11 = vld [vmem:[%s5387_s0 + $0x36c] ss:$16 sps:$4 sm:$0xff]  }
 0x12b   :  { %1717 = vmatprep.mubr.bf16.mxu0 %v3778_v12  ;;  %v255_v12 = vsub.s32 1, %v250_v6 }
 0x131   :  { %2364 = vmatmul.mubr.bf16.gmra.mrb[120].mxu1 %v3780_v13 }
 0x132   :  { %1718 = vmatmul.mubr.bf16.gmra.mrb[120].mxu0 %v3780_v13  ;;  %2371 = vmatprep.mubr.bf16.mxu1 %v3781_v14  ;;  %v4575_v13 = vrot.slane %v247_v9, %v259_v8  ;;  %v3877_v8 = vld [vmem:[%s5387_s0 + $0x3ec] ss:$16 sps:$4 sm:$0xff]  }
 0x133   :  { %1727 = vmatprep.mubr.bf16.mxu0 %v3781_v14  ;;  %v4577_v14 = vrot.slane %v247_v9, %v251_v10 }
 0x139   :  { %2372 = vmatmul.mubr.bf16.gmra.mrb[124].mxu1 %v3783_v15 }
 0x13a   :  { %1728 = vmatmul.mubr.bf16.gmra.mrb[124].mxu0 %v3783_v15  ;;  %3103 = vmatprep.mubr.msk.bf16.mxu1 %vm1288_vm0, %v3786_v16  ;;  %v4580_v15 = vrot.slane %v247_v9, %v255_v12 }
 0x13b   :  { %3071 = vmatprep.mubr.msk.bf16.mxu0 %vm1288_vm0, %v3786_v16 }
 0x141   :  { %2413 = vmatmul.mubr.bf16.vlgmr.msra.gmra.mrb[0].mxu1 %v3784_v17 }
 0x142   :  { %1771 = vmatmul.mubr.bf16.vlgmr.msra.gmra.mrb[0].mxu0 %v3784_v17  ;;  %3104 = vmatprep.mubr.msk.bf16.mxu1 %vm1288_vm0, %v3787_v18 }
 0x143   :  { %3072 = vmatprep.mubr.msk.bf16.mxu0 %vm1288_vm0, %v3787_v18 }
 0x149   :  { %2421 = vmatmul.mubr.bf16.gmra.mrb[4].mxu1 %v3789_v19 }
 0x14a   :  { %1781 = vmatmul.mubr.bf16.gmra.mrb[4].mxu0 %v3789_v19  ;;  %3105 = vmatprep.mubr.msk.bf16.mxu1 %vm1288_vm0, %v3790_v20 }
 0x14b   :  { %3073 = vmatprep.mubr.msk.bf16.mxu0 %vm1288_vm0, %v3790_v20  ;;  %v3867_v20 = vld [vmem:[%s5387_s0 + $0x368] ss:$16 sps:$4 sm:$0xff]  }
 0x151   :  { %2429 = vmatmul.mubr.bf16.gmra.mrb[8].mxu1 %v3792_v21 }
 0x152   :  { %1791 = vmatmul.mubr.bf16.gmra.mrb[8].mxu0 %v3792_v21  ;;  %3106 = vmatprep.mubr.msk.bf16.mxu1 %vm1288_vm0, %v3793_v22 }
 0x153   :  { %3074 = vmatprep.mubr.msk.bf16.mxu0 %vm1288_vm0, %v3793_v22 }
 0x159   :  { %2437 = vmatmul.mubr.bf16.gmra.mrb[12].mxu1 %v3795_v23 }
 0x15a   :  { %1801 = vmatmul.mubr.bf16.gmra.mrb[12].mxu0 %v3795_v23  ;;  %3107 = vmatprep.mubr.msk.bf16.mxu1 %vm1288_vm0, %v3796_v24 }
 0x15b   :  { %3075 = vmatprep.mubr.msk.bf16.mxu0 %vm1288_vm0, %v3796_v24  ;;  %v3868_v24 = vld [vmem:[%s5387_s0 + $0x38c] ss:$16 sps:$4 sm:$0xff]  }
 0x161   :  { %2445 = vmatmul.mubr.bf16.gmra.mrb[16].mxu1 %v3798_v25 }
 0x162   :  { %1811 = vmatmul.mubr.bf16.gmra.mrb[16].mxu0 %v3798_v25  ;;  %3108 = vmatprep.mubr.msk.bf16.mxu1 %vm1288_vm0, %v3799_v26 }
 0x163   :  { %3076 = vmatprep.mubr.msk.bf16.mxu0 %vm1288_vm0, %v3799_v26 }
 0x169   :  { %2453 = vmatmul.mubr.bf16.gmra.mrb[20].mxu1 %v3801_v27 }
 0x16a   :  { %1821 = vmatmul.mubr.bf16.gmra.mrb[20].mxu0 %v3801_v27  ;;  %3109 = vmatprep.mubr.msk.bf16.mxu1 %vm1288_vm0, %v3802_v28 }
 0x16b   :  { %3077 = vmatprep.mubr.msk.bf16.mxu0 %vm1288_vm0, %v3802_v28 }
 0x171   :  { %2461 = vmatmul.mubr.bf16.gmra.mrb[24].mxu1 %v3804_v29 }
 0x172   :  { %1831 = vmatmul.mubr.bf16.gmra.mrb[24].mxu0 %v3804_v29  ;;  %3110 = vmatprep.mubr.msk.bf16.mxu1 %vm1288_vm0, %v3805_v30 }
 0x173   :  { %3078 = vmatprep.mubr.msk.bf16.mxu0 %vm1288_vm0, %v3805_v30 }
 0x179   :  { %2469 = vmatmul.mubr.bf16.gmra.mrb[28].mxu1 %v3807_v31 }
 0x17a   :  { %1841 = vmatmul.mubr.bf16.gmra.mrb[28].mxu0 %v3807_v31  ;;  %3111 = vmatprep.mubr.msk.bf16.mxu1 %vm1288_vm0, %v3808_v32 }
 0x17b   :  { %3079 = vmatprep.mubr.msk.bf16.mxu0 %vm1288_vm0, %v3808_v32 }
 0x181   :  { %2477 = vmatmul.mubr.bf16.gmra.mrb[32].mxu1 %v3810_v33 }
 0x182   :  { %1851 = vmatmul.mubr.bf16.gmra.mrb[32].mxu0 %v3810_v33  ;;  %3112 = vmatprep.mubr.msk.bf16.mxu1 %vm1288_vm0, %v3811_v34 }
 0x183   :  { %3080 = vmatprep.mubr.msk.bf16.mxu0 %vm1288_vm0, %v3811_v34 }
 0x189   :  { %2485 = vmatmul.mubr.bf16.gmra.mrb[36].mxu1 %v3813_v35 }
 0x18a   :  { %1861 = vmatmul.mubr.bf16.gmra.mrb[36].mxu0 %v3813_v35  ;;  %3113 = vmatprep.mubr.msk.bf16.mxu1 %vm1288_vm0, %v3814_v36 }
 0x18b   :  { %3081 = vmatprep.mubr.msk.bf16.mxu0 %vm1288_vm0, %v3814_v36  ;;  %v3870_v36 = vld [vmem:[%s5387_s0 + $0x388] ss:$16 sps:$4 sm:$0xff]  }
 0x191   :  { %2493 = vmatmul.mubr.bf16.gmra.mrb[40].mxu1 %v3816_v37 }
 0x192   :  { %1871 = vmatmul.mubr.bf16.gmra.mrb[40].mxu0 %v3816_v37  ;;  %3114 = vmatprep.mubr.msk.bf16.mxu1 %vm1288_vm0, %v3817_v38 }
 0x193   :  { %3082 = vmatprep.mubr.msk.bf16.mxu0 %vm1288_vm0, %v3817_v38 }
 0x199   :  { %2501 = vmatmul.mubr.bf16.gmra.mrb[44].mxu1 %v3819_v0 }
 0x19a   :  { %1881 = vmatmul.mubr.bf16.gmra.mrb[44].mxu0 %v3819_v0  ;;  %3115 = vmatprep.mubr.msk.bf16.mxu1 %vm1288_vm0, %v3820_v39 }
 0x19b   :  { %3083 = vmatprep.mubr.msk.bf16.mxu0 %vm1288_vm0, %v3820_v39  ;;  %v3871_v39 = vld [vmem:[%s5387_s0 + $0x3ac] ss:$16 sps:$4 sm:$0xff]  }
 0x1a1   :  { %2509 = vmatmul.mubr.bf16.gmra.mrb[48].mxu1 %v3822_v40 }
 0x1a2   :  { %1891 = vmatmul.mubr.bf16.gmra.mrb[48].mxu0 %v3822_v40  ;;  %3116 = vmatprep.mubr.msk.bf16.mxu1 %vm1288_vm0, %v3823_v41 }
 0x1a3   :  { %3084 = vmatprep.mubr.msk.bf16.mxu0 %vm1288_vm0, %v3823_v41 }
 0x1a9   :  { %2517 = vmatmul.mubr.bf16.gmra.mrb[52].mxu1 %v3825_v42 }
 0x1aa   :  { %1901 = vmatmul.mubr.bf16.gmra.mrb[52].mxu0 %v3825_v42  ;;  %3117 = vmatprep.mubr.msk.bf16.mxu1 %vm1288_vm0, %v3826_v43 }
 0x1ab   :  { %3085 = vmatprep.mubr.msk.bf16.mxu0 %vm1288_vm0, %v3826_v43 }
 0x1b1   :  { %2525 = vmatmul.mubr.bf16.gmra.mrb[56].mxu1 %v3828_v44 }
 0x1b2   :  { %1911 = vmatmul.mubr.bf16.gmra.mrb[56].mxu0 %v3828_v44  ;;  %3118 = vmatprep.mubr.msk.bf16.mxu1 %vm1288_vm0, %v3829_v45 }
 0x1b3   :  { %3086 = vmatprep.mubr.msk.bf16.mxu0 %vm1288_vm0, %v3829_v45 }
 0x1b9   :  { %2533 = vmatmul.mubr.bf16.gmra.mrb[60].mxu1 %v3831_v46 }
 0x1ba   :  { %1921 = vmatmul.mubr.bf16.gmra.mrb[60].mxu0 %v3831_v46  ;;  %3119 = vmatprep.mubr.msk.bf16.mxu1 %vm1288_vm0, %v3832_v47 }
 0x1bb   :  { %3087 = vmatprep.mubr.msk.bf16.mxu0 %vm1288_vm0, %v3832_v47 }
 0x1c1   :  { %2541 = vmatmul.mubr.bf16.gmra.mrb[64].mxu1 %v3834_v48 }
 0x1c2   :  { %1931 = vmatmul.mubr.bf16.gmra.mrb[64].mxu0 %v3834_v48  ;;  %3120 = vmatprep.mubr.msk.bf16.mxu1 %vm1288_vm0, %v3835_v49 }
 0x1c3   :  { %3088 = vmatprep.mubr.msk.bf16.mxu0 %vm1288_vm0, %v3835_v49 }
 0x1c9   :  { %2549 = vmatmul.mubr.bf16.gmra.mrb[68].mxu1 %v3837_v50 }
 0x1ca   :  { %1941 = vmatmul.mubr.bf16.gmra.mrb[68].mxu0 %v3837_v50  ;;  %3121 = vmatprep.mubr.msk.bf16.mxu1 %vm1288_vm0, %v3838_v51 }
 0x1cb   :  { %3089 = vmatprep.mubr.msk.bf16.mxu0 %vm1288_vm0, %v3838_v51  ;;  %v3873_v51 = vld [vmem:[%s5387_s0 + $0x3a8] ss:$16 sps:$4 sm:$0xff]  }
 0x1d1   :  { %2557 = vmatmul.mubr.bf16.gmra.mrb[72].mxu1 %v3840_v52 }
 0x1d2   :  { %1951 = vmatmul.mubr.bf16.gmra.mrb[72].mxu0 %v3840_v52  ;;  %3122 = vmatprep.mubr.msk.bf16.mxu1 %vm1288_vm0, %v3841_v53 }
 0x1d3   :  { %3090 = vmatprep.mubr.msk.bf16.mxu0 %vm1288_vm0, %v3841_v53 }
 0x1d9   :  { %2565 = vmatmul.mubr.bf16.gmra.mrb[76].mxu1 %v3843_v54 }
 0x1da   :  { %1961 = vmatmul.mubr.bf16.gmra.mrb[76].mxu0 %v3843_v54  ;;  %3123 = vmatprep.mubr.msk.bf16.mxu1 %vm1288_vm0, %v3844_v55 }
 0x1db   :  { %3091 = vmatprep.mubr.msk.bf16.mxu0 %vm1288_vm0, %v3844_v55  ;;  %v3874_v55 = vld [vmem:[%s5387_s0 + $0x3cc] ss:$16 sps:$4 sm:$0xff]  }
 0x1e1   :  { %2573 = vmatmul.mubr.bf16.gmra.mrb[80].mxu1 %v3846_v56 }
 0x1e2   :  { %1971 = vmatmul.mubr.bf16.gmra.mrb[80].mxu0 %v3846_v56  ;;  %3124 = vmatprep.mubr.msk.bf16.mxu1 %vm1288_vm0, %v3847_v57 }
 0x1e3   :  { %3092 = vmatprep.mubr.msk.bf16.mxu0 %vm1288_vm0, %v3847_v57 }
 0x1e9   :  { %2581 = vmatmul.mubr.bf16.gmra.mrb[84].mxu1 %v3849_v58 }
 0x1ea   :  { %1981 = vmatmul.mubr.bf16.gmra.mrb[84].mxu0 %v3849_v58  ;;  %3125 = vmatprep.mubr.msk.bf16.mxu1 %vm1288_vm0, %v3850_v59 }
 0x1eb   :  { %3093 = vmatprep.mubr.msk.bf16.mxu0 %vm1288_vm0, %v3850_v59 }
 0x1f1   :  { %2589 = vmatmul.mubr.bf16.gmra.mrb[88].mxu1 %v3852_v60 }
 0x1f2   :  { %1991 = vmatmul.mubr.bf16.gmra.mrb[88].mxu0 %v3852_v60  ;;  %3126 = vmatprep.mubr.msk.bf16.mxu1 %vm1288_vm0, %v3853_v61 }
 0x1f3   :  { %3094 = vmatprep.mubr.msk.bf16.mxu0 %vm1288_vm0, %v3853_v61 }
 0x1f9   :  { %2597 = vmatmul.mubr.bf16.gmra.mrb[92].mxu1 %v3855_v62 }
 0x1fa   :  { %2001 = vmatmul.mubr.bf16.gmra.mrb[92].mxu0 %v3855_v62  ;;  %3127 = vmatprep.mubr.msk.bf16.mxu1 %vm1288_vm0, %v3856_v63 }
 0x1fb   :  { %3095 = vmatprep.mubr.msk.bf16.mxu0 %vm1288_vm0, %v3856_v63 }
 0x201   :  { %2605 = vmatmul.mubr.bf16.gmra.mrb[96].mxu1 %v3858_v1 }
 0x202   :  { %2011 = vmatmul.mubr.bf16.gmra.mrb[96].mxu0 %v3858_v1  ;;  %3128 = vmatprep.mubr.msk.bf16.mxu1 %vm1288_vm0, %v3859_v2 }
 0x203   :  { %3096 = vmatprep.mubr.msk.bf16.mxu0 %vm1288_vm0, %v3859_v2 }
 0x209   :  { %2613 = vmatmul.mubr.bf16.gmra.mrb[100].mxu1 %v3861_v3 }
 0x20a   :  { %2021 = vmatmul.mubr.bf16.gmra.mrb[100].mxu0 %v3861_v3  ;;  %3129 = vmatprep.mubr.msk.bf16.mxu1 %vm1288_vm0, %v3862_v5 }
 0x20b   :  { %3097 = vmatprep.mubr.msk.bf16.mxu0 %vm1288_vm0, %v3862_v5 }
 0x211   :  { %2621 = vmatmul.mubr.bf16.gmra.mrb[104].mxu1 %v3864_v7 }
 0x212   :  { %2031 = vmatmul.mubr.bf16.gmra.mrb[104].mxu0 %v3864_v7  ;;  %3130 = vmatprep.mubr.msk.bf16.mxu1 %vm1288_vm0, %v3865_v11 }
 0x213   :  { %3098 = vmatprep.mubr.msk.bf16.mxu0 %vm1288_vm0, %v3865_v11 }
 0x214   :  { %v2414_v16 = vpop.f32.mrb[0].mxu1 }
 0x215   :  { %v3263_v17 = vadd.f32 %v2414_v16, %v4575_v13  ;;  %v1772_v18 = vpop.f32.mrb[0].mxu0  ;;  %v2416_v19 = vpop.f32.mrb[1].mxu1 }
 0x216   :  { %v3135_v21 = vadd.f32 %v1772_v18, %v4577_v14  ;;  %v1774_v22 = vpop.f32.mrb[1].mxu0  ;;  %v2417_v23 = vpop.f32.mrb[2].mxu1 }
 0x217   :  { %2671 = vst [vmem:[%s5389_s3 + $0x10] sm:$0xff] %v3263_v17  ;;  %v3136_v25 = vadd.f32 %v1774_v22, %v4580_v15  ;;  %v3264_v26 = vadd.f32 %v2417_v23, %v4575_v13  ;;  %v1776_v27 = vpop.f32.mrb[2].mxu0  ;;  %v2419_v28 = vpop.f32.mrb[3].mxu1  ;;  %v3879_v23 = vld [vmem:[%s5387_s0 + $0x3e8] ss:$16 sps:$4 sm:$0xff]  }
 0x218   :  { %2669 = vst [vmem:[%s5389_s3] sm:$0xff] %v3135_v21  ;;  %v3137_v29 = vadd.f32 %v1776_v27, %v4577_v14  ;;  %v1778_v30 = vpop.f32.mrb[3].mxu0 }
 0x219   :  { %2670 = vst [vmem:[%s5389_s3 + $0x8] sm:$0xff] %v3136_v25  ;;  %2674 = vst [vmem:[%s5389_s3 + $0x28] sm:$0xff] %v3264_v26  ;;  %v3138_v31 = vadd.f32 %v1778_v30, %v4580_v15  ;;  %2629 = vmatmul.mubr.bf16.gmra.mrb[108].mxu1 %v3867_v20 }
 0x21a   :  { %2672 = vst [vmem:[%s5389_s3 + $0x18] sm:$0xff] %v3137_v29  ;;  %2041 = vmatmul.mubr.bf16.gmra.mrb[108].mxu0 %v3867_v20  ;;  %3131 = vmatprep.mubr.msk.bf16.mxu1 %vm1288_vm0, %v3868_v24 }
 0x21b   :  { %2673 = vst [vmem:[%s5389_s3 + $0x20] sm:$0xff] %v3138_v31  ;;  %3099 = vmatprep.mubr.msk.bf16.mxu0 %vm1288_vm0, %v3868_v24 }
 0x21c   :  { %v2422_v32 = vpop.f32.mrb[4].mxu1 }
 0x21d   :  { %v3265_v33 = vadd.f32 %v2422_v32, %v4575_v13  ;;  %v1782_v34 = vpop.f32.mrb[4].mxu0  ;;  %v2424_v35 = vpop.f32.mrb[5].mxu1 }
 0x21e   :  { %v3139_v37 = vadd.f32 %v1782_v34, %v4577_v14  ;;  %v1784_v38 = vpop.f32.mrb[5].mxu0  ;;  %v2425_v0 = vpop.f32.mrb[6].mxu1 }
 0x21f   :  { %2677 = vst [vmem:[%s5389_s3 + $0x40] sm:$0xff] %v3265_v33  ;;  %v3140_v40 = vadd.f32 %v1784_v38, %v4580_v15  ;;  %v3266_v41 = vadd.f32 %v2425_v0, %v4575_v13  ;;  %v1786_v42 = vpop.f32.mrb[6].mxu0  ;;  %v2427_v43 = vpop.f32.mrb[7].mxu1 }
 0x220   :  { %2675 = vst [vmem:[%s5389_s3 + $0x30] sm:$0xff] %v3139_v37  ;;  %v3141_v44 = vadd.f32 %v1786_v42, %v4577_v14  ;;  %v1788_v45 = vpop.f32.mrb[7].mxu0 }
 0x221   :  { %2676 = vst [vmem:[%s5389_s3 + $0x38] sm:$0xff] %v3140_v40  ;;  %2680 = vst [vmem:[%s5389_s3 + $0x58] sm:$0xff] %v3266_v41  ;;  %v3142_v46 = vadd.f32 %v1788_v45, %v4580_v15  ;;  %2637 = vmatmul.mubr.bf16.gmra.mrb[112].mxu1 %v3870_v36 }
 0x222   :  { %2678 = vst [vmem:[%s5389_s3 + $0x48] sm:$0xff] %v3141_v44  ;;  %2051 = vmatmul.mubr.bf16.gmra.mrb[112].mxu0 %v3870_v36  ;;  %3132 = vmatprep.mubr.msk.bf16.mxu1 %vm1288_vm0, %v3871_v39 }
 0x223   :  { %2679 = vst [vmem:[%s5389_s3 + $0x50] sm:$0xff] %v3142_v46  ;;  %3100 = vmatprep.mubr.msk.bf16.mxu0 %vm1288_vm0, %v3871_v39 }
 0x224   :  { %v2430_v47 = vpop.f32.mrb[8].mxu1 }
 0x225   :  { %v3267_v48 = vadd.f32 %v2430_v47, %v4575_v13  ;;  %v1792_v49 = vpop.f32.mrb[8].mxu0  ;;  %v2432_v50 = vpop.f32.mrb[9].mxu1 }
 0x226   :  { %v3143_v52 = vadd.f32 %v1792_v49, %v4577_v14  ;;  %v1794_v53 = vpop.f32.mrb[9].mxu0  ;;  %v2433_v54 = vpop.f32.mrb[10].mxu1 }
 0x227   :  { %2683 = vst [vmem:[%s5389_s3 + $0x70] sm:$0xff] %v3267_v48  ;;  %v3144_v56 = vadd.f32 %v1794_v53, %v4580_v15  ;;  %v3268_v57 = vadd.f32 %v2433_v54, %v4575_v13  ;;  %v1796_v58 = vpop.f32.mrb[10].mxu0  ;;  %v2435_v59 = vpop.f32.mrb[11].mxu1 }
 0x228   :  { %2681 = vst [vmem:[%s5389_s3 + $0x60] sm:$0xff] %v3143_v52  ;;  %v3145_v60 = vadd.f32 %v1796_v58, %v4577_v14  ;;  %v1798_v61 = vpop.f32.mrb[11].mxu0 }
 0x229   :  { %2682 = vst [vmem:[%s5389_s3 + $0x68] sm:$0xff] %v3144_v56  ;;  %2686 = vst [vmem:[%s5389_s3 + $0x88] sm:$0xff] %v3268_v57  ;;  %v3146_v62 = vadd.f32 %v1798_v61, %v4580_v15  ;;  %2645 = vmatmul.mubr.bf16.gmra.mrb[116].mxu1 %v3873_v51 }
 0x22a   :  { %2684 = vst [vmem:[%s5389_s3 + $0x78] sm:$0xff] %v3145_v60  ;;  %2061 = vmatmul.mubr.bf16.gmra.mrb[116].mxu0 %v3873_v51  ;;  %3133 = vmatprep.mubr.msk.bf16.mxu1 %vm1288_vm0, %v3874_v55 }
 0x22b   :  { %2685 = vst [vmem:[%s5389_s3 + $0x80] sm:$0xff] %v3146_v62  ;;  %3101 = vmatprep.mubr.msk.bf16.mxu0 %vm1288_vm0, %v3874_v55 }
 0x22c   :  { %v2438_v63 = vpop.f32.mrb[12].mxu1 }
 0x22d   :  { %v3269_v1 = vadd.f32 %v2438_v63, %v4575_v13  ;;  %v1802_v2 = vpop.f32.mrb[12].mxu0  ;;  %v2440_v3 = vpop.f32.mrb[13].mxu1 }
 0x22e   :  { %v3147_v5 = vadd.f32 %v1802_v2, %v4577_v14  ;;  %v1804_v6 = vpop.f32.mrb[13].mxu0  ;;  %v2441_v7 = vpop.f32.mrb[14].mxu1 }
 0x22f   :  { %2689 = vst [vmem:[%s5389_s3 + $0xa0] sm:$0xff] %v3269_v1  ;;  %v3148_v9 = vadd.f32 %v1804_v6, %v4580_v15  ;;  %v3270_v10 = vadd.f32 %v2441_v7, %v4575_v13  ;;  %v1806_v11 = vpop.f32.mrb[14].mxu0  ;;  %v2443_v12 = vpop.f32.mrb[15].mxu1 }
 0x230   :  { %2687 = vst [vmem:[%s5389_s3 + $0x90] sm:$0xff] %v3147_v5  ;;  %v3149_v16 = vadd.f32 %v1806_v11, %v4577_v14  ;;  %v1808_v17 = vpop.f32.mrb[15].mxu0 }
 0x231   :  { %2688 = vst [vmem:[%s5389_s3 + $0x98] sm:$0xff] %v3148_v9  ;;  %2692 = vst [vmem:[%s5389_s3 + $0xb8] sm:$0xff] %v3270_v10  ;;  %v3150_v18 = vadd.f32 %v1808_v17, %v4580_v15  ;;  %2653 = vmatmul.mubr.bf16.gmra.mrb[120].mxu1 %v3876_v4 }
 0x232   :  { %2690 = vst [vmem:[%s5389_s3 + $0xa8] sm:$0xff] %v3149_v16  ;;  %2071 = vmatmul.mubr.bf16.gmra.mrb[120].mxu0 %v3876_v4  ;;  %3134 = vmatprep.mubr.msk.bf16.mxu1 %vm1288_vm0, %v3877_v8 }
 0x233   :  { %2691 = vst [vmem:[%s5389_s3 + $0xb0] sm:$0xff] %v3150_v18  ;;  %3102 = vmatprep.mubr.msk.bf16.mxu0 %vm1288_vm0, %v3877_v8 }
 0x234   :  { %v2446_v19 = vpop.f32.mrb[16].mxu1 }
 0x235   :  { %v3271_v20 = vadd.f32 %v2446_v19, %v4575_v13  ;;  %v1812_v21 = vpop.f32.mrb[16].mxu0  ;;  %v2448_v22 = vpop.f32.mrb[17].mxu1 }
 0x236   :  { %v3151_v24 = vadd.f32 %v1812_v21, %v4577_v14  ;;  %v1814_v25 = vpop.f32.mrb[17].mxu0  ;;  %v2449_v26 = vpop.f32.mrb[18].mxu1 }
 0x237   :  { %2695 = vst [vmem:[%s5389_s3 + $0xd0] sm:$0xff] %v3271_v20  ;;  %v3152_v27 = vadd.f32 %v1814_v25, %v4580_v15  ;;  %v3272_v28 = vadd.f32 %v2449_v26, %v4575_v13  ;;  %v1816_v29 = vpop.f32.mrb[18].mxu0  ;;  %v2451_v30 = vpop.f32.mrb[19].mxu1 }
 0x238   :  { %2693 = vst [vmem:[%s5389_s3 + $0xc0] sm:$0xff] %v3151_v24  ;;  %v3153_v31 = vadd.f32 %v1816_v29, %v4577_v14  ;;  %v1818_v32 = vpop.f32.mrb[19].mxu0 }
 0x239   :  { %2694 = vst [vmem:[%s5389_s3 + $0xc8] sm:$0xff] %v3152_v27  ;;  %2698 = vst [vmem:[%s5389_s3 + $0xe8] sm:$0xff] %v3272_v28  ;;  %v3154_v33 = vadd.f32 %v1818_v32, %v4580_v15  ;;  %2661 = vmatmul.mubr.bf16.gmra.mrb[124].mxu1 %v3879_v23 }
 0x23a   :  { %2696 = vst [vmem:[%s5389_s3 + $0xd8] sm:$0xff] %v3153_v31  ;;  %2081 = vmatmul.mubr.bf16.gmra.mrb[124].mxu0 %v3879_v23 }
 0x23b   :  { %2697 = vst [vmem:[%s5389_s3 + $0xe0] sm:$0xff] %v3154_v33 }
 0x23c   :  { %v2454_v34 = vpop.f32.mrb[20].mxu1 }
 0x23d   :  { %v3273_v35 = vadd.f32 %v2454_v34, %v4575_v13  ;;  %v1822_v36 = vpop.f32.mrb[20].mxu0  ;;  %v2456_v37 = vpop.f32.mrb[21].mxu1 }
 0x23e   :  { %v3155_v38 = vadd.f32 %v1822_v36, %v4577_v14  ;;  %v1824_v0 = vpop.f32.mrb[21].mxu0  ;;  %v2457_v39 = vpop.f32.mrb[22].mxu1 }
 0x23f   :  { %2701 = vst [vmem:[%s5389_s3 + $0x100] sm:$0xff] %v3273_v35  ;;  %v3156_v40 = vadd.f32 %v1824_v0, %v4580_v15  ;;  %v3274_v41 = vadd.f32 %v2457_v39, %v4575_v13  ;;  %v1826_v42 = vpop.f32.mrb[22].mxu0  ;;  %v2459_v43 = vpop.f32.mrb[23].mxu1 }
 0x240   :  { %2699 = vst [vmem:[%s5389_s3 + $0xf0] sm:$0xff] %v3155_v38  ;;  %v3157_v44 = vadd.f32 %v1826_v42, %v4577_v14  ;;  %v1828_v45 = vpop.f32.mrb[23].mxu0 }
 0x241   :  { %2700 = vst [vmem:[%s5389_s3 + $0xf8] sm:$0xff] %v3156_v40  ;;  %2704 = vst [vmem:[%s5389_s3 + $0x118] sm:$0xff] %v3274_v41  ;;  %v3158_v46 = vadd.f32 %v1828_v45, %v4580_v15 }
 0x242   :  { %2702 = vst [vmem:[%s5389_s3 + $0x108] sm:$0xff] %v3157_v44 }
 0x243   :  { %2703 = vst [vmem:[%s5389_s3 + $0x110] sm:$0xff] %v3158_v46 }
 0x244   :  { %v2462_v47 = vpop.f32.mrb[24].mxu1 }
 0x245   :  { %v3275_v48 = vadd.f32 %v2462_v47, %v4575_v13  ;;  %v1832_v49 = vpop.f32.mrb[24].mxu0  ;;  %v2464_v50 = vpop.f32.mrb[25].mxu1 }
 0x246   :  { %v3159_v51 = vadd.f32 %v1832_v49, %v4577_v14  ;;  %v1834_v52 = vpop.f32.mrb[25].mxu0  ;;  %v2465_v53 = vpop.f32.mrb[26].mxu1 }
 0x247   :  { %2707 = vst [vmem:[%s5389_s3 + $0x130] sm:$0xff] %v3275_v48  ;;  %v3160_v54 = vadd.f32 %v1834_v52, %v4580_v15  ;;  %v3276_v55 = vadd.f32 %v2465_v53, %v4575_v13  ;;  %v1836_v56 = vpop.f32.mrb[26].mxu0  ;;  %v2467_v57 = vpop.f32.mrb[27].mxu1 }
 0x248   :  { %2705 = vst [vmem:[%s5389_s3 + $0x120] sm:$0xff] %v3159_v51  ;;  %v3161_v58 = vadd.f32 %v1836_v56, %v4577_v14  ;;  %v1838_v59 = vpop.f32.mrb[27].mxu0 }
 0x249   :  { %2706 = vst [vmem:[%s5389_s3 + $0x128] sm:$0xff] %v3160_v54  ;;  %2710 = vst [vmem:[%s5389_s3 + $0x148] sm:$0xff] %v3276_v55  ;;  %v3162_v60 = vadd.f32 %v1838_v59, %v4580_v15 }
 0x24a   :  { %2708 = vst [vmem:[%s5389_s3 + $0x138] sm:$0xff] %v3161_v58 }
 0x24b   :  { %2709 = vst [vmem:[%s5389_s3 + $0x140] sm:$0xff] %v3162_v60 }
 0x24c   :  { %v2470_v61 = vpop.f32.mrb[28].mxu1 }
 0x24d   :  { %v3277_v62 = vadd.f32 %v2470_v61, %v4575_v13  ;;  %v1842_v63 = vpop.f32.mrb[28].mxu0  ;;  %v2472_v1 = vpop.f32.mrb[29].mxu1 }
 0x24e   :  { %v3163_v2 = vadd.f32 %v1842_v63, %v4577_v14  ;;  %v1844_v3 = vpop.f32.mrb[29].mxu0  ;;  %v2473_v4 = vpop.f32.mrb[30].mxu1 }
 0x24f   :  { %2713 = vst [vmem:[%s5389_s3 + $0x160] sm:$0xff] %v3277_v62  ;;  %v3164_v5 = vadd.f32 %v1844_v3, %v4580_v15  ;;  %v3278_v6 = vadd.f32 %v2473_v4, %v4575_v13  ;;  %v1846_v7 = vpop.f32.mrb[30].mxu0  ;;  %v2475_v8 = vpop.f32.mrb[31].mxu1 }
 0x250   :  { %2711 = vst [vmem:[%s5389_s3 + $0x150] sm:$0xff] %v3163_v2  ;;  %v3165_v9 = vadd.f32 %v1846_v7, %v4577_v14  ;;  %v1848_v10 = vpop.f32.mrb[31].mxu0 }
 0x251   :  { %2712 = vst [vmem:[%s5389_s3 + $0x158] sm:$0xff] %v3164_v5  ;;  %2716 = vst [vmem:[%s5389_s3 + $0x178] sm:$0xff] %v3278_v6  ;;  %v3166_v11 = vadd.f32 %v1848_v10, %v4580_v15 }
 0x252   :  { %2714 = vst [vmem:[%s5389_s3 + $0x168] sm:$0xff] %v3165_v9 }
 0x253   :  { %2715 = vst [vmem:[%s5389_s3 + $0x170] sm:$0xff] %v3166_v11 }
 0x254   :  { %v2478_v12 = vpop.f32.mrb[32].mxu1 }
 0x255   :  { %v3279_v16 = vadd.f32 %v2478_v12, %v4575_v13  ;;  %v1852_v17 = vpop.f32.mrb[32].mxu0  ;;  %v2480_v18 = vpop.f32.mrb[33].mxu1 }
 0x256   :  { %v3167_v19 = vadd.f32 %v1852_v17, %v4577_v14  ;;  %v1854_v20 = vpop.f32.mrb[33].mxu0  ;;  %v2481_v21 = vpop.f32.mrb[34].mxu1 }
 0x257   :  { %2719 = vst [vmem:[%s5389_s3 + $0x190] sm:$0xff] %v3279_v16  ;;  %v3168_v22 = vadd.f32 %v1854_v20, %v4580_v15  ;;  %v3280_v23 = vadd.f32 %v2481_v21, %v4575_v13  ;;  %v1856_v24 = vpop.f32.mrb[34].mxu0  ;;  %v2483_v25 = vpop.f32.mrb[35].mxu1 }
 0x258   :  { %2717 = vst [vmem:[%s5389_s3 + $0x180] sm:$0xff] %v3167_v19  ;;  %v3169_v26 = vadd.f32 %v1856_v24, %v4577_v14  ;;  %v1858_v27 = vpop.f32.mrb[35].mxu0 }
 0x259   :  { %2718 = vst [vmem:[%s5389_s3 + $0x188] sm:$0xff] %v3168_v22  ;;  %2722 = vst [vmem:[%s5389_s3 + $0x1a8] sm:$0xff] %v3280_v23  ;;  %v3170_v28 = vadd.f32 %v1858_v27, %v4580_v15 }
 0x25a   :  { %2720 = vst [vmem:[%s5389_s3 + $0x198] sm:$0xff] %v3169_v26 }
 0x25b   :  { %2721 = vst [vmem:[%s5389_s3 + $0x1a0] sm:$0xff] %v3170_v28 }
 0x25c   :  { %v2486_v29 = vpop.f32.mrb[36].mxu1 }
 0x25d   :  { %v3281_v30 = vadd.f32 %v2486_v29, %v4575_v13  ;;  %v1862_v31 = vpop.f32.mrb[36].mxu0  ;;  %v2488_v32 = vpop.f32.mrb[37].mxu1 }
 0x25e   :  { %v3171_v33 = vadd.f32 %v1862_v31, %v4577_v14  ;;  %v1864_v34 = vpop.f32.mrb[37].mxu0  ;;  %v2489_v35 = vpop.f32.mrb[38].mxu1 }
 0x25f   :  { %2725 = vst [vmem:[%s5389_s3 + $0x1c0] sm:$0xff] %v3281_v30  ;;  %v3172_v36 = vadd.f32 %v1864_v34, %v4580_v15  ;;  %v3282_v37 = vadd.f32 %v2489_v35, %v4575_v13  ;;  %v1866_v38 = vpop.f32.mrb[38].mxu0  ;;  %v2491_v0 = vpop.f32.mrb[39].mxu1 }
 0x260   :  { %2723 = vst [vmem:[%s5389_s3 + $0x1b0] sm:$0xff] %v3171_v33  ;;  %v3173_v39 = vadd.f32 %v1866_v38, %v4577_v14  ;;  %v1868_v40 = vpop.f32.mrb[39].mxu0 }
 0x261   :  { %2724 = vst [vmem:[%s5389_s3 + $0x1b8] sm:$0xff] %v3172_v36  ;;  %2728 = vst [vmem:[%s5389_s3 + $0x1d8] sm:$0xff] %v3282_v37  ;;  %v3174_v41 = vadd.f32 %v1868_v40, %v4580_v15 }
 0x262   :  { %2726 = vst [vmem:[%s5389_s3 + $0x1c8] sm:$0xff] %v3173_v39 }
 0x263   :  { %2727 = vst [vmem:[%s5389_s3 + $0x1d0] sm:$0xff] %v3174_v41 }
 0x264   :  { %v2494_v42 = vpop.f32.mrb[40].mxu1 }
 0x265   :  { %v3283_v43 = vadd.f32 %v2494_v42, %v4575_v13  ;;  %v1872_v44 = vpop.f32.mrb[40].mxu0  ;;  %v2496_v45 = vpop.f32.mrb[41].mxu1 }
 0x266   :  { %v3175_v46 = vadd.f32 %v1872_v44, %v4577_v14  ;;  %v1874_v47 = vpop.f32.mrb[41].mxu0  ;;  %v2497_v48 = vpop.f32.mrb[42].mxu1 }
 0x267   :  { %2731 = vst [vmem:[%s5389_s3 + $0x1f0] sm:$0xff] %v3283_v43  ;;  %v3176_v49 = vadd.f32 %v1874_v47, %v4580_v15  ;;  %v3284_v50 = vadd.f32 %v2497_v48, %v4575_v13  ;;  %v1876_v51 = vpop.f32.mrb[42].mxu0  ;;  %v2499_v52 = vpop.f32.mrb[43].mxu1 }
 0x268   :  { %2729 = vst [vmem:[%s5389_s3 + $0x1e0] sm:$0xff] %v3175_v46  ;;  %v3177_v53 = vadd.f32 %v1876_v51, %v4577_v14  ;;  %v1878_v54 = vpop.f32.mrb[43].mxu0 }
 0x269   :  { %2730 = vst [vmem:[%s5389_s3 + $0x1e8] sm:$0xff] %v3176_v49  ;;  %2734 = vst [vmem:[%s5389_s3 + $0x208] sm:$0xff] %v3284_v50  ;;  %v3178_v55 = vadd.f32 %v1878_v54, %v4580_v15 }
 0x26a   :  { %2732 = vst [vmem:[%s5389_s3 + $0x1f8] sm:$0xff] %v3177_v53 }
 0x26b   :  { %2733 = vst [vmem:[%s5389_s3 + $0x200] sm:$0xff] %v3178_v55 }
 0x26c   :  { %v2502_v56 = vpop.f32.mrb[44].mxu1 }
 0x26d   :  { %v3285_v57 = vadd.f32 %v2502_v56, %v4575_v13  ;;  %v1882_v58 = vpop.f32.mrb[44].mxu0  ;;  %v2504_v59 = vpop.f32.mrb[45].mxu1 }
 0x26e   :  { %v3179_v60 = vadd.f32 %v1882_v58, %v4577_v14  ;;  %v1884_v61 = vpop.f32.mrb[45].mxu0  ;;  %v2505_v62 = vpop.f32.mrb[46].mxu1 }
 0x26f   :  { %2737 = vst [vmem:[%s5389_s3 + $0x220] sm:$0xff] %v3285_v57  ;;  %v3180_v63 = vadd.f32 %v1884_v61, %v4580_v15  ;;  %v3286_v1 = vadd.f32 %v2505_v62, %v4575_v13  ;;  %v1886_v2 = vpop.f32.mrb[46].mxu0  ;;  %v2507_v3 = vpop.f32.mrb[47].mxu1 }
 0x270   :  { %2735 = vst [vmem:[%s5389_s3 + $0x210] sm:$0xff] %v3179_v60  ;;  %v3181_v4 = vadd.f32 %v1886_v2, %v4577_v14  ;;  %v1888_v5 = vpop.f32.mrb[47].mxu0 }
 0x271   :  { %2736 = vst [vmem:[%s5389_s3 + $0x218] sm:$0xff] %v3180_v63  ;;  %2740 = vst [vmem:[%s5389_s3 + $0x238] sm:$0xff] %v3286_v1  ;;  %v3182_v6 = vadd.f32 %v1888_v5, %v4580_v15 }
 0x272   :  { %2738 = vst [vmem:[%s5389_s3 + $0x228] sm:$0xff] %v3181_v4 }
 0x273   :  { %2739 = vst [vmem:[%s5389_s3 + $0x230] sm:$0xff] %v3182_v6 }
 0x274   :  { %v2510_v7 = vpop.f32.mrb[48].mxu1 }
 0x275   :  { %v3287_v8 = vadd.f32 %v2510_v7, %v4575_v13  ;;  %v1892_v9 = vpop.f32.mrb[48].mxu0  ;;  %v2512_v10 = vpop.f32.mrb[49].mxu1 }
 0x276   :  { %v3183_v11 = vadd.f32 %v1892_v9, %v4577_v14  ;;  %v1894_v12 = vpop.f32.mrb[49].mxu0  ;;  %v2513_v16 = vpop.f32.mrb[50].mxu1 }
 0x277   :  { %2743 = vst [vmem:[%s5389_s3 + $0x250] sm:$0xff] %v3287_v8  ;;  %v3184_v17 = vadd.f32 %v1894_v12, %v4580_v15  ;;  %v3288_v18 = vadd.f32 %v2513_v16, %v4575_v13  ;;  %v1896_v19 = vpop.f32.mrb[50].mxu0  ;;  %v2515_v20 = vpop.f32.mrb[51].mxu1 }
 0x278   :  { %2741 = vst [vmem:[%s5389_s3 + $0x240] sm:$0xff] %v3183_v11  ;;  %v3185_v21 = vadd.f32 %v1896_v19, %v4577_v14  ;;  %v1898_v22 = vpop.f32.mrb[51].mxu0 }
 0x279   :  { %2742 = vst [vmem:[%s5389_s3 + $0x248] sm:$0xff] %v3184_v17  ;;  %2746 = vst [vmem:[%s5389_s3 + $0x268] sm:$0xff] %v3288_v18  ;;  %v3186_v23 = vadd.f32 %v1898_v22, %v4580_v15 }
 0x27a   :  { %2744 = vst [vmem:[%s5389_s3 + $0x258] sm:$0xff] %v3185_v21 }
 0x27b   :  { %2745 = vst [vmem:[%s5389_s3 + $0x260] sm:$0xff] %v3186_v23 }
 0x27c   :  { %v2518_v24 = vpop.f32.mrb[52].mxu1 }
 0x27d   :  { %v3289_v25 = vadd.f32 %v2518_v24, %v4575_v13  ;;  %v1902_v26 = vpop.f32.mrb[52].mxu0  ;;  %v2520_v27 = vpop.f32.mrb[53].mxu1 }
 0x27e   :  { %v3187_v28 = vadd.f32 %v1902_v26, %v4577_v14  ;;  %v1904_v29 = vpop.f32.mrb[53].mxu0  ;;  %v2521_v30 = vpop.f32.mrb[54].mxu1 }
 0x27f   :  { %2749 = vst [vmem:[%s5389_s3 + $0x280] sm:$0xff] %v3289_v25  ;;  %v3188_v31 = vadd.f32 %v1904_v29, %v4580_v15  ;;  %v3290_v32 = vadd.f32 %v2521_v30, %v4575_v13  ;;  %v1906_v33 = vpop.f32.mrb[54].mxu0  ;;  %v2523_v34 = vpop.f32.mrb[55].mxu1 }
 0x280   :  { %2747 = vst [vmem:[%s5389_s3 + $0x270] sm:$0xff] %v3187_v28  ;;  %v3189_v35 = vadd.f32 %v1906_v33, %v4577_v14  ;;  %v1908_v36 = vpop.f32.mrb[55].mxu0 }
 0x281   :  { %2748 = vst [vmem:[%s5389_s3 + $0x278] sm:$0xff] %v3188_v31  ;;  %2752 = vst [vmem:[%s5389_s3 + $0x298] sm:$0xff] %v3290_v32  ;;  %v3190_v37 = vadd.f32 %v1908_v36, %v4580_v15 }
 0x282   :  { %2750 = vst [vmem:[%s5389_s3 + $0x288] sm:$0xff] %v3189_v35 }
 0x283   :  { %2751 = vst [vmem:[%s5389_s3 + $0x290] sm:$0xff] %v3190_v37 }
 0x284   :  { %v2526_v38 = vpop.f32.mrb[56].mxu1 }
 0x285   :  { %v3291_v0 = vadd.f32 %v2526_v38, %v4575_v13  ;;  %v1912_v39 = vpop.f32.mrb[56].mxu0  ;;  %v2528_v40 = vpop.f32.mrb[57].mxu1 }
 0x286   :  { %v3191_v41 = vadd.f32 %v1912_v39, %v4577_v14  ;;  %v1914_v42 = vpop.f32.mrb[57].mxu0  ;;  %v2529_v43 = vpop.f32.mrb[58].mxu1 }
 0x287   :  { %2755 = vst [vmem:[%s5389_s3 + $0x2b0] sm:$0xff] %v3291_v0  ;;  %v3192_v44 = vadd.f32 %v1914_v42, %v4580_v15  ;;  %v3292_v45 = vadd.f32 %v2529_v43, %v4575_v13  ;;  %v1916_v46 = vpop.f32.mrb[58].mxu0  ;;  %v2531_v47 = vpop.f32.mrb[59].mxu1 }
 0x288   :  { %2753 = vst [vmem:[%s5389_s3 + $0x2a0] sm:$0xff] %v3191_v41  ;;  %v3193_v48 = vadd.f32 %v1916_v46, %v4577_v14  ;;  %v1918_v49 = vpop.f32.mrb[59].mxu0 }
 0x289   :  { %2754 = vst [vmem:[%s5389_s3 + $0x2a8] sm:$0xff] %v3192_v44  ;;  %2758 = vst [vmem:[%s5389_s3 + $0x2c8] sm:$0xff] %v3292_v45  ;;  %v3194_v50 = vadd.f32 %v1918_v49, %v4580_v15 }
 0x28a   :  { %2756 = vst [vmem:[%s5389_s3 + $0x2b8] sm:$0xff] %v3193_v48 }
 0x28b   :  { %2757 = vst [vmem:[%s5389_s3 + $0x2c0] sm:$0xff] %v3194_v50 }
 0x28c   :  { %v2534_v51 = vpop.f32.mrb[60].mxu1 }
 0x28d   :  { %v3293_v52 = vadd.f32 %v2534_v51, %v4575_v13  ;;  %v1922_v53 = vpop.f32.mrb[60].mxu0  ;;  %v2536_v54 = vpop.f32.mrb[61].mxu1 }
 0x28e   :  { %v3195_v55 = vadd.f32 %v1922_v53, %v4577_v14  ;;  %v1924_v56 = vpop.f32.mrb[61].mxu0  ;;  %v2537_v57 = vpop.f32.mrb[62].mxu1 }
 0x28f   :  { %2761 = vst [vmem:[%s5389_s3 + $0x2e0] sm:$0xff] %v3293_v52  ;;  %v3196_v58 = vadd.f32 %v1924_v56, %v4580_v15  ;;  %v3294_v59 = vadd.f32 %v2537_v57, %v4575_v13  ;;  %v1926_v60 = vpop.f32.mrb[62].mxu0  ;;  %v2539_v61 = vpop.f32.mrb[63].mxu1 }
 0x290   :  { %2759 = vst [vmem:[%s5389_s3 + $0x2d0] sm:$0xff] %v3195_v55  ;;  %v3197_v62 = vadd.f32 %v1926_v60, %v4577_v14  ;;  %v1928_v63 = vpop.f32.mrb[63].mxu0 }
 0x291   :  { %2760 = vst [vmem:[%s5389_s3 + $0x2d8] sm:$0xff] %v3196_v58  ;;  %2764 = vst [vmem:[%s5389_s3 + $0x2f8] sm:$0xff] %v3294_v59  ;;  %v3198_v1 = vadd.f32 %v1928_v63, %v4580_v15 }
 0x292   :  { %2762 = vst [vmem:[%s5389_s3 + $0x2e8] sm:$0xff] %v3197_v62 }
 0x293   :  { %2763 = vst [vmem:[%s5389_s3 + $0x2f0] sm:$0xff] %v3198_v1 }
 0x294   :  { %v2542_v2 = vpop.f32.mrb[64].mxu1 }
 0x295   :  { %v3295_v3 = vadd.f32 %v2542_v2, %v4575_v13  ;;  %v1932_v4 = vpop.f32.mrb[64].mxu0  ;;  %v2544_v5 = vpop.f32.mrb[65].mxu1 }
 0x296   :  { %v3199_v6 = vadd.f32 %v1932_v4, %v4577_v14  ;;  %v1934_v7 = vpop.f32.mrb[65].mxu0  ;;  %v2545_v8 = vpop.f32.mrb[66].mxu1 }
 0x297   :  { %2767 = vst [vmem:[%s5389_s3 + $0x310] sm:$0xff] %v3295_v3  ;;  %v3200_v9 = vadd.f32 %v1934_v7, %v4580_v15  ;;  %v3296_v10 = vadd.f32 %v2545_v8, %v4575_v13  ;;  %v1936_v11 = vpop.f32.mrb[66].mxu0  ;;  %v2547_v12 = vpop.f32.mrb[67].mxu1 }
 0x298   :  { %2765 = vst [vmem:[%s5389_s3 + $0x300] sm:$0xff] %v3199_v6  ;;  %v3201_v16 = vadd.f32 %v1936_v11, %v4577_v14  ;;  %v1938_v17 = vpop.f32.mrb[67].mxu0 }
 0x299   :  { %2766 = vst [vmem:[%s5389_s3 + $0x308] sm:$0xff] %v3200_v9  ;;  %2770 = vst [vmem:[%s5389_s3 + $0x328] sm:$0xff] %v3296_v10  ;;  %v3202_v18 = vadd.f32 %v1938_v17, %v4580_v15 }
 0x29a   :  { %2768 = vst [vmem:[%s5389_s3 + $0x318] sm:$0xff] %v3201_v16 }
 0x29b   :  { %2769 = vst [vmem:[%s5389_s3 + $0x320] sm:$0xff] %v3202_v18 }
 0x29c   :  { %v2550_v19 = vpop.f32.mrb[68].mxu1 }
 0x29d   :  { %v3297_v20 = vadd.f32 %v2550_v19, %v4575_v13  ;;  %v1942_v21 = vpop.f32.mrb[68].mxu0  ;;  %v2552_v22 = vpop.f32.mrb[69].mxu1 }
 0x29e   :  { %v3203_v23 = vadd.f32 %v1942_v21, %v4577_v14  ;;  %v1944_v24 = vpop.f32.mrb[69].mxu0  ;;  %v2553_v25 = vpop.f32.mrb[70].mxu1 }
 0x29f   :  { %2773 = vst [vmem:[%s5389_s3 + $0x340] sm:$0xff] %v3297_v20  ;;  %v3204_v26 = vadd.f32 %v1944_v24, %v4580_v15  ;;  %v3298_v27 = vadd.f32 %v2553_v25, %v4575_v13  ;;  %v1946_v28 = vpop.f32.mrb[70].mxu0  ;;  %v2555_v29 = vpop.f32.mrb[71].mxu1 }
 0x2a0   :  { %2771 = vst [vmem:[%s5389_s3 + $0x330] sm:$0xff] %v3203_v23  ;;  %v3205_v30 = vadd.f32 %v1946_v28, %v4577_v14  ;;  %v1948_v31 = vpop.f32.mrb[71].mxu0 }
 0x2a1   :  { %2772 = vst [vmem:[%s5389_s3 + $0x338] sm:$0xff] %v3204_v26  ;;  %2776 = vst [vmem:[%s5389_s3 + $0x358] sm:$0xff] %v3298_v27  ;;  %v3206_v32 = vadd.f32 %v1948_v31, %v4580_v15 }
 0x2a2   :  { %2774 = vst [vmem:[%s5389_s3 + $0x348] sm:$0xff] %v3205_v30 }
 0x2a3   :  { %2775 = vst [vmem:[%s5389_s3 + $0x350] sm:$0xff] %v3206_v32 }
 0x2a4   :  { %v2558_v33 = vpop.f32.mrb[72].mxu1 }
 0x2a5   :  { %v3299_v34 = vadd.f32 %v2558_v33, %v4575_v13  ;;  %v1952_v35 = vpop.f32.mrb[72].mxu0  ;;  %v2560_v36 = vpop.f32.mrb[73].mxu1 }
 0x2a6   :  { %v3207_v37 = vadd.f32 %v1952_v35, %v4577_v14  ;;  %v1954_v38 = vpop.f32.mrb[73].mxu0  ;;  %v2561_v0 = vpop.f32.mrb[74].mxu1 }
 0x2a7   :  { %2779 = vst [vmem:[%s5389_s3 + $0x370] sm:$0xff] %v3299_v34  ;;  %v3208_v39 = vadd.f32 %v1954_v38, %v4580_v15  ;;  %v3300_v40 = vadd.f32 %v2561_v0, %v4575_v13  ;;  %v1956_v41 = vpop.f32.mrb[74].mxu0  ;;  %v2563_v42 = vpop.f32.mrb[75].mxu1 }
 0x2a8   :  { %2777 = vst [vmem:[%s5389_s3 + $0x360] sm:$0xff] %v3207_v37  ;;  %v3209_v43 = vadd.f32 %v1956_v41, %v4577_v14  ;;  %v1958_v44 = vpop.f32.mrb[75].mxu0 }
 0x2a9   :  { %2778 = vst [vmem:[%s5389_s3 + $0x368] sm:$0xff] %v3208_v39  ;;  %2782 = vst [vmem:[%s5389_s3 + $0x388] sm:$0xff] %v3300_v40  ;;  %v3210_v45 = vadd.f32 %v1958_v44, %v4580_v15 }
 0x2aa   :  { %2780 = vst [vmem:[%s5389_s3 + $0x378] sm:$0xff] %v3209_v43 }
 0x2ab   :  { %2781 = vst [vmem:[%s5389_s3 + $0x380] sm:$0xff] %v3210_v45 }
 0x2ac   :  { %v2566_v46 = vpop.f32.mrb[76].mxu1 }
 0x2ad   :  { %v3301_v47 = vadd.f32 %v2566_v46, %v4575_v13  ;;  %v1962_v48 = vpop.f32.mrb[76].mxu0  ;;  %v2568_v49 = vpop.f32.mrb[77].mxu1 }
 0x2ae   :  { %v3211_v50 = vadd.f32 %v1962_v48, %v4577_v14  ;;  %v1964_v51 = vpop.f32.mrb[77].mxu0  ;;  %v2569_v52 = vpop.f32.mrb[78].mxu1 }
 0x2af   :  { %2785 = vst [vmem:[%s5389_s3 + $0x3a0] sm:$0xff] %v3301_v47  ;;  %v3212_v53 = vadd.f32 %v1964_v51, %v4580_v15  ;;  %v3302_v54 = vadd.f32 %v2569_v52, %v4575_v13  ;;  %v1966_v55 = vpop.f32.mrb[78].mxu0  ;;  %v2571_v56 = vpop.f32.mrb[79].mxu1 }
 0x2b0   :  { %2783 = vst [vmem:[%s5389_s3 + $0x390] sm:$0xff] %v3211_v50  ;;  %v3213_v57 = vadd.f32 %v1966_v55, %v4577_v14  ;;  %v1968_v58 = vpop.f32.mrb[79].mxu0 }
 0x2b1   :  { %2784 = vst [vmem:[%s5389_s3 + $0x398] sm:$0xff] %v3212_v53  ;;  %2788 = vst [vmem:[%s5389_s3 + $0x3b8] sm:$0xff] %v3302_v54  ;;  %v3214_v59 = vadd.f32 %v1968_v58, %v4580_v15 }
 0x2b2   :  { %2786 = vst [vmem:[%s5389_s3 + $0x3a8] sm:$0xff] %v3213_v57 }
 0x2b3   :  { %2787 = vst [vmem:[%s5389_s3 + $0x3b0] sm:$0xff] %v3214_v59 }
 0x2b4   :  { %v2574_v60 = vpop.f32.mrb[80].mxu1 }
 0x2b5   :  { %v3303_v61 = vadd.f32 %v2574_v60, %v4575_v13  ;;  %v1972_v62 = vpop.f32.mrb[80].mxu0  ;;  %v2576_v63 = vpop.f32.mrb[81].mxu1 }
 0x2b6   :  { %v3215_v1 = vadd.f32 %v1972_v62, %v4577_v14  ;;  %v1974_v2 = vpop.f32.mrb[81].mxu0  ;;  %v2577_v3 = vpop.f32.mrb[82].mxu1 }
 0x2b7   :  { %2791 = vst [vmem:[%s5389_s3 + $0x3d0] sm:$0xff] %v3303_v61  ;;  %v3216_v4 = vadd.f32 %v1974_v2, %v4580_v15  ;;  %v3304_v5 = vadd.f32 %v2577_v3, %v4575_v13  ;;  %v1976_v6 = vpop.f32.mrb[82].mxu0  ;;  %v2579_v7 = vpop.f32.mrb[83].mxu1 }
 0x2b8   :  { %2789 = vst [vmem:[%s5389_s3 + $0x3c0] sm:$0xff] %v3215_v1  ;;  %v3217_v8 = vadd.f32 %v1976_v6, %v4577_v14  ;;  %v1978_v9 = vpop.f32.mrb[83].mxu0 }
 0x2b9   :  { %2790 = vst [vmem:[%s5389_s3 + $0x3c8] sm:$0xff] %v3216_v4  ;;  %2794 = vst [vmem:[%s5389_s3 + $0x3e8] sm:$0xff] %v3304_v5  ;;  %v3218_v10 = vadd.f32 %v1978_v9, %v4580_v15 }
 0x2ba   :  { %2792 = vst [vmem:[%s5389_s3 + $0x3d8] sm:$0xff] %v3217_v8 }
 0x2bb   :  { %2793 = vst [vmem:[%s5389_s3 + $0x3e0] sm:$0xff] %v3218_v10 }
 0x2bc   :  { %v2582_v11 = vpop.f32.mrb[84].mxu1 }
 0x2bd   :  { %v3305_v12 = vadd.f32 %v2582_v11, %v4575_v13  ;;  %v1982_v16 = vpop.f32.mrb[84].mxu0  ;;  %v2584_v17 = vpop.f32.mrb[85].mxu1 }
 0x2be   :  { %v3219_v18 = vadd.f32 %v1982_v16, %v4577_v14  ;;  %v1984_v19 = vpop.f32.mrb[85].mxu0  ;;  %v2585_v20 = vpop.f32.mrb[86].mxu1 }
 0x2bf   :  { %2797 = vst [vmem:[%s5389_s3 + $0x400] sm:$0xff] %v3305_v12  ;;  %v3220_v21 = vadd.f32 %v1984_v19, %v4580_v15  ;;  %v3306_v22 = vadd.f32 %v2585_v20, %v4575_v13  ;;  %v1986_v23 = vpop.f32.mrb[86].mxu0  ;;  %v2587_v24 = vpop.f32.mrb[87].mxu1 }
 0x2c0   :  { %2795 = vst [vmem:[%s5389_s3 + $0x3f0] sm:$0xff] %v3219_v18  ;;  %v3221_v25 = vadd.f32 %v1986_v23, %v4577_v14  ;;  %v1988_v26 = vpop.f32.mrb[87].mxu0 }
 0x2c1   :  { %2796 = vst [vmem:[%s5389_s3 + $0x3f8] sm:$0xff] %v3220_v21  ;;  %2800 = vst [vmem:[%s5389_s3 + $0x418] sm:$0xff] %v3306_v22  ;;  %v3222_v27 = vadd.f32 %v1988_v26, %v4580_v15 }
 0x2c2   :  { %2798 = vst [vmem:[%s5389_s3 + $0x408] sm:$0xff] %v3221_v25 }
 0x2c3   :  { %2799 = vst [vmem:[%s5389_s3 + $0x410] sm:$0xff] %v3222_v27 }
 0x2c4   :  { %v2590_v28 = vpop.f32.mrb[88].mxu1 }
 0x2c5   :  { %v3307_v29 = vadd.f32 %v2590_v28, %v4575_v13  ;;  %v1992_v30 = vpop.f32.mrb[88].mxu0  ;;  %v2592_v31 = vpop.f32.mrb[89].mxu1 }
 0x2c6   :  { %v3223_v32 = vadd.f32 %v1992_v30, %v4577_v14  ;;  %v1994_v33 = vpop.f32.mrb[89].mxu0  ;;  %v2593_v34 = vpop.f32.mrb[90].mxu1 }
 0x2c7   :  { %2803 = vst [vmem:[%s5389_s3 + $0x430] sm:$0xff] %v3307_v29  ;;  %v3224_v35 = vadd.f32 %v1994_v33, %v4580_v15  ;;  %v3308_v36 = vadd.f32 %v2593_v34, %v4575_v13  ;;  %v1996_v37 = vpop.f32.mrb[90].mxu0  ;;  %v2595_v38 = vpop.f32.mrb[91].mxu1 }
 0x2c8   :  { %2801 = vst [vmem:[%s5389_s3 + $0x420] sm:$0xff] %v3223_v32  ;;  %v3225_v0 = vadd.f32 %v1996_v37, %v4577_v14  ;;  %v1998_v39 = vpop.f32.mrb[91].mxu0 }
 0x2c9   :  { %2802 = vst [vmem:[%s5389_s3 + $0x428] sm:$0xff] %v3224_v35  ;;  %2806 = vst [vmem:[%s5389_s3 + $0x448] sm:$0xff] %v3308_v36  ;;  %v3226_v40 = vadd.f32 %v1998_v39, %v4580_v15 }
 0x2ca   :  { %2804 = vst [vmem:[%s5389_s3 + $0x438] sm:$0xff] %v3225_v0 }
 0x2cb   :  { %2805 = vst [vmem:[%s5389_s3 + $0x440] sm:$0xff] %v3226_v40 }
 0x2cc   :  { %v2598_v41 = vpop.f32.mrb[92].mxu1 }
 0x2cd   :  { %v3309_v42 = vadd.f32 %v2598_v41, %v4575_v13  ;;  %v2002_v43 = vpop.f32.mrb[92].mxu0  ;;  %v2600_v44 = vpop.f32.mrb[93].mxu1 }
 0x2ce   :  { %v3227_v45 = vadd.f32 %v2002_v43, %v4577_v14  ;;  %v2004_v46 = vpop.f32.mrb[93].mxu0  ;;  %v2601_v47 = vpop.f32.mrb[94].mxu1 }
 0x2cf   :  { %2809 = vst [vmem:[%s5389_s3 + $0x460] sm:$0xff] %v3309_v42  ;;  %v3228_v48 = vadd.f32 %v2004_v46, %v4580_v15  ;;  %v3310_v49 = vadd.f32 %v2601_v47, %v4575_v13  ;;  %v2006_v50 = vpop.f32.mrb[94].mxu0  ;;  %v2603_v51 = vpop.f32.mrb[95].mxu1 }
 0x2d0   :  { %2807 = vst [vmem:[%s5389_s3 + $0x450] sm:$0xff] %v3227_v45  ;;  %v3229_v52 = vadd.f32 %v2006_v50, %v4577_v14  ;;  %v2008_v53 = vpop.f32.mrb[95].mxu0 }
 0x2d1   :  { %2808 = vst [vmem:[%s5389_s3 + $0x458] sm:$0xff] %v3228_v48  ;;  %2812 = vst [vmem:[%s5389_s3 + $0x478] sm:$0xff] %v3310_v49  ;;  %v3230_v54 = vadd.f32 %v2008_v53, %v4580_v15 }
 0x2d2   :  { %2810 = vst [vmem:[%s5389_s3 + $0x468] sm:$0xff] %v3229_v52 }
 0x2d3   :  { %2811 = vst [vmem:[%s5389_s3 + $0x470] sm:$0xff] %v3230_v54 }
 0x2d4   :  { %v2606_v55 = vpop.f32.mrb[96].mxu1 }
 0x2d5   :  { %v3311_v56 = vadd.f32 %v2606_v55, %v4575_v13  ;;  %v2012_v57 = vpop.f32.mrb[96].mxu0  ;;  %v2608_v58 = vpop.f32.mrb[97].mxu1 }
 0x2d6   :  { %v3231_v59 = vadd.f32 %v2012_v57, %v4577_v14  ;;  %v2014_v60 = vpop.f32.mrb[97].mxu0  ;;  %v2609_v61 = vpop.f32.mrb[98].mxu1 }
 0x2d7   :  { %2815 = vst [vmem:[%s5389_s3 + $0x490] sm:$0xff] %v3311_v56  ;;  %v3232_v62 = vadd.f32 %v2014_v60, %v4580_v15  ;;  %v3312_v63 = vadd.f32 %v2609_v61, %v4575_v13  ;;  %v2016_v1 = vpop.f32.mrb[98].mxu0  ;;  %v2611_v2 = vpop.f32.mrb[99].mxu1 }
 0x2d8   :  { %2813 = vst [vmem:[%s5389_s3 + $0x480] sm:$0xff] %v3231_v59  ;;  %v3233_v3 = vadd.f32 %v2016_v1, %v4577_v14  ;;  %v2018_v4 = vpop.f32.mrb[99].mxu0 }
 0x2d9   :  { %2814 = vst [vmem:[%s5389_s3 + $0x488] sm:$0xff] %v3232_v62  ;;  %2818 = vst [vmem:[%s5389_s3 + $0x4a8] sm:$0xff] %v3312_v63  ;;  %v3234_v5 = vadd.f32 %v2018_v4, %v4580_v15 }
 0x2da   :  { %2816 = vst [vmem:[%s5389_s3 + $0x498] sm:$0xff] %v3233_v3 }
 0x2db   :  { %2817 = vst [vmem:[%s5389_s3 + $0x4a0] sm:$0xff] %v3234_v5 }
 0x2dc   :  { %v2614_v6 = vpop.f32.mrb[100].mxu1 }
 0x2dd   :  { %v3313_v7 = vadd.f32 %v2614_v6, %v4575_v13  ;;  %v2022_v8 = vpop.f32.mrb[100].mxu0  ;;  %v2616_v9 = vpop.f32.mrb[101].mxu1 }
 0x2de   :  { %v3235_v10 = vadd.f32 %v2022_v8, %v4577_v14  ;;  %v2024_v11 = vpop.f32.mrb[101].mxu0  ;;  %v2617_v12 = vpop.f32.mrb[102].mxu1 }
 0x2df   :  { %2821 = vst [vmem:[%s5389_s3 + $0x4c0] sm:$0xff] %v3313_v7  ;;  %v3236_v16 = vadd.f32 %v2024_v11, %v4580_v15  ;;  %v3314_v17 = vadd.f32 %v2617_v12, %v4575_v13  ;;  %v2026_v18 = vpop.f32.mrb[102].mxu0  ;;  %v2619_v19 = vpop.f32.mrb[103].mxu1 }
 0x2e0   :  { %2819 = vst [vmem:[%s5389_s3 + $0x4b0] sm:$0xff] %v3235_v10  ;;  %v3237_v20 = vadd.f32 %v2026_v18, %v4577_v14  ;;  %v2028_v21 = vpop.f32.mrb[103].mxu0 }
 0x2e1   :  { %2820 = vst [vmem:[%s5389_s3 + $0x4b8] sm:$0xff] %v3236_v16  ;;  %2824 = vst [vmem:[%s5389_s3 + $0x4d8] sm:$0xff] %v3314_v17  ;;  %v3238_v22 = vadd.f32 %v2028_v21, %v4580_v15 }
 0x2e2   :  { %2822 = vst [vmem:[%s5389_s3 + $0x4c8] sm:$0xff] %v3237_v20 }
 0x2e3   :  { %2823 = vst [vmem:[%s5389_s3 + $0x4d0] sm:$0xff] %v3238_v22 }
 0x2e4   :  { %v2622_v23 = vpop.f32.mrb[104].mxu1 }
 0x2e5   :  { %v3315_v24 = vadd.f32 %v2622_v23, %v4575_v13  ;;  %v2032_v25 = vpop.f32.mrb[104].mxu0  ;;  %v2624_v26 = vpop.f32.mrb[105].mxu1 }
 0x2e6   :  { %v3239_v27 = vadd.f32 %v2032_v25, %v4577_v14  ;;  %v2034_v28 = vpop.f32.mrb[105].mxu0  ;;  %v2625_v29 = vpop.f32.mrb[106].mxu1 }
 0x2e7   :  { %2827 = vst [vmem:[%s5389_s3 + $0x4f0] sm:$0xff] %v3315_v24  ;;  %v3240_v30 = vadd.f32 %v2034_v28, %v4580_v15  ;;  %v3316_v31 = vadd.f32 %v2625_v29, %v4575_v13  ;;  %v2036_v32 = vpop.f32.mrb[106].mxu0  ;;  %v2627_v33 = vpop.f32.mrb[107].mxu1 }
 0x2e8   :  { %2825 = vst [vmem:[%s5389_s3 + $0x4e0] sm:$0xff] %v3239_v27  ;;  %v3241_v34 = vadd.f32 %v2036_v32, %v4577_v14  ;;  %v2038_v35 = vpop.f32.mrb[107].mxu0 }
 0x2e9   :  { %2826 = vst [vmem:[%s5389_s3 + $0x4e8] sm:$0xff] %v3240_v30  ;;  %2830 = vst [vmem:[%s5389_s3 + $0x508] sm:$0xff] %v3316_v31  ;;  %v3242_v36 = vadd.f32 %v2038_v35, %v4580_v15 }
 0x2ea   :  { %2828 = vst [vmem:[%s5389_s3 + $0x4f8] sm:$0xff] %v3241_v34 }
 0x2eb   :  { %2829 = vst [vmem:[%s5389_s3 + $0x500] sm:$0xff] %v3242_v36 }
 0x2ec   :  { %v2630_v37 = vpop.f32.mrb[108].mxu1 }
 0x2ed   :  { %v3317_v38 = vadd.f32 %v2630_v37, %v4575_v13  ;;  %v2042_v0 = vpop.f32.mrb[108].mxu0  ;;  %v2632_v39 = vpop.f32.mrb[109].mxu1 }
 0x2ee   :  { %v3243_v40 = vadd.f32 %v2042_v0, %v4577_v14  ;;  %v2044_v41 = vpop.f32.mrb[109].mxu0  ;;  %v2633_v42 = vpop.f32.mrb[110].mxu1 }
 0x2ef   :  { %2833 = vst [vmem:[%s5389_s3 + $0x520] sm:$0xff] %v3317_v38  ;;  %v3244_v43 = vadd.f32 %v2044_v41, %v4580_v15  ;;  %v3318_v44 = vadd.f32 %v2633_v42, %v4575_v13  ;;  %v2046_v45 = vpop.f32.mrb[110].mxu0  ;;  %v2635_v46 = vpop.f32.mrb[111].mxu1 }
 0x2f0   :  { %2831 = vst [vmem:[%s5389_s3 + $0x510] sm:$0xff] %v3243_v40  ;;  %v3245_v47 = vadd.f32 %v2046_v45, %v4577_v14  ;;  %v2048_v48 = vpop.f32.mrb[111].mxu0 }
 0x2f1   :  { %2832 = vst [vmem:[%s5389_s3 + $0x518] sm:$0xff] %v3244_v43  ;;  %2836 = vst [vmem:[%s5389_s3 + $0x538] sm:$0xff] %v3318_v44  ;;  %v3246_v49 = vadd.f32 %v2048_v48, %v4580_v15 }
 0x2f2   :  { %2834 = vst [vmem:[%s5389_s3 + $0x528] sm:$0xff] %v3245_v47 }
 0x2f3   :  { %2835 = vst [vmem:[%s5389_s3 + $0x530] sm:$0xff] %v3246_v49 }
 0x2f4   :  { %v2638_v50 = vpop.f32.mrb[112].mxu1 }
 0x2f5   :  { %v3319_v51 = vadd.f32 %v2638_v50, %v4575_v13  ;;  %v2052_v52 = vpop.f32.mrb[112].mxu0  ;;  %v2640_v53 = vpop.f32.mrb[113].mxu1 }
 0x2f6   :  { %v3247_v54 = vadd.f32 %v2052_v52, %v4577_v14  ;;  %v2054_v55 = vpop.f32.mrb[113].mxu0  ;;  %v2641_v56 = vpop.f32.mrb[114].mxu1 }
 0x2f7   :  { %2839 = vst [vmem:[%s5389_s3 + $0x550] sm:$0xff] %v3319_v51  ;;  %v3248_v57 = vadd.f32 %v2054_v55, %v4580_v15  ;;  %v3320_v58 = vadd.f32 %v2641_v56, %v4575_v13  ;;  %v2056_v59 = vpop.f32.mrb[114].mxu0  ;;  %v2643_v60 = vpop.f32.mrb[115].mxu1 }
 0x2f8   :  { %2837 = vst [vmem:[%s5389_s3 + $0x540] sm:$0xff] %v3247_v54  ;;  %v3249_v61 = vadd.f32 %v2056_v59, %v4577_v14  ;;  %v2058_v62 = vpop.f32.mrb[115].mxu0 }
 0x2f9   :  { %2838 = vst [vmem:[%s5389_s3 + $0x548] sm:$0xff] %v3248_v57  ;;  %2842 = vst [vmem:[%s5389_s3 + $0x568] sm:$0xff] %v3320_v58  ;;  %v3250_v63 = vadd.f32 %v2058_v62, %v4580_v15 }
 0x2fa   :  { %2840 = vst [vmem:[%s5389_s3 + $0x558] sm:$0xff] %v3249_v61 }
 0x2fb   :  { %2841 = vst [vmem:[%s5389_s3 + $0x560] sm:$0xff] %v3250_v63 }
 0x2fc   :  { %v2646_v1 = vpop.f32.mrb[116].mxu1 }
 0x2fd   :  { %v3321_v2 = vadd.f32 %v2646_v1, %v4575_v13  ;;  %v2062_v3 = vpop.f32.mrb[116].mxu0  ;;  %v2648_v4 = vpop.f32.mrb[117].mxu1 }
 0x2fe   :  { %v3251_v5 = vadd.f32 %v2062_v3, %v4577_v14  ;;  %v2064_v6 = vpop.f32.mrb[117].mxu0  ;;  %v2649_v7 = vpop.f32.mrb[118].mxu1 }
 0x2ff   :  { %2845 = vst [vmem:[%s5389_s3 + $0x580] sm:$0xff] %v3321_v2  ;;  %v3252_v8 = vadd.f32 %v2064_v6, %v4580_v15  ;;  %v3322_v9 = vadd.f32 %v2649_v7, %v4575_v13  ;;  %v2066_v10 = vpop.f32.mrb[118].mxu0  ;;  %v2651_v11 = vpop.f32.mrb[119].mxu1 }
 0x300   :  { %2843 = vst [vmem:[%s5389_s3 + $0x570] sm:$0xff] %v3251_v5  ;;  %v3253_v12 = vadd.f32 %v2066_v10, %v4577_v14  ;;  %v2068_v16 = vpop.f32.mrb[119].mxu0 }
 0x301   :  { %2844 = vst [vmem:[%s5389_s3 + $0x578] sm:$0xff] %v3252_v8  ;;  %2848 = vst [vmem:[%s5389_s3 + $0x598] sm:$0xff] %v3322_v9  ;;  %v3254_v17 = vadd.f32 %v2068_v16, %v4580_v15 }
 0x302   :  { %2846 = vst [vmem:[%s5389_s3 + $0x588] sm:$0xff] %v3253_v12 }
 0x303   :  { %2847 = vst [vmem:[%s5389_s3 + $0x590] sm:$0xff] %v3254_v17 }
 0x304   :  { %v2654_v18 = vpop.f32.mrb[120].mxu1 }
 0x305   :  { %v3323_v19 = vadd.f32 %v2654_v18, %v4575_v13  ;;  %v2072_v20 = vpop.f32.mrb[120].mxu0  ;;  %v2656_v21 = vpop.f32.mrb[121].mxu1 }
 0x306   :  { %v3255_v22 = vadd.f32 %v2072_v20, %v4577_v14  ;;  %v2074_v23 = vpop.f32.mrb[121].mxu0  ;;  %v2657_v24 = vpop.f32.mrb[122].mxu1 }
 0x307   :  { %2851 = vst [vmem:[%s5389_s3 + $0x5b0] sm:$0xff] %v3323_v19  ;;  %v3256_v25 = vadd.f32 %v2074_v23, %v4580_v15  ;;  %v3324_v26 = vadd.f32 %v2657_v24, %v4575_v13  ;;  %v2076_v27 = vpop.f32.mrb[122].mxu0  ;;  %v2659_v28 = vpop.f32.mrb[123].mxu1 }
 0x308   :  { %2849 = vst [vmem:[%s5389_s3 + $0x5a0] sm:$0xff] %v3255_v22  ;;  %v3257_v29 = vadd.f32 %v2076_v27, %v4577_v14  ;;  %v2078_v30 = vpop.f32.mrb[123].mxu0 }
 0x309   :  { %2850 = vst [vmem:[%s5389_s3 + $0x5a8] sm:$0xff] %v3256_v25  ;;  %2854 = vst [vmem:[%s5389_s3 + $0x5c8] sm:$0xff] %v3324_v26  ;;  %v3258_v31 = vadd.f32 %v2078_v30, %v4580_v15 }
 0x30a   :  { %2852 = vst [vmem:[%s5389_s3 + $0x5b8] sm:$0xff] %v3257_v29 }
 0x30b   :  { %2853 = vst [vmem:[%s5389_s3 + $0x5c0] sm:$0xff] %v3258_v31 }
 0x30c   :  { %v2662_v32 = vpop.f32.mrb[124].mxu1 }
 0x30d   :  { %v3325_v33 = vadd.f32 %v2662_v32, %v4575_v13  ;;  %v2082_v34 = vpop.f32.mrb[124].mxu0  ;;  %v2664_v35 = vpop.f32.mrb[125].mxu1 }
 0x30e   :  { %v3259_v36 = vadd.f32 %v2082_v34, %v4577_v14  ;;  %v2084_v37 = vpop.f32.mrb[125].mxu0  ;;  %v2665_v38 = vpop.f32.mrb[126].mxu1 }
 0x30f   :  { %2857 = vst [vmem:[%s5389_s3 + $0x5e0] sm:$0xff] %v3325_v33  ;;  %v3260_v0 = vadd.f32 %v2084_v37, %v4580_v15  ;;  %v3326_v39 = vadd.f32 %v2665_v38, %v4575_v13  ;;  %v2086_v40 = vpop.f32.mrb[126].mxu0  ;;  %v2667_v41 = vpop.f32.mrb[127].mxu1 }
 0x310   :  { %2855 = vst [vmem:[%s5389_s3 + $0x5d0] sm:$0xff] %v3259_v36  ;;  %v3261_v42 = vadd.f32 %v2086_v40, %v4577_v14  ;;  %v2088_v43 = vpop.f32.mrb[127].mxu0 }
 0x311   :  { %2856 = vst [vmem:[%s5389_s3 + $0x5d8] sm:$0xff] %v3260_v0  ;;  %2860 = vst [vmem:[%s5389_s3 + $0x5f8] sm:$0xff] %v3326_v39  ;;  %v3262_v44 = vadd.f32 %v2088_v43, %v4580_v15 }
 0x312   :  { %2858 = vst [vmem:[%s5389_s3 + $0x5e8] sm:$0xff] %v3261_v42 }
 0x313   :  { %2859 = vst [vmem:[%s5389_s3 + $0x5f0] sm:$0xff] %v3262_v44 }

// kernel: _attention_forward.5
= control target key start
LH: loop header
LB: loop body
LE: loop exit
PB: predicated region body
PF: predicated region fallthrough
CT: control target
= control target key end

     0   :  { %v4895_v1 = vmov 0   ;;  %vm1226_vm0 = vcmask 261120   ;;  %vm3317_vm1 = vcmask 523264   ;;  %s7672_s1 = inlined_call_operand.vmem [shape: bf16[288,576], index: 1, kind: input, shape index: {}]   ;;  %s7673_s0 = inlined_call_operand.vmem [shape: bf16[512,288], index: 0, kind: input, shape index: {}]   ;;  %s7674_s2 = inlined_call_operand.vmem [shape: f32[1,576], index: 2, kind: input, shape index: {}]   ;;  %s7675_s3 = inlined_call_operand.vmem [shape: f32[512,576], index: 3, kind: output, shape index: {}]  }
   0x1   :  { %v4539_v0 = vld [vmem:[%s7672_s1 + $0x4] ss:$20 sps:$4 sm:$0xff]   ;;  %1918 = vmatprep.mubr.bf16.mxu1 %v4895_v1  ;;  %v4543_v3 = vld [vmem:[%s7672_s1] ss:$20 sps:$4 sm:$0xff]   ;;  %v4549_v7 = vld [vmem:[%s7672_s1 + $0x28] ss:$20 sps:$4 sm:$0xff]  }
   0x2   :  { %v4923_v2 = vld [vmem:[%s7672_s1 + $0x284] ss:$20 sps:$4 sm:$0xff]   ;;  %1323 = vmatprep.subr.bf16.mxu0 %v4539_v0  ;;  %v4931_v4 = vld [vmem:[%s7672_s1 + $0x280] ss:$20 sps:$4 sm:$0xff]   ;;  %v4949_v8 = vld [vmem:[%s7672_s1 + $0x2a8] ss:$20 sps:$4 sm:$0xff]  }
   0x3   :  { %4022 = vmatprep.subr.bf16.mxu1 %v4923_v2  ;;  %v4545_v5 = vld [vmem:[%s7672_s1 + $0x2c] ss:$20 sps:$4 sm:$0xff]   ;;  %1324 = vmatpush1.bf16.msra.mxu0 %v4543_v3  ;;  %v4551_v9 = vld [vmem:[%s7672_s1 + $0x54] ss:$20 sps:$4 sm:$0xff]   ;;  %v4554_v11 = vld [vmem:[%s7672_s1 + $0x50] ss:$20 sps:$4 sm:$0xff]  }
   0x4   :  { %4024 = vmatpush1.bf16.msra.mxu1 %v4931_v4  ;;  %v4941_v6 = vld [vmem:[%s7672_s1 + $0x2ac] ss:$20 sps:$4 sm:$0xff]   ;;  %1325 = vmatprep.subr.bf16.mxu0 %v4545_v5  ;;  %v4555_v12 = vld [vmem:[%s7672_s1 + $0x7c] ss:$20 sps:$4 sm:$0xff]   ;;  %v4558_v16 = vld [vmem:[%s7672_s1 + $0xa4] ss:$20 sps:$4 sm:$0xff]  }
   0x5   :  { %4023 = vmatprep.subr.bf16.mxu1 %v4941_v6  ;;  %v4553_v10 = vld [vmem:[%s7673_s0 + $0x200] ss:$12 sps:$4 sm:$0xff]   ;;  %v4562_v14 = vld [vmem:[%s7672_s1 + $0x8] ss:$20 sps:$4 sm:$0xff]   ;;  %v4560_v17 = vld [vmem:[%s7673_s0 + $0x218] ss:$12 sps:$4 sm:$0xff]  }
   0x6   :  { %v4557_v13 = vld [vmem:[%s7672_s1 + $0x78] ss:$20 sps:$4 sm:$0xff]   ;;  %v4570_v18 = vld [vmem:[%s7672_s1 + $0x34] ss:$20 sps:$4 sm:$0xff]   ;;  %v4568_v21 = vld [vmem:[%s7672_s1 + $0x30] ss:$20 sps:$4 sm:$0xff]  }
   0x7   :  { %1326 = vmatpush1.bf16.msra.mxu0 %v4549_v7  ;;  %v4564_v15 = vld [vmem:[%s7672_s1 + $0xc] ss:$20 sps:$4 sm:$0xff]   ;;  %v4567_v22 = vld [vmem:[%s7672_s1 + $0xc8] ss:$20 sps:$4 sm:$0xff]   ;;  %v4574_v27 = vld [vmem:[%s7672_s1 + $0xf0] ss:$20 sps:$4 sm:$0xff]  }
   0x8   :  { %4025 = vmatpush1.bf16.msra.mxu1 %v4949_v8  ;;  %1327 = vmatprep.subr.bf16.mxu0 %v4551_v9  ;;  %v4561_v19 = vld [vmem:[%s7672_s1 + $0xa0] ss:$20 sps:$4 sm:$0xff]   ;;  %v4579_v23 = vld [vmem:[%s7672_s1 + $0x5c] ss:$20 sps:$4 sm:$0xff]   ;;  %v4577_v25 = vld [vmem:[%s7672_s1 + $0x58] ss:$20 sps:$4 sm:$0xff]  }
   0x9   :  { %2029 = vmatprep.subr.bf16.mxu1 %v4564_v15  ;;  %v4565_v20 = vld [vmem:[%s7672_s1 + $0xcc] ss:$20 sps:$4 sm:$0xff]   ;;  %v4571_v24 = vld [vmem:[%s7672_s1 + $0xf4] ss:$20 sps:$4 sm:$0xff]   ;;  %v4573_v26 = vld [vmem:[%s7673_s0 + $0x230] ss:$12 sps:$4 sm:$0xff]  }
   0xa   :  { %v4587_v28 = vld [vmem:[%s7672_s1 + $0x84] ss:$20 sps:$4 sm:$0xff]   ;;  %v4575_v29 = vld [vmem:[%s7672_s1 + $0x11c] ss:$20 sps:$4 sm:$0xff]   ;;  %v4585_v30 = vld [vmem:[%s7672_s1 + $0x80] ss:$20 sps:$4 sm:$0xff]  }
   0xb   :  { %3845 = vmatmul.mubr.msk.bf16.vlgmr.msra.gmra.mrb[0].mxu1 %vm1226_vm0, %v4553_v10  ;;  %1328 = vmatpush1.bf16.msra.mxu0 %v4554_v11  ;;  %v4593_v31 = vld [vmem:[%s7672_s1 + $0xac] ss:$20 sps:$4 sm:$0xff]   ;;  %v4581_v33 = vld [vmem:[%s7672_s1 + $0x144] ss:$20 sps:$4 sm:$0xff]   ;;  %v4591_v34 = vld [vmem:[%s7672_s1 + $0xa8] ss:$20 sps:$4 sm:$0xff]  }
   0xc   :  { %1928 = vmatprep.mubr.bf16.mxu1 %v4895_v1  ;;  %1329 = vmatprep.subr.bf16.mxu0 %v4555_v12  ;;  %v4580_v32 = vld [vmem:[%s7672_s1 + $0x118] ss:$20 sps:$4 sm:$0xff]   ;;  %v4583_v35 = vld [vmem:[%s7673_s0 + $0x248] ss:$12 sps:$4 sm:$0xff]   ;;  %v4601_v39 = vld [vmem:[%s7672_s1 + $0xd0] ss:$20 sps:$4 sm:$0xff]  }
   0xd   :  { %2030 = vmatpush1.bf16.msra.mxu1 %v4562_v14  ;;  %v4603_v36 = vld [vmem:[%s7672_s1 + $0xd4] ss:$20 sps:$4 sm:$0xff]   ;;  %v4588_v38 = vld [vmem:[%s7672_s1 + $0x16c] ss:$20 sps:$4 sm:$0xff]   ;;  %v4610_v40 = vld [vmem:[%s7672_s1 + $0xfc] ss:$20 sps:$4 sm:$0xff]  }
   0xe   :  { %2031 = vmatprep.subr.bf16.mxu1 %v4570_v18  ;;  %v4584_v37 = vld [vmem:[%s7672_s1 + $0x140] ss:$20 sps:$4 sm:$0xff]   ;;  %v4590_v41 = vld [vmem:[%s7672_s1 + $0x168] ss:$20 sps:$4 sm:$0xff]   ;;  %v4608_v43 = vld [vmem:[%s7672_s1 + $0xf8] ss:$20 sps:$4 sm:$0xff]  }
   0xf   :  { %1330 = vmatpush1.bf16.msra.mxu0 %v4557_v13  ;;  %v4594_v42 = vld [vmem:[%s7672_s1 + $0x194] ss:$20 sps:$4 sm:$0xff]   ;;  %v4596_v44 = vld [vmem:[%s7673_s0 + $0x260] ss:$12 sps:$4 sm:$0xff]   ;;  %v4619_v45 = vld [vmem:[%s7672_s1 + $0x124] ss:$20 sps:$4 sm:$0xff]  }
  0x10   :  { %1331 = vmatprep.subr.bf16.mxu0 %v4558_v16  ;;  %v4597_v46 = vld [vmem:[%s7672_s1 + $0x190] ss:$20 sps:$4 sm:$0xff]   ;;  %v4617_v48 = vld [vmem:[%s7672_s1 + $0x120] ss:$20 sps:$4 sm:$0xff]   ;;  %v4600_v49 = vld [vmem:[%s7672_s1 + $0x1b8] ss:$20 sps:$4 sm:$0xff]  }
  0x11   :  { %2032 = vmatpush1.bf16.msra.mxu1 %v4568_v21  ;;  %v4598_v47 = vld [vmem:[%s7672_s1 + $0x1bc] ss:$20 sps:$4 sm:$0xff]   ;;  %v4626_v50 = vld [vmem:[%s7672_s1 + $0x14c] ss:$20 sps:$4 sm:$0xff]   ;;  %v4604_v52 = vld [vmem:[%s7672_s1 + $0x1e4] ss:$20 sps:$4 sm:$0xff]  }
  0x12   :  { %2033 = vmatprep.subr.bf16.mxu1 %v4579_v23  ;;  %v5091_v51 = vld [vmem:[%s7673_s0 + $0x4] ss:$12 sps:$4 sm:$0xff]   ;;  %v4624_v53 = vld [vmem:[%s7672_s1 + $0x148] ss:$20 sps:$4 sm:$0xff]   ;;  %v4607_v56 = vld [vmem:[%s7672_s1 + $0x1e0] ss:$20 sps:$4 sm:$0xff]  }
  0x13   :  { %3846 = vmatmul.mubr.msk.bf16.gmra.mrb[4].mxu1 %vm1226_vm0, %v4560_v17  ;;  %1332 = vmatpush1.bf16.msra.mxu0 %v4561_v19  ;;  %v4633_v54 = vld [vmem:[%s7672_s1 + $0x174] ss:$20 sps:$4 sm:$0xff]   ;;  %v4606_v55 = vld [vmem:[%s7673_s0 + $0x278] ss:$12 sps:$4 sm:$0xff]   ;;  %v4611_v57 = vld [vmem:[%s7672_s1 + $0x20c] ss:$20 sps:$4 sm:$0xff]  }
  0x14   :  { %1938 = vmatprep.mubr.bf16.mxu1 %v4895_v1  ;;  %1333 = vmatprep.subr.bf16.mxu0 %v4565_v20  ;;  %v4631_v58 = vld [vmem:[%s7672_s1 + $0x170] ss:$20 sps:$4 sm:$0xff]   ;;  %v4613_v60 = vld [vmem:[%s7672_s1 + $0x208] ss:$20 sps:$4 sm:$0xff]   ;;  %v4638_v62 = vld [vmem:[%s7672_s1 + $0x198] ss:$20 sps:$4 sm:$0xff]  }
  0x15   :  { %2034 = vmatpush1.bf16.msra.mxu1 %v4577_v25  ;;  %1355 = vmatprep.mubr.bf16.mxu0 %v5091_v51  ;;  %v4640_v59 = vld [vmem:[%s7672_s1 + $0x19c] ss:$20 sps:$4 sm:$0xff]   ;;  %v4614_v61 = vld [vmem:[%s7672_s1 + $0x234] ss:$20 sps:$4 sm:$0xff]   ;;  %v4643_v63 = vld [vmem:[%s7672_s1 + $0x1c4] ss:$20 sps:$4 sm:$0xff]  }
  0x16   :  { %2035 = vmatprep.subr.bf16.mxu1 %v4587_v28  ;;  %v4616_v0 = vld [vmem:[%s7673_s0 + $0x290] ss:$12 sps:$4 sm:$0xff]   ;;  %v4641_v7 = vld [vmem:[%s7672_s1 + $0x1c0] ss:$20 sps:$4 sm:$0xff]   ;;  %v4623_v10 = vld [vmem:[%s7672_s1 + $0x258] ss:$20 sps:$4 sm:$0xff]  }
  0x17   :  { %1334 = vmatpush1.bf16.msra.mxu0 %v4567_v22  ;;  %v4620_v3 = vld [vmem:[%s7672_s1 + $0x230] ss:$20 sps:$4 sm:$0xff]   ;;  %v4650_v9 = vld [vmem:[%s7672_s1 + $0x1ec] ss:$20 sps:$4 sm:$0xff]   ;;  %v4648_v11 = vld [vmem:[%s7672_s1 + $0x1e8] ss:$20 sps:$4 sm:$0xff]  }
  0x18   :  { %1335 = vmatprep.subr.bf16.mxu0 %v4571_v24  ;;  %v4621_v5 = vld [vmem:[%s7672_s1 + $0x25c] ss:$20 sps:$4 sm:$0xff]   ;;  %v4629_v12 = vld [vmem:[%s7673_s0] ss:$12 sps:$4 sm:$0xff]   ;;  %v4653_v13 = vld [vmem:[%s7672_s1 + $0x214] ss:$20 sps:$4 sm:$0xff]  }
  0x19   :  { %2036 = vmatpush1.bf16.msra.mxu1 %v4585_v30  ;;  %v4630_v14 = vld [vmem:[%s7673_s0 + $0x2a8] ss:$12 sps:$4 sm:$0xff]   ;;  %v4651_v16 = vld [vmem:[%s7672_s1 + $0x210] ss:$20 sps:$4 sm:$0xff]   ;;  %v4654_v23 = vld [vmem:[%s7673_s0 + $0x4c] ss:$12 sps:$4 sm:$0xff]  }
  0x1a   :  { %2037 = vmatprep.subr.bf16.mxu1 %v4593_v31  ;;  %v4634_v15 = vld [vmem:[%s7673_s0 + $0x1c] ss:$12 sps:$4 sm:$0xff]   ;;  %v4636_v18 = vld [vmem:[%s7673_s0 + $0x18] ss:$12 sps:$4 sm:$0xff]   ;;  %v4644_v20 = vld [vmem:[%s7673_s0 + $0x34] ss:$12 sps:$4 sm:$0xff]  }
  0x1b   :  { %3847 = vmatmul.mubr.msk.bf16.gmra.mrb[8].mxu1 %vm1226_vm0, %v4573_v26  ;;  %1336 = vmatpush1.bf16.msra.mxu0 %v4574_v27  ;;  %v4660_v17 = vld [vmem:[%s7672_s1 + $0x23c] ss:$20 sps:$4 sm:$0xff]   ;;  %v4663_v19 = vld [vmem:[%s7672_s1 + $0x264] ss:$20 sps:$4 sm:$0xff]   ;;  %v4661_v21 = vld [vmem:[%s7672_s1 + $0x260] ss:$20 sps:$4 sm:$0xff]  }
  0x1c   :  { %1948 = vmatprep.mubr.bf16.mxu1 %v4895_v1  ;;  %1337 = vmatprep.subr.bf16.mxu0 %v4575_v29  ;;  %v4647_v22 = vld [vmem:[%s7673_s0 + $0x2d8] ss:$12 sps:$4 sm:$0xff]   ;;  %v4656_v24 = vld [vmem:[%s7673_s0 + $0x48] ss:$12 sps:$4 sm:$0xff]   ;;  %v4657_v25 = vld [vmem:[%s7673_s0 + $0x2f0] ss:$12 sps:$4 sm:$0xff]  }
  0x1d   :  { %2038 = vmatpush1.bf16.msra.mxu1 %v4591_v34  ;;  %v4664_v26 = vld [vmem:[%s7673_s0 + $0x64] ss:$12 sps:$4 sm:$0xff]   ;;  %v4666_v27 = vld [vmem:[%s7673_s0 + $0x60] ss:$12 sps:$4 sm:$0xff]   ;;  %v4667_v28 = vld [vmem:[%s7673_s0 + $0x7c] ss:$12 sps:$4 sm:$0xff]  }
  0x1e   :  { %2039 = vmatprep.subr.bf16.mxu1 %v4603_v36  ;;  %v4670_v29 = vld [vmem:[%s7672_s1 + $0x288] ss:$20 sps:$4 sm:$0xff]   ;;  %v4669_v30 = vld [vmem:[%s7673_s0 + $0x78] ss:$12 sps:$4 sm:$0xff]   ;;  %v4673_v31 = vld [vmem:[%s7673_s0 + $0x94] ss:$12 sps:$4 sm:$0xff]  }
  0x1f   :  { %1338 = vmatpush1.bf16.msra.mxu0 %v4580_v32  ;;  %v4721_v32 = vld [vmem:[%s7672_s1 + $0x2b0] ss:$20 sps:$4 sm:$0xff]   ;;  %v4678_v36 = vld [vmem:[%s7673_s0 + $0xa8] ss:$12 sps:$4 sm:$0xff]  }
  0x20   :  { %1339 = vmatprep.subr.bf16.mxu0 %v4581_v33  ;;  %v4723_v33 = vld [vmem:[%s7672_s1 + $0x2b4] ss:$20 sps:$4 sm:$0xff]   ;;  %v4675_v34 = vld [vmem:[%s7673_s0 + $0x90] ss:$12 sps:$4 sm:$0xff]  }
  0x21   :  { %2040 = vmatpush1.bf16.msra.mxu1 %v4601_v39  ;;  %v4682_v39 = vld [vmem:[%s7673_s0 + $0xdc] ss:$12 sps:$4 sm:$0xff]  }
  0x22   :  { %2041 = vmatprep.subr.bf16.mxu1 %v4610_v40  ;;  %v4684_v40 = vld [vmem:[%s7673_s0 + $0xd8] ss:$12 sps:$4 sm:$0xff]  }
  0x23   :  { %3848 = vmatmul.mubr.msk.bf16.gmra.mrb[12].mxu1 %vm1226_vm0, %v4583_v35  ;;  %1340 = vmatpush1.bf16.msra.mxu0 %v4584_v37  ;;  %v4676_v35 = vld [vmem:[%s7673_s0 + $0xac] ss:$12 sps:$4 sm:$0xff]   ;;  %v4679_v37 = vld [vmem:[%s7673_s0 + $0xc4] ss:$12 sps:$4 sm:$0xff]  }
  0x24   :  { %1958 = vmatprep.mubr.bf16.mxu1 %v4895_v1  ;;  %1341 = vmatprep.subr.bf16.mxu0 %v4588_v38  ;;  %v4681_v38 = vld [vmem:[%s7673_s0 + $0xc0] ss:$12 sps:$4 sm:$0xff]  }
  0x25   :  { %2042 = vmatpush1.bf16.msra.mxu1 %v4608_v43  ;;  %v4688_v43 = vld [vmem:[%s7673_s0 + $0x10c] ss:$12 sps:$4 sm:$0xff]  }
  0x26   :  { %2043 = vmatprep.subr.bf16.mxu1 %v4619_v45  ;;  %v4691_v45 = vld [vmem:[%s7673_s0 + $0x124] ss:$12 sps:$4 sm:$0xff]  }
  0x27   :  { %1342 = vmatpush1.bf16.msra.mxu0 %v4590_v41  ;;  %v4685_v41 = vld [vmem:[%s7673_s0 + $0xf4] ss:$12 sps:$4 sm:$0xff]  }
  0x28   :  { %1343 = vmatprep.subr.bf16.mxu0 %v4594_v42  ;;  %v4687_v42 = vld [vmem:[%s7673_s0 + $0xf0] ss:$12 sps:$4 sm:$0xff]  }
  0x29   :  { %2044 = vmatpush1.bf16.msra.mxu1 %v4617_v48  ;;  %v4696_v48 = vld [vmem:[%s7673_s0 + $0x138] ss:$12 sps:$4 sm:$0xff]  }
  0x2a   :  { %2045 = vmatprep.subr.bf16.mxu1 %v4626_v50  ;;  %v4699_v50 = vld [vmem:[%s7673_s0 + $0x150] ss:$12 sps:$4 sm:$0xff]  }
  0x2b   :  { %3849 = vmatmul.mubr.msk.bf16.gmra.mrb[16].mxu1 %vm1226_vm0, %v4596_v44  ;;  %1344 = vmatpush1.bf16.msra.mxu0 %v4597_v46  ;;  %v4690_v44 = vld [vmem:[%s7673_s0 + $0x108] ss:$12 sps:$4 sm:$0xff]   ;;  %v4693_v46 = vld [vmem:[%s7673_s0 + $0x120] ss:$12 sps:$4 sm:$0xff]  }
  0x2c   :  { %1968 = vmatprep.mubr.bf16.mxu1 %v4895_v1  ;;  %1345 = vmatprep.subr.bf16.mxu0 %v4598_v47  ;;  %v4694_v47 = vld [vmem:[%s7673_s0 + $0x13c] ss:$12 sps:$4 sm:$0xff]  }
  0x2d   :  { %2046 = vmatpush1.bf16.msra.mxu1 %v4624_v53  ;;  %v4703_v53 = vld [vmem:[%s7673_s0 + $0x184] ss:$12 sps:$4 sm:$0xff]  }
  0x2e   :  { %2047 = vmatprep.subr.bf16.mxu1 %v4633_v54  ;;  %v4705_v54 = vld [vmem:[%s7673_s0 + $0x180] ss:$12 sps:$4 sm:$0xff]  }
  0x2f   :  { %1346 = vmatpush1.bf16.msra.mxu0 %v4600_v49  ;;  %v4697_v49 = vld [vmem:[%s7673_s0 + $0x154] ss:$12 sps:$4 sm:$0xff]  }
  0x30   :  { %1347 = vmatprep.subr.bf16.mxu0 %v4604_v52  ;;  %v4702_v52 = vld [vmem:[%s7673_s0 + $0x168] ss:$12 sps:$4 sm:$0xff]  }
  0x31   :  { %2048 = vmatpush1.bf16.msra.mxu1 %v4631_v58  ;;  %v4711_v58 = vld [vmem:[%s7673_s0 + $0x1b0] ss:$12 sps:$4 sm:$0xff]  }
  0x32   :  { %2049 = vmatprep.subr.bf16.mxu1 %v4640_v59  ;;  %v4712_v59 = vld [vmem:[%s7673_s0 + $0x1cc] ss:$12 sps:$4 sm:$0xff]  }
  0x33   :  { %3850 = vmatmul.mubr.msk.bf16.gmra.mrb[20].mxu1 %vm1226_vm0, %v4606_v55  ;;  %1348 = vmatpush1.bf16.msra.mxu0 %v4607_v56  ;;  %v4706_v55 = vld [vmem:[%s7673_s0 + $0x19c] ss:$12 sps:$4 sm:$0xff]   ;;  %v4708_v56 = vld [vmem:[%s7673_s0 + $0x198] ss:$12 sps:$4 sm:$0xff]  }
  0x34   :  { %1978 = vmatprep.mubr.bf16.mxu1 %v4895_v1  ;;  %1349 = vmatprep.subr.bf16.mxu0 %v4611_v57  ;;  %v4709_v57 = vld [vmem:[%s7673_s0 + $0x1b4] ss:$12 sps:$4 sm:$0xff]  }
  0x35   :  { %2050 = vmatpush1.bf16.msra.mxu1 %v4638_v62 }
  0x36   :  { %2051 = vmatprep.subr.bf16.mxu1 %v4643_v63  ;;  %v4717_v63 = vld [vmem:[%s7673_s0 + $0x1e0] ss:$12 sps:$4 sm:$0xff]  }
  0x37   :  { %1350 = vmatpush1.bf16.msra.mxu0 %v4613_v60  ;;  %v4714_v60 = vld [vmem:[%s7673_s0 + $0x1c8] ss:$12 sps:$4 sm:$0xff]  }
  0x38   :  { %1351 = vmatprep.subr.bf16.mxu0 %v4614_v61  ;;  %v4715_v61 = vld [vmem:[%s7673_s0 + $0x1e4] ss:$12 sps:$4 sm:$0xff]  }
  0x39   :  { %2052 = vmatpush1.bf16.msra.mxu1 %v4641_v7 }
  0x3a   :  { %2053 = vmatprep.subr.bf16.mxu1 %v4650_v9 }
  0x3b   :  { %3851 = vmatmul.mubr.msk.bf16.gmra.mrb[24].mxu1 %vm1226_vm0, %v4616_v0  ;;  %1352 = vmatpush1.bf16.msra.mxu0 %v4620_v3 }
  0x3c   :  { %1988 = vmatprep.mubr.bf16.mxu1 %v4895_v1  ;;  %1353 = vmatprep.subr.bf16.mxu0 %v4621_v5  ;;  %v4718_v5 = vld [vmem:[%s7673_s0 + $0x1fc] ss:$12 sps:$4 sm:$0xff]  }
  0x3d   :  { %2054 = vmatpush1.bf16.msra.mxu1 %v4648_v11 }
  0x3e   :  { %2055 = vmatprep.subr.bf16.mxu1 %v4653_v13  ;;  %v4724_v13 = vld [vmem:[%s7673_s0 + $0x214] ss:$12 sps:$4 sm:$0xff]  }
  0x3f   :  { %1354 = vmatpush1.bf16.msra.mxu0 %v4623_v10  ;;  %v4720_v10 = vld [vmem:[%s7673_s0 + $0x1f8] ss:$12 sps:$4 sm:$0xff]  }
  0x40   :  { %1676 = vmatprep.subr.bf16.mxu0 %v4923_v2  ;;  %v4658_v2 = vld [vmem:[%s7672_s1 + $0x238] ss:$20 sps:$4 sm:$0xff]  }
  0x41   :  { %2056 = vmatpush1.bf16.msra.mxu1 %v4651_v16 }
  0x42   :  { %1356 = vmatmul.mubr.bf16.vlgmr.msra.gmra.mrb[0].mxu0 %v4629_v12  ;;  %2057 = vmatprep.subr.bf16.mxu1 %v4660_v17  ;;  %v4726_v17 = vld [vmem:[%s7673_s0 + $0x210] ss:$12 sps:$4 sm:$0xff]  }
  0x43   :  { %3852 = vmatmul.mubr.msk.bf16.gmra.mrb[28].mxu1 %vm1226_vm0, %v4630_v14  ;;  %1677 = vmatpush1.bf16.msra.mxu0 %v4931_v4  ;;  %v4637_v4 = vld [vmem:[%s7673_s0 + $0x2c0] ss:$12 sps:$4 sm:$0xff]  }
  0x44   :  { %1365 = vmatprep.mubr.bf16.mxu0 %v4634_v15  ;;  %1998 = vmatprep.mubr.bf16.mxu1 %v4895_v1 }
  0x45   :  { %1678 = vmatprep.subr.bf16.mxu0 %v4941_v6  ;;  %2058 = vmatpush1.bf16.msra.mxu1 %v4658_v2  ;;  %v4672_v6 = vld [vmem:[%s7672_s1 + $0x28c] ss:$20 sps:$4 sm:$0xff]  }
  0x46   :  { %2059 = vmatprep.subr.bf16.mxu1 %v4663_v19  ;;  %v4727_v19 = vld [vmem:[%s7673_s0 + $0x22c] ss:$12 sps:$4 sm:$0xff]  }
  0x47   :  { %1679 = vmatpush1.bf16.msra.mxu0 %v4949_v8  ;;  %v4646_v8 = vld [vmem:[%s7673_s0 + $0x30] ss:$12 sps:$4 sm:$0xff]  }
  0x48   :  { %2735 = vmatprep.subr.bf16.mxu0 %v4895_v1 }
  0x49   :  { %2060 = vmatpush1.bf16.msra.mxu1 %v4661_v21  ;;  %v4729_v21 = vld [vmem:[%s7673_s0 + $0x228] ss:$12 sps:$4 sm:$0xff]  }
  0x4a   :  { %1366 = vmatmul.mubr.bf16.gmra.mrb[4].mxu0 %v4636_v18  ;;  %2382 = vmatprep.subr.bf16.mxu1 %v4672_v6 }
  0x4b   :  { %3853 = vmatmul.mubr.msk.bf16.gmra.mrb[32].mxu1 %vm1226_vm0, %v4637_v4  ;;  %1375 = vmatprep.mubr.bf16.mxu0 %v4644_v20 }
  0x4c   :  { %2008 = vmatprep.mubr.bf16.mxu1 %v4895_v1 }
  0x52   :  { %1376 = vmatmul.mubr.bf16.gmra.mrb[8].mxu0 %v4646_v8 }
  0x53   :  { %3854 = vmatmul.mubr.msk.bf16.gmra.mrb[36].mxu1 %vm1226_vm0, %v4647_v22  ;;  %1385 = vmatprep.mubr.bf16.mxu0 %v4654_v23  ;;  %v4730_v22 = vld [vmem:[%s7673_s0 + $0x244] ss:$12 sps:$4 sm:$0xff]  }
  0x54   :  { %2018 = vmatprep.mubr.bf16.mxu1 %v4895_v1 }
  0x5a   :  { %1386 = vmatmul.mubr.bf16.gmra.mrb[12].mxu0 %v4656_v24 }
  0x5b   :  { %3855 = vmatmul.mubr.msk.bf16.gmra.mrb[40].mxu1 %vm1226_vm0, %v4657_v25  ;;  %1395 = vmatprep.mubr.bf16.mxu0 %v4664_v26  ;;  %v4732_v25 = vld [vmem:[%s7673_s0 + $0x240] ss:$12 sps:$4 sm:$0xff]  }
  0x5c   :  { %2061 = vmatprep.mubr.bf16.mxu1 %v5091_v51  ;;  %v4700_v51 = vld [vmem:[%s7673_s0 + $0x16c] ss:$12 sps:$4 sm:$0xff]  }
  0x62   :  { %1396 = vmatmul.mubr.bf16.gmra.mrb[16].mxu0 %v4666_v27 }
  0x63   :  { %2062 = vmatmul.mubr.bf16.vlgmr.msra.gmra.mrb[44].mxu1 %v4629_v12  ;;  %1405 = vmatprep.mubr.bf16.mxu0 %v4667_v28 }
  0x64   :  { %2071 = vmatprep.mubr.bf16.mxu1 %v4634_v15  ;;  %2383 = vmatpush1.bf16.msra.mxu1 %v4670_v29  ;;  %v5362_v15 = vld [vmem:[%s7672_s1 + $0x290] ss:$20 sps:$4 sm:$0xff]  }
  0x65   :  { %2384 = vmatprep.subr.bf16.mxu1 %v4723_v33 }
  0x68   :  { %2385 = vmatpush1.bf16.msra.mxu1 %v4721_v32 }
  0x69   :  { %3954 = vmatprep.subr.bf16.mxu1 %v5362_v15 }
  0x6a   :  { %1406 = vmatmul.mubr.bf16.gmra.mrb[20].mxu0 %v4669_v30 }
  0x6b   :  { %2072 = vmatmul.mubr.bf16.gmra.mrb[48].mxu1 %v4636_v18  ;;  %1415 = vmatprep.mubr.bf16.mxu0 %v4673_v31 }
  0x6c   :  { %2081 = vmatprep.mubr.bf16.mxu1 %v4644_v20 }
  0x72   :  { %1416 = vmatmul.mubr.bf16.gmra.mrb[24].mxu0 %v4675_v34 }
  0x73   :  { %2082 = vmatmul.mubr.bf16.gmra.mrb[52].mxu1 %v4646_v8  ;;  %1425 = vmatprep.mubr.bf16.mxu0 %v4676_v35 }
  0x74   :  { %2091 = vmatprep.mubr.bf16.mxu1 %v4654_v23 }
  0x7a   :  { %1426 = vmatmul.mubr.bf16.gmra.mrb[28].mxu0 %v4678_v36 }
  0x7b   :  { %2092 = vmatmul.mubr.bf16.gmra.mrb[56].mxu1 %v4656_v24  ;;  %1435 = vmatprep.mubr.bf16.mxu0 %v4679_v37 }
  0x7c   :  { %2101 = vmatprep.mubr.bf16.mxu1 %v4664_v26 }
  0x82   :  { %1436 = vmatmul.mubr.bf16.gmra.mrb[32].mxu0 %v4681_v38 }
  0x83   :  { %2102 = vmatmul.mubr.bf16.gmra.mrb[60].mxu1 %v4666_v27  ;;  %1445 = vmatprep.mubr.bf16.mxu0 %v4682_v39 }
  0x84   :  { %2111 = vmatprep.mubr.bf16.mxu1 %v4667_v28  ;;  %v4733_v28 = vld [vmem:[%s7673_s0 + $0x25c] ss:$12 sps:$4 sm:$0xff]  }
  0x8a   :  { %1446 = vmatmul.mubr.bf16.gmra.mrb[36].mxu0 %v4684_v40 }
  0x8b   :  { %2112 = vmatmul.mubr.bf16.gmra.mrb[64].mxu1 %v4669_v30  ;;  %1455 = vmatprep.mubr.bf16.mxu0 %v4685_v41 }
  0x8c   :  { %2121 = vmatprep.mubr.bf16.mxu1 %v4673_v31  ;;  %v4735_v31 = vld [vmem:[%s7673_s0 + $0x258] ss:$12 sps:$4 sm:$0xff]  }
  0x92   :  { %1456 = vmatmul.mubr.bf16.gmra.mrb[40].mxu0 %v4687_v42 }
  0x93   :  { %2122 = vmatmul.mubr.bf16.gmra.mrb[68].mxu1 %v4675_v34  ;;  %1465 = vmatprep.mubr.bf16.mxu0 %v4688_v43  ;;  %v4736_v34 = vld [vmem:[%s7673_s0 + $0x274] ss:$12 sps:$4 sm:$0xff]  }
  0x94   :  { %2131 = vmatprep.mubr.bf16.mxu1 %v4676_v35 }
  0x9a   :  { %1466 = vmatmul.mubr.bf16.gmra.mrb[44].mxu0 %v4690_v44 }
  0x9b   :  { %2132 = vmatmul.mubr.bf16.gmra.mrb[72].mxu1 %v4678_v36  ;;  %1475 = vmatprep.mubr.bf16.mxu0 %v4691_v45 }
  0x9c   :  { %2141 = vmatprep.mubr.bf16.mxu1 %v4679_v37  ;;  %v4738_v37 = vld [vmem:[%s7673_s0 + $0x270] ss:$12 sps:$4 sm:$0xff]  }
  0xa2   :  { %1476 = vmatmul.mubr.bf16.gmra.mrb[48].mxu0 %v4693_v46 }
  0xa3   :  { %2142 = vmatmul.mubr.bf16.gmra.mrb[76].mxu1 %v4681_v38  ;;  %1485 = vmatprep.mubr.bf16.mxu0 %v4694_v47 }
  0xa4   :  { %2151 = vmatprep.mubr.bf16.mxu1 %v4682_v39 }
  0xaa   :  { %1486 = vmatmul.mubr.bf16.gmra.mrb[52].mxu0 %v4696_v48 }
  0xab   :  { %2152 = vmatmul.mubr.bf16.gmra.mrb[80].mxu1 %v4684_v40  ;;  %1495 = vmatprep.mubr.bf16.mxu0 %v4697_v49  ;;  %v4739_v40 = vld [vmem:[%s7673_s0 + $0x28c] ss:$12 sps:$4 sm:$0xff]  }
  0xac   :  { %2161 = vmatprep.mubr.bf16.mxu1 %v4685_v41 }
  0xb2   :  { %1496 = vmatmul.mubr.bf16.gmra.mrb[56].mxu0 %v4699_v50 }
  0xb3   :  { %2162 = vmatmul.mubr.bf16.gmra.mrb[84].mxu1 %v4687_v42  ;;  %1505 = vmatprep.mubr.bf16.mxu0 %v4700_v51 }
  0xb4   :  { %2171 = vmatprep.mubr.bf16.mxu1 %v4688_v43  ;;  %v4741_v43 = vld [vmem:[%s7673_s0 + $0x288] ss:$12 sps:$4 sm:$0xff]  }
  0xba   :  { %1506 = vmatmul.mubr.bf16.gmra.mrb[60].mxu0 %v4702_v52 }
  0xbb   :  { %2172 = vmatmul.mubr.bf16.gmra.mrb[88].mxu1 %v4690_v44  ;;  %1515 = vmatprep.mubr.bf16.mxu0 %v4703_v53 }
  0xbc   :  { %2181 = vmatprep.mubr.bf16.mxu1 %v4691_v45 }
  0xc2   :  { %1516 = vmatmul.mubr.bf16.gmra.mrb[64].mxu0 %v4705_v54 }
  0xc3   :  { %2182 = vmatmul.mubr.bf16.gmra.mrb[92].mxu1 %v4693_v46  ;;  %1525 = vmatprep.mubr.bf16.mxu0 %v4706_v55  ;;  %v4742_v46 = vld [vmem:[%s7673_s0 + $0x2a4] ss:$12 sps:$4 sm:$0xff]  }
  0xc4   :  { %2191 = vmatprep.mubr.bf16.mxu1 %v4694_v47 }
  0xca   :  { %1526 = vmatmul.mubr.bf16.gmra.mrb[68].mxu0 %v4708_v56 }
  0xcb   :  { %2192 = vmatmul.mubr.bf16.gmra.mrb[96].mxu1 %v4696_v48  ;;  %1535 = vmatprep.mubr.bf16.mxu0 %v4709_v57 }
  0xcc   :  { %2201 = vmatprep.mubr.bf16.mxu1 %v4697_v49  ;;  %v4744_v49 = vld [vmem:[%s7673_s0 + $0x2a0] ss:$12 sps:$4 sm:$0xff]  }
  0xd2   :  { %1536 = vmatmul.mubr.bf16.gmra.mrb[72].mxu0 %v4711_v58 }
  0xd3   :  { %2202 = vmatmul.mubr.bf16.gmra.mrb[100].mxu1 %v4699_v50  ;;  %1545 = vmatprep.mubr.bf16.mxu0 %v4712_v59 }
  0xd4   :  { %2211 = vmatprep.mubr.bf16.mxu1 %v4700_v51 }
  0xda   :  { %1546 = vmatmul.mubr.bf16.gmra.mrb[76].mxu0 %v4714_v60 }
  0xdb   :  { %2212 = vmatmul.mubr.bf16.gmra.mrb[104].mxu1 %v4702_v52  ;;  %1555 = vmatprep.mubr.bf16.mxu0 %v4715_v61  ;;  %v4745_v52 = vld [vmem:[%s7673_s0 + $0x2bc] ss:$12 sps:$4 sm:$0xff]  }
  0xdc   :  { %2221 = vmatprep.mubr.bf16.mxu1 %v4703_v53 }
  0xde   :  { %v5331_v62 = vpop.f32.mrb[0].mxu1 }
  0xdf   :  { %v5336_v0 = vpop.f32.mrb[1].mxu1 }
  0xe0   :  { %v5338_v3 = vpop.f32.mrb[2].mxu1 }
  0xe1   :  { %v5343_v7 = vpop.f32.mrb[3].mxu1 }
  0xe2   :  { %1556 = vmatmul.mubr.bf16.gmra.mrb[80].mxu0 %v4717_v63 }
  0xe3   :  { %2222 = vmatmul.mubr.bf16.gmra.mrb[108].mxu1 %v4705_v54  ;;  %1565 = vmatprep.mubr.bf16.mxu0 %v4718_v5 }
  0xe4   :  { %2231 = vmatprep.mubr.bf16.mxu1 %v4706_v55  ;;  %v4747_v55 = vld [vmem:[%s7673_s0 + $0x2b8] ss:$12 sps:$4 sm:$0xff]  }
  0xe6   :  { %v5345_v9 = vpop.f32.mrb[4].mxu1 }
  0xe7   :  { %v5350_v11 = vpop.f32.mrb[5].mxu1 }
  0xe8   :  { %v5352_v12 = vpop.f32.mrb[6].mxu1 }
  0xe9   :  { %v5357_v14 = vpop.f32.mrb[7].mxu1 }
  0xea   :  { %1566 = vmatmul.mubr.bf16.gmra.mrb[84].mxu0 %v4720_v10 }
  0xeb   :  { %2232 = vmatmul.mubr.bf16.gmra.mrb[112].mxu1 %v4708_v56  ;;  %1575 = vmatprep.mubr.bf16.mxu0 %v4724_v13 }
  0xec   :  { %2241 = vmatprep.mubr.bf16.mxu1 %v4709_v57 }
  0xee   :  { %v5365_v16 = vpop.f32.mrb[8].mxu1 }
  0xef   :  { %v5370_v2 = vpop.f32.mrb[9].mxu1 }
  0xf0   :  { %v5372_v18 = vpop.f32.mrb[10].mxu1 }
  0xf1   :  { %v5377_v4 = vpop.f32.mrb[11].mxu1 }
  0xf2   :  { %1576 = vmatmul.mubr.bf16.gmra.mrb[88].mxu0 %v4726_v17 }
  0xf3   :  { %2242 = vmatmul.mubr.bf16.gmra.mrb[116].mxu1 %v4711_v58  ;;  %1585 = vmatprep.mubr.bf16.mxu0 %v4727_v19  ;;  %v4748_v58 = vld [vmem:[%s7673_s0 + $0x2d4] ss:$12 sps:$4 sm:$0xff]  }
  0xf4   :  { %2251 = vmatprep.mubr.bf16.mxu1 %v4712_v59 }
  0xf6   :  { %v5379_v20 = vpop.f32.mrb[12].mxu1 }
  0xf7   :  { %v5384_v6 = vpop.f32.mrb[13].mxu1 }
  0xf8   :  { %v5386_v8 = vpop.f32.mrb[14].mxu1 }
  0xf9   :  { %v5391_v23 = vpop.f32.mrb[15].mxu1 }
  0xfa   :  { %1586 = vmatmul.mubr.bf16.gmra.mrb[92].mxu0 %v4729_v21 }
  0xfb   :  { %2252 = vmatmul.mubr.bf16.gmra.mrb[120].mxu1 %v4714_v60  ;;  %1595 = vmatprep.mubr.bf16.mxu0 %v4730_v22 }
  0xfc   :  { %2261 = vmatprep.mubr.bf16.mxu1 %v4715_v61  ;;  %v4750_v61 = vld [vmem:[%s7673_s0 + $0x2d0] ss:$12 sps:$4 sm:$0xff]  }
  0xfe   :  { %v5393_v24 = vpop.f32.mrb[16].mxu1 }
  0xff   :  { %v5398_v26 = vpop.f32.mrb[17].mxu1 }
 0x100   :  { %v5400_v27 = vpop.f32.mrb[18].mxu1 }
 0x101   :  { %v5405_v29 = vpop.f32.mrb[19].mxu1 }
 0x102   :  { %1596 = vmatmul.mubr.bf16.gmra.mrb[96].mxu0 %v4732_v25 }
 0x103   :  { %2262 = vmatmul.mubr.bf16.gmra.mrb[124].mxu1 %v4717_v63  ;;  %1605 = vmatprep.mubr.bf16.mxu0 %v4733_v28 }
 0x104   :  { %2271 = vmatprep.mubr.bf16.mxu1 %v4718_v5 }
 0x106   :  { %v5407_v30 = vpop.f32.mrb[20].mxu1 }
 0x107   :  { %v5412_v32 = vpop.f32.mrb[21].mxu1 }
 0x108   :  { %v5414_v33 = vpop.f32.mrb[22].mxu1 }
 0x109   :  { %v5419_v35 = vpop.f32.mrb[23].mxu1 }
 0x10a   :  { %1606 = vmatmul.mubr.bf16.gmra.mrb[100].mxu0 %v4735_v31 }
 0x10b   :  { %2272 = vmatmul.mubr.bf16.gmra.mrb[128].mxu1 %v4720_v10  ;;  %1615 = vmatprep.mubr.bf16.mxu0 %v4736_v34  ;;  %v4751_v10 = vld [vmem:[%s7673_s0 + $0x2ec] ss:$12 sps:$4 sm:$0xff]  }
 0x10c   :  { %2281 = vmatprep.mubr.bf16.mxu1 %v4724_v13 }
 0x10e   :  { %v5421_v36 = vpop.f32.mrb[24].mxu1 }
 0x10f   :  { %v5426_v38 = vpop.f32.mrb[25].mxu1 }
 0x110   :  { %v5428_v39 = vpop.f32.mrb[26].mxu1 }
 0x111   :  { %v5433_v41 = vpop.f32.mrb[27].mxu1 }
 0x112   :  { %1616 = vmatmul.mubr.bf16.gmra.mrb[104].mxu0 %v4738_v37 }
 0x113   :  { %2282 = vmatmul.mubr.bf16.gmra.mrb[132].mxu1 %v4726_v17  ;;  %1625 = vmatprep.mubr.bf16.mxu0 %v4739_v40  ;;  %v4753_v17 = vld [vmem:[%s7673_s0 + $0x2e8] ss:$12 sps:$4 sm:$0xff]  }
 0x114   :  { %2291 = vmatprep.mubr.bf16.mxu1 %v4727_v19  ;;  %v4754_v19 = vld [vmem:[%s7673_s0 + $0x8] ss:$12 sps:$4 sm:$0xff]  }
 0x116   :  { %v5435_v42 = vpop.f32.mrb[28].mxu1 }
 0x117   :  { %v5440_v44 = vpop.f32.mrb[29].mxu1 }
 0x118   :  { %v5442_v45 = vpop.f32.mrb[30].mxu1 }
 0x119   :  { %v5447_v47 = vpop.f32.mrb[31].mxu1 }
 0x11a   :  { %1626 = vmatmul.mubr.bf16.gmra.mrb[108].mxu0 %v4741_v43 }
 0x11b   :  { %2292 = vmatmul.mubr.bf16.gmra.mrb[136].mxu1 %v4729_v21  ;;  %1635 = vmatprep.mubr.bf16.mxu0 %v4742_v46  ;;  %v4755_v21 = vld [vmem:[%s7672_s1 + $0x10] ss:$20 sps:$4 sm:$0xff]  }
 0x11c   :  { %2301 = vmatprep.mubr.bf16.mxu1 %v4730_v22  ;;  %v4757_v22 = vld [vmem:[%s7672_s1 + $0x38] ss:$20 sps:$4 sm:$0xff]  }
 0x11e   :  { %v5449_v48 = vpop.f32.mrb[32].mxu1 }
 0x11f   :  { %v5454_v50 = vpop.f32.mrb[33].mxu1 }
 0x120   :  { %v5456_v51 = vpop.f32.mrb[34].mxu1 }
 0x121   :  { %v5461_v53 = vpop.f32.mrb[35].mxu1 }
 0x122   :  { %1636 = vmatmul.mubr.bf16.gmra.mrb[112].mxu0 %v4744_v49 }
 0x123   :  { %2302 = vmatmul.mubr.bf16.gmra.mrb[140].mxu1 %v4732_v25  ;;  %1645 = vmatprep.mubr.bf16.mxu0 %v4745_v52  ;;  %v4756_v25 = vld [vmem:[%s7673_s0 + $0x20] ss:$12 sps:$4 sm:$0xff]  }
 0x124   :  { %2311 = vmatprep.mubr.bf16.mxu1 %v4733_v28  ;;  %v4759_v28 = vld [vmem:[%s7672_s1 + $0x60] ss:$20 sps:$4 sm:$0xff]  }
 0x126   :  { %v5463_v54 = vpop.f32.mrb[36].mxu1 }
 0x127   :  { %v5468_v56 = vpop.f32.mrb[37].mxu1 }
 0x128   :  { %v5470_v57 = vpop.f32.mrb[38].mxu1 }
 0x129   :  { %v5475_v59 = vpop.f32.mrb[39].mxu1 }
 0x12a   :  { %1646 = vmatmul.mubr.bf16.gmra.mrb[116].mxu0 %v4747_v55 }
 0x12b   :  { %2312 = vmatmul.mubr.bf16.gmra.mrb[144].mxu1 %v4735_v31  ;;  %1655 = vmatprep.mubr.bf16.mxu0 %v4748_v58  ;;  %v4762_v31 = vld [vmem:[%s7672_s1 + $0x88] ss:$20 sps:$4 sm:$0xff]  }
 0x12c   :  { %2321 = vmatprep.mubr.bf16.mxu1 %v4736_v34  ;;  %v4758_v34 = vld [vmem:[%s7673_s0 + $0x38] ss:$12 sps:$4 sm:$0xff]  }
 0x12e   :  { %v5477_v60 = vpop.f32.mrb[40].mxu1 }
 0x12f   :  { %v5482_v63 = vpop.f32.mrb[41].mxu1 }
 0x130   :  { %v5484_v5 = vpop.f32.mrb[42].mxu1 }
 0x131   :  { %v5489_v13 = vpop.f32.mrb[43].mxu1 }
 0x132   :  { %1656 = vmatmul.mubr.bf16.gmra.mrb[120].mxu0 %v4750_v61 }
 0x133   :  { %2322 = vmatmul.mubr.bf16.gmra.mrb[148].mxu1 %v4738_v37  ;;  %1665 = vmatprep.mubr.bf16.mxu0 %v4751_v10  ;;  %v4765_v37 = vld [vmem:[%s7672_s1 + $0xb0] ss:$20 sps:$4 sm:$0xff]  }
 0x134   :  { %2331 = vmatprep.mubr.bf16.mxu1 %v4739_v40  ;;  %v4767_v40 = vld [vmem:[%s7672_s1 + $0xd8] ss:$20 sps:$4 sm:$0xff]  }
 0x13a   :  { %1666 = vmatmul.mubr.bf16.gmra.mrb[124].mxu0 %v4753_v17 }
 0x13b   :  { %2332 = vmatmul.mubr.bf16.gmra.mrb[152].mxu1 %v4741_v43  ;;  %1708 = vmatprep.mubr.bf16.mxu0 %v4895_v1  ;;  %v4760_v43 = vld [vmem:[%s7673_s0 + $0x50] ss:$12 sps:$4 sm:$0xff]  }
 0x13c   :  { %2341 = vmatprep.mubr.bf16.mxu1 %v4742_v46  ;;  %v4770_v46 = vld [vmem:[%s7672_s1 + $0x100] ss:$20 sps:$4 sm:$0xff]  }
 0x142   :  { %3824 = vmatmul.mubr.msk.bf16.vlgmr.msra.gmra.mrb[0].mxu0 %vm1226_vm0, %v4754_v19 }
 0x143   :  { %2342 = vmatmul.mubr.bf16.gmra.mrb[156].mxu1 %v4744_v49  ;;  %2736 = vmatpush1.bf16.msra.mxu0 %v4755_v21  ;;  %v4772_v49 = vld [vmem:[%s7672_s1 + $0x128] ss:$20 sps:$4 sm:$0xff]   ;;  %v4783_v21 = vld [vmem:[%s7672_s1 + $0x1f0] ss:$20 sps:$4 sm:$0xff]  }
 0x144   :  { %1718 = vmatprep.mubr.bf16.mxu0 %v4895_v1  ;;  %2351 = vmatprep.mubr.bf16.mxu1 %v4745_v52  ;;  %v4761_v52 = vld [vmem:[%s7673_s0 + $0x68] ss:$12 sps:$4 sm:$0xff]  }
 0x145   :  { %2737 = vmatprep.subr.bf16.mxu0 %v4895_v1 }
 0x147   :  { %2738 = vmatpush1.bf16.msra.mxu0 %v4757_v22  ;;  %v4786_v22 = vld [vmem:[%s7672_s1 + $0x218] ss:$20 sps:$4 sm:$0xff]  }
 0x148   :  { %2739 = vmatprep.subr.bf16.mxu0 %v4895_v1 }
 0x14a   :  { %3825 = vmatmul.mubr.msk.bf16.gmra.mrb[4].mxu0 %vm1226_vm0, %v4756_v25 }
 0x14b   :  { %2352 = vmatmul.mubr.bf16.gmra.mrb[160].mxu1 %v4747_v55  ;;  %1728 = vmatprep.mubr.bf16.mxu0 %v4895_v1  ;;  %v4774_v55 = vld [vmem:[%s7672_s1 + $0x150] ss:$20 sps:$4 sm:$0xff]  }
 0x14c   :  { %2361 = vmatprep.mubr.bf16.mxu1 %v4748_v58  ;;  %2740 = vmatpush1.bf16.msra.mxu0 %v4759_v28  ;;  %v4777_v58 = vld [vmem:[%s7672_s1 + $0x178] ss:$20 sps:$4 sm:$0xff]   ;;  %v4788_v28 = vld [vmem:[%s7672_s1 + $0x240] ss:$20 sps:$4 sm:$0xff]  }
 0x14d   :  { %2741 = vmatprep.subr.bf16.mxu0 %v4895_v1 }
 0x150   :  { %2742 = vmatpush1.bf16.msra.mxu0 %v4762_v31  ;;  %v4790_v31 = vld [vmem:[%s7672_s1 + $0x268] ss:$20 sps:$4 sm:$0xff]  }
 0x151   :  { %2743 = vmatprep.subr.bf16.mxu0 %v4895_v1 }
 0x152   :  { %3826 = vmatmul.mubr.msk.bf16.gmra.mrb[8].mxu0 %vm1226_vm0, %v4758_v34 }
 0x153   :  { %2362 = vmatmul.mubr.bf16.gmra.mrb[164].mxu1 %v4750_v61  ;;  %1738 = vmatprep.mubr.bf16.mxu0 %v4895_v1  ;;  %v4763_v61 = vld [vmem:[%s7673_s0 + $0x80] ss:$12 sps:$4 sm:$0xff]  }
 0x154   :  { %2371 = vmatprep.mubr.bf16.mxu1 %v4751_v10  ;;  %2744 = vmatpush1.bf16.msra.mxu0 %v4765_v37  ;;  %v4779_v10 = vld [vmem:[%s7672_s1 + $0x1a0] ss:$20 sps:$4 sm:$0xff]  }
 0x155   :  { %2745 = vmatprep.subr.bf16.mxu0 %v4895_v1  ;;  %v4771_v37 = vld [vmem:[%s7673_s0 + $0xe0] ss:$12 sps:$4 sm:$0xff]  }
 0x158   :  { %2746 = vmatpush1.bf16.msra.mxu0 %v4767_v40  ;;  %v4773_v40 = vld [vmem:[%s7673_s0 + $0xf8] ss:$12 sps:$4 sm:$0xff]  }
 0x159   :  { %2747 = vmatprep.subr.bf16.mxu0 %v4895_v1 }
 0x15a   :  { %3827 = vmatmul.mubr.msk.bf16.gmra.mrb[12].mxu0 %vm1226_vm0, %v4760_v43 }
 0x15b   :  { %2372 = vmatmul.mubr.bf16.gmra.mrb[168].mxu1 %v4753_v17  ;;  %1748 = vmatprep.mubr.bf16.mxu0 %v4895_v1  ;;  %v4792_v17 = vld [vmem:[%s7672_s1 + $0x2b8] ss:$20 sps:$4 sm:$0xff]  }
 0x15c   :  { %2414 = vmatprep.mubr.bf16.mxu1 %v4895_v1  ;;  %2748 = vmatpush1.bf16.msra.mxu0 %v4770_v46  ;;  %v4776_v46 = vld [vmem:[%s7673_s0 + $0x128] ss:$12 sps:$4 sm:$0xff]  }
 0x15d   :  { %2749 = vmatprep.subr.bf16.mxu0 %v4895_v1 }
 0x160   :  { %2750 = vmatpush1.bf16.msra.mxu0 %v4772_v49  ;;  %v4778_v49 = vld [vmem:[%s7673_s0 + $0x140] ss:$12 sps:$4 sm:$0xff]  }
 0x161   :  { %2751 = vmatprep.subr.bf16.mxu0 %v4895_v1 }
 0x162   :  { %3828 = vmatmul.mubr.msk.bf16.gmra.mrb[16].mxu0 %vm1226_vm0, %v4761_v52 }
 0x163   :  { %3856 = vmatmul.mubr.msk.bf16.vlgmr.msra.gmra.mrb[44].mxu1 %vm1226_vm0, %v4754_v19  ;;  %1758 = vmatprep.mubr.bf16.mxu0 %v4895_v1  ;;  %v4766_v19 = vld [vmem:[%s7673_s0 + $0x98] ss:$12 sps:$4 sm:$0xff]  }
 0x164   :  { %2424 = vmatprep.mubr.bf16.mxu1 %v4895_v1  ;;  %3955 = vmatpush3.bf16.msra.mxu1 %v5362_v15  ;;  %v4781_v15 = vld [vmem:[%s7672_s1 + $0x1c8] ss:$20 sps:$4 sm:$0xff]  }
 0x165   :  { %2752 = vmatpush1.bf16.msra.mxu0 %v4774_v55  ;;  %3956 = vmatprep.subr.bf16.mxu1 %v4792_v17  ;;  %v253_v55 = vlaneseq }
 0x166   :  { %2753 = vmatprep.subr.bf16.mxu0 %v4895_v1 }
 0x168   :  { %3957 = vmatpush3.bf16.msra.mxu1 %v4792_v17 }
 0x169   :  { %2754 = vmatpush1.bf16.msra.mxu0 %v4777_v58  ;;  %v5661_v58 = vshrl.u32 %v253_v55, 7 }
 0x16a   :  { %2755 = vmatprep.subr.bf16.mxu0 %v4895_v1  ;;  %3829 = vmatmul.mubr.msk.bf16.gmra.mrb[20].mxu0 %vm1226_vm0, %v4763_v61 }
 0x16b   :  { %3857 = vmatmul.mubr.msk.bf16.gmra.mrb[48].mxu1 %vm1226_vm0, %v4756_v25  ;;  %1768 = vmatprep.mubr.bf16.mxu0 %v4895_v1  ;;  %v4768_v25 = vld [vmem:[%s7673_s0 + $0xb0] ss:$12 sps:$4 sm:$0xff]   ;;  %v259_v17 = vsub.s32 1, %v5661_v58 }
 0x16c   :  { %2434 = vmatprep.mubr.bf16.mxu1 %v4895_v1 }
 0x16d   :  { %2756 = vmatpush1.bf16.msra.mxu0 %v4779_v10  ;;  %v255_v10 = vsub.s32 0, %v5661_v58 }
 0x16e   :  { %2757 = vmatprep.subr.bf16.mxu0 %v4895_v1 }
 0x171   :  { %2758 = vmatpush1.bf16.msra.mxu0 %v4781_v15  ;;  %v5674_v15 = vld [vmem:[%s7674_s2] sm:$0x1f] }
 0x172   :  { %2759 = vmatprep.subr.bf16.mxu0 %v4895_v1  ;;  %3830 = vmatmul.mubr.msk.bf16.gmra.mrb[24].mxu0 %vm1226_vm0, %v4766_v19 }
 0x173   :  { %3858 = vmatmul.mubr.msk.bf16.gmra.mrb[52].mxu1 %vm1226_vm0, %v4758_v34  ;;  %1778 = vmatprep.mubr.bf16.mxu0 %v4895_v1  ;;  %v4769_v34 = vld [vmem:[%s7673_s0 + $0xc8] ss:$12 sps:$4 sm:$0xff]  }
 0x174   :  { %2444 = vmatprep.mubr.bf16.mxu1 %v4895_v1 }
 0x175   :  { %2760 = vmatpush1.bf16.msra.mxu0 %v4783_v21  ;;  %v5684_v21 = vrot.slane %v5674_v15, %v259_v17 }
 0x176   :  { %2761 = vmatprep.subr.bf16.mxu0 %v4895_v1 }
 0x179   :  { %2762 = vmatpush1.bf16.msra.mxu0 %v4786_v22 }
 0x17a   :  { %2763 = vmatprep.subr.bf16.mxu0 %v4895_v1  ;;  %3831 = vmatmul.mubr.msk.bf16.gmra.mrb[28].mxu0 %vm1226_vm0, %v4768_v25 }
 0x17b   :  { %3859 = vmatmul.mubr.msk.bf16.gmra.mrb[56].mxu1 %vm1226_vm0, %v4760_v43  ;;  %1788 = vmatprep.mubr.bf16.mxu0 %v4895_v1  ;;  %v4775_v43 = vld [vmem:[%s7673_s0 + $0x110] ss:$12 sps:$4 sm:$0xff]  }
 0x17c   :  { %2454 = vmatprep.mubr.bf16.mxu1 %v4895_v1 }
 0x17d   :  { %2764 = vmatpush1.bf16.msra.mxu0 %v4788_v28 }
 0x17e   :  { %2765 = vmatprep.subr.bf16.mxu0 %v4895_v1 }
 0x181   :  { %2766 = vmatpush1.bf16.msra.mxu0 %v4790_v31  ;;  %v5692_v31 = vld [vmem:[%s7673_s0 + $0x188] ss:$12 sps:$4 sm:$0xff]  }
 0x182   :  { %3832 = vmatmul.mubr.msk.bf16.gmra.mrb[32].mxu0 %vm1226_vm0, %v4769_v34 }
 0x183   :  { %3860 = vmatmul.mubr.msk.bf16.gmra.mrb[60].mxu1 %vm1226_vm0, %v4761_v52  ;;  %1798 = vmatprep.mubr.bf16.mxu0 %v4895_v1  ;;  %v5656_v52 = vld [vmem:[%s7673_s0 + $0x158] ss:$12 sps:$4 sm:$0xff]  }
 0x184   :  { %2464 = vmatprep.mubr.bf16.mxu1 %v4895_v1 }
 0x18a   :  { %3833 = vmatmul.mubr.msk.bf16.gmra.mrb[36].mxu0 %vm1226_vm0, %v4771_v37 }
 0x18b   :  { %3861 = vmatmul.mubr.msk.bf16.gmra.mrb[64].mxu1 %vm1226_vm0, %v4763_v61  ;;  %1808 = vmatprep.mubr.bf16.mxu0 %v4895_v1  ;;  %v5668_v61 = vld [vmem:[%s7673_s0 + $0x170] ss:$12 sps:$4 sm:$0xff]  }
 0x18c   :  { %2474 = vmatprep.mubr.bf16.mxu1 %v4895_v1 }
 0x192   :  { %3834 = vmatmul.mubr.msk.bf16.gmra.mrb[40].mxu0 %vm1226_vm0, %v4773_v40 }
 0x193   :  { %3862 = vmatmul.mubr.msk.bf16.gmra.mrb[68].mxu1 %vm1226_vm0, %v4766_v19  ;;  %1818 = vmatprep.mubr.bf16.mxu0 %v4895_v1  ;;  %v5681_v19 = vrot.slane %v5674_v15, %v255_v10 }
 0x194   :  { %2484 = vmatprep.mubr.bf16.mxu1 %v4895_v1 }
 0x19a   :  { %3835 = vmatmul.mubr.msk.bf16.gmra.mrb[44].mxu0 %vm1226_vm0, %v4775_v43 }
 0x19b   :  { %3863 = vmatmul.mubr.msk.bf16.gmra.mrb[72].mxu1 %vm1226_vm0, %v4768_v25  ;;  %1828 = vmatprep.mubr.bf16.mxu0 %v4895_v1 }
 0x19c   :  { %2494 = vmatprep.mubr.bf16.mxu1 %v4895_v1 }
 0x1a2   :  { %3836 = vmatmul.mubr.msk.bf16.gmra.mrb[48].mxu0 %vm1226_vm0, %v4776_v46 }
 0x1a3   :  { %3864 = vmatmul.mubr.msk.bf16.gmra.mrb[76].mxu1 %vm1226_vm0, %v4769_v34  ;;  %1838 = vmatprep.mubr.bf16.mxu0 %v4895_v1 }
 0x1a4   :  { %2504 = vmatprep.mubr.bf16.mxu1 %v4895_v1 }
 0x1aa   :  { %3837 = vmatmul.mubr.msk.bf16.gmra.mrb[52].mxu0 %vm1226_vm0, %v4778_v49 }
 0x1ab   :  { %3865 = vmatmul.mubr.msk.bf16.gmra.mrb[80].mxu1 %vm1226_vm0, %v4771_v37  ;;  %1848 = vmatprep.mubr.bf16.mxu0 %v4895_v1 }
 0x1ac   :  { %2514 = vmatprep.mubr.bf16.mxu1 %v4895_v1 }
 0x1b2   :  { %3838 = vmatmul.mubr.msk.bf16.gmra.mrb[56].mxu0 %vm1226_vm0, %v5656_v52 }
 0x1b3   :  { %3866 = vmatmul.mubr.msk.bf16.gmra.mrb[84].mxu1 %vm1226_vm0, %v4773_v40  ;;  %1858 = vmatprep.mubr.bf16.mxu0 %v4895_v1 }
 0x1b4   :  { %2524 = vmatprep.mubr.bf16.mxu1 %v4895_v1 }
 0x1ba   :  { %3839 = vmatmul.mubr.msk.bf16.gmra.mrb[60].mxu0 %vm1226_vm0, %v5668_v61 }
 0x1bb   :  { %3867 = vmatmul.mubr.msk.bf16.gmra.mrb[88].mxu1 %vm1226_vm0, %v4775_v43  ;;  %1868 = vmatprep.mubr.bf16.mxu0 %v4895_v1 }
 0x1bc   :  { %2534 = vmatprep.mubr.bf16.mxu1 %v4895_v1 }
 0x1bd   :  { %v1567_v22 = vpop.f32.mrb[84].mxu0 }
 0x1be   :  { %v1568_v25 = vadd.f32 %v1567_v22, %v5681_v19  ;;  %v1569_v28 = vpop.f32.mrb[85].mxu0 }
 0x1bf   :  { %v1570_v34 = vadd.f32 %v1569_v28, %v5684_v21  ;;  %v1571_v37 = vpop.f32.mrb[86].mxu0 }
 0x1c0   :  { %v1921_v40 = vadd.f32 %v5331_v62, %v1568_v25  ;;  %v1572_v43 = vadd.f32 %v1571_v37, %v5681_v19  ;;  %v1573_v55 = vpop.f32.mrb[87].mxu0 }
 0x1c1   :  { %v1923_v10 = vadd.f32 %v5336_v0, %v1570_v34  ;;  %v1574_v17 = vadd.f32 %v1573_v55, %v5684_v21 }
 0x1c2   :  { %3524 = vst [vmem:[%s7675_s3 + $0x690] sm:$0xff] %v1921_v40  ;;  %v1925_v22 = vadd.f32 %v5338_v3, %v1572_v43  ;;  %3840 = vmatmul.mubr.msk.bf16.gmra.mrb[64].mxu0 %vm1226_vm0, %v5692_v31 }
 0x1c3   :  { %3868 = vmatmul.mubr.msk.bf16.gmra.mrb[92].mxu1 %vm1226_vm0, %v4776_v46  ;;  %3525 = vst [vmem:[%s7675_s3 + $0x698] sm:$0xff] %v1923_v10  ;;  %v1927_v62 = vadd.f32 %v5343_v7, %v1574_v17  ;;  %1878 = vmatprep.mubr.bf16.mxu0 %v4895_v1  ;;  %v5722_v7 = vld [vmem:[%s7673_s0 + $0x1a0] ss:$12 sps:$4 sm:$0xff]  }
 0x1c4   :  { %2544 = vmatprep.mubr.bf16.mxu1 %v4895_v1  ;;  %3529 = vst [vmem:[%s7675_s3 + $0x6b8] sm:$0xff] %v1925_v22 }
 0x1c5   :  { %3530 = vst [vmem:[%s7675_s3 + $0x6c0] sm:$0xff] %v1927_v62  ;;  %v1577_v0 = vpop.f32.mrb[88].mxu0 }
 0x1c6   :  { %v1578_v3 = vadd.f32 %v1577_v0, %v5681_v19  ;;  %v1579_v46 = vpop.f32.mrb[89].mxu0 }
 0x1c7   :  { %v1580_v25 = vadd.f32 %v1579_v46, %v5684_v21  ;;  %v1581_v28 = vpop.f32.mrb[90].mxu0 }
 0x1c8   :  { %v1931_v34 = vadd.f32 %v5345_v9, %v1578_v3  ;;  %v1582_v37 = vadd.f32 %v1581_v28, %v5681_v19  ;;  %v1583_v40 = vpop.f32.mrb[91].mxu0 }
 0x1c9   :  { %v1933_v43 = vadd.f32 %v5350_v11, %v1580_v25  ;;  %v1584_v55 = vadd.f32 %v1583_v40, %v5684_v21 }
 0x1ca   :  { %3534 = vst [vmem:[%s7675_s3 + $0x6e0] sm:$0xff] %v1931_v34  ;;  %v1935_v10 = vadd.f32 %v5352_v12, %v1582_v37  ;;  %3841 = vmatmul.mubr.msk.bf16.gmra.mrb[68].mxu0 %vm1226_vm0, %v5722_v7 }
 0x1cb   :  { %3869 = vmatmul.mubr.msk.bf16.gmra.mrb[96].mxu1 %vm1226_vm0, %v4778_v49  ;;  %3535 = vst [vmem:[%s7675_s3 + $0x6e8] sm:$0xff] %v1933_v43  ;;  %v1937_v9 = vadd.f32 %v5357_v14, %v1584_v55  ;;  %1888 = vmatprep.mubr.bf16.mxu0 %v4895_v1  ;;  %v5752_v14 = vld [vmem:[%s7673_s0 + $0x1b8] ss:$12 sps:$4 sm:$0xff]  }
 0x1cc   :  { %2554 = vmatprep.mubr.bf16.mxu1 %v4895_v1  ;;  %3539 = vst [vmem:[%s7675_s3 + $0x708] sm:$0xff] %v1935_v10 }
 0x1cd   :  { %3540 = vst [vmem:[%s7675_s3 + $0x710] sm:$0xff] %v1937_v9  ;;  %v1587_v11 = vpop.f32.mrb[92].mxu0 }
 0x1ce   :  { %v1588_v12 = vadd.f32 %v1587_v11, %v5681_v19  ;;  %v1589_v49 = vpop.f32.mrb[93].mxu0 }
 0x1cf   :  { %v1590_v17 = vadd.f32 %v1589_v49, %v5684_v21  ;;  %v1591_v22 = vpop.f32.mrb[94].mxu0 }
 0x1d0   :  { %v1941_v62 = vadd.f32 %v5365_v16, %v1588_v12  ;;  %v1592_v0 = vadd.f32 %v1591_v22, %v5681_v19  ;;  %v1593_v3 = vpop.f32.mrb[95].mxu0 }
 0x1d1   :  { %v1943_v46 = vadd.f32 %v5370_v2, %v1590_v17  ;;  %v1594_v25 = vadd.f32 %v1593_v3, %v5684_v21 }
 0x1d2   :  { %3544 = vst [vmem:[%s7675_s3 + $0x730] sm:$0xff] %v1941_v62  ;;  %v1945_v28 = vadd.f32 %v5372_v18, %v1592_v0  ;;  %3842 = vmatmul.mubr.msk.bf16.gmra.mrb[72].mxu0 %vm1226_vm0, %v5752_v14 }
 0x1d3   :  { %3870 = vmatmul.mubr.msk.bf16.gmra.mrb[100].mxu1 %vm1226_vm0, %v5656_v52  ;;  %3545 = vst [vmem:[%s7675_s3 + $0x738] sm:$0xff] %v1943_v46  ;;  %v1947_v16 = vadd.f32 %v5377_v4, %v1594_v25  ;;  %1898 = vmatprep.mubr.bf16.mxu0 %v4895_v1  ;;  %v5783_v4 = vld [vmem:[%s7673_s0 + $0x1d0] ss:$12 sps:$4 sm:$0xff]  }
 0x1d4   :  { %2564 = vmatprep.mubr.bf16.mxu1 %v4895_v1  ;;  %3549 = vst [vmem:[%s7675_s3 + $0x758] sm:$0xff] %v1945_v28 }
 0x1d5   :  { %3550 = vst [vmem:[%s7675_s3 + $0x760] sm:$0xff] %v1947_v16  ;;  %v1597_v2 = vpop.f32.mrb[96].mxu0 }
 0x1d6   :  { %v1598_v18 = vadd.f32 %v1597_v2, %v5681_v19  ;;  %v1599_v52 = vpop.f32.mrb[97].mxu0 }
 0x1d7   :  { %v1600_v34 = vadd.f32 %v1599_v52, %v5684_v21  ;;  %v1601_v37 = vpop.f32.mrb[98].mxu0 }
 0x1d8   :  { %v1951_v40 = vadd.f32 %v5379_v20, %v1598_v18  ;;  %v1602_v43 = vadd.f32 %v1601_v37, %v5681_v19  ;;  %v1603_v55 = vpop.f32.mrb[99].mxu0 }
 0x1d9   :  { %v1953_v10 = vadd.f32 %v5384_v6, %v1600_v34  ;;  %v1604_v9 = vadd.f32 %v1603_v55, %v5684_v21 }
 0x1da   :  { %3554 = vst [vmem:[%s7675_s3 + $0x780] sm:$0xff] %v1951_v40  ;;  %v1955_v11 = vadd.f32 %v5386_v8, %v1602_v43  ;;  %3843 = vmatmul.mubr.msk.bf16.gmra.mrb[76].mxu0 %vm1226_vm0, %v5783_v4 }
 0x1db   :  { %3871 = vmatmul.mubr.msk.bf16.gmra.mrb[104].mxu1 %vm1226_vm0, %v5668_v61  ;;  %3555 = vst [vmem:[%s7675_s3 + $0x788] sm:$0xff] %v1953_v10  ;;  %v1957_v20 = vadd.f32 %v5391_v23, %v1604_v9  ;;  %1908 = vmatprep.mubr.bf16.mxu0 %v4895_v1  ;;  %v5814_v23 = vld [vmem:[%s7673_s0 + $0x1e8] ss:$12 sps:$4 sm:$0xff]  }
 0x1dc   :  { %2574 = vmatprep.mubr.bf16.mxu1 %v4895_v1  ;;  %3559 = vst [vmem:[%s7675_s3 + $0x7a8] sm:$0xff] %v1955_v11 }
 0x1dd   :  { %3560 = vst [vmem:[%s7675_s3 + $0x7b0] sm:$0xff] %v1957_v20  ;;  %v1607_v6 = vpop.f32.mrb[100].mxu0 }
 0x1de   :  { %v1608_v8 = vadd.f32 %v1607_v6, %v5681_v19  ;;  %v1609_v61 = vpop.f32.mrb[101].mxu0 }
 0x1df   :  { %v1610_v12 = vadd.f32 %v1609_v61, %v5684_v21  ;;  %v1611_v49 = vpop.f32.mrb[102].mxu0 }
 0x1e0   :  { %v1961_v17 = vadd.f32 %v5393_v24, %v1608_v8  ;;  %v1612_v22 = vadd.f32 %v1611_v49, %v5681_v19  ;;  %v1613_v62 = vpop.f32.mrb[103].mxu0 }
 0x1e1   :  { %v1963_v0 = vadd.f32 %v5398_v26, %v1610_v12  ;;  %v1614_v3 = vadd.f32 %v1613_v62, %v5684_v21  ;;  %v4793_v26 = vld [vmem:[%s7673_s0 + $0x4] ss:$12 sps:$4 sm:$0xff]  }
 0x1e2   :  { %3564 = vst [vmem:[%s7675_s3 + $0x7d0] sm:$0xff] %v1961_v17  ;;  %v1965_v46 = vadd.f32 %v5400_v27, %v1612_v22  ;;  %3844 = vmatmul.mubr.msk.bf16.gmra.mrb[80].mxu0 %vm1226_vm0, %v5814_v23 }
 0x1e3   :  { %3872 = vmatmul.mubr.msk.bf16.gmra.mrb[108].mxu1 %vm1226_vm0, %v5692_v31  ;;  %3565 = vst [vmem:[%s7675_s3 + $0x7d8] sm:$0xff] %v1963_v0  ;;  %v1967_v24 = vadd.f32 %v5405_v29, %v1614_v3  ;;  %2767 = vmatprep.mubr.bf16.mxu0 %v4793_v26 }
 0x1e4   :  { %2584 = vmatprep.mubr.bf16.mxu1 %v4895_v1  ;;  %3569 = vst [vmem:[%s7675_s3 + $0x7f8] sm:$0xff] %v1965_v46 }
 0x1e5   :  { %3570 = vst [vmem:[%s7675_s3 + $0x800] sm:$0xff] %v1967_v24  ;;  %v1617_v27 = vpop.f32.mrb[104].mxu0 }
 0x1e6   :  { %v1618_v31 = vadd.f32 %v1617_v27, %v5681_v19  ;;  %v1619_v25 = vpop.f32.mrb[105].mxu0 }
 0x1e7   :  { %v1620_v29 = vadd.f32 %v1619_v25, %v5684_v21  ;;  %v1621_v28 = vpop.f32.mrb[106].mxu0 }
 0x1e8   :  { %v1971_v16 = vadd.f32 %v5407_v30, %v1618_v31  ;;  %v1622_v2 = vadd.f32 %v1621_v28, %v5681_v19  ;;  %v1623_v18 = vpop.f32.mrb[107].mxu0  ;;  %v4794_v30 = vld [vmem:[%s7673_s0] ss:$12 sps:$4 sm:$0xff]  }
 0x1e9   :  { %v1973_v52 = vadd.f32 %v5412_v32, %v1620_v29  ;;  %v1624_v34 = vadd.f32 %v1623_v18, %v5684_v21 }
 0x1ea   :  { %3574 = vst [vmem:[%s7675_s3 + $0x820] sm:$0xff] %v1971_v16  ;;  %v1975_v37 = vadd.f32 %v5414_v33, %v1622_v2  ;;  %2768 = vmatmul.mubr.bf16.vlgmr.msra.gmra.mrb[128].mxu0 %v4794_v30  ;;  %v4795_v33 = vld [vmem:[%s7673_s0 + $0x1c] ss:$12 sps:$4 sm:$0xff]  }
 0x1eb   :  { %3873 = vmatmul.mubr.msk.bf16.gmra.mrb[112].mxu1 %vm1226_vm0, %v5722_v7  ;;  %3575 = vst [vmem:[%s7675_s3 + $0x828] sm:$0xff] %v1973_v52  ;;  %v1977_v32 = vadd.f32 %v5419_v35, %v1624_v34  ;;  %2775 = vmatprep.mubr.bf16.mxu0 %v4795_v33 }
 0x1ec   :  { %2594 = vmatprep.mubr.bf16.mxu1 %v4895_v1  ;;  %3579 = vst [vmem:[%s7675_s3 + $0x848] sm:$0xff] %v1975_v37 }
 0x1ed   :  { %3580 = vst [vmem:[%s7675_s3 + $0x850] sm:$0xff] %v1977_v32  ;;  %v1627_v7 = vpop.f32.mrb[108].mxu0 }
 0x1ee   :  { %v1628_v40 = vadd.f32 %v1627_v7, %v5681_v19  ;;  %v1629_v43 = vpop.f32.mrb[109].mxu0 }
 0x1ef   :  { %v1630_v35 = vadd.f32 %v1629_v43, %v5684_v21  ;;  %v1631_v55 = vpop.f32.mrb[110].mxu0  ;;  %v4802_v43 = vld [vmem:[%s7673_s0 + $0x200] ss:$12 sps:$4 sm:$0xff]  }
 0x1f0   :  { %v1981_v10 = vadd.f32 %v5421_v36, %v1628_v40  ;;  %v1632_v9 = vadd.f32 %v1631_v55, %v5681_v19  ;;  %v1633_v11 = vpop.f32.mrb[111].mxu0  ;;  %v4796_v36 = vld [vmem:[%s7673_s0 + $0x18] ss:$12 sps:$4 sm:$0xff]  }
 0x1f1   :  { %v1983_v20 = vadd.f32 %v5426_v38, %v1630_v35  ;;  %v1634_v6 = vadd.f32 %v1633_v11, %v5684_v21 }
 0x1f2   :  { %3584 = vst [vmem:[%s7675_s3 + $0x870] sm:$0xff] %v1981_v10  ;;  %v1985_v8 = vadd.f32 %v5428_v39, %v1632_v9  ;;  %2776 = vmatmul.mubr.bf16.gmra.mrb[132].mxu0 %v4796_v36  ;;  %v4797_v39 = vld [vmem:[%s7673_s0 + $0x34] ss:$12 sps:$4 sm:$0xff]  }
 0x1f3   :  { %3874 = vmatmul.mubr.msk.bf16.gmra.mrb[116].mxu1 %vm1226_vm0, %v5752_v14  ;;  %3585 = vst [vmem:[%s7675_s3 + $0x878] sm:$0xff] %v1983_v20  ;;  %v1987_v38 = vadd.f32 %v5433_v41, %v1634_v6  ;;  %2783 = vmatprep.mubr.bf16.mxu0 %v4797_v39  ;;  %v4805_v39 = vld [vmem:[%s7673_s0 + $0x218] ss:$12 sps:$4 sm:$0xff]  }
 0x1f4   :  { %2604 = vmatprep.mubr.bf16.mxu1 %v4895_v1  ;;  %3589 = vst [vmem:[%s7675_s3 + $0x898] sm:$0xff] %v1985_v8 }
 0x1f5   :  { %3590 = vst [vmem:[%s7675_s3 + $0x8a0] sm:$0xff] %v1987_v38  ;;  %v1637_v14 = vpop.f32.mrb[112].mxu0 }
 0x1f6   :  { %v1638_v61 = vadd.f32 %v1637_v14, %v5681_v19  ;;  %v1639_v12 = vpop.f32.mrb[113].mxu0 }
 0x1f7   :  { %v1640_v41 = vadd.f32 %v1639_v12, %v5684_v21  ;;  %v1641_v49 = vpop.f32.mrb[114].mxu0 }
 0x1f8   :  { %v1991_v17 = vadd.f32 %v5435_v42, %v1638_v61  ;;  %v1642_v22 = vadd.f32 %v1641_v49, %v5681_v19  ;;  %v1643_v62 = vpop.f32.mrb[115].mxu0  ;;  %v4798_v42 = vld [vmem:[%s7673_s0 + $0x30] ss:$12 sps:$4 sm:$0xff]  }
 0x1f9   :  { %v1993_v0 = vadd.f32 %v5440_v44, %v1640_v41  ;;  %v1644_v3 = vadd.f32 %v1643_v62, %v5684_v21  ;;  %v4808_v62 = vld [vmem:[%s7673_s0 + $0x230] ss:$12 sps:$4 sm:$0xff]  }
 0x1fa   :  { %3594 = vst [vmem:[%s7675_s3 + $0x8c0] sm:$0xff] %v1991_v17  ;;  %v1995_v46 = vadd.f32 %v5442_v45, %v1642_v22  ;;  %2784 = vmatmul.mubr.bf16.gmra.mrb[136].mxu0 %v4798_v42  ;;  %v4799_v45 = vld [vmem:[%s7673_s0 + $0x4c] ss:$12 sps:$4 sm:$0xff]  }
 0x1fb   :  { %3875 = vmatmul.mubr.msk.bf16.gmra.mrb[120].mxu1 %vm1226_vm0, %v5783_v4  ;;  %3595 = vst [vmem:[%s7675_s3 + $0x8c8] sm:$0xff] %v1993_v0  ;;  %v1997_v44 = vadd.f32 %v5447_v47, %v1644_v3  ;;  %2791 = vmatprep.mubr.bf16.mxu0 %v4799_v45  ;;  %v4809_v0 = vld [vmem:[%s7673_s0 + $0x90] ss:$12 sps:$4 sm:$0xff]   ;;  %v4810_v3 = vld [vmem:[%s7673_s0 + $0xac] ss:$12 sps:$4 sm:$0xff]  }
 0x1fc   :  { %2614 = vmatprep.mubr.bf16.mxu1 %v4895_v1  ;;  %3599 = vst [vmem:[%s7675_s3 + $0x8e8] sm:$0xff] %v1995_v46 }
 0x1fd   :  { %3600 = vst [vmem:[%s7675_s3 + $0x8f0] sm:$0xff] %v1997_v44  ;;  %v1647_v4 = vpop.f32.mrb[116].mxu0 }
 0x1fe   :  { %v1648_v24 = vadd.f32 %v1647_v4, %v5681_v19  ;;  %v1649_v26 = vpop.f32.mrb[117].mxu0 }
 0x1ff   :  { %v1650_v47 = vadd.f32 %v1649_v26, %v5684_v21  ;;  %v1651_v27 = vpop.f32.mrb[118].mxu0 }
 0x200   :  { %v2001_v31 = vadd.f32 %v5449_v48, %v1648_v24  ;;  %v1652_v25 = vadd.f32 %v1651_v27, %v5681_v19  ;;  %v1653_v29 = vpop.f32.mrb[119].mxu0  ;;  %v4800_v48 = vld [vmem:[%s7673_s0 + $0x48] ss:$12 sps:$4 sm:$0xff]  }
 0x201   :  { %v2003_v28 = vadd.f32 %v5454_v50, %v1650_v47  ;;  %v1654_v16 = vadd.f32 %v1653_v29, %v5684_v21  ;;  %v4811_v27 = vld [vmem:[%s7673_s0 + $0x248] ss:$12 sps:$4 sm:$0xff]  }
 0x202   :  { %3604 = vst [vmem:[%s7675_s3 + $0x910] sm:$0xff] %v2001_v31  ;;  %v2005_v2 = vadd.f32 %v5456_v51, %v1652_v25  ;;  %2792 = vmatmul.mubr.bf16.gmra.mrb[140].mxu0 %v4800_v48  ;;  %v4801_v51 = vld [vmem:[%s7673_s0 + $0x64] ss:$12 sps:$4 sm:$0xff]   ;;  %v4812_v31 = vld [vmem:[%s7673_s0 + $0xa8] ss:$12 sps:$4 sm:$0xff]  }
 0x203   :  { %3876 = vmatmul.mubr.msk.bf16.gmra.mrb[124].mxu1 %vm1226_vm0, %v5814_v23  ;;  %3605 = vst [vmem:[%s7675_s3 + $0x918] sm:$0xff] %v2003_v28  ;;  %v2007_v50 = vadd.f32 %v5461_v53, %v1654_v16  ;;  %2799 = vmatprep.mubr.bf16.mxu0 %v4801_v51  ;;  %v4813_v25 = vld [vmem:[%s7673_s0 + $0xc4] ss:$12 sps:$4 sm:$0xff]  }
 0x204   :  { %2624 = vmatprep.mubr.bf16.mxu1 %v4895_v1  ;;  %3609 = vst [vmem:[%s7675_s3 + $0x938] sm:$0xff] %v2005_v2 }
 0x205   :  { %3610 = vst [vmem:[%s7675_s3 + $0x940] sm:$0xff] %v2007_v50  ;;  %v1657_v23 = vpop.f32.mrb[120].mxu0 }
 0x206   :  { %v1658_v18 = vadd.f32 %v1657_v23, %v5681_v19  ;;  %v1659_v52 = vpop.f32.mrb[121].mxu0 }
 0x207   :  { %v1660_v53 = vadd.f32 %v1659_v52, %v5684_v21  ;;  %v1661_v34 = vpop.f32.mrb[122].mxu0  ;;  %v4815_v52 = vld [vmem:[%s7673_s0 + $0xc0] ss:$12 sps:$4 sm:$0xff]  }
 0x208   :  { %v2011_v37 = vadd.f32 %v5463_v54, %v1658_v18  ;;  %v1662_v30 = vadd.f32 %v1661_v34, %v5681_v19  ;;  %v1663_v32 = vpop.f32.mrb[123].mxu0  ;;  %v4803_v54 = vld [vmem:[%s7673_s0 + $0x60] ss:$12 sps:$4 sm:$0xff]  }
 0x209   :  { %v2013_v33 = vadd.f32 %v5468_v56, %v1660_v53  ;;  %v1664_v7 = vadd.f32 %v1663_v32, %v5684_v21  ;;  %v4814_v18 = vld [vmem:[%s7673_s0 + $0x260] ss:$12 sps:$4 sm:$0xff]   ;;  %v4816_v53 = vld [vmem:[%s7673_s0 + $0xdc] ss:$12 sps:$4 sm:$0xff]   ;;  %v263_v32 = vsub.s32 2, %v5661_v58 }
 0x20a   :  { %3614 = vst [vmem:[%s7675_s3 + $0x960] sm:$0xff] %v2011_v37  ;;  %v2015_v40 = vadd.f32 %v5470_v57, %v1662_v30  ;;  %2800 = vmatmul.mubr.bf16.gmra.mrb[144].mxu0 %v4803_v54  ;;  %v4804_v57 = vld [vmem:[%s7673_s0 + $0x7c] ss:$12 sps:$4 sm:$0xff]  }
 0x20b   :  { %3877 = vmatmul.mubr.msk.bf16.gmra.mrb[128].mxu1 %vm1226_vm0, %v4802_v43  ;;  %3615 = vst [vmem:[%s7675_s3 + $0x968] sm:$0xff] %v2013_v33  ;;  %v2017_v56 = vadd.f32 %v5475_v59, %v1664_v7  ;;  %2807 = vmatprep.mubr.bf16.mxu0 %v4804_v57  ;;  %v6120_v57 = vld [vmem:[%s7673_s0 + $0x278] ss:$12 sps:$4 sm:$0xff]  }
 0x20c   :  { %2634 = vmatprep.mubr.bf16.mxu1 %v4895_v1  ;;  %3619 = vst [vmem:[%s7675_s3 + $0x988] sm:$0xff] %v2015_v40  ;;  %v267_v40 = vsub.s32 3, %v5661_v58 }
 0x20d   :  { %3620 = vst [vmem:[%s7675_s3 + $0x990] sm:$0xff] %v2017_v56  ;;  %v1667_v35 = vpop.f32.mrb[124].mxu0 }
 0x20e   :  { %v1668_v55 = vadd.f32 %v1667_v35, %v5681_v19  ;;  %v1669_v10 = vpop.f32.mrb[125].mxu0  ;;  %v4818_v35 = vld [vmem:[%s7673_s0 + $0xd8] ss:$12 sps:$4 sm:$0xff]  }
 0x20f   :  { %v1670_v59 = vadd.f32 %v1669_v10, %v5684_v21  ;;  %v1671_v9 = vpop.f32.mrb[126].mxu0  ;;  %v6134_v10 = vrot.slane %v5674_v15, %v267_v40 }
 0x210   :  { %v2021_v11 = vadd.f32 %v5477_v60, %v1668_v55  ;;  %v1672_v20 = vadd.f32 %v1671_v9, %v5681_v19  ;;  %v1673_v6 = vpop.f32.mrb[127].mxu0  ;;  %v4806_v60 = vld [vmem:[%s7673_s0 + $0x78] ss:$12 sps:$4 sm:$0xff]   ;;  %v6128_v55 = vrot.slane %v5674_v15, %v263_v32 }
 0x211   :  { %v2023_v8 = vadd.f32 %v5482_v63, %v1670_v59  ;;  %v1674_v36 = vadd.f32 %v1673_v6, %v5684_v21  ;;  %v4819_v59 = vld [vmem:[%s7673_s0 + $0xf4] ss:$12 sps:$4 sm:$0xff]  }
 0x212   :  { %3624 = vst [vmem:[%s7675_s3 + $0x9b0] sm:$0xff] %v2021_v11  ;;  %v2025_v38 = vadd.f32 %v5484_v5, %v1672_v20  ;;  %2808 = vmatmul.mubr.bf16.gmra.mrb[148].mxu0 %v4806_v60  ;;  %v4807_v5 = vld [vmem:[%s7673_s0 + $0x94] ss:$12 sps:$4 sm:$0xff]  }
 0x213   :  { %3878 = vmatmul.mubr.msk.bf16.gmra.mrb[132].mxu1 %vm1226_vm0, %v4805_v39  ;;  %3625 = vst [vmem:[%s7675_s3 + $0x9b8] sm:$0xff] %v2023_v8  ;;  %v2027_v63 = vadd.f32 %v5489_v13, %v1674_v36  ;;  %2815 = vmatprep.mubr.bf16.mxu0 %v4807_v5 }
 0x214   :  { %2644 = vmatprep.mubr.bf16.mxu1 %v4895_v1  ;;  %3629 = vst [vmem:[%s7675_s3 + $0x9d8] sm:$0xff] %v2025_v38 }
 0x215   :  { %3630 = vst [vmem:[%s7675_s3 + $0x9e0] sm:$0xff] %v2027_v63  ;;  %v1710_v14 = vpop.f32.mrb[0].mxu0 }
 0x216   :  { %v4026_v61 = vadd.f32 %v1710_v14, %v5681_v19  ;;  %v1712_v12 = vpop.f32.mrb[1].mxu0 }
 0x217   :  { %v4027_v13 = vadd.f32 %v1712_v12, %v5684_v21  ;;  %v1714_v41 = vpop.f32.mrb[2].mxu0 }
 0x218   :  { %3313 = vst [vmem:[%s7675_s3] sm:$0xff] %v4026_v61  ;;  %v4028_v49 = vadd.f32 %v1714_v41, %v5681_v19  ;;  %v1716_v17 = vpop.f32.mrb[3].mxu0  ;;  %v6169_v41 = vld [vmem:[%s7673_s0 + $0x290] ss:$12 sps:$4 sm:$0xff]  }
 0x219   :  { %3314 = vst [vmem:[%s7675_s3 + $0x8] sm:$0xff] %v4027_v13  ;;  %v4029_v22 = vadd.f32 %v1716_v17, %v5684_v21  ;;  %v4822_v17 = vld [vmem:[%s7673_s0 + $0x10c] ss:$12 sps:$4 sm:$0xff]  }
 0x21a   :  { %3319 = vst [vmem:[%s7675_s3 + $0x28] sm:$0xff] %v4028_v49  ;;  %2816 = vmatmul.mubr.bf16.gmra.mrb[152].mxu0 %v4809_v0  ;;  %v4821_v49 = vld [vmem:[%s7673_s0 + $0xf0] ss:$12 sps:$4 sm:$0xff]  }
 0x21b   :  { %3879 = vmatmul.mubr.msk.bf16.gmra.mrb[136].mxu1 %vm1226_vm0, %v4808_v62  ;;  %3320 = vst [vmem:[%s7675_s3 + $0x30] sm:$0xff] %v4029_v22  ;;  %2823 = vmatprep.mubr.bf16.mxu0 %v4810_v3 }
 0x21c   :  { %2654 = vmatprep.mubr.bf16.mxu1 %v4895_v1 }
 0x21d   :  { %v1720_v46 = vpop.f32.mrb[4].mxu0 }
 0x21e   :  { %v4030_v42 = vadd.f32 %v1720_v46, %v5681_v19  ;;  %v1722_v44 = vpop.f32.mrb[5].mxu0 }
 0x21f   :  { %v4031_v45 = vadd.f32 %v1722_v44, %v5684_v21  ;;  %v1724_v4 = vpop.f32.mrb[6].mxu0 }
 0x220   :  { %3324 = vst [vmem:[%s7675_s3 + $0x50] sm:$0xff] %v4030_v42  ;;  %v4032_v24 = vadd.f32 %v1724_v4, %v5681_v19  ;;  %v1726_v26 = vpop.f32.mrb[7].mxu0 }
 0x221   :  { %3325 = vst [vmem:[%s7675_s3 + $0x58] sm:$0xff] %v4031_v45  ;;  %v4033_v47 = vadd.f32 %v1726_v26, %v5684_v21 }
 0x222   :  { %3329 = vst [vmem:[%s7675_s3 + $0x78] sm:$0xff] %v4032_v24  ;;  %2824 = vmatmul.mubr.bf16.gmra.mrb[156].mxu0 %v4812_v31 }
 0x223   :  { %3880 = vmatmul.mubr.msk.bf16.gmra.mrb[140].mxu1 %vm1226_vm0, %v4811_v27  ;;  %3330 = vst [vmem:[%s7675_s3 + $0x80] sm:$0xff] %v4033_v47  ;;  %2831 = vmatprep.mubr.bf16.mxu0 %v4813_v25 }
 0x224   :  { %2664 = vmatprep.mubr.bf16.mxu1 %v4895_v1 }
 0x225   :  { %v1730_v29 = vpop.f32.mrb[8].mxu0 }
 0x226   :  { %v4034_v28 = vadd.f32 %v1730_v29, %v5681_v19  ;;  %v1732_v16 = vpop.f32.mrb[9].mxu0 }
 0x227   :  { %v4035_v2 = vadd.f32 %v1732_v16, %v5684_v21  ;;  %v1734_v48 = vpop.f32.mrb[10].mxu0  ;;  %v4824_v16 = vld [vmem:[%s7673_s0 + $0x108] ss:$12 sps:$4 sm:$0xff]  }
 0x228   :  { %3334 = vst [vmem:[%s7675_s3 + $0xa0] sm:$0xff] %v4034_v28  ;;  %v4036_v50 = vadd.f32 %v1734_v48, %v5681_v19  ;;  %v1736_v51 = vpop.f32.mrb[11].mxu0  ;;  %v6215_v28 = vld [vmem:[%s7673_s0 + $0x2a8] ss:$12 sps:$4 sm:$0xff]  }
 0x229   :  { %3335 = vst [vmem:[%s7675_s3 + $0xa8] sm:$0xff] %v4035_v2  ;;  %v4037_v23 = vadd.f32 %v1736_v51, %v5684_v21  ;;  %v4825_v2 = vld [vmem:[%s7673_s0 + $0x124] ss:$12 sps:$4 sm:$0xff]  }
 0x22a   :  { %3339 = vst [vmem:[%s7675_s3 + $0xc8] sm:$0xff] %v4036_v50  ;;  %2832 = vmatmul.mubr.bf16.gmra.mrb[160].mxu0 %v4815_v52 }
 0x22b   :  { %3881 = vmatmul.mubr.msk.bf16.gmra.mrb[144].mxu1 %vm1226_vm0, %v4814_v18  ;;  %3340 = vst [vmem:[%s7675_s3 + $0xd0] sm:$0xff] %v4037_v23  ;;  %2839 = vmatprep.mubr.bf16.mxu0 %v4816_v53 }
 0x22c   :  { %2674 = vmatprep.mubr.bf16.mxu1 %v4895_v1 }
 0x22d   :  { %v1740_v34 = vpop.f32.mrb[12].mxu0 }
 0x22e   :  { %v4038_v37 = vadd.f32 %v1740_v34, %v5681_v19  ;;  %v1742_v30 = vpop.f32.mrb[13].mxu0 }
 0x22f   :  { %v4039_v33 = vadd.f32 %v1742_v30, %v5684_v21  ;;  %v1744_v7 = vpop.f32.mrb[14].mxu0 }
 0x230   :  { %3344 = vst [vmem:[%s7675_s3 + $0xf0] sm:$0xff] %v4038_v37  ;;  %v4040_v43 = vadd.f32 %v1744_v7, %v5681_v19  ;;  %v1746_v54 = vpop.f32.mrb[15].mxu0 }
 0x231   :  { %3345 = vst [vmem:[%s7675_s3 + $0xf8] sm:$0xff] %v4039_v33  ;;  %v4041_v56 = vadd.f32 %v1746_v54, %v5684_v21 }
 0x232   :  { %3349 = vst [vmem:[%s7675_s3 + $0x118] sm:$0xff] %v4040_v43  ;;  %2840 = vmatmul.mubr.bf16.gmra.mrb[164].mxu0 %v4818_v35  ;;  %v4827_v35 = vld [vmem:[%s7673_s0 + $0x120] ss:$12 sps:$4 sm:$0xff]  }
 0x233   :  { %3882 = vmatmul.mubr.msk.bf16.gmra.mrb[148].mxu1 %vm1226_vm0, %v6120_v57  ;;  %3350 = vst [vmem:[%s7675_s3 + $0x120] sm:$0xff] %v4041_v56  ;;  %2847 = vmatprep.mubr.bf16.mxu0 %v4819_v59  ;;  %v6261_v56 = vld [vmem:[%s7673_s0 + $0x2c0] ss:$12 sps:$4 sm:$0xff]   ;;  %v4828_v59 = vld [vmem:[%s7673_s0 + $0x13c] ss:$12 sps:$4 sm:$0xff]  }
 0x234   :  { %2684 = vmatprep.mubr.bf16.mxu1 %v4895_v1 }
 0x235   :  { %v1750_v9 = vpop.f32.mrb[16].mxu0 }
 0x236   :  { %v2416_v11 = vpop.f32.mrb[44].mxu1  ;;  %v4042_v20 = vadd.f32 %v1750_v9, %v5681_v19  ;;  %v1752_v8 = vpop.f32.mrb[17].mxu0 }
 0x237   :  { %v4198_v6 = vadd.f32 %v2416_v11, %v6128_v55  ;;  %v2418_v36 = vpop.f32.mrb[45].mxu1  ;;  %v4043_v38 = vadd.f32 %v1752_v8, %v5684_v21  ;;  %v1754_v39 = vpop.f32.mrb[18].mxu0 }
 0x238   :  { %v4199_v15 = vadd.f32 %v2418_v36, %v6134_v10  ;;  %v2420_v60 = vpop.f32.mrb[46].mxu1  ;;  %3354 = vst [vmem:[%s7675_s3 + $0x140] sm:$0xff] %v4042_v20  ;;  %v4044_v63 = vadd.f32 %v1754_v39, %v5681_v19  ;;  %v1756_v14 = vpop.f32.mrb[19].mxu0 }
 0x239   :  { %3315 = vst [vmem:[%s7675_s3 + $0x10] sm:$0xff] %v4198_v6  ;;  %v4200_v5 = vadd.f32 %v2420_v60, %v6128_v55  ;;  %v2422_v61 = vpop.f32.mrb[47].mxu1  ;;  %3355 = vst [vmem:[%s7675_s3 + $0x148] sm:$0xff] %v4043_v38  ;;  %v4045_v12 = vadd.f32 %v1756_v14, %v5684_v21 }
 0x23a   :  { %3316 = vst [vmem:[%s7675_s3 + $0x18] sm:$0xff] %v4199_v15  ;;  %v4201_v13 = vadd.f32 %v2422_v61, %v6134_v10  ;;  %3359 = vst [vmem:[%s7675_s3 + $0x168] sm:$0xff] %v4044_v63  ;;  %2848 = vmatmul.mubr.bf16.gmra.mrb[168].mxu0 %v4821_v49  ;;  %v6307_v49 = vld [vmem:[%s7673_s0 + $0x2d8] ss:$12 sps:$4 sm:$0xff]  }
 0x23b   :  { %3321 = vst [vmem:[%s7675_s3 + $0x38] sm:$0xff] %v4200_v5  ;;  %3883 = vmatmul.mubr.msk.bf16.gmra.mrb[152].mxu1 %vm1226_vm0, %v6169_v41  ;;  %3360 = vst [vmem:[%s7675_s3 + $0x170] sm:$0xff] %v4045_v12  ;;  %2855 = vmatprep.mubr.bf16.mxu0 %v4822_v17  ;;  %v4830_v17 = vld [vmem:[%s7673_s0 + $0x138] ss:$12 sps:$4 sm:$0xff]  }
 0x23c   :  { %3322 = vst [vmem:[%s7675_s3 + $0x40] sm:$0xff] %v4201_v13  ;;  %2694 = vmatprep.mubr.bf16.mxu1 %v4895_v1 }
 0x23d   :  { %v1760_v22 = vpop.f32.mrb[20].mxu0 }
 0x23e   :  { %v2426_v62 = vpop.f32.mrb[48].mxu1  ;;  %v4046_v0 = vadd.f32 %v1760_v22, %v5681_v19  ;;  %v1762_v46 = vpop.f32.mrb[21].mxu0  ;;  %v4831_v22 = vld [vmem:[%s7673_s0 + $0x154] ss:$12 sps:$4 sm:$0xff]  }
 0x23f   :  { %v4202_v3 = vadd.f32 %v2426_v62, %v6128_v55  ;;  %v2428_v42 = vpop.f32.mrb[49].mxu1  ;;  %v4047_v44 = vadd.f32 %v1762_v46, %v5684_v21  ;;  %v1764_v4 = vpop.f32.mrb[22].mxu0 }
 0x240   :  { %v4203_v45 = vadd.f32 %v2428_v42, %v6134_v10  ;;  %v2430_v24 = vpop.f32.mrb[50].mxu1  ;;  %3364 = vst [vmem:[%s7675_s3 + $0x190] sm:$0xff] %v4046_v0  ;;  %v4048_v26 = vadd.f32 %v1764_v4, %v5681_v19  ;;  %v1766_v27 = vpop.f32.mrb[23].mxu0 }
 0x241   :  { %3326 = vst [vmem:[%s7675_s3 + $0x60] sm:$0xff] %v4202_v3  ;;  %v4204_v47 = vadd.f32 %v2430_v24, %v6128_v55  ;;  %v2432_v31 = vpop.f32.mrb[51].mxu1  ;;  %3365 = vst [vmem:[%s7675_s3 + $0x198] sm:$0xff] %v4047_v44  ;;  %v4049_v25 = vadd.f32 %v1766_v27, %v5684_v21 }
 0x242   :  { %3327 = vst [vmem:[%s7675_s3 + $0x68] sm:$0xff] %v4203_v45  ;;  %v4205_v29 = vadd.f32 %v2432_v31, %v6134_v10  ;;  %3369 = vst [vmem:[%s7675_s3 + $0x1b8] sm:$0xff] %v4048_v26  ;;  %2856 = vmatmul.mubr.bf16.gmra.mrb[172].mxu0 %v4824_v16  ;;  %v6353_v16 = vld [vmem:[%s7673_s0 + $0x2f0] ss:$12 sps:$4 sm:$0xff]  }
 0x243   :  { %3331 = vst [vmem:[%s7675_s3 + $0x88] sm:$0xff] %v4204_v47  ;;  %3884 = vmatmul.mubr.msk.bf16.gmra.mrb[156].mxu1 %vm1226_vm0, %v6215_v28  ;;  %3370 = vst [vmem:[%s7675_s3 + $0x1c0] sm:$0xff] %v4049_v25  ;;  %2863 = vmatprep.mubr.bf16.mxu0 %v4825_v2  ;;  %v4833_v2 = vld [vmem:[%s7673_s0 + $0x150] ss:$12 sps:$4 sm:$0xff]  }
 0x244   :  { %3332 = vst [vmem:[%s7675_s3 + $0x90] sm:$0xff] %v4205_v29  ;;  %2704 = vmatprep.mubr.bf16.mxu1 %v4895_v1 }
 0x245   :  { %v1770_v48 = vpop.f32.mrb[24].mxu0 }
 0x246   :  { %v2436_v50 = vpop.f32.mrb[52].mxu1  ;;  %v4050_v51 = vadd.f32 %v1770_v48, %v5681_v19  ;;  %v1772_v18 = vpop.f32.mrb[25].mxu0  ;;  %v4834_v48 = vld [vmem:[%s7673_s0 + $0x16c] ss:$12 sps:$4 sm:$0xff]  }
 0x247   :  { %v4206_v23 = vadd.f32 %v2436_v50, %v6128_v55  ;;  %v2438_v52 = vpop.f32.mrb[53].mxu1  ;;  %v4051_v53 = vadd.f32 %v1772_v18, %v5684_v21  ;;  %v1774_v37 = vpop.f32.mrb[26].mxu0  ;;  %v4835_v50 = vld [vmem:[%s7673_s0 + $0x8] ss:$12 sps:$4 sm:$0xff]  }
 0x248   :  { %v4207_v34 = vadd.f32 %v2438_v52, %v6134_v10  ;;  %v2440_v30 = vpop.f32.mrb[54].mxu1  ;;  %3374 = vst [vmem:[%s7675_s3 + $0x1e0] sm:$0xff] %v4050_v51  ;;  %v4052_v32 = vadd.f32 %v1774_v37, %v5681_v19  ;;  %v1776_v7 = vpop.f32.mrb[27].mxu0 }
 0x249   :  { %3336 = vst [vmem:[%s7675_s3 + $0xb0] sm:$0xff] %v4206_v23  ;;  %v4208_v33 = vadd.f32 %v2440_v30, %v6128_v55  ;;  %v2442_v40 = vpop.f32.mrb[55].mxu1  ;;  %3375 = vst [vmem:[%s7675_s3 + $0x1e8] sm:$0xff] %v4051_v53  ;;  %v4053_v43 = vadd.f32 %v1776_v7, %v5684_v21 }
 0x24a   :  { %3337 = vst [vmem:[%s7675_s3 + $0xb8] sm:$0xff] %v4207_v34  ;;  %v4209_v54 = vadd.f32 %v2442_v40, %v6134_v10  ;;  %3379 = vst [vmem:[%s7675_s3 + $0x208] sm:$0xff] %v4052_v32  ;;  %2864 = vmatmul.mubr.bf16.gmra.mrb[176].mxu0 %v4827_v35 }
 0x24b   :  { %3341 = vst [vmem:[%s7675_s3 + $0xd8] sm:$0xff] %v4208_v33  ;;  %3885 = vmatmul.mubr.msk.bf16.gmra.mrb[160].mxu1 %vm1226_vm0, %v6261_v56  ;;  %3380 = vst [vmem:[%s7675_s3 + $0x210] sm:$0xff] %v4053_v43  ;;  %2871 = vmatprep.mubr.bf16.mxu0 %v4828_v59 }
 0x24c   :  { %3342 = vst [vmem:[%s7675_s3 + $0xe0] sm:$0xff] %v4209_v54  ;;  %2714 = vmatprep.mubr.bf16.mxu1 %v4895_v1 }
 0x24d   :  { %v1780_v9 = vpop.f32.mrb[28].mxu0 }
 0x24e   :  { %v2446_v11 = vpop.f32.mrb[56].mxu1  ;;  %v4054_v20 = vadd.f32 %v1780_v9, %v5681_v19  ;;  %v1782_v8 = vpop.f32.mrb[29].mxu0  ;;  %v4836_v9 = vld [vmem:[%s7673_s0 + $0x168] ss:$12 sps:$4 sm:$0xff]  }
 0x24f   :  { %v4210_v6 = vadd.f32 %v2446_v11, %v6128_v55  ;;  %v2448_v36 = vpop.f32.mrb[57].mxu1  ;;  %v4055_v38 = vadd.f32 %v1782_v8, %v5684_v21  ;;  %v1784_v39 = vpop.f32.mrb[30].mxu0  ;;  %v4837_v11 = vld [vmem:[%s7673_s0 + $0x20] ss:$12 sps:$4 sm:$0xff]  }
 0x250   :  { %v4211_v15 = vadd.f32 %v2448_v36, %v6134_v10  ;;  %v2450_v60 = vpop.f32.mrb[58].mxu1  ;;  %3384 = vst [vmem:[%s7675_s3 + $0x230] sm:$0xff] %v4054_v20  ;;  %v4056_v63 = vadd.f32 %v1784_v39, %v5681_v19  ;;  %v1786_v14 = vpop.f32.mrb[31].mxu0  ;;  %v4838_v20 = vld [vmem:[%s7673_s0 + $0x184] ss:$12 sps:$4 sm:$0xff]  }
 0x251   :  { %3346 = vst [vmem:[%s7675_s3 + $0x100] sm:$0xff] %v4210_v6  ;;  %v4212_v5 = vadd.f32 %v2450_v60, %v6128_v55  ;;  %v2452_v61 = vpop.f32.mrb[59].mxu1  ;;  %3385 = vst [vmem:[%s7675_s3 + $0x238] sm:$0xff] %v4055_v38  ;;  %v4057_v12 = vadd.f32 %v1786_v14, %v5684_v21  ;;  %v4839_v6 = vld [vmem:[%s7673_s0 + $0x38] ss:$12 sps:$4 sm:$0xff]  }
 0x252   :  { %3347 = vst [vmem:[%s7675_s3 + $0x108] sm:$0xff] %v4211_v15  ;;  %v4213_v13 = vadd.f32 %v2452_v61, %v6134_v10  ;;  %3389 = vst [vmem:[%s7675_s3 + $0x258] sm:$0xff] %v4056_v63  ;;  %2872 = vmatmul.mubr.bf16.gmra.mrb[180].mxu0 %v4830_v17 }
 0x253   :  { %3351 = vst [vmem:[%s7675_s3 + $0x128] sm:$0xff] %v4212_v5  ;;  %3886 = vmatmul.mubr.msk.bf16.gmra.mrb[164].mxu1 %vm1226_vm0, %v6307_v49  ;;  %3390 = vst [vmem:[%s7675_s3 + $0x260] sm:$0xff] %v4057_v12  ;;  %2879 = vmatprep.mubr.bf16.mxu0 %v4831_v22 }
 0x254   :  { %3352 = vst [vmem:[%s7675_s3 + $0x130] sm:$0xff] %v4213_v13  ;;  %2724 = vmatprep.mubr.bf16.mxu1 %v4895_v1 }
 0x255   :  { %v1790_v62 = vpop.f32.mrb[32].mxu0 }
 0x256   :  { %v2456_v0 = vpop.f32.mrb[60].mxu1  ;;  %v4058_v3 = vadd.f32 %v1790_v62, %v5681_v19  ;;  %v1792_v42 = vpop.f32.mrb[33].mxu0 }
 0x257   :  { %v4214_v46 = vadd.f32 %v2456_v0, %v6128_v55  ;;  %v2458_v44 = vpop.f32.mrb[61].mxu1  ;;  %v4059_v45 = vadd.f32 %v1792_v42, %v5684_v21  ;;  %v1794_v24 = vpop.f32.mrb[34].mxu0  ;;  %v4842_v42 = vld [vmem:[%s7673_s0 + $0x19c] ss:$12 sps:$4 sm:$0xff]  }
 0x258   :  { %v4215_v4 = vadd.f32 %v2458_v44, %v6134_v10  ;;  %v2460_v26 = vpop.f32.mrb[62].mxu1  ;;  %3394 = vst [vmem:[%s7675_s3 + $0x280] sm:$0xff] %v4058_v3  ;;  %v4060_v1 = vadd.f32 %v1794_v24, %v5681_v19  ;;  %v1796_v27 = vpop.f32.mrb[35].mxu0  ;;  %v4840_v3 = vld [vmem:[%s7673_s0 + $0x180] ss:$12 sps:$4 sm:$0xff]  }
 0x259   :  { %3356 = vst [vmem:[%s7675_s3 + $0x150] sm:$0xff] %v4214_v46  ;;  %v4216_v47 = vadd.f32 %v2460_v26, %v6128_v55  ;;  %v2462_v31 = vpop.f32.mrb[63].mxu1  ;;  %3395 = vst [vmem:[%s7675_s3 + $0x288] sm:$0xff] %v4059_v45  ;;  %v4061_v25 = vadd.f32 %v1796_v27, %v5684_v21  ;;  %v4841_v46 = vld [vmem:[%s7673_s0 + $0x50] ss:$12 sps:$4 sm:$0xff]  }
 0x25a   :  { %3357 = vst [vmem:[%s7675_s3 + $0x158] sm:$0xff] %v4215_v4  ;;  %v4217_v29 = vadd.f32 %v2462_v31, %v6134_v10  ;;  %3399 = vst [vmem:[%s7675_s3 + $0x2a8] sm:$0xff] %v4060_v1  ;;  %2880 = vmatmul.mubr.bf16.gmra.mrb[184].mxu0 %v4833_v2  ;;  %v4843_v44 = vld [vmem:[%s7673_s0 + $0x68] ss:$12 sps:$4 sm:$0xff]  }
 0x25b   :  { %3361 = vst [vmem:[%s7675_s3 + $0x178] sm:$0xff] %v4216_v47  ;;  %3887 = vmatmul.mubr.msk.bf16.gmra.mrb[168].mxu1 %vm1226_vm0, %v6353_v16  ;;  %3400 = vst [vmem:[%s7675_s3 + $0x2b0] sm:$0xff] %v4061_v25  ;;  %2887 = vmatprep.mubr.bf16.mxu0 %v4834_v48 }
 0x25c   :  { %3362 = vst [vmem:[%s7675_s3 + $0x180] sm:$0xff] %v4217_v29  ;;  %3958 = vmatprep.mubr.msk.bf16.mxu1 %vm1226_vm0, %v4835_v50 }
 0x25d   :  { %v1800_v51 = vpop.f32.mrb[36].mxu0 }
 0x25e   :  { %v2466_v23 = vpop.f32.mrb[64].mxu1  ;;  %v4062_v18 = vadd.f32 %v1800_v51, %v5681_v19  ;;  %v1802_v53 = vpop.f32.mrb[37].mxu0 }
 0x25f   :  { %v4218_v52 = vadd.f32 %v2466_v23, %v6128_v55  ;;  %v2468_v34 = vpop.f32.mrb[65].mxu1  ;;  %v4063_v37 = vadd.f32 %v1802_v53, %v5684_v21  ;;  %v1804_v32 = vpop.f32.mrb[38].mxu0  ;;  %v4845_v53 = vld [vmem:[%s7673_s0 + $0x80] ss:$12 sps:$4 sm:$0xff]  }
 0x260   :  { %v4219_v30 = vadd.f32 %v2468_v34, %v6134_v10  ;;  %v2470_v33 = vpop.f32.mrb[66].mxu1  ;;  %3404 = vst [vmem:[%s7675_s3 + $0x2d0] sm:$0xff] %v4062_v18  ;;  %v4064_v7 = vadd.f32 %v1804_v32, %v5681_v19  ;;  %v1806_v43 = vpop.f32.mrb[39].mxu0  ;;  %v4846_v34 = vld [vmem:[%s7673_s0 + $0x1b4] ss:$12 sps:$4 sm:$0xff]  }
 0x261   :  { %3366 = vst [vmem:[%s7675_s3 + $0x1a0] sm:$0xff] %v4218_v52  ;;  %v4220_v40 = vadd.f32 %v2470_v33, %v6128_v55  ;;  %v2472_v54 = vpop.f32.mrb[67].mxu1  ;;  %3405 = vst [vmem:[%s7675_s3 + $0x2d8] sm:$0xff] %v4063_v37  ;;  %v4065_v35 = vadd.f32 %v1806_v43, %v5684_v21  ;;  %v4844_v52 = vld [vmem:[%s7673_s0 + $0x198] ss:$12 sps:$4 sm:$0xff]  }
 0x262   :  { %3367 = vst [vmem:[%s7675_s3 + $0x1a8] sm:$0xff] %v4219_v30  ;;  %v4221_v59 = vadd.f32 %v2472_v54, %v6134_v10  ;;  %3409 = vst [vmem:[%s7675_s3 + $0x2f8] sm:$0xff] %v4064_v7  ;;  %2888 = vmatmul.mubr.bf16.gmra.mrb[188].mxu0 %v4836_v9  ;;  %v4847_v37 = vld [vmem:[%s7673_s0 + $0x98] ss:$12 sps:$4 sm:$0xff]  }
 0x263   :  { %3371 = vst [vmem:[%s7675_s3 + $0x1c8] sm:$0xff] %v4220_v40  ;;  %3959 = vmatmul.mubr.msk.bf16.vlgmr.msra.gmra.mrb[172].mxu1 %vm1226_vm0, %v4837_v11  ;;  %3410 = vst [vmem:[%s7675_s3 + $0x300] sm:$0xff] %v4065_v35  ;;  %2895 = vmatprep.mubr.bf16.mxu0 %v4838_v20 }
 0x264   :  { %3372 = vst [vmem:[%s7675_s3 + $0x1d0] sm:$0xff] %v4221_v59  ;;  %3962 = vmatprep.mubr.msk.bf16.mxu1 %vm1226_vm0, %v4839_v6 }
 0x265   :  { %v1810_v8 = vpop.f32.mrb[40].mxu0 }
 0x266   :  { %v2476_v36 = vpop.f32.mrb[68].mxu1  ;;  %v4066_v38 = vadd.f32 %v1810_v8, %v5681_v19  ;;  %v1812_v39 = vpop.f32.mrb[41].mxu0 }
 0x267   :  { %v4222_v15 = vadd.f32 %v2476_v36, %v6128_v55  ;;  %v2478_v60 = vpop.f32.mrb[69].mxu1  ;;  %v4067_v63 = vadd.f32 %v1812_v39, %v5684_v21  ;;  %v1814_v14 = vpop.f32.mrb[42].mxu0  ;;  %v4849_v39 = vld [vmem:[%s7673_s0 + $0xb0] ss:$12 sps:$4 sm:$0xff]  }
 0x268   :  { %v4223_v5 = vadd.f32 %v2478_v60, %v6134_v10  ;;  %v2480_v61 = vpop.f32.mrb[70].mxu1  ;;  %3414 = vst [vmem:[%s7675_s3 + $0x320] sm:$0xff] %v4066_v38  ;;  %v4068_v12 = vadd.f32 %v1814_v14, %v5681_v19  ;;  %v1816_v17 = vpop.f32.mrb[43].mxu0  ;;  %v4850_v60 = vld [vmem:[%s7673_s0 + $0x1cc] ss:$12 sps:$4 sm:$0xff]  }
 0x269   :  { %3376 = vst [vmem:[%s7675_s3 + $0x1f0] sm:$0xff] %v4222_v15  ;;  %v4224_v13 = vadd.f32 %v2480_v61, %v6128_v55  ;;  %v2482_v22 = vpop.f32.mrb[71].mxu1  ;;  %3415 = vst [vmem:[%s7675_s3 + $0x328] sm:$0xff] %v4067_v63  ;;  %v4069_v62 = vadd.f32 %v1816_v17, %v5684_v21  ;;  %v4848_v15 = vld [vmem:[%s7673_s0 + $0x1b0] ss:$12 sps:$4 sm:$0xff]  }
 0x26a   :  { %3377 = vst [vmem:[%s7675_s3 + $0x1f8] sm:$0xff] %v4223_v5  ;;  %v4225_v0 = vadd.f32 %v2482_v22, %v6134_v10  ;;  %3419 = vst [vmem:[%s7675_s3 + $0x348] sm:$0xff] %v4068_v12  ;;  %2896 = vmatmul.mubr.bf16.gmra.mrb[192].mxu0 %v4840_v3  ;;  %v4851_v63 = vld [vmem:[%s7673_s0 + $0xc8] ss:$12 sps:$4 sm:$0xff]  }
 0x26b   :  { %3381 = vst [vmem:[%s7675_s3 + $0x218] sm:$0xff] %v4224_v13  ;;  %3963 = vmatmul.mubr.msk.bf16.gmra.mrb[176].mxu1 %vm1226_vm0, %v4841_v46  ;;  %3420 = vst [vmem:[%s7675_s3 + $0x350] sm:$0xff] %v4069_v62  ;;  %2903 = vmatprep.mubr.bf16.mxu0 %v4842_v42 }
 0x26c   :  { %3382 = vst [vmem:[%s7675_s3 + $0x220] sm:$0xff] %v4225_v0  ;;  %3966 = vmatprep.mubr.msk.bf16.mxu1 %vm1226_vm0, %v4843_v44 }
 0x26d   :  { %v1820_v45 = vpop.f32.mrb[44].mxu0 }
 0x26e   :  { %v2486_v4 = vpop.f32.mrb[72].mxu1  ;;  %v4070_v24 = vadd.f32 %v1820_v45, %v5681_v19  ;;  %v1822_v1 = vpop.f32.mrb[45].mxu0 }
 0x26f   :  { %v4226_v26 = vadd.f32 %v2486_v4, %v6128_v55  ;;  %v2488_v47 = vpop.f32.mrb[73].mxu1  ;;  %v4071_v27 = vadd.f32 %v1822_v1, %v5684_v21  ;;  %v1824_v25 = vpop.f32.mrb[46].mxu0  ;;  %v4853_v1 = vld [vmem:[%s7673_s0 + $0xe0] ss:$12 sps:$4 sm:$0xff]  }
 0x270   :  { %v4227_v31 = vadd.f32 %v2488_v47, %v6134_v10  ;;  %v2490_v29 = vpop.f32.mrb[74].mxu1  ;;  %3424 = vst [vmem:[%s7675_s3 + $0x370] sm:$0xff] %v4070_v24  ;;  %v4072_v2 = vadd.f32 %v1824_v25, %v5681_v19  ;;  %v1826_v50 = vpop.f32.mrb[47].mxu0  ;;  %v4854_v47 = vld [vmem:[%s7673_s0 + $0x1e4] ss:$12 sps:$4 sm:$0xff]  }
 0x271   :  { %3386 = vst [vmem:[%s7675_s3 + $0x240] sm:$0xff] %v4226_v26  ;;  %v4228_v48 = vadd.f32 %v2490_v29, %v6128_v55  ;;  %v2492_v51 = vpop.f32.mrb[75].mxu1  ;;  %3425 = vst [vmem:[%s7675_s3 + $0x378] sm:$0xff] %v4071_v27  ;;  %v4073_v23 = vadd.f32 %v1826_v50, %v5684_v21  ;;  %v4852_v26 = vld [vmem:[%s7673_s0 + $0x1c8] ss:$12 sps:$4 sm:$0xff]  }
 0x272   :  { %3387 = vst [vmem:[%s7675_s3 + $0x248] sm:$0xff] %v4227_v31  ;;  %v4229_v18 = vadd.f32 %v2492_v51, %v6134_v10  ;;  %3429 = vst [vmem:[%s7675_s3 + $0x398] sm:$0xff] %v4072_v2  ;;  %2904 = vmatmul.mubr.bf16.gmra.mrb[196].mxu0 %v4844_v52  ;;  %v4855_v27 = vld [vmem:[%s7673_s0 + $0xf8] ss:$12 sps:$4 sm:$0xff]  }
 0x273   :  { %3391 = vst [vmem:[%s7675_s3 + $0x268] sm:$0xff] %v4228_v48  ;;  %3967 = vmatmul.mubr.msk.bf16.gmra.mrb[180].mxu1 %vm1226_vm0, %v4845_v53  ;;  %3430 = vst [vmem:[%s7675_s3 + $0x3a0] sm:$0xff] %v4073_v23  ;;  %2911 = vmatprep.mubr.bf16.mxu0 %v4846_v34 }
 0x274   :  { %3392 = vst [vmem:[%s7675_s3 + $0x270] sm:$0xff] %v4229_v18  ;;  %3970 = vmatprep.mubr.msk.bf16.mxu1 %vm1226_vm0, %v4847_v37 }
 0x275   :  { %v1830_v30 = vpop.f32.mrb[48].mxu0 }
 0x276   :  { %v2496_v32 = vpop.f32.mrb[76].mxu1  ;;  %v4074_v33 = vadd.f32 %v1830_v30, %v5681_v19  ;;  %v1832_v40 = vpop.f32.mrb[49].mxu0 }
 0x277   :  { %v4230_v7 = vadd.f32 %v2496_v32, %v6128_v55  ;;  %v2498_v43 = vpop.f32.mrb[77].mxu1  ;;  %v4075_v54 = vadd.f32 %v1832_v40, %v5684_v21  ;;  %v1834_v59 = vpop.f32.mrb[50].mxu0  ;;  %v4857_v40 = vld [vmem:[%s7673_s0 + $0x110] ss:$12 sps:$4 sm:$0xff]  }
 0x278   :  { %v4231_v35 = vadd.f32 %v2498_v43, %v6134_v10  ;;  %v2500_v9 = vpop.f32.mrb[78].mxu1  ;;  %3434 = vst [vmem:[%s7675_s3 + $0x3c0] sm:$0xff] %v4074_v33  ;;  %v4076_v11 = vadd.f32 %v1834_v59, %v5681_v19  ;;  %v1836_v6 = vpop.f32.mrb[51].mxu0  ;;  %v4858_v43 = vld [vmem:[%s7673_s0 + $0x1fc] ss:$12 sps:$4 sm:$0xff]  }
 0x279   :  { %3396 = vst [vmem:[%s7675_s3 + $0x290] sm:$0xff] %v4230_v7  ;;  %v4232_v20 = vadd.f32 %v2500_v9, %v6128_v55  ;;  %v2502_v8 = vpop.f32.mrb[79].mxu1  ;;  %3435 = vst [vmem:[%s7675_s3 + $0x3c8] sm:$0xff] %v4075_v54  ;;  %v4077_v36 = vadd.f32 %v1836_v6, %v5684_v21  ;;  %v4856_v7 = vld [vmem:[%s7673_s0 + $0x1e0] ss:$12 sps:$4 sm:$0xff]  }
 0x27a   :  { %3397 = vst [vmem:[%s7675_s3 + $0x298] sm:$0xff] %v4231_v35  ;;  %v4233_v38 = vadd.f32 %v2502_v8, %v6134_v10  ;;  %3439 = vst [vmem:[%s7675_s3 + $0x3e8] sm:$0xff] %v4076_v11  ;;  %2912 = vmatmul.mubr.bf16.gmra.mrb[200].mxu0 %v4848_v15  ;;  %v4859_v54 = vld [vmem:[%s7673_s0 + $0x128] ss:$12 sps:$4 sm:$0xff]  }
 0x27b   :  { %3401 = vst [vmem:[%s7675_s3 + $0x2b8] sm:$0xff] %v4232_v20  ;;  %3971 = vmatmul.mubr.msk.bf16.gmra.mrb[184].mxu1 %vm1226_vm0, %v4849_v39  ;;  %3440 = vst [vmem:[%s7675_s3 + $0x3f0] sm:$0xff] %v4077_v36  ;;  %2919 = vmatprep.mubr.bf16.mxu0 %v4850_v60 }
 0x27c   :  { %3402 = vst [vmem:[%s7675_s3 + $0x2c0] sm:$0xff] %v4233_v38  ;;  %3974 = vmatprep.mubr.msk.bf16.mxu1 %vm1226_vm0, %v4851_v63 }
 0x27d   :  { %v1840_v5 = vpop.f32.mrb[52].mxu0 }
 0x27e   :  { %v2506_v14 = vpop.f32.mrb[80].mxu1  ;;  %v4078_v61 = vadd.f32 %v1840_v5, %v5681_v19  ;;  %v1842_v13 = vpop.f32.mrb[53].mxu0 }
 0x27f   :  { %v4234_v12 = vadd.f32 %v2506_v14, %v6128_v55  ;;  %v2508_v17 = vpop.f32.mrb[81].mxu1  ;;  %v4079_v22 = vadd.f32 %v1842_v13, %v5684_v21  ;;  %v1844_v0 = vpop.f32.mrb[54].mxu0  ;;  %v4861_v13 = vld [vmem:[%s7673_s0 + $0x140] ss:$12 sps:$4 sm:$0xff]  }
 0x280   :  { %v4235_v62 = vadd.f32 %v2508_v17, %v6134_v10  ;;  %v2510_v3 = vpop.f32.mrb[82].mxu1  ;;  %3444 = vst [vmem:[%s7675_s3 + $0x410] sm:$0xff] %v4078_v61  ;;  %v4080_v46 = vadd.f32 %v1844_v0, %v5681_v19  ;;  %v1846_v44 = vpop.f32.mrb[55].mxu0  ;;  %v4862_v17 = vld [vmem:[%s7673_s0 + $0x214] ss:$12 sps:$4 sm:$0xff]  }
 0x281   :  { %3406 = vst [vmem:[%s7675_s3 + $0x2e0] sm:$0xff] %v4234_v12  ;;  %v4236_v42 = vadd.f32 %v2510_v3, %v6128_v55  ;;  %v2512_v45 = vpop.f32.mrb[83].mxu1  ;;  %3445 = vst [vmem:[%s7675_s3 + $0x418] sm:$0xff] %v4079_v22  ;;  %v4081_v4 = vadd.f32 %v1846_v44, %v5684_v21  ;;  %v4860_v12 = vld [vmem:[%s7673_s0 + $0x1f8] ss:$12 sps:$4 sm:$0xff]  }
 0x282   :  { %3407 = vst [vmem:[%s7675_s3 + $0x2e8] sm:$0xff] %v4235_v62  ;;  %v4237_v24 = vadd.f32 %v2512_v45, %v6134_v10  ;;  %3449 = vst [vmem:[%s7675_s3 + $0x438] sm:$0xff] %v4080_v46  ;;  %2920 = vmatmul.mubr.bf16.gmra.mrb[204].mxu0 %v4852_v26  ;;  %v4863_v22 = vld [vmem:[%s7673_s0 + $0x158] ss:$12 sps:$4 sm:$0xff]  }
 0x283   :  { %3411 = vst [vmem:[%s7675_s3 + $0x308] sm:$0xff] %v4236_v42  ;;  %3975 = vmatmul.mubr.msk.bf16.gmra.mrb[188].mxu1 %vm1226_vm0, %v4853_v1  ;;  %3450 = vst [vmem:[%s7675_s3 + $0x440] sm:$0xff] %v4081_v4  ;;  %2927 = vmatprep.mubr.bf16.mxu0 %v4854_v47 }
 0x284   :  { %3412 = vst [vmem:[%s7675_s3 + $0x310] sm:$0xff] %v4237_v24  ;;  %3978 = vmatprep.mubr.msk.bf16.mxu1 %vm1226_vm0, %v4855_v27 }
 0x285   :  { %v1850_v31 = vpop.f32.mrb[56].mxu0 }
 0x286   :  { %v2516_v25 = vpop.f32.mrb[84].mxu1  ;;  %v4082_v29 = vadd.f32 %v1850_v31, %v5681_v19  ;;  %v1852_v48 = vpop.f32.mrb[57].mxu0 }
 0x287   :  { %v4238_v2 = vadd.f32 %v2516_v25, %v6128_v55  ;;  %v2518_v50 = vpop.f32.mrb[85].mxu1  ;;  %v4083_v51 = vadd.f32 %v1852_v48, %v5684_v21  ;;  %v1854_v18 = vpop.f32.mrb[58].mxu0  ;;  %v4865_v48 = vld [vmem:[%s7673_s0 + $0x170] ss:$12 sps:$4 sm:$0xff]  }
 0x288   :  { %v4239_v23 = vadd.f32 %v2518_v50, %v6134_v10  ;;  %v2520_v52 = vpop.f32.mrb[86].mxu1  ;;  %3454 = vst [vmem:[%s7675_s3 + $0x460] sm:$0xff] %v4082_v29  ;;  %v4084_v53 = vadd.f32 %v1854_v18, %v5681_v19  ;;  %v1856_v37 = vpop.f32.mrb[59].mxu0  ;;  %v4866_v50 = vld [vmem:[%s7673_s0 + $0x22c] ss:$12 sps:$4 sm:$0xff]  }
 0x289   :  { %3416 = vst [vmem:[%s7675_s3 + $0x330] sm:$0xff] %v4238_v2  ;;  %v4240_v34 = vadd.f32 %v2520_v52, %v6128_v55  ;;  %v2522_v30 = vpop.f32.mrb[87].mxu1  ;;  %3455 = vst [vmem:[%s7675_s3 + $0x468] sm:$0xff] %v4083_v51  ;;  %v4085_v32 = vadd.f32 %v1856_v37, %v5684_v21  ;;  %v4864_v2 = vld [vmem:[%s7673_s0 + $0x210] ss:$12 sps:$4 sm:$0xff]  }
 0x28a   :  { %3417 = vst [vmem:[%s7675_s3 + $0x338] sm:$0xff] %v4239_v23  ;;  %v4241_v33 = vadd.f32 %v2522_v30, %v6134_v10  ;;  %3459 = vst [vmem:[%s7675_s3 + $0x488] sm:$0xff] %v4084_v53  ;;  %2928 = vmatmul.mubr.bf16.gmra.mrb[208].mxu0 %v4856_v7  ;;  %v4867_v51 = vld [vmem:[%s7673_s0 + $0x188] ss:$12 sps:$4 sm:$0xff]  }
 0x28b   :  { %3421 = vst [vmem:[%s7675_s3 + $0x358] sm:$0xff] %v4240_v34  ;;  %3979 = vmatmul.mubr.msk.bf16.gmra.mrb[192].mxu1 %vm1226_vm0, %v4857_v40  ;;  %3460 = vst [vmem:[%s7675_s3 + $0x490] sm:$0xff] %v4085_v32  ;;  %2935 = vmatprep.mubr.bf16.mxu0 %v4858_v43 }
 0x28c   :  { %3422 = vst [vmem:[%s7675_s3 + $0x360] sm:$0xff] %v4241_v33  ;;  %3982 = vmatprep.mubr.msk.bf16.mxu1 %vm1226_vm0, %v4859_v54 }
 0x28d   :  { %v1860_v35 = vpop.f32.mrb[60].mxu0 }
 0x28e   :  { %v2526_v59 = vpop.f32.mrb[88].mxu1  ;;  %v4086_v9 = vadd.f32 %v1860_v35, %v5681_v19  ;;  %v1862_v20 = vpop.f32.mrb[61].mxu0 }
 0x28f   :  { %v4242_v11 = vadd.f32 %v2526_v59, %v6128_v55  ;;  %v2528_v6 = vpop.f32.mrb[89].mxu1  ;;  %v4087_v8 = vadd.f32 %v1862_v20, %v5684_v21  ;;  %v1864_v38 = vpop.f32.mrb[62].mxu0  ;;  %v4869_v20 = vld [vmem:[%s7673_s0 + $0x1a0] ss:$12 sps:$4 sm:$0xff]  }
 0x290   :  { %v4243_v36 = vadd.f32 %v2528_v6, %v6134_v10  ;;  %v2530_v15 = vpop.f32.mrb[90].mxu1  ;;  %3464 = vst [vmem:[%s7675_s3 + $0x4b0] sm:$0xff] %v4086_v9  ;;  %v4088_v39 = vadd.f32 %v1864_v38, %v5681_v19  ;;  %v1866_v63 = vpop.f32.mrb[63].mxu0  ;;  %v4870_v6 = vld [vmem:[%s7673_s0 + $0x244] ss:$12 sps:$4 sm:$0xff]  }
 0x291   :  { %3426 = vst [vmem:[%s7675_s3 + $0x380] sm:$0xff] %v4242_v11  ;;  %v4244_v60 = vadd.f32 %v2530_v15, %v6128_v55  ;;  %v2532_v5 = vpop.f32.mrb[91].mxu1  ;;  %3465 = vst [vmem:[%s7675_s3 + $0x4b8] sm:$0xff] %v4087_v8  ;;  %v4089_v14 = vadd.f32 %v1866_v63, %v5684_v21  ;;  %v4868_v11 = vld [vmem:[%s7673_s0 + $0x228] ss:$12 sps:$4 sm:$0xff]  }
 0x292   :  { %3427 = vst [vmem:[%s7675_s3 + $0x388] sm:$0xff] %v4243_v36  ;;  %v4245_v61 = vadd.f32 %v2532_v5, %v6134_v10  ;;  %3469 = vst [vmem:[%s7675_s3 + $0x4d8] sm:$0xff] %v4088_v39  ;;  %2936 = vmatmul.mubr.bf16.gmra.mrb[212].mxu0 %v4860_v12  ;;  %v4871_v8 = vld [vmem:[%s7673_s0 + $0x1b8] ss:$12 sps:$4 sm:$0xff]  }
 0x293   :  { %3431 = vst [vmem:[%s7675_s3 + $0x3a8] sm:$0xff] %v4244_v60  ;;  %3983 = vmatmul.mubr.msk.bf16.gmra.mrb[196].mxu1 %vm1226_vm0, %v4861_v13  ;;  %3470 = vst [vmem:[%s7675_s3 + $0x4e0] sm:$0xff] %v4089_v14  ;;  %2943 = vmatprep.mubr.bf16.mxu0 %v4862_v17 }
 0x294   :  { %3432 = vst [vmem:[%s7675_s3 + $0x3b0] sm:$0xff] %v4245_v61  ;;  %3986 = vmatprep.mubr.msk.bf16.mxu1 %vm1226_vm0, %v4863_v22 }
 0x295   :  { %v1870_v62 = vpop.f32.mrb[64].mxu0 }
 0x296   :  { %v2536_v0 = vpop.f32.mrb[92].mxu1  ;;  %v4090_v3 = vadd.f32 %v1870_v62, %v5681_v19  ;;  %v1872_v42 = vpop.f32.mrb[65].mxu0 }
 0x297   :  { %v4246_v46 = vadd.f32 %v2536_v0, %v6128_v55  ;;  %v2538_v44 = vpop.f32.mrb[93].mxu1  ;;  %v4091_v45 = vadd.f32 %v1872_v42, %v5684_v21  ;;  %v1874_v24 = vpop.f32.mrb[66].mxu0  ;;  %v4873_v42 = vld [vmem:[%s7673_s0 + $0x1d0] ss:$12 sps:$4 sm:$0xff]  }
 0x298   :  { %v4247_v4 = vadd.f32 %v2538_v44, %v6134_v10  ;;  %v2540_v26 = vpop.f32.mrb[94].mxu1  ;;  %3474 = vst [vmem:[%s7675_s3 + $0x500] sm:$0xff] %v4090_v3  ;;  %v4092_v1 = vadd.f32 %v1874_v24, %v5681_v19  ;;  %v1876_v27 = vpop.f32.mrb[67].mxu0  ;;  %v4874_v44 = vld [vmem:[%s7673_s0 + $0x25c] ss:$12 sps:$4 sm:$0xff]  }
 0x299   :  { %3436 = vst [vmem:[%s7675_s3 + $0x3d0] sm:$0xff] %v4246_v46  ;;  %v4248_v47 = vadd.f32 %v2540_v26, %v6128_v55  ;;  %v2542_v31 = vpop.f32.mrb[95].mxu1  ;;  %3475 = vst [vmem:[%s7675_s3 + $0x508] sm:$0xff] %v4091_v45  ;;  %v4093_v25 = vadd.f32 %v1876_v27, %v5684_v21  ;;  %v4872_v46 = vld [vmem:[%s7673_s0 + $0x240] ss:$12 sps:$4 sm:$0xff]  }
 0x29a   :  { %3437 = vst [vmem:[%s7675_s3 + $0x3d8] sm:$0xff] %v4247_v4  ;;  %v4249_v29 = vadd.f32 %v2542_v31, %v6134_v10  ;;  %3479 = vst [vmem:[%s7675_s3 + $0x528] sm:$0xff] %v4092_v1  ;;  %2944 = vmatmul.mubr.bf16.gmra.mrb[216].mxu0 %v4864_v2  ;;  %v4875_v45 = vld [vmem:[%s7673_s0 + $0x1e8] ss:$12 sps:$4 sm:$0xff]  }
 0x29b   :  { %3441 = vst [vmem:[%s7675_s3 + $0x3f8] sm:$0xff] %v4248_v47  ;;  %3987 = vmatmul.mubr.msk.bf16.gmra.mrb[200].mxu1 %vm1226_vm0, %v4865_v48  ;;  %3480 = vst [vmem:[%s7675_s3 + $0x530] sm:$0xff] %v4093_v25  ;;  %2951 = vmatprep.mubr.bf16.mxu0 %v4866_v50 }
 0x29c   :  { %3442 = vst [vmem:[%s7675_s3 + $0x400] sm:$0xff] %v4249_v29  ;;  %3990 = vmatprep.mubr.msk.bf16.mxu1 %vm1226_vm0, %v4867_v51 }
 0x29d   :  { %v1880_v23 = vpop.f32.mrb[68].mxu0 }
 0x29e   :  { %v2546_v18 = vpop.f32.mrb[96].mxu1  ;;  %v4094_v52 = vadd.f32 %v1880_v23, %v5681_v19  ;;  %v1882_v34 = vpop.f32.mrb[69].mxu0 }
 0x29f   :  { %v4250_v53 = vadd.f32 %v2546_v18, %v6128_v55  ;;  %v2548_v37 = vpop.f32.mrb[97].mxu1  ;;  %v4095_v30 = vadd.f32 %v1882_v34, %v5684_v21  ;;  %v1884_v33 = vpop.f32.mrb[70].mxu0  ;;  %v4877_v34 = vld [vmem:[%s7673_s0 + $0x200] ss:$12 sps:$4 sm:$0xff]  }
 0x2a0   :  { %v4251_v32 = vadd.f32 %v2548_v37, %v6134_v10  ;;  %v2550_v7 = vpop.f32.mrb[98].mxu1  ;;  %3484 = vst [vmem:[%s7675_s3 + $0x550] sm:$0xff] %v4094_v52  ;;  %v4096_v40 = vadd.f32 %v1884_v33, %v5681_v19  ;;  %v1886_v54 = vpop.f32.mrb[71].mxu0  ;;  %v4878_v37 = vld [vmem:[%s7673_s0 + $0x274] ss:$12 sps:$4 sm:$0xff]  }
 0x2a1   :  { %3446 = vst [vmem:[%s7675_s3 + $0x420] sm:$0xff] %v4250_v53  ;;  %v4252_v43 = vadd.f32 %v2550_v7, %v6128_v55  ;;  %v2552_v35 = vpop.f32.mrb[99].mxu1  ;;  %3485 = vst [vmem:[%s7675_s3 + $0x558] sm:$0xff] %v4095_v30  ;;  %v4097_v59 = vadd.f32 %v1886_v54, %v5684_v21  ;;  %v4876_v53 = vld [vmem:[%s7673_s0 + $0x258] ss:$12 sps:$4 sm:$0xff]  }
 0x2a2   :  { %3447 = vst [vmem:[%s7675_s3 + $0x428] sm:$0xff] %v4251_v32  ;;  %v4253_v9 = vadd.f32 %v2552_v35, %v6134_v10  ;;  %3489 = vst [vmem:[%s7675_s3 + $0x578] sm:$0xff] %v4096_v40  ;;  %2952 = vmatmul.mubr.bf16.gmra.mrb[220].mxu0 %v4868_v11  ;;  %v4879_v30 = vld [vmem:[%s7673_s0 + $0x218] ss:$12 sps:$4 sm:$0xff]  }
 0x2a3   :  { %3451 = vst [vmem:[%s7675_s3 + $0x448] sm:$0xff] %v4252_v43  ;;  %3991 = vmatmul.mubr.msk.bf16.gmra.mrb[204].mxu1 %vm1226_vm0, %v4869_v20  ;;  %3490 = vst [vmem:[%s7675_s3 + $0x580] sm:$0xff] %v4097_v59  ;;  %2959 = vmatprep.mubr.bf16.mxu0 %v4870_v6 }
 0x2a4   :  { %3452 = vst [vmem:[%s7675_s3 + $0x450] sm:$0xff] %v4253_v9  ;;  %3994 = vmatprep.mubr.msk.bf16.mxu1 %vm1226_vm0, %v4871_v8 }
 0x2a5   :  { %v1890_v36 = vpop.f32.mrb[72].mxu0 }
 0x2a6   :  { %v2556_v38 = vpop.f32.mrb[100].mxu1  ;;  %v4098_v15 = vadd.f32 %v1890_v36, %v5681_v19  ;;  %v1892_v60 = vpop.f32.mrb[73].mxu0 }
 0x2a7   :  { %v4254_v39 = vadd.f32 %v2556_v38, %v6128_v55  ;;  %v2558_v63 = vpop.f32.mrb[101].mxu1  ;;  %v4099_v5 = vadd.f32 %v1892_v60, %v5684_v21  ;;  %v1894_v61 = vpop.f32.mrb[74].mxu0  ;;  %v4883_v60 = vld [vmem:[%s7673_s0 + $0x248] ss:$12 sps:$4 sm:$0xff]  }
 0x2a8   :  { %v4255_v14 = vadd.f32 %v2558_v63, %v6134_v10  ;;  %v2560_v12 = vpop.f32.mrb[102].mxu1  ;;  %3494 = vst [vmem:[%s7675_s3 + $0x5a0] sm:$0xff] %v4098_v15  ;;  %v4100_v13 = vadd.f32 %v1894_v61, %v5681_v19  ;;  %v1896_v22 = vpop.f32.mrb[75].mxu0 }
 0x2a9   :  { %3456 = vst [vmem:[%s7675_s3 + $0x470] sm:$0xff] %v4254_v39  ;;  %v4256_v17 = vadd.f32 %v2560_v12, %v6128_v55  ;;  %v2562_v62 = vpop.f32.mrb[103].mxu1  ;;  %3495 = vst [vmem:[%s7675_s3 + $0x5a8] sm:$0xff] %v4099_v5  ;;  %v4101_v0 = vadd.f32 %v1896_v22, %v5684_v21  ;;  %v4881_v39 = vld [vmem:[%s7673_s0 + $0x230] ss:$12 sps:$4 sm:$0xff]  }
 0x2aa   :  { %3457 = vst [vmem:[%s7675_s3 + $0x478] sm:$0xff] %v4255_v14  ;;  %v4257_v3 = vadd.f32 %v2562_v62, %v6134_v10  ;;  %3499 = vst [vmem:[%s7675_s3 + $0x5c8] sm:$0xff] %v4100_v13  ;;  %2960 = vmatmul.mubr.bf16.gmra.mrb[224].mxu0 %v4872_v46 }
 0x2ab   :  { %3461 = vst [vmem:[%s7675_s3 + $0x498] sm:$0xff] %v4256_v17  ;;  %3995 = vmatmul.mubr.msk.bf16.gmra.mrb[208].mxu1 %vm1226_vm0, %v4873_v42  ;;  %3500 = vst [vmem:[%s7675_s3 + $0x5d0] sm:$0xff] %v4101_v0  ;;  %2967 = vmatprep.mubr.bf16.mxu0 %v4874_v44  ;;  %v4884_v42 = vld [vmem:[%s7673_s0 + $0x288] ss:$12 sps:$4 sm:$0xff]   ;;  %v4885_v44 = vld [vmem:[%s7673_s0 + $0x260] ss:$12 sps:$4 sm:$0xff]  }
 0x2ac   :  { %3462 = vst [vmem:[%s7675_s3 + $0x4a0] sm:$0xff] %v4257_v3  ;;  %3998 = vmatprep.mubr.msk.bf16.mxu1 %vm1226_vm0, %v4875_v45  ;;  %v4886_v45 = vld [vmem:[%s7673_s0 + $0x2a4] ss:$12 sps:$4 sm:$0xff]  }
 0x2ad   :  { %v1900_v4 = vpop.f32.mrb[76].mxu0 }
 0x2ae   :  { %v2566_v24 = vpop.f32.mrb[104].mxu1  ;;  %v4102_v26 = vadd.f32 %v1900_v4, %v5681_v19  ;;  %v1902_v47 = vpop.f32.mrb[77].mxu0 }
 0x2af   :  { %v4258_v1 = vadd.f32 %v2566_v24, %v6128_v55  ;;  %v2568_v27 = vpop.f32.mrb[105].mxu1  ;;  %v4103_v31 = vadd.f32 %v1902_v47, %v5684_v21  ;;  %v1904_v29 = vpop.f32.mrb[78].mxu0 }
 0x2b0   :  { %v4259_v25 = vadd.f32 %v2568_v27, %v6134_v10  ;;  %v2570_v2 = vpop.f32.mrb[106].mxu1  ;;  %3504 = vst [vmem:[%s7675_s3 + $0x5f0] sm:$0xff] %v4102_v26  ;;  %v4104_v48 = vadd.f32 %v1904_v29, %v5681_v19  ;;  %v1906_v51 = vpop.f32.mrb[79].mxu0 }
 0x2b1   :  { %3466 = vst [vmem:[%s7675_s3 + $0x4c0] sm:$0xff] %v4258_v1  ;;  %v4260_v50 = vadd.f32 %v2570_v2, %v6128_v55  ;;  %v2572_v23 = vpop.f32.mrb[107].mxu1  ;;  %3505 = vst [vmem:[%s7675_s3 + $0x5f8] sm:$0xff] %v4103_v31  ;;  %v4105_v18 = vadd.f32 %v1906_v51, %v5684_v21  ;;  %v4888_v51 = vld [vmem:[%s7673_s0 + $0x2bc] ss:$12 sps:$4 sm:$0xff]  }
 0x2b2   :  { %3467 = vst [vmem:[%s7675_s3 + $0x4c8] sm:$0xff] %v4259_v25  ;;  %v4261_v52 = vadd.f32 %v2572_v23, %v6134_v10  ;;  %3509 = vst [vmem:[%s7675_s3 + $0x618] sm:$0xff] %v4104_v48  ;;  %2968 = vmatmul.mubr.bf16.gmra.mrb[228].mxu0 %v4876_v53 }
 0x2b3   :  { %3471 = vst [vmem:[%s7675_s3 + $0x4e8] sm:$0xff] %v4260_v50  ;;  %3999 = vmatmul.mubr.msk.bf16.gmra.mrb[212].mxu1 %vm1226_vm0, %v4877_v34  ;;  %3510 = vst [vmem:[%s7675_s3 + $0x620] sm:$0xff] %v4105_v18  ;;  %2975 = vmatprep.mubr.bf16.mxu0 %v4878_v37  ;;  %v4887_v50 = vld [vmem:[%s7673_s0 + $0x2a0] ss:$12 sps:$4 sm:$0xff]  }
 0x2b4   :  { %3472 = vst [vmem:[%s7675_s3 + $0x4f0] sm:$0xff] %v4261_v52  ;;  %4002 = vmatprep.mubr.msk.bf16.mxu1 %vm1226_vm0, %v4879_v30 }
 0x2b5   :  { %v1910_v32 = vpop.f32.mrb[80].mxu0 }
 0x2b6   :  { %v2576_v33 = vpop.f32.mrb[108].mxu1  ;;  %v4106_v7 = vadd.f32 %v1910_v32, %v5681_v19  ;;  %v1912_v43 = vpop.f32.mrb[81].mxu0 }
 0x2b7   :  { %v4262_v40 = vadd.f32 %v2576_v33, %v6128_v55  ;;  %v2578_v54 = vpop.f32.mrb[109].mxu1  ;;  %v4107_v35 = vadd.f32 %v1912_v43, %v5684_v21  ;;  %v1914_v9 = vpop.f32.mrb[82].mxu0  ;;  %v4890_v43 = vld [vmem:[%s7673_s0 + $0x2d4] ss:$12 sps:$4 sm:$0xff]  }
 0x2b8   :  { %v4263_v59 = vadd.f32 %v2578_v54, %v6134_v10  ;;  %v2580_v11 = vpop.f32.mrb[110].mxu1  ;;  %3514 = vst [vmem:[%s7675_s3 + $0x640] sm:$0xff] %v4106_v7  ;;  %v4108_v20 = vadd.f32 %v1914_v9, %v5681_v19  ;;  %v1916_v8 = vpop.f32.mrb[83].mxu0  ;;  %v4880_v19 = vld [vmem:[%s7673_s0 + $0x270] ss:$12 sps:$4 sm:$0xff]  }
 0x2b9   :  { %3476 = vst [vmem:[%s7675_s3 + $0x510] sm:$0xff] %v4262_v40  ;;  %v4264_v6 = vadd.f32 %v2580_v11, %v6128_v55  ;;  %v2582_v36 = vpop.f32.mrb[111].mxu1  ;;  %3515 = vst [vmem:[%s7675_s3 + $0x648] sm:$0xff] %v4107_v35  ;;  %v4109_v38 = vadd.f32 %v1916_v8, %v5684_v21  ;;  %v4882_v21 = vld [vmem:[%s7673_s0 + $0x28c] ss:$12 sps:$4 sm:$0xff]  }
 0x2ba   :  { %3477 = vst [vmem:[%s7675_s3 + $0x518] sm:$0xff] %v4263_v59  ;;  %v4265_v15 = vadd.f32 %v2582_v36, %v6134_v10  ;;  %3519 = vst [vmem:[%s7675_s3 + $0x668] sm:$0xff] %v4108_v20  ;;  %2976 = vmatmul.mubr.bf16.gmra.mrb[232].mxu0 %v4880_v19  ;;  %v4889_v40 = vld [vmem:[%s7673_s0 + $0x2b8] ss:$12 sps:$4 sm:$0xff]  }
 0x2bb   :  { %3481 = vst [vmem:[%s7675_s3 + $0x538] sm:$0xff] %v4264_v6  ;;  %4003 = vmatmul.mubr.msk.bf16.gmra.mrb[216].mxu1 %vm1226_vm0, %v4881_v39  ;;  %3520 = vst [vmem:[%s7675_s3 + $0x670] sm:$0xff] %v4109_v38  ;;  %2983 = vmatprep.mubr.bf16.mxu0 %v4882_v21  ;;  %v4892_v19 = vld [vmem:[%s7673_s0 + $0x2ec] ss:$12 sps:$4 sm:$0xff]  }
 0x2bc   :  { %3482 = vst [vmem:[%s7675_s3 + $0x540] sm:$0xff] %v4265_v15  ;;  %4006 = vmatprep.mubr.msk.bf16.mxu1 %vm1226_vm0, %v4883_v60  ;;  %v4891_v15 = vld [vmem:[%s7673_s0 + $0x2d0] ss:$12 sps:$4 sm:$0xff]  }
 0x2bd   :  { %v6925_v5 = vpop.f32.mrb[128].mxu0 }
 0x2be   :  { %v2586_v63 = vpop.f32.mrb[112].mxu1  ;;  %v2771_v12 = vpop.f32.mrb[129].mxu0 }
 0x2bf   :  { %v4266_v14 = vadd.f32 %v2586_v63, %v6128_v55  ;;  %v2588_v61 = vpop.f32.mrb[113].mxu1  ;;  %v6929_v22 = vpop.f32.mrb[130].mxu0 }
 0x2c0   :  { %v4267_v13 = vadd.f32 %v2588_v61, %v6134_v10  ;;  %v2590_v17 = vpop.f32.mrb[114].mxu1  ;;  %v2774_v3 = vpop.f32.mrb[131].mxu0 }
 0x2c1   :  { %3486 = vst [vmem:[%s7675_s3 + $0x560] sm:$0xff] %v4266_v14  ;;  %v4268_v62 = vadd.f32 %v2590_v17, %v6128_v55  ;;  %v2592_v0 = vpop.f32.mrb[115].mxu1  ;;  %v4893_v3 = vld [vmem:[%s7673_s0 + $0x2e8] ss:$12 sps:$4 sm:$0xff]  }
 0x2c2   :  { %3487 = vst [vmem:[%s7675_s3 + $0x568] sm:$0xff] %v4267_v13  ;;  %v4269_v46 = vadd.f32 %v2592_v0, %v6134_v10  ;;  %2984 = vmatmul.mubr.bf16.gmra.mrb[236].mxu0 %v4884_v42 }
 0x2c3   :  { %3491 = vst [vmem:[%s7675_s3 + $0x588] sm:$0xff] %v4268_v62  ;;  %4007 = vmatmul.mubr.msk.bf16.gmra.mrb[220].mxu1 %vm1226_vm0, %v4885_v44  ;;  %2991 = vmatprep.mubr.bf16.mxu0 %v4886_v45 }
 0x2c4   :  { %3492 = vst [vmem:[%s7675_s3 + $0x590] sm:$0xff] %v4269_v46  ;;  %4010 = vmatprep.mubr.msk.bf16.mxu1 %vm1226_vm0, %v6120_v57 }
 0x2c5   :  { %v6957_v24 = vpop.f32.mrb[132].mxu0 }
 0x2c6   :  { %v2596_v4 = vpop.f32.mrb[116].mxu1  ;;  %v2779_v47 = vpop.f32.mrb[133].mxu0 }
 0x2c7   :  { %v4270_v26 = vadd.f32 %v2596_v4, %v6128_v55  ;;  %v2598_v1 = vpop.f32.mrb[117].mxu1  ;;  %v6961_v25 = vpop.f32.mrb[134].mxu0 }
 0x2c8   :  { %v4271_v27 = vadd.f32 %v2598_v1, %v6134_v10  ;;  %v2600_v31 = vpop.f32.mrb[118].mxu1  ;;  %v2782_v57 = vpop.f32.mrb[135].mxu0 }
 0x2c9   :  { %3496 = vst [vmem:[%s7675_s3 + $0x5b0] sm:$0xff] %v4270_v26  ;;  %v4272_v29 = vadd.f32 %v2600_v31, %v6128_v55  ;;  %v2602_v2 = vpop.f32.mrb[119].mxu1 }
 0x2ca   :  { %3497 = vst [vmem:[%s7675_s3 + $0x5b8] sm:$0xff] %v4271_v27  ;;  %v4273_v48 = vadd.f32 %v2602_v2, %v6134_v10  ;;  %2992 = vmatmul.mubr.bf16.gmra.mrb[240].mxu0 %v4887_v50 }
 0x2cb   :  { %3501 = vst [vmem:[%s7675_s3 + $0x5d8] sm:$0xff] %v4272_v29  ;;  %4011 = vmatmul.mubr.msk.bf16.gmra.mrb[224].mxu1 %vm1226_vm0, %v6169_v41  ;;  %2999 = vmatprep.mubr.bf16.mxu0 %v4888_v51 }
 0x2cc   :  { %3502 = vst [vmem:[%s7675_s3 + $0x5e0] sm:$0xff] %v4273_v48  ;;  %4014 = vmatprep.mubr.msk.bf16.mxu1 %vm1226_vm0, %v6215_v28 }
 0x2cd   :  { %v6987_v18 = vpop.f32.mrb[136].mxu0 }
 0x2ce   :  { %v2606_v23 = vpop.f32.mrb[120].mxu1  ;;  %v2787_v34 = vpop.f32.mrb[137].mxu0 }
 0x2cf   :  { %v4274_v52 = vadd.f32 %v2606_v23, %v6128_v55  ;;  %v2608_v53 = vpop.f32.mrb[121].mxu1  ;;  %v6991_v30 = vpop.f32.mrb[138].mxu0 }
 0x2d0   :  { %v4275_v41 = vadd.f32 %v2608_v53, %v6134_v10  ;;  %v2610_v37 = vpop.f32.mrb[122].mxu1  ;;  %v2790_v28 = vpop.f32.mrb[139].mxu0 }
 0x2d1   :  { %3506 = vst [vmem:[%s7675_s3 + $0x600] sm:$0xff] %v4274_v52  ;;  %v4276_v32 = vadd.f32 %v2610_v37, %v6128_v55  ;;  %v2612_v33 = vpop.f32.mrb[123].mxu1 }
 0x2d2   :  { %3507 = vst [vmem:[%s7675_s3 + $0x608] sm:$0xff] %v4275_v41  ;;  %v4277_v7 = vadd.f32 %v2612_v33, %v6134_v10  ;;  %3000 = vmatmul.mubr.bf16.gmra.mrb[244].mxu0 %v4889_v40 }
 0x2d3   :  { %3511 = vst [vmem:[%s7675_s3 + $0x628] sm:$0xff] %v4276_v32  ;;  %4015 = vmatmul.mubr.msk.bf16.gmra.mrb[228].mxu1 %vm1226_vm0, %v6261_v56  ;;  %3007 = vmatprep.mubr.bf16.mxu0 %v4890_v43 }
 0x2d4   :  { %3512 = vst [vmem:[%s7675_s3 + $0x630] sm:$0xff] %v4277_v7  ;;  %4018 = vmatprep.mubr.msk.bf16.mxu1 %vm1226_vm0, %v6307_v49 }
 0x2d5   :  { %v7017_v35 = vpop.f32.mrb[140].mxu0 }
 0x2d6   :  { %v2616_v54 = vpop.f32.mrb[124].mxu1  ;;  %v2795_v11 = vpop.f32.mrb[141].mxu0 }
 0x2d7   :  { %v4278_v59 = vadd.f32 %v2616_v54, %v6128_v55  ;;  %v2618_v9 = vpop.f32.mrb[125].mxu1  ;;  %v7021_v6 = vpop.f32.mrb[142].mxu0 }
 0x2d8   :  { %v4279_v56 = vadd.f32 %v2618_v9, %v6134_v10  ;;  %v2620_v20 = vpop.f32.mrb[126].mxu1  ;;  %v2798_v49 = vpop.f32.mrb[143].mxu0 }
 0x2d9   :  { %3516 = vst [vmem:[%s7675_s3 + $0x650] sm:$0xff] %v4278_v59  ;;  %v4280_v8 = vadd.f32 %v2620_v20, %v6128_v55  ;;  %v2622_v36 = vpop.f32.mrb[127].mxu1 }
 0x2da   :  { %3517 = vst [vmem:[%s7675_s3 + $0x658] sm:$0xff] %v4279_v56  ;;  %v4281_v38 = vadd.f32 %v2622_v36, %v6134_v10  ;;  %3008 = vmatmul.mubr.bf16.gmra.mrb[248].mxu0 %v4891_v15 }
 0x2db   :  { %3521 = vst [vmem:[%s7675_s3 + $0x678] sm:$0xff] %v4280_v8  ;;  %4019 = vmatmul.mubr.msk.bf16.gmra.mrb[232].mxu1 %vm1226_vm0, %v6353_v16  ;;  %3015 = vmatprep.mubr.bf16.mxu0 %v4892_v19 }
 0x2dc   :  { %3522 = vst [vmem:[%s7675_s3 + $0x680] sm:$0xff] %v4281_v38 }
 0x2dd   :  { %v7045_v21 = vpop.f32.mrb[144].mxu0 }
 0x2de   :  { %v2626_v39 = vpop.f32.mrb[128].mxu1  ;;  %v2803_v14 = vpop.f32.mrb[145].mxu0 }
 0x2df   :  { %v4282_v60 = vadd.f32 %v2626_v39, %v6128_v55  ;;  %v2628_v63 = vpop.f32.mrb[129].mxu1  ;;  %v7049_v16 = vpop.f32.mrb[146].mxu0 }
 0x2e0   :  { %v4283_v61 = vadd.f32 %v2628_v63, %v6134_v10  ;;  %v2630_v12 = vpop.f32.mrb[130].mxu1  ;;  %v2806_v62 = vpop.f32.mrb[147].mxu0 }
 0x2e1   :  { %3526 = vst [vmem:[%s7675_s3 + $0x6a0] sm:$0xff] %v4282_v60  ;;  %v4284_v13 = vadd.f32 %v2630_v12, %v6128_v55  ;;  %v2632_v17 = vpop.f32.mrb[131].mxu1 }
 0x2e2   :  { %3527 = vst [vmem:[%s7675_s3 + $0x6a8] sm:$0xff] %v4283_v61  ;;  %v4285_v0 = vadd.f32 %v2632_v17, %v6134_v10  ;;  %3016 = vmatmul.mubr.bf16.gmra.mrb[252].mxu0 %v4893_v3 }
 0x2e3   :  { %3531 = vst [vmem:[%s7675_s3 + $0x6c8] sm:$0xff] %v4284_v13 }
 0x2e4   :  { %3532 = vst [vmem:[%s7675_s3 + $0x6d0] sm:$0xff] %v4285_v0 }
 0x2e5   :  { %v7068_v42 = vpop.f32.mrb[148].mxu0 }
 0x2e6   :  { %v2636_v46 = vpop.f32.mrb[132].mxu1  ;;  %v2811_v4 = vpop.f32.mrb[149].mxu0 }
 0x2e7   :  { %v4286_v44 = vadd.f32 %v2636_v46, %v6128_v55  ;;  %v2638_v45 = vpop.f32.mrb[133].mxu1  ;;  %v7072_v47 = vpop.f32.mrb[150].mxu0 }
 0x2e8   :  { %v4287_v26 = vadd.f32 %v2638_v45, %v6134_v10  ;;  %v2640_v1 = vpop.f32.mrb[134].mxu1  ;;  %v2814_v29 = vpop.f32.mrb[151].mxu0 }
 0x2e9   :  { %3536 = vst [vmem:[%s7675_s3 + $0x6f0] sm:$0xff] %v4286_v44  ;;  %v4288_v27 = vadd.f32 %v2640_v1, %v6128_v55  ;;  %v2642_v31 = vpop.f32.mrb[135].mxu1 }
 0x2ea   :  { %3537 = vst [vmem:[%s7675_s3 + $0x6f8] sm:$0xff] %v4287_v26  ;;  %v4289_v2 = vadd.f32 %v2642_v31, %v6134_v10 }
 0x2eb   :  { %3541 = vst [vmem:[%s7675_s3 + $0x718] sm:$0xff] %v4288_v27 }
 0x2ec   :  { %3542 = vst [vmem:[%s7675_s3 + $0x720] sm:$0xff] %v4289_v2 }
 0x2ed   :  { %v7088_v48 = vpop.f32.mrb[152].mxu0 }
 0x2ee   :  { %v2646_v57 = vpop.f32.mrb[136].mxu1  ;;  %v2819_v23 = vpop.f32.mrb[153].mxu0 }
 0x2ef   :  { %v4290_v50 = vadd.f32 %v2646_v57, %v6128_v55  ;;  %v2648_v51 = vpop.f32.mrb[137].mxu1  ;;  %v7092_v34 = vpop.f32.mrb[154].mxu0 }
 0x2f0   :  { %v4291_v52 = vadd.f32 %v2648_v51, %v6134_v10  ;;  %v2650_v53 = vpop.f32.mrb[138].mxu1  ;;  %v2822_v32 = vpop.f32.mrb[155].mxu0 }
 0x2f1   :  { %3546 = vst [vmem:[%s7675_s3 + $0x740] sm:$0xff] %v4290_v50  ;;  %v4292_v41 = vadd.f32 %v2650_v53, %v6128_v55  ;;  %v2652_v37 = vpop.f32.mrb[139].mxu1 }
 0x2f2   :  { %3547 = vst [vmem:[%s7675_s3 + $0x748] sm:$0xff] %v4291_v52  ;;  %v4293_v33 = vadd.f32 %v2652_v37, %v6134_v10 }
 0x2f3   :  { %3551 = vst [vmem:[%s7675_s3 + $0x768] sm:$0xff] %v4292_v41 }
 0x2f4   :  { %3552 = vst [vmem:[%s7675_s3 + $0x770] sm:$0xff] %v4293_v33 }
 0x2f5   :  { %v7108_v7 = vpop.f32.mrb[156].mxu0 }
 0x2f6   :  { %v2656_v28 = vpop.f32.mrb[140].mxu1  ;;  %v2827_v54 = vpop.f32.mrb[157].mxu0 }
 0x2f7   :  { %v4294_v40 = vadd.f32 %v2656_v28, %v6128_v55  ;;  %v2658_v43 = vpop.f32.mrb[141].mxu1  ;;  %v7112_v11 = vpop.f32.mrb[158].mxu0 }
 0x2f8   :  { %v4295_v59 = vadd.f32 %v2658_v43, %v6134_v10  ;;  %v2660_v9 = vpop.f32.mrb[142].mxu1  ;;  %v2830_v8 = vpop.f32.mrb[159].mxu0 }
 0x2f9   :  { %3556 = vst [vmem:[%s7675_s3 + $0x790] sm:$0xff] %v4294_v40  ;;  %v4296_v56 = vadd.f32 %v2660_v9, %v6128_v55  ;;  %v2662_v20 = vpop.f32.mrb[143].mxu1 }
 0x2fa   :  { %3557 = vst [vmem:[%s7675_s3 + $0x798] sm:$0xff] %v4295_v59  ;;  %v4297_v36 = vadd.f32 %v2662_v20, %v6134_v10 }
 0x2fb   :  { %3561 = vst [vmem:[%s7675_s3 + $0x7b8] sm:$0xff] %v4296_v56 }
 0x2fc   :  { %3562 = vst [vmem:[%s7675_s3 + $0x7c0] sm:$0xff] %v4297_v36 }
 0x2fd   :  { %v7128_v38 = vpop.f32.mrb[160].mxu0 }
 0x2fe   :  { %v2666_v49 = vpop.f32.mrb[144].mxu1  ;;  %v2835_v39 = vpop.f32.mrb[161].mxu0 }
 0x2ff   :  { %v4298_v15 = vadd.f32 %v2666_v49, %v6128_v55  ;;  %v2668_v19 = vpop.f32.mrb[145].mxu1  ;;  %v7132_v14 = vpop.f32.mrb[162].mxu0 }
 0x300   :  { %v4299_v60 = vadd.f32 %v2668_v19, %v6134_v10  ;;  %v2670_v63 = vpop.f32.mrb[146].mxu1  ;;  %v2838_v13 = vpop.f32.mrb[163].mxu0 }
 0x301   :  { %3566 = vst [vmem:[%s7675_s3 + $0x7e0] sm:$0xff] %v4298_v15  ;;  %v4300_v61 = vadd.f32 %v2670_v63, %v6128_v55  ;;  %v2672_v12 = vpop.f32.mrb[147].mxu1 }
 0x302   :  { %3567 = vst [vmem:[%s7675_s3 + $0x7e8] sm:$0xff] %v4299_v60  ;;  %v4301_v17 = vadd.f32 %v2672_v12, %v6134_v10 }
 0x303   :  { %3571 = vst [vmem:[%s7675_s3 + $0x808] sm:$0xff] %v4300_v61 }
 0x304   :  { %3572 = vst [vmem:[%s7675_s3 + $0x810] sm:$0xff] %v4301_v17 }
 0x305   :  { %v7148_v0 = vpop.f32.mrb[164].mxu0 }
 0x306   :  { %v2676_v62 = vpop.f32.mrb[148].mxu1  ;;  %v2843_v44 = vpop.f32.mrb[165].mxu0 }
 0x307   :  { %v4302_v3 = vadd.f32 %v2676_v62, %v6128_v55  ;;  %v2678_v46 = vpop.f32.mrb[149].mxu1  ;;  %v7152_v26 = vpop.f32.mrb[166].mxu0 }
 0x308   :  { %v4303_v45 = vadd.f32 %v2678_v46, %v6134_v10  ;;  %v2680_v4 = vpop.f32.mrb[150].mxu1  ;;  %v2846_v31 = vpop.f32.mrb[167].mxu0 }
 0x309   :  { %3576 = vst [vmem:[%s7675_s3 + $0x830] sm:$0xff] %v4302_v3  ;;  %v4304_v1 = vadd.f32 %v2680_v4, %v6128_v55  ;;  %v2682_v27 = vpop.f32.mrb[151].mxu1 }
 0x30a   :  { %3577 = vst [vmem:[%s7675_s3 + $0x838] sm:$0xff] %v4303_v45  ;;  %v4305_v29 = vadd.f32 %v2682_v27, %v6134_v10 }
 0x30b   :  { %3581 = vst [vmem:[%s7675_s3 + $0x858] sm:$0xff] %v4304_v1 }
 0x30c   :  { %3582 = vst [vmem:[%s7675_s3 + $0x860] sm:$0xff] %v4305_v29 }
 0x30d   :  { %v7168_v57 = vpop.f32.mrb[168].mxu0 }
 0x30e   :  { %v2686_v2 = vpop.f32.mrb[152].mxu1  ;;  %v2851_v23 = vpop.f32.mrb[169].mxu0 }
 0x30f   :  { %v4306_v50 = vadd.f32 %v2686_v2, %v6128_v55  ;;  %v2688_v51 = vpop.f32.mrb[153].mxu1  ;;  %v7172_v41 = vpop.f32.mrb[170].mxu0 }
 0x310   :  { %v4307_v52 = vadd.f32 %v2688_v51, %v6134_v10  ;;  %v2690_v53 = vpop.f32.mrb[154].mxu1  ;;  %v2854_v33 = vpop.f32.mrb[171].mxu0 }
 0x311   :  { %3586 = vst [vmem:[%s7675_s3 + $0x880] sm:$0xff] %v4306_v50  ;;  %v4308_v37 = vadd.f32 %v2690_v53, %v6128_v55  ;;  %v2692_v32 = vpop.f32.mrb[155].mxu1 }
 0x312   :  { %3587 = vst [vmem:[%s7675_s3 + $0x888] sm:$0xff] %v4307_v52  ;;  %v4309_v28 = vadd.f32 %v2692_v32, %v6134_v10  ;;  %v271_v32 = vsub.s32 4, %v5661_v58 }
 0x313   :  { %3591 = vst [vmem:[%s7675_s3 + $0x8a8] sm:$0xff] %v4308_v37 }
 0x314   :  { %3592 = vst [vmem:[%s7675_s3 + $0x8b0] sm:$0xff] %v4309_v28 }
 0x315   :  { %v7188_v43 = vpop.f32.mrb[172].mxu0 }
 0x316   :  { %v2696_v40 = vpop.f32.mrb[156].mxu1  ;;  %v2859_v9 = vpop.f32.mrb[173].mxu0 }
 0x317   :  { %v4310_v54 = vadd.f32 %v2696_v40, %v6128_v55  ;;  %v2698_v59 = vpop.f32.mrb[157].mxu1  ;;  %v7192_v8 = vpop.f32.mrb[174].mxu0 }
 0x318   :  { %v4311_v56 = vadd.f32 %v2698_v59, %v6134_v10  ;;  %v2700_v20 = vpop.f32.mrb[158].mxu1  ;;  %v2862_v15 = vpop.f32.mrb[175].mxu0 }
 0x319   :  { %3596 = vst [vmem:[%s7675_s3 + $0x8d0] sm:$0xff] %v4310_v54  ;;  %v4312_v36 = vadd.f32 %v2700_v20, %v6128_v55  ;;  %v2702_v49 = vpop.f32.mrb[159].mxu1  ;;  %v4894_v15 = vld [vmem:[%s7674_s2] sm:$0x1f] }
 0x31a   :  { %3597 = vst [vmem:[%s7675_s3 + $0x8d8] sm:$0xff] %v4311_v56  ;;  %v4313_v19 = vadd.f32 %v2702_v49, %v6134_v10 }
 0x31b   :  { %3601 = vst [vmem:[%s7675_s3 + $0x8f8] sm:$0xff] %v4312_v36 }
 0x31c   :  { %3602 = vst [vmem:[%s7675_s3 + $0x900] sm:$0xff] %v4313_v19  ;;  %v7262_v19 = vrot.slane %v4894_v15, %v271_v32 }
 0x31d   :  { %v7208_v60 = vpop.f32.mrb[176].mxu0 }
 0x31e   :  { %v2706_v39 = vpop.f32.mrb[160].mxu1  ;;  %v2867_v12 = vpop.f32.mrb[177].mxu0 }
 0x31f   :  { %v4314_v63 = vadd.f32 %v2706_v39, %v6128_v55  ;;  %v2708_v61 = vpop.f32.mrb[161].mxu1  ;;  %v7212_v62 = vpop.f32.mrb[178].mxu0 }
 0x320   :  { %v4315_v13 = vadd.f32 %v2708_v61, %v6134_v10  ;;  %v2710_v17 = vpop.f32.mrb[162].mxu1  ;;  %v2870_v44 = vpop.f32.mrb[179].mxu0 }
 0x321   :  { %3606 = vst [vmem:[%s7675_s3 + $0x920] sm:$0xff] %v4314_v63  ;;  %v4316_v3 = vadd.f32 %v2710_v17, %v6128_v55  ;;  %v2712_v46 = vpop.f32.mrb[163].mxu1  ;;  %v2770_v63 = vadd.f32 %v6925_v5, %v7262_v19 }
 0x322   :  { %3607 = vst [vmem:[%s7675_s3 + $0x928] sm:$0xff] %v4315_v13  ;;  %v4317_v45 = vadd.f32 %v2712_v46, %v6134_v10  ;;  %v2773_v46 = vadd.f32 %v6929_v22, %v7262_v19  ;;  %v2794_v22 = vadd.f32 %v7017_v35, %v7262_v19 }
 0x323   :  { %3611 = vst [vmem:[%s7675_s3 + $0x948] sm:$0xff] %v4316_v3 }
 0x324   :  { %3612 = vst [vmem:[%s7675_s3 + $0x950] sm:$0xff] %v4317_v45 }
 0x325   :  { %v7228_v1 = vpop.f32.mrb[180].mxu0 }
 0x326   :  { %v2716_v4 = vpop.f32.mrb[164].mxu1  ;;  %v2875_v29 = vpop.f32.mrb[181].mxu0 }
 0x327   :  { %v4318_v27 = vadd.f32 %v2716_v4, %v6128_v55  ;;  %v2718_v31 = vpop.f32.mrb[165].mxu1  ;;  %v7232_v51 = vpop.f32.mrb[182].mxu0 }
 0x328   :  { %v4319_v2 = vadd.f32 %v2718_v31, %v6134_v10  ;;  %v2720_v50 = vpop.f32.mrb[166].mxu1  ;;  %v2878_v53 = vpop.f32.mrb[183].mxu0  ;;  %v2786_v31 = vadd.f32 %v6987_v18, %v7262_v19 }
 0x329   :  { %3616 = vst [vmem:[%s7675_s3 + $0x970] sm:$0xff] %v4318_v27  ;;  %v4320_v23 = vadd.f32 %v2720_v50, %v6128_v55  ;;  %v2722_v52 = vpop.f32.mrb[167].mxu1  ;;  %v2797_v50 = vadd.f32 %v7021_v6, %v7262_v19 }
 0x32a   :  { %3617 = vst [vmem:[%s7675_s3 + $0x978] sm:$0xff] %v4319_v2  ;;  %v4321_v37 = vadd.f32 %v2722_v52, %v6134_v10 }
 0x32b   :  { %3621 = vst [vmem:[%s7675_s3 + $0x998] sm:$0xff] %v4320_v23 }
 0x32c   :  { %3622 = vst [vmem:[%s7675_s3 + $0x9a0] sm:$0xff] %v4321_v37  ;;  %v2789_v37 = vadd.f32 %v6991_v30, %v7262_v19  ;;  %v2810_v30 = vadd.f32 %v7068_v42, %v7262_v19 }
 0x32d   :  { %v7249_v28 = vpop.f32.mrb[184].mxu0 }
 0x32e   :  { %v2726_v33 = vpop.f32.mrb[168].mxu1  ;;  %v2883_v59 = vpop.f32.mrb[185].mxu0 }
 0x32f   :  { %v4322_v40 = vadd.f32 %v2726_v33, %v6128_v55  ;;  %v2728_v54 = vpop.f32.mrb[169].mxu1  ;;  %v7253_v20 = vpop.f32.mrb[186].mxu0  ;;  %v2802_v59 = vadd.f32 %v7045_v21, %v7262_v19 }
 0x330   :  { %v4323_v9 = vadd.f32 %v2728_v54, %v6134_v10  ;;  %v2730_v56 = vpop.f32.mrb[170].mxu1  ;;  %v2886_v58 = vpop.f32.mrb[187].mxu0 }
 0x331   :  { %3626 = vst [vmem:[%s7675_s3 + $0x9c0] sm:$0xff] %v4322_v40  ;;  %v4324_v36 = vadd.f32 %v2730_v56, %v6128_v55  ;;  %v2732_v49 = vpop.f32.mrb[171].mxu1  ;;  %v2778_v55 = vadd.f32 %v6957_v24, %v7262_v19 }
 0x332   :  { %3627 = vst [vmem:[%s7675_s3 + $0x9c8] sm:$0xff] %v4323_v9  ;;  %v4325_v39 = vadd.f32 %v2732_v49, %v6134_v10  ;;  %v2781_v10 = vadd.f32 %v6961_v25, %v7262_v19 }
 0x333   :  { %3631 = vst [vmem:[%s7675_s3 + $0x9e8] sm:$0xff] %v4324_v36  ;;  %v2813_v36 = vadd.f32 %v7072_v47, %v7262_v19 }
 0x334   :  { %3632 = vst [vmem:[%s7675_s3 + $0x9f0] sm:$0xff] %v4325_v39  ;;  %v2805_v39 = vadd.f32 %v7049_v16, %v7262_v19  ;;  %v2826_v16 = vadd.f32 %v7108_v7, %v7262_v19 }
 0x335   :  { %v7278_v61 = vpop.f32.mrb[188].mxu0 }
 0x336   :  { %v3960_v12 = vpop.f32.mrb[172].mxu1  ;;  %v2891_v17 = vpop.f32.mrb[189].mxu0 }
 0x337   :  { %v3067_v13 = vadd.f32 %v3960_v12, %v2778_v55  ;;  %v3058_v3 = vpop.f32.mrb[173].mxu1  ;;  %v7284_v45 = vpop.f32.mrb[190].mxu0 }
 0x338   :  { %v3059_v44 = vadd.f32 %v3058_v3, %v2770_v63  ;;  %v3961_v24 = vpop.f32.mrb[174].mxu1  ;;  %v2894_v4 = vpop.f32.mrb[191].mxu0 }
 0x339   :  { %3328 = vst.msk [vmem:[%s7675_s3 + $0x70] sm:$0xff] %vm3317_vm1, %v3067_v13  ;;  %v3070_v5 = vadd.f32 %v3961_v24, %v2781_v10  ;;  %v3061_v27 = vpop.f32.mrb[175].mxu1  ;;  %v2818_v13 = vadd.f32 %v7088_v48, %v7262_v19  ;;  %v2821_v4 = vadd.f32 %v7092_v34, %v7262_v19  ;;  %v2842_v34 = vadd.f32 %v7148_v0, %v7262_v19 }
 0x33a   :  { %3318 = vst.msk [vmem:[%s7675_s3 + $0x20] sm:$0xff] %vm3317_vm1, %v3059_v44  ;;  %v3062_v25 = vadd.f32 %v3061_v27, %v2773_v46  ;;  %v2829_v46 = vadd.f32 %v7112_v11, %v7262_v19 }
 0x33b   :  { %3333 = vst.msk [vmem:[%s7675_s3 + $0x98] sm:$0xff] %vm3317_vm1, %v3070_v5 }
 0x33c   :  { %3323 = vst.msk [vmem:[%s7675_s3 + $0x48] sm:$0xff] %vm3317_vm1, %v3062_v25 }
 0x33d   :  { %v7306_v29 = vpop.f32.mrb[192].mxu0 }
 0x33e   :  { %v3964_v2 = vpop.f32.mrb[176].mxu1  ;;  %v2899_v52 = vpop.f32.mrb[193].mxu0 }
 0x33f   :  { %v3083_v23 = vadd.f32 %v3964_v2, %v2794_v22  ;;  %v3074_v53 = vpop.f32.mrb[177].mxu1  ;;  %v7312_v33 = vpop.f32.mrb[194].mxu0  ;;  %v2834_v2 = vadd.f32 %v7128_v38, %v7262_v19  ;;  %v2845_v52 = vadd.f32 %v7152_v26, %v7262_v19 }
 0x340   :  { %v3075_v32 = vadd.f32 %v3074_v53, %v2786_v31  ;;  %v3965_v40 = vpop.f32.mrb[178].mxu1  ;;  %v2902_v35 = vpop.f32.mrb[195].mxu0 }
 0x341   :  { %3348 = vst.msk [vmem:[%s7675_s3 + $0x110] sm:$0xff] %vm3317_vm1, %v3083_v23  ;;  %v3086_v18 = vadd.f32 %v3965_v40, %v2797_v50  ;;  %v3077_v54 = vpop.f32.mrb[179].mxu1  ;;  %v2837_v40 = vadd.f32 %v7132_v14, %v7262_v19  ;;  %v2858_v14 = vadd.f32 %v7188_v43, %v7262_v19 }
 0x342   :  { %3338 = vst.msk [vmem:[%s7675_s3 + $0xc0] sm:$0xff] %vm3317_vm1, %v3075_v32  ;;  %v3078_v6 = vadd.f32 %v3077_v54, %v2789_v37 }
 0x343   :  { %3353 = vst.msk [vmem:[%s7675_s3 + $0x138] sm:$0xff] %vm3317_vm1, %v3086_v18 }
 0x344   :  { %3343 = vst.msk [vmem:[%s7675_s3 + $0xe8] sm:$0xff] %vm3317_vm1, %v3078_v6 }
 0x345   :  { %v7334_v9 = vpop.f32.mrb[196].mxu0 }
 0x346   :  { %v3968_v56 = vpop.f32.mrb[180].mxu1  ;;  %v2907_v58 = vpop.f32.mrb[197].mxu0 }
 0x347   :  { %v3099_v49 = vadd.f32 %v3968_v56, %v2810_v30  ;;  %v3090_v15 = vpop.f32.mrb[181].mxu1  ;;  %v7340_v63 = vpop.f32.mrb[198].mxu0  ;;  %v2850_v30 = vadd.f32 %v7168_v57, %v7262_v19 }
 0x348   :  { %v3091_v55 = vadd.f32 %v3090_v15, %v2802_v59  ;;  %v3969_v12 = vpop.f32.mrb[182].mxu1  ;;  %v2910_v42 = vpop.f32.mrb[199].mxu0 }
 0x349   :  { %3368 = vst.msk [vmem:[%s7675_s3 + $0x1b0] sm:$0xff] %vm3317_vm1, %v3099_v49  ;;  %v3102_v21 = vadd.f32 %v3969_v12, %v2813_v36  ;;  %v3093_v10 = vpop.f32.mrb[183].mxu1  ;;  %v2861_v36 = vadd.f32 %v7192_v8, %v7262_v19 }
 0x34a   :  { %3358 = vst.msk [vmem:[%s7675_s3 + $0x160] sm:$0xff] %vm3317_vm1, %v3091_v55  ;;  %v3094_v47 = vadd.f32 %v3093_v10, %v2805_v39  ;;  %v2853_v39 = vadd.f32 %v7172_v41, %v7262_v19  ;;  %v2874_v41 = vadd.f32 %v7228_v1, %v7262_v19  ;;  %v2866_v10 = vadd.f32 %v7208_v60, %v7262_v19 }
 0x34b   :  { %3373 = vst.msk [vmem:[%s7675_s3 + $0x1d8] sm:$0xff] %vm3317_vm1, %v3102_v21 }
 0x34c   :  { %3363 = vst.msk [vmem:[%s7675_s3 + $0x188] sm:$0xff] %vm3317_vm1, %v3094_v47 }
 0x34d   :  { %v7362_v17 = vpop.f32.mrb[200].mxu0 }
 0x34e   :  { %v3972_v3 = vpop.f32.mrb[184].mxu1  ;;  %v2915_v24 = vpop.f32.mrb[201].mxu0 }
 0x34f   :  { %v3115_v44 = vadd.f32 %v3972_v3, %v2826_v16  ;;  %v3106_v5 = vpop.f32.mrb[185].mxu1  ;;  %v7368_v25 = vpop.f32.mrb[202].mxu0  ;;  %v2869_v24 = vadd.f32 %v7212_v62, %v7262_v19  ;;  %v2890_v62 = vadd.f32 %v7278_v61, %v7262_v19 }
 0x350   :  { %v3107_v27 = vadd.f32 %v3106_v5, %v2818_v13  ;;  %v3973_v22 = vpop.f32.mrb[186].mxu1  ;;  %v2918_v7 = vpop.f32.mrb[203].mxu0  ;;  %v2877_v13 = vadd.f32 %v7232_v51, %v7262_v19 }
 0x351   :  { %3388 = vst.msk [vmem:[%s7675_s3 + $0x250] sm:$0xff] %vm3317_vm1, %v3115_v44  ;;  %v3118_v48 = vadd.f32 %v3973_v22, %v2829_v46  ;;  %v3109_v31 = vpop.f32.mrb[187].mxu1 }
 0x352   :  { %3378 = vst.msk [vmem:[%s7675_s3 + $0x200] sm:$0xff] %vm3317_vm1, %v3107_v27  ;;  %v3110_v11 = vadd.f32 %v3109_v31, %v2821_v4 }
 0x353   :  { %3393 = vst.msk [vmem:[%s7675_s3 + $0x278] sm:$0xff] %vm3317_vm1, %v3118_v48  ;;  %v2882_v48 = vadd.f32 %v7249_v28, %v7262_v19 }
 0x354   :  { %3383 = vst.msk [vmem:[%s7675_s3 + $0x228] sm:$0xff] %vm3317_vm1, %v3110_v11  ;;  %v2893_v11 = vadd.f32 %v7284_v45, %v7262_v19 }
 0x355   :  { %v7390_v50 = vpop.f32.mrb[204].mxu0 }
 0x356   :  { %v3976_v23 = vpop.f32.mrb[188].mxu1  ;;  %v2923_v37 = vpop.f32.mrb[205].mxu0 }
 0x357   :  { %v3131_v53 = vadd.f32 %v3976_v23, %v2842_v34  ;;  %v3122_v32 = vpop.f32.mrb[189].mxu1  ;;  %v7396_v35 = vpop.f32.mrb[206].mxu0 }
 0x358   :  { %v3123_v18 = vadd.f32 %v3122_v32, %v2834_v2  ;;  %v3977_v54 = vpop.f32.mrb[190].mxu1  ;;  %v2926_v0 = vpop.f32.mrb[207].mxu0 }
 0x359   :  { %3408 = vst.msk [vmem:[%s7675_s3 + $0x2f0] sm:$0xff] %vm3317_vm1, %v3131_v53  ;;  %v3134_v38 = vadd.f32 %v3977_v54, %v2845_v52  ;;  %v3125_v6 = vpop.f32.mrb[191].mxu1  ;;  %v2885_v52 = vadd.f32 %v7253_v20, %v7262_v19  ;;  %v2906_v20 = vadd.f32 %v7334_v9, %v7262_v19  ;;  %v2909_v0 = vadd.f32 %v7340_v63, %v7262_v19 }
 0x35a   :  { %3398 = vst.msk [vmem:[%s7675_s3 + $0x2a0] sm:$0xff] %vm3317_vm1, %v3123_v18  ;;  %v3126_v26 = vadd.f32 %v3125_v6, %v2837_v40  ;;  %v2898_v18 = vadd.f32 %v7306_v29, %v7262_v19 }
 0x35b   :  { %3413 = vst.msk [vmem:[%s7675_s3 + $0x318] sm:$0xff] %vm3317_vm1, %v3134_v38 }
 0x35c   :  { %3403 = vst.msk [vmem:[%s7675_s3 + $0x2c8] sm:$0xff] %vm3317_vm1, %v3126_v26 }
 0x35d   :  { %v7418_v59 = vpop.f32.mrb[208].mxu0 }
 0x35e   :  { %v3980_v56 = vpop.f32.mrb[192].mxu1  ;;  %v2931_v58 = vpop.f32.mrb[209].mxu0 }
 0x35f   :  { %v3147_v49 = vadd.f32 %v3980_v56, %v2858_v14  ;;  %v3138_v15 = vpop.f32.mrb[193].mxu1  ;;  %v7424_v12 = vpop.f32.mrb[210].mxu0 }
 0x360   :  { %v3139_v55 = vadd.f32 %v3138_v15, %v2850_v30  ;;  %v3981_v21 = vpop.f32.mrb[194].mxu1  ;;  %v2934_v43 = vpop.f32.mrb[211].mxu0  ;;  %v2901_v30 = vadd.f32 %v7312_v33, %v7262_v19  ;;  %v2922_v33 = vadd.f32 %v7390_v50, %v7262_v19  ;;  %v2914_v15 = vadd.f32 %v7362_v17, %v7262_v19 }
 0x361   :  { %3428 = vst.msk [vmem:[%s7675_s3 + $0x390] sm:$0xff] %vm3317_vm1, %v3147_v49  ;;  %v3150_v57 = vadd.f32 %v3981_v21, %v2861_v36  ;;  %v3141_v42 = vpop.f32.mrb[195].mxu1  ;;  %v2925_v21 = vadd.f32 %v7396_v35, %v7262_v19 }
 0x362   :  { %3418 = vst.msk [vmem:[%s7675_s3 + $0x340] sm:$0xff] %vm3317_vm1, %v3139_v55  ;;  %v3142_v8 = vadd.f32 %v3141_v42, %v2853_v39 }
 0x363   :  { %3433 = vst.msk [vmem:[%s7675_s3 + $0x3b8] sm:$0xff] %vm3317_vm1, %v3150_v57 }
 0x364   :  { %3423 = vst.msk [vmem:[%s7675_s3 + $0x368] sm:$0xff] %vm3317_vm1, %v3142_v8  ;;  %v2917_v8 = vadd.f32 %v7368_v25, %v7262_v19 }
 0x365   :  { %v7446_v47 = vpop.f32.mrb[212].mxu0 }
 0x366   :  { %v3984_v16 = vpop.f32.mrb[196].mxu1  ;;  %v2939_v46 = vpop.f32.mrb[213].mxu0  ;;  %v2938_v25 = vadd.f32 %v7446_v47, %v7262_v19 }
 0x367   :  { %v3163_v3 = vadd.f32 %v3984_v16, %v2874_v41  ;;  %v3154_v44 = vpop.f32.mrb[197].mxu1  ;;  %v7452_v4 = vpop.f32.mrb[214].mxu0 }
 0x368   :  { %v3155_v5 = vadd.f32 %v3154_v44, %v2866_v10  ;;  %v3985_v27 = vpop.f32.mrb[198].mxu1  ;;  %v2942_v1 = vpop.f32.mrb[215].mxu0 }
 0x369   :  { %3448 = vst.msk [vmem:[%s7675_s3 + $0x430] sm:$0xff] %vm3317_vm1, %v3163_v3  ;;  %v3166_v60 = vadd.f32 %v3985_v27, %v2877_v13  ;;  %v3157_v22 = vpop.f32.mrb[199].mxu1  ;;  %v2930_v3 = vadd.f32 %v7418_v59, %v7262_v19  ;;  %v2933_v1 = vadd.f32 %v7424_v12, %v7262_v19 }
 0x36a   :  { %3438 = vst.msk [vmem:[%s7675_s3 + $0x3e0] sm:$0xff] %vm3317_vm1, %v3155_v5  ;;  %v3158_v51 = vadd.f32 %v3157_v22, %v2869_v24  ;;  %v2941_v24 = vadd.f32 %v7452_v4, %v7262_v19 }
 0x36b   :  { %3453 = vst.msk [vmem:[%s7675_s3 + $0x458] sm:$0xff] %vm3317_vm1, %v3166_v60 }
 0x36c   :  { %3443 = vst.msk [vmem:[%s7675_s3 + $0x408] sm:$0xff] %vm3317_vm1, %v3158_v51 }
 0x36d   :  { %v7474_v7 = vpop.f32.mrb[216].mxu0 }
 0x36e   :  { %v3988_v31 = vpop.f32.mrb[200].mxu1  ;;  %v2947_v2 = vpop.f32.mrb[217].mxu0 }
 0x36f   :  { %v3179_v34 = vadd.f32 %v3988_v31, %v2890_v62  ;;  %v3170_v23 = vpop.f32.mrb[201].mxu1  ;;  %v7480_v37 = vpop.f32.mrb[218].mxu0  ;;  %v2946_v31 = vadd.f32 %v7474_v7, %v7262_v19 }
 0x370   :  { %v3171_v53 = vadd.f32 %v3170_v23, %v2882_v48  ;;  %v3989_v32 = vpop.f32.mrb[202].mxu1  ;;  %v2950_v61 = vpop.f32.mrb[219].mxu0 }
 0x371   :  { %3468 = vst.msk [vmem:[%s7675_s3 + $0x4d0] sm:$0xff] %vm3317_vm1, %v3179_v34  ;;  %v3182_v28 = vadd.f32 %v3989_v32, %v2893_v11  ;;  %v3173_v40 = vpop.f32.mrb[203].mxu1  ;;  %v2949_v32 = vadd.f32 %v7480_v37, %v7262_v19 }
 0x372   :  { %3458 = vst.msk [vmem:[%s7675_s3 + $0x480] sm:$0xff] %vm3317_vm1, %v3171_v53  ;;  %v3174_v45 = vadd.f32 %v3173_v40, %v2885_v52 }
 0x373   :  { %3473 = vst.msk [vmem:[%s7675_s3 + $0x4f8] sm:$0xff] %vm3317_vm1, %v3182_v28 }
 0x374   :  { %3463 = vst.msk [vmem:[%s7675_s3 + $0x4a8] sm:$0xff] %vm3317_vm1, %v3174_v45 }
 0x375   :  { %v2953_v54 = vpop.f32.mrb[220].mxu0 }
 0x376   :  { %v3992_v38 = vpop.f32.mrb[204].mxu1  ;;  %v2955_v26 = vpop.f32.mrb[221].mxu0  ;;  %v2954_v12 = vadd.f32 %v2953_v54, %v7262_v19 }
 0x377   :  { %v3195_v6 = vadd.f32 %v3992_v38, %v2906_v20  ;;  %v3186_v14 = vpop.f32.mrb[205].mxu1  ;;  %v2956_v36 = vpop.f32.mrb[222].mxu0 }
 0x378   :  { %v3187_v56 = vadd.f32 %v3186_v14, %v2898_v18  ;;  %v3993_v49 = vpop.f32.mrb[206].mxu1  ;;  %v2958_v9 = vpop.f32.mrb[223].mxu0  ;;  %v2957_v2 = vadd.f32 %v2956_v36, %v7262_v19 }
 0x379   :  { %3488 = vst.msk [vmem:[%s7675_s3 + $0x570] sm:$0xff] %vm3317_vm1, %v3195_v6  ;;  %v3198_v29 = vadd.f32 %v3993_v49, %v2909_v0  ;;  %v3189_v58 = vpop.f32.mrb[207].mxu1 }
 0x37a   :  { %3478 = vst.msk [vmem:[%s7675_s3 + $0x520] sm:$0xff] %vm3317_vm1, %v3187_v56  ;;  %v3190_v63 = vadd.f32 %v3189_v58, %v2901_v30 }
 0x37b   :  { %3493 = vst.msk [vmem:[%s7675_s3 + $0x598] sm:$0xff] %vm3317_vm1, %v3198_v29 }
 0x37c   :  { %3483 = vst.msk [vmem:[%s7675_s3 + $0x548] sm:$0xff] %vm3317_vm1, %v3190_v63 }
 0x37d   :  { %v2961_v39 = vpop.f32.mrb[224].mxu0 }
 0x37e   :  { %v3996_v55 = vpop.f32.mrb[208].mxu1  ;;  %v2963_v43 = vpop.f32.mrb[225].mxu0  ;;  %v2962_v54 = vadd.f32 %v2961_v39, %v7262_v19 }
 0x37f   :  { %v3211_v57 = vadd.f32 %v3996_v55, %v2922_v33  ;;  %v3202_v42 = vpop.f32.mrb[209].mxu1  ;;  %v2964_v10 = vpop.f32.mrb[226].mxu0 }
 0x380   :  { %v3203_v41 = vadd.f32 %v3202_v42, %v2914_v15  ;;  %v3997_v16 = vpop.f32.mrb[210].mxu1  ;;  %v2966_v50 = vpop.f32.mrb[227].mxu0  ;;  %v2965_v56 = vadd.f32 %v2964_v10, %v7262_v19 }
 0x381   :  { %3508 = vst.msk [vmem:[%s7675_s3 + $0x610] sm:$0xff] %vm3317_vm1, %v3211_v57  ;;  %v3214_v17 = vadd.f32 %v3997_v16, %v2925_v21  ;;  %v3205_v13 = vpop.f32.mrb[211].mxu1 }
 0x382   :  { %3498 = vst.msk [vmem:[%s7675_s3 + $0x5c0] sm:$0xff] %vm3317_vm1, %v3203_v41  ;;  %v3206_v35 = vadd.f32 %v3205_v13, %v2917_v8 }
 0x383   :  { %3513 = vst.msk [vmem:[%s7675_s3 + $0x638] sm:$0xff] %vm3317_vm1, %v3214_v17 }
 0x384   :  { %3503 = vst.msk [vmem:[%s7675_s3 + $0x5e8] sm:$0xff] %vm3317_vm1, %v3206_v35 }
 0x385   :  { %v2969_v46 = vpop.f32.mrb[228].mxu0 }
 0x386   :  { %v4000_v44 = vpop.f32.mrb[212].mxu1  ;;  %v2971_v27 = vpop.f32.mrb[229].mxu0  ;;  %v2970_v37 = vadd.f32 %v2969_v46, %v7262_v19 }
 0x387   :  { %v3227_v5 = vadd.f32 %v4000_v44, %v2938_v25  ;;  %v3218_v60 = vpop.f32.mrb[213].mxu1  ;;  %v2972_v51 = vpop.f32.mrb[230].mxu0 }
 0x388   :  { %v3219_v22 = vadd.f32 %v3218_v60, %v2930_v3  ;;  %v4001_v62 = vpop.f32.mrb[214].mxu1  ;;  %v2974_v47 = vpop.f32.mrb[231].mxu0  ;;  %v2973_v6 = vadd.f32 %v2972_v51, %v7262_v19 }
 0x389   :  { %3528 = vst.msk [vmem:[%s7675_s3 + $0x6b0] sm:$0xff] %vm3317_vm1, %v3227_v5  ;;  %v3230_v59 = vadd.f32 %v4001_v62, %v2941_v24  ;;  %v3221_v48 = vpop.f32.mrb[215].mxu1 }
 0x38a   :  { %3518 = vst.msk [vmem:[%s7675_s3 + $0x660] sm:$0xff] %vm3317_vm1, %v3219_v22  ;;  %v3222_v4 = vadd.f32 %v3221_v48, %v2933_v1 }
 0x38b   :  { %3533 = vst.msk [vmem:[%s7675_s3 + $0x6d8] sm:$0xff] %vm3317_vm1, %v3230_v59 }
 0x38c   :  { %3523 = vst.msk [vmem:[%s7675_s3 + $0x688] sm:$0xff] %vm3317_vm1, %v3222_v4 }
 0x38d   :  { %v2977_v11 = vpop.f32.mrb[232].mxu0 }
 0x38e   :  { %v4004_v34 = vpop.f32.mrb[216].mxu1  ;;  %v2979_v52 = vpop.f32.mrb[233].mxu0  ;;  %v2978_v39 = vadd.f32 %v2977_v11, %v7262_v19 }
 0x38f   :  { %v3243_v23 = vadd.f32 %v4004_v34, %v2954_v12  ;;  %v3234_v53 = vpop.f32.mrb[217].mxu1  ;;  %v2980_v61 = vpop.f32.mrb[234].mxu0 }
 0x390   :  { %v3235_v28 = vadd.f32 %v3234_v53, %v2946_v31  ;;  %v4005_v40 = vpop.f32.mrb[218].mxu1  ;;  %v2982_v7 = vpop.f32.mrb[235].mxu0  ;;  %v2981_v41 = vadd.f32 %v2980_v61, %v7262_v19 }
 0x391   :  { %3548 = vst.msk [vmem:[%s7675_s3 + $0x750] sm:$0xff] %vm3317_vm1, %v3243_v23  ;;  %v3246_v45 = vadd.f32 %v4005_v40, %v2957_v2  ;;  %v3237_v20 = vpop.f32.mrb[219].mxu1 }
 0x392   :  { %3538 = vst.msk [vmem:[%s7675_s3 + $0x700] sm:$0xff] %vm3317_vm1, %v3235_v28  ;;  %v3238_v18 = vadd.f32 %v3237_v20, %v2949_v32 }
 0x393   :  { %3553 = vst.msk [vmem:[%s7675_s3 + $0x778] sm:$0xff] %vm3317_vm1, %v3246_v45 }
 0x394   :  { %3543 = vst.msk [vmem:[%s7675_s3 + $0x728] sm:$0xff] %vm3317_vm1, %v3238_v18 }
 0x395   :  { %v2985_v38 = vpop.f32.mrb[236].mxu0 }
 0x396   :  { %v4008_v0 = vpop.f32.mrb[220].mxu1  ;;  %v2987_v14 = vpop.f32.mrb[237].mxu0  ;;  %v2986_v15 = vadd.f32 %v2985_v38, %v7262_v19 }
 0x397   :  { %v3259_v26 = vadd.f32 %v4008_v0, %v2970_v37  ;;  %v3250_v30 = vpop.f32.mrb[221].mxu1  ;;  %v2988_v49 = vpop.f32.mrb[238].mxu0 }
 0x398   :  { %v3251_v36 = vadd.f32 %v3250_v30, %v2962_v54  ;;  %v4009_v29 = vpop.f32.mrb[222].mxu1  ;;  %v2990_v58 = vpop.f32.mrb[239].mxu0  ;;  %v2989_v57 = vadd.f32 %v2988_v49, %v7262_v19 }
 0x399   :  { %3568 = vst.msk [vmem:[%s7675_s3 + $0x7f0] sm:$0xff] %vm3317_vm1, %v3259_v26  ;;  %v3262_v9 = vadd.f32 %v4009_v29, %v2973_v6  ;;  %v3253_v63 = vpop.f32.mrb[223].mxu1 }
 0x39a   :  { %3558 = vst.msk [vmem:[%s7675_s3 + $0x7a0] sm:$0xff] %vm3317_vm1, %v3251_v36  ;;  %v3254_v33 = vadd.f32 %v3253_v63, %v2965_v56 }
 0x39b   :  { %3573 = vst.msk [vmem:[%s7675_s3 + $0x818] sm:$0xff] %vm3317_vm1, %v3262_v9 }
 0x39c   :  { %3563 = vst.msk [vmem:[%s7675_s3 + $0x7c8] sm:$0xff] %vm3317_vm1, %v3254_v33 }
 0x39d   :  { %v2993_v55 = vpop.f32.mrb[240].mxu0 }
 0x39e   :  { %v4012_v21 = vpop.f32.mrb[224].mxu1  ;;  %v2995_v42 = vpop.f32.mrb[241].mxu0  ;;  %v2994_v3 = vadd.f32 %v2993_v55, %v7262_v19 }
 0x39f   :  { %v3275_v43 = vadd.f32 %v4012_v21, %v2986_v15  ;;  %v3266_v8 = vpop.f32.mrb[225].mxu1  ;;  %v2996_v16 = vpop.f32.mrb[242].mxu0 }
 0x3a0   :  { %v3267_v10 = vadd.f32 %v3266_v8, %v2978_v39  ;;  %v4013_v17 = vpop.f32.mrb[226].mxu1  ;;  %v2998_v13 = vpop.f32.mrb[243].mxu0  ;;  %v2997_v60 = vadd.f32 %v2996_v16, %v7262_v19 }
 0x3a1   :  { %3588 = vst.msk [vmem:[%s7675_s3 + $0x890] sm:$0xff] %vm3317_vm1, %v3275_v43  ;;  %v3278_v50 = vadd.f32 %v4013_v17, %v2989_v57  ;;  %v3269_v35 = vpop.f32.mrb[227].mxu1 }
 0x3a2   :  { %3578 = vst.msk [vmem:[%s7675_s3 + $0x840] sm:$0xff] %vm3317_vm1, %v3267_v10  ;;  %v3270_v25 = vadd.f32 %v3269_v35, %v2981_v41 }
 0x3a3   :  { %3593 = vst.msk [vmem:[%s7675_s3 + $0x8b8] sm:$0xff] %vm3317_vm1, %v3278_v50 }
 0x3a4   :  { %3583 = vst.msk [vmem:[%s7675_s3 + $0x868] sm:$0xff] %vm3317_vm1, %v3270_v25 }
 0x3a5   :  { %v3001_v46 = vpop.f32.mrb[244].mxu0 }
 0x3a6   :  { %v4016_v44 = vpop.f32.mrb[228].mxu1  ;;  %v3002_v24 = vadd.f32 %v3001_v46, %v7262_v19  ;;  %v3003_v5 = vpop.f32.mrb[245].mxu0 }
 0x3a7   :  { %v3282_v27 = vpop.f32.mrb[229].mxu1  ;;  %v3004_v22 = vpop.f32.mrb[246].mxu0 }
 0x3a8   :  { %v3283_v1 = vadd.f32 %v3282_v27, %v2994_v3  ;;  %v4017_v51 = vpop.f32.mrb[230].mxu1  ;;  %v3291_v62 = vadd.f32 %v4016_v44, %v3002_v24  ;;  %v3005_v59 = vadd.f32 %v3004_v22, %v7262_v19  ;;  %v3006_v47 = vpop.f32.mrb[247].mxu0 }
 0x3a9   :  { %v3285_v48 = vpop.f32.mrb[231].mxu1 }
 0x3aa   :  { %3598 = vst.msk [vmem:[%s7675_s3 + $0x8e0] sm:$0xff] %vm3317_vm1, %v3283_v1  ;;  %v3286_v4 = vadd.f32 %v3285_v48, %v2997_v60  ;;  %3608 = vst.msk [vmem:[%s7675_s3 + $0x930] sm:$0xff] %vm3317_vm1, %v3291_v62  ;;  %v3294_v12 = vadd.f32 %v4017_v51, %v3005_v59 }
 0x3ac   :  { %3603 = vst.msk [vmem:[%s7675_s3 + $0x908] sm:$0xff] %vm3317_vm1, %v3286_v4  ;;  %3613 = vst.msk [vmem:[%s7675_s3 + $0x958] sm:$0xff] %vm3317_vm1, %v3294_v12 }
 0x3ad   :  { %v3009_v31 = vpop.f32.mrb[248].mxu0 }
 0x3ae   :  { %v4020_v11 = vpop.f32.mrb[232].mxu1  ;;  %v3010_v34 = vadd.f32 %v3009_v31, %v7262_v19  ;;  %v3011_v2 = vpop.f32.mrb[249].mxu0 }
 0x3af   :  { %v3298_v23 = vpop.f32.mrb[233].mxu1  ;;  %v3012_v52 = vpop.f32.mrb[250].mxu0 }
 0x3b0   :  { %v4021_v53 = vpop.f32.mrb[234].mxu1  ;;  %v3013_v32 = vadd.f32 %v3012_v52, %v7262_v19  ;;  %v3299_v28 = vadd.f32 %v3298_v23, %v3010_v34  ;;  %v3014_v61 = vpop.f32.mrb[251].mxu0 }
 0x3b1   :  { %v3301_v40 = vpop.f32.mrb[235].mxu1 }
 0x3b2   :  { %3618 = vst.msk [vmem:[%s7675_s3 + $0x980] sm:$0xff] %vm3317_vm1, %v3299_v28  ;;  %v3302_v45 = vadd.f32 %v3301_v40, %v3013_v32 }
 0x3b4   :  { %3623 = vst.msk [vmem:[%s7675_s3 + $0x9a8] sm:$0xff] %vm3317_vm1, %v3302_v45 }
 0x3b5   :  { %v3017_v7 = vpop.f32.mrb[252].mxu0 }
 0x3b6   :  { %v3018_v20 = vadd.f32 %v3017_v7, %v7262_v19  ;;  %v3019_v18 = vpop.f32.mrb[253].mxu0 }
 0x3b7   :  { %v3020_v37 = vpop.f32.mrb[254].mxu0 }
 0x3b8   :  { %v3307_v54 = vadd.f32 %v4020_v11, %v3018_v20  ;;  %v3021_v38 = vadd.f32 %v3020_v37, %v7262_v19  ;;  %v3022_v0 = vpop.f32.mrb[255].mxu0 }
 0x3ba   :  { %3628 = vst.msk [vmem:[%s7675_s3 + $0x9d0] sm:$0xff] %vm3317_vm1, %v3307_v54  ;;  %v3310_v6 = vadd.f32 %v4021_v53, %v3021_v38 }
 0x3bc   :  { %3633 = vst.msk [vmem:[%s7675_s3 + $0x9f8] sm:$0xff] %vm3317_vm1, %v3310_v6 }

// kernel: _attention_forward.6
= control target key start
LH: loop header
LB: loop body
LE: loop exit
PB: predicated region body
PF: predicated region fallthrough
CT: control target
= control target key end

     0   :  { %s2522_s12 = smov 0   ;;  %s2524_s13 = smov 0   ;;  %s3295_s0 = inlined_call_operand.vmem [shape: bf16[2,256,96], index: 0, kind: input, shape index: {}]   ;;  %s3296_s1 = inlined_call_operand.vmem [shape: bf16[2,256,96], index: 1, kind: input, shape index: {}]   ;;  %s3297_s2 = inlined_call_operand.vmem [shape: bf16[2,256,288], index: 2, kind: input, shape index: {}]   ;;  %s3298_s3 = inlined_call_operand.vmem [shape: f32[2,256,288], index: 3, kind: output, shape index: {}]  }
   0x1   :  { %s2526_s14 = smov 0   ;;  %s2528_s15 = smov 0  }
   0x2   :  { %s2530_s16 = smov 0   ;;  %s2532_s17 = smov 0  }
   0x3   :  { %s2534_s18 = smov 0  }
   0x4 LB: > { %s25_s19 = sadd.s32 1, %s2484_s15  ;;  %s28_s20 = sadd.s32 1, %s2488_s16  ;;  %s2496_s18 = sphi %s2534_s18, %s13_s18   ;;  %s2492_s17 = sphi %s2532_s17, %s3308_s17   ;;  %s2488_s16 = sphi %s2530_s16, %s3307_s16   ;;  %s2484_s15 = sphi %s2528_s15, %s3306_s15   ;;  %s2480_s14 = sphi %s2526_s14, %s3305_s14   ;;  %s2476_s13 = sphi %s2524_s13, %s3304_s13   ;;  %s2472_s12 = sphi %s2522_s12, %s3303_s12  }
   0x5   : > { %p26_p0 = scmp.ge.s32.totalorder %s25_s19, 2  ;;  %p2048_p1 = scmp.ge.s32.totalorder %s2496_s18, 1 }
   0x6   : > { %p200_p2 = scmp.lt.s32.totalorder %s2496_s18, 9  ;;  %s32_s21 = sadd.s32 1, %s2492_s17 }
   0x7   : > { %s3310_s19 = smov (%p26_p0, %s25_s19), 0  ;;  %s3312_s20 = smov (!%p26_p0, %s28_s20), %s2488_s16 }
   0x8   : > { %p201_p3 = pnand %p2048_p1, %p200_p2  ;;  %p30_p4 = scmp.ge.s32.totalorder %s3312_s20, 2 }
   0x9   : > { %s2049_s22 = sshll.u32 (!%p201_p3), %s2476_s13, 4  ;;  %p253_p6 = scmp.lt.s32.totalorder (!%p201_p3), %s2480_s14, 1 }
   0xa   : > { %s3314_s20 = smov (%p30_p4, %s3312_s20), 0  ;;  %s3316_s21 = smov (!%p30_p4, %s32_s21), %s2492_s17 }
   0xb   : > { %3299 = sst [smem:[#allocation5_spill]] %s3314_s20  ;;  %p34_p5 = scmp.ge.s32.totalorder %s3316_s21, 2 }
   0xc   : > { %204 = sbr.rel (%p201_p3) target bundleno = 1061 (0x425), region = 32  ;;  %p255_p7 = scmp.lt.s32.totalorder (!%p201_p3), %s2049_s22, 31 }
   0xd   : > { %s3318_s21 = smov (%p34_p5, %s3316_s21), 0  ;;  %s2052_s23 = sshll.u32 (!%p201_p3), %s2472_s12, 4 }
   0xe   : > { %3300 = sst [smem:[#allocation6_spill]] %s3318_s21  ;;  %p265_p8 = scmp.lt.s32.totalorder (!%p201_p3), %s2052_s23, 31 }
   0xf   : > { %p2059_p9 = scmp.ne.s32.totalorder (!%p201_p3), %s2472_s12, 0 }
  0x13   : > { %s3320_s14 = smov (!%p253_p6, %s2480_s14), 1  ;;  %s3322_s22 = smov (!%p255_p7, %s2049_s22), 31 }
  0x14   : > { %s2050_s24 = sshll.u32 %s3320_s14, 5  ;;  %s2232_s26 = smul.u32 96, %s3320_s14  ;;  %vm299_vm0 = vcmask (!%p2059_p9), 7168   ;;  %vm334_vm1 = vcmask (!%p2059_p9), 261120   ;;  %v2498_v0 = vmov (!%p2059_p9), -inf   ;;  %v2499_v1 = vmov (!%p2059_p9), 0.0  }
  0x15   : > { %s258_s25 = sadd.s32 %s2050_s24, %s3322_s22  ;;  %s2233_s28 = smul.u32 3, %s3322_s22  ;;  %300 = vst.msk [vmem:[#allocation2] sm:$0xff] (!%p2059_p9), %vm299_vm0, %v2498_v0  ;;  %301 = vst.msk [vmem:[#allocation2 + $0x8] sm:$0xff] (!%p2059_p9), %vm299_vm0, %v2498_v0 }
  0x16   : > { %s2051_s27 = sshll.u32 %s258_s25, 2  ;;  %s3324_s23 = smov (!%p265_p8, %s2052_s23), 31  ;;  %302 = vst.msk [vmem:[#allocation2 + $0x10] sm:$0xff] (!%p2059_p9), %vm299_vm0, %v2498_v0  ;;  %303 = vst.msk [vmem:[#allocation2 + $0x18] sm:$0xff] (!%p2059_p9), %vm299_vm0, %v2498_v0 }
  0x17   : > { %s2570_s4 = scalar_lea.vmem %s3295_s0, %s2051_s27  ;;  %s290_s5 = sadd.s32 %s2233_s28, %s2232_s26  ;;  %304 = vst.msk [vmem:[#allocation2 + $0x20] sm:$0xff] (!%p2059_p9), %vm299_vm0, %v2498_v0  ;;  %305 = vst.msk [vmem:[#allocation2 + $0x28] sm:$0xff] (!%p2059_p9), %vm299_vm0, %v2498_v0 }
  0x18   : > { %s268_s6 = sadd.s32 %s2050_s24, %s3324_s23  ;;  %s2231_s7 = smul.u32 3, %s3324_s23  ;;  %306 = vst.msk [vmem:[#allocation2 + $0x30] sm:$0xff] (!%p2059_p9), %vm299_vm0, %v2498_v0  ;;  %307 = vst.msk [vmem:[#allocation2 + $0x38] sm:$0xff] (!%p2059_p9), %vm299_vm0, %v2498_v0 }
  0x19   : > { %s2054_s8 = sshll.u32 %s268_s6, 2  ;;  %s2058_s9 = sshll.u32 %s290_s5, 3  ;;  %308 = vst.msk [vmem:[#allocation2 + $0x40] sm:$0xff] (!%p2059_p9), %vm299_vm0, %v2498_v0  ;;  %309 = vst.msk [vmem:[#allocation2 + $0x48] sm:$0xff] (!%p2059_p9), %vm299_vm0, %v2498_v0 }
  0x1a   : > { %s2575_s13 = scalar_lea.vmem %s3296_s1, %s2054_s8  ;;  %s279_s21 = sadd.s32 %s2232_s26, %s2231_s7  ;;  %310 = vst.msk [vmem:[#allocation2 + $0x50] sm:$0xff] (!%p2059_p9), %vm299_vm0, %v2498_v0  ;;  %311 = vst.msk [vmem:[#allocation2 + $0x58] sm:$0xff] (!%p2059_p9), %vm299_vm0, %v2498_v0 }
  0x1b   : > { %s2056_s14 = sshll.u32 %s279_s21, 2  ;;  %s2580_s20 = scalar_lea.vmem %s3298_s3, %s2058_s9  ;;  %312 = vst.msk [vmem:[#allocation2 + $0x60] sm:$0xff] (!%p2059_p9), %vm299_vm0, %v2498_v0  ;;  %313 = vst.msk [vmem:[#allocation2 + $0x68] sm:$0xff] (!%p2059_p9), %vm299_vm0, %v2498_v0 }
  0x1c   : > { %s2585_s28 = scalar_lea.vmem %s3297_s2, %s2056_s14  ;;  %298 = sbr.rel (%p2059_p9) target bundleno = 61 (0x3d), region = 36  ;;  %314 = vst.msk [vmem:[#allocation2 + $0x70] sm:$0xff] (!%p2059_p9), %vm299_vm0, %v2498_v0  ;;  %315 = vst.msk [vmem:[#allocation2 + $0x78] sm:$0xff] (!%p2059_p9), %vm299_vm0, %v2498_v0 }
  0x1d   : > { %316 = vst.msk [vmem:[#allocation3] sm:$0xff] (!%p2059_p9), %vm299_vm0, %v2499_v1  ;;  %317 = vst.msk [vmem:[#allocation3 + $0x8] sm:$0xff] (!%p2059_p9), %vm299_vm0, %v2499_v1 }
  0x1e   : > { %318 = vst.msk [vmem:[#allocation3 + $0x10] sm:$0xff] (!%p2059_p9), %vm299_vm0, %v2499_v1  ;;  %319 = vst.msk [vmem:[#allocation3 + $0x18] sm:$0xff] (!%p2059_p9), %vm299_vm0, %v2499_v1 }
  0x1f   : > { %320 = vst.msk [vmem:[#allocation3 + $0x20] sm:$0xff] (!%p2059_p9), %vm299_vm0, %v2499_v1  ;;  %321 = vst.msk [vmem:[#allocation3 + $0x28] sm:$0xff] (!%p2059_p9), %vm299_vm0, %v2499_v1 }
  0x20   : > { %322 = vst.msk [vmem:[#allocation3 + $0x30] sm:$0xff] (!%p2059_p9), %vm299_vm0, %v2499_v1  ;;  %323 = vst.msk [vmem:[#allocation3 + $0x38] sm:$0xff] (!%p2059_p9), %vm299_vm0, %v2499_v1 }
  0x21   : > { %324 = vst.msk [vmem:[#allocation3 + $0x40] sm:$0xff] (!%p2059_p9), %vm299_vm0, %v2499_v1  ;;  %325 = vst.msk [vmem:[#allocation3 + $0x48] sm:$0xff] (!%p2059_p9), %vm299_vm0, %v2499_v1 }
  0x22   : > { %326 = vst.msk [vmem:[#allocation3 + $0x50] sm:$0xff] (!%p2059_p9), %vm299_vm0, %v2499_v1  ;;  %327 = vst.msk [vmem:[#allocation3 + $0x58] sm:$0xff] (!%p2059_p9), %vm299_vm0, %v2499_v1 }
  0x23   : > { %328 = vst.msk [vmem:[#allocation3 + $0x60] sm:$0xff] %vm299_vm0, %v2499_v1  ;;  %329 = vst.msk [vmem:[#allocation3 + $0x68] sm:$0xff] %vm299_vm0, %v2499_v1 }
  0x24   : > { %330 = vst.msk [vmem:[#allocation3 + $0x70] sm:$0xff] %vm299_vm0, %v2499_v1  ;;  %331 = vst.msk [vmem:[#allocation3 + $0x78] sm:$0xff] %vm299_vm0, %v2499_v1 }
  0x25   : > { %332 = vst [vmem:[#allocation4] sm:$0xff] %v2499_v1  ;;  %333 = vst [vmem:[#allocation4 + $0x8] sm:$0xff] %v2499_v1 }
  0x26   : > { %336 = vst [vmem:[#allocation4 + $0x18] sm:$0xff] %v2499_v1  ;;  %337 = vst [vmem:[#allocation4 + $0x20] sm:$0xff] %v2499_v1 }
  0x27   : > { %339 = vst [vmem:[#allocation4 + $0x30] sm:$0xff] %v2499_v1  ;;  %340 = vst [vmem:[#allocation4 + $0x38] sm:$0xff] %v2499_v1 }
  0x28   : > { %342 = vst [vmem:[#allocation4 + $0x48] sm:$0xff] %v2499_v1  ;;  %343 = vst [vmem:[#allocation4 + $0x50] sm:$0xff] %v2499_v1 }
  0x29   : > { %345 = vst [vmem:[#allocation4 + $0x60] sm:$0xff] %v2499_v1  ;;  %346 = vst [vmem:[#allocation4 + $0x68] sm:$0xff] %v2499_v1 }
  0x2a   : > { %348 = vst [vmem:[#allocation4 + $0x78] sm:$0xff] %v2499_v1  ;;  %349 = vst [vmem:[#allocation4 + $0x80] sm:$0xff] %v2499_v1 }
  0x2b   : > { %351 = vst [vmem:[#allocation4 + $0x90] sm:$0xff] %v2499_v1  ;;  %352 = vst [vmem:[#allocation4 + $0x98] sm:$0xff] %v2499_v1 }
  0x2c   : > { %354 = vst [vmem:[#allocation4 + $0xa8] sm:$0xff] %v2499_v1  ;;  %355 = vst [vmem:[#allocation4 + $0xb0] sm:$0xff] %v2499_v1 }
  0x2d   : > { %357 = vst [vmem:[#allocation4 + $0xc0] sm:$0xff] %v2499_v1  ;;  %358 = vst [vmem:[#allocation4 + $0xc8] sm:$0xff] %v2499_v1 }
  0x2e   : > { %360 = vst [vmem:[#allocation4 + $0xd8] sm:$0xff] %v2499_v1  ;;  %361 = vst [vmem:[#allocation4 + $0xe0] sm:$0xff] %v2499_v1 }
  0x2f   : > { %363 = vst [vmem:[#allocation4 + $0xf0] sm:$0xff] %v2499_v1  ;;  %364 = vst [vmem:[#allocation4 + $0xf8] sm:$0xff] %v2499_v1 }
  0x30   : > { %366 = vst [vmem:[#allocation4 + $0x108] sm:$0xff] %v2499_v1  ;;  %367 = vst [vmem:[#allocation4 + $0x110] sm:$0xff] %v2499_v1 }
  0x31   : > { %369 = vst [vmem:[#allocation4 + $0x120] sm:$0xff] %v2499_v1  ;;  %370 = vst [vmem:[#allocation4 + $0x128] sm:$0xff] %v2499_v1 }
  0x32   : > { %372 = vst [vmem:[#allocation4 + $0x138] sm:$0xff] %v2499_v1  ;;  %373 = vst [vmem:[#allocation4 + $0x140] sm:$0xff] %v2499_v1 }
  0x33   : > { %375 = vst [vmem:[#allocation4 + $0x150] sm:$0xff] %v2499_v1  ;;  %376 = vst [vmem:[#allocation4 + $0x158] sm:$0xff] %v2499_v1 }
  0x34   : > { %378 = vst [vmem:[#allocation4 + $0x168] sm:$0xff] %v2499_v1  ;;  %379 = vst [vmem:[#allocation4 + $0x170] sm:$0xff] %v2499_v1 }
  0x35   : > { %335 = vst.msk [vmem:[#allocation4 + $0x10] sm:$0xff] %vm334_vm1, %v2499_v1  ;;  %338 = vst.msk [vmem:[#allocation4 + $0x28] sm:$0xff] %vm334_vm1, %v2499_v1 }
  0x36   : > { %341 = vst.msk [vmem:[#allocation4 + $0x40] sm:$0xff] %vm334_vm1, %v2499_v1  ;;  %344 = vst.msk [vmem:[#allocation4 + $0x58] sm:$0xff] %vm334_vm1, %v2499_v1 }
  0x37   : > { %347 = vst.msk [vmem:[#allocation4 + $0x70] sm:$0xff] %vm334_vm1, %v2499_v1  ;;  %350 = vst.msk [vmem:[#allocation4 + $0x88] sm:$0xff] %vm334_vm1, %v2499_v1 }
  0x38   : > { %353 = vst.msk [vmem:[#allocation4 + $0xa0] sm:$0xff] %vm334_vm1, %v2499_v1  ;;  %356 = vst.msk [vmem:[#allocation4 + $0xb8] sm:$0xff] %vm334_vm1, %v2499_v1 }
  0x39   : > { %359 = vst.msk [vmem:[#allocation4 + $0xd0] sm:$0xff] %vm334_vm1, %v2499_v1  ;;  %362 = vst.msk [vmem:[#allocation4 + $0xe8] sm:$0xff] %vm334_vm1, %v2499_v1 }
  0x3a   : > { %365 = vst.msk [vmem:[#allocation4 + $0x100] sm:$0xff] %vm334_vm1, %v2499_v1  ;;  %368 = vst.msk [vmem:[#allocation4 + $0x118] sm:$0xff] %vm334_vm1, %v2499_v1 }
  0x3b   : > { %371 = vst.msk [vmem:[#allocation4 + $0x130] sm:$0xff] %vm334_vm1, %v2499_v1  ;;  %374 = vst.msk [vmem:[#allocation4 + $0x148] sm:$0xff] %vm334_vm1, %v2499_v1 }
  0x3c   : > { %377 = vst.msk [vmem:[#allocation4 + $0x160] sm:$0xff] %vm334_vm1, %v2499_v1  ;;  %380 = vst.msk [vmem:[#allocation4 + $0x178] sm:$0xff] %vm334_vm1, %v2499_v1 }
  0x3d PF: > { %v2296_v2 = vld [vmem:[%s2575_s13] sm:$0xff]   ;;  %vm493_vm2 = vcmask 785408   ;;  %v2297_v3 = vld [vmem:[%s2575_s13 + $0x8] sm:$0xff]   ;;  %v2298_v5 = vld [vmem:[%s2575_s13 + $0x10] sm:$0xff]   ;;  %v2500_v36 = vmov 0   ;;  %vm959_vm3 = vcmask 7168  }
  0x3e   : > { %2223 = vmatprep.subr.msk.bf16.mxu0 %vm493_vm2, %v2296_v2  ;;  %v519_v4 = vsel %vm493_vm2, %v2296_v2, 0  ;;  %v522_v6 = vsel %vm493_vm2, %v2297_v3, 0  ;;  %v2304_v7 = vld [vmem:[%s2570_s4] sm:$0xff]   ;;  %v2299_v8 = vld [vmem:[%s2575_s13 + $0x18] sm:$0xff]   ;;  %v525_v9 = vsel %vm493_vm2, %v2298_v5, 0  ;;  %v2301_v13 = vld [vmem:[%s2575_s13 + $0x28] sm:$0xff]   ;;  %2294 = vset.pattern.permute.xlu0 %v2500_v36 }
  0x3f   : > { %2144 = vmatpush3.bf16.xpose.msra.mxu0 %v519_v4  ;;  %2159 = vmatprep.mubr.msk.bf16.mxu0 %vm493_vm2, %v2304_v7  ;;  %v2300_v10 = vld [vmem:[%s2575_s13 + $0x20] sm:$0xff]   ;;  %v528_v11 = vsel %vm493_vm2, %v2299_v8, 0  ;;  %v534_v14 = vsel %vm493_vm2, %v2301_v13, 0  ;;  %v2302_v15 = vld [vmem:[%s2575_s13 + $0x30] sm:$0xff]   ;;  %v2303_v17 = vld [vmem:[%s2575_s13 + $0x38] sm:$0xff]   ;;  %vm1580_vm4 = vcmask 261120  }
  0x40   : > { %2224 = vmatprep.subr.msk.bf16.mxu0 %vm493_vm2, %v2297_v3  ;;  %v531_v12 = vsel %vm493_vm2, %v2300_v10, 0  ;;  %v537_v16 = vsel %vm493_vm2, %v2302_v15, 0  ;;  %v540_v18 = vsel %vm493_vm2, %v2303_v17, 0  ;;  %v2305_v19 = vld [vmem:[%s2570_s4 + $0x8] sm:$0xff]   ;;  %v2306_v20 = vld [vmem:[%s2570_s4 + $0x10] sm:$0xff]   ;;  %v2307_v21 = vld [vmem:[%s2570_s4 + $0x18] sm:$0xff]   ;;  %2295 = vset.pattern.permute.xlu1 %v2500_v36 }
  0x41   : > { %v2308_v22 = vld [vmem:[%s2570_s4 + $0x20] sm:$0xff]   ;;  %v2309_v23 = vld [vmem:[%s2570_s4 + $0x28] sm:$0xff]   ;;  %v2310_v24 = vld [vmem:[%s2570_s4 + $0x30] sm:$0xff]   ;;  %1352 = vmatprep.mubr.bf16.mxu1 %v2500_v36  ;;  %p2108_p10 = scmp.ne.s32.totalorder %s2472_s12, 1 }
  0x42   : > { %v2311_v25 = vld [vmem:[%s2570_s4 + $0x38] sm:$0xff]   ;;  %v2312_v43 = vld [vmem:[%s2585_s28 + $0x4] ss:$12 sps:$4 sm:$0xff]   ;;  %v2314_v44 = vld [vmem:[%s2585_s28] ss:$12 sps:$4 sm:$0xff]  }
  0x43   : > { %v2315_v45 = vld [vmem:[%s2585_s28 + $0x1c] ss:$12 sps:$4 sm:$0xff]   ;;  %1320 = vmatprep.subr.bf16.mxu1 %v2312_v43  ;;  %v2317_v47 = vld [vmem:[%s2585_s28 + $0x18] ss:$12 sps:$4 sm:$0xff]   ;;  %v2318_v48 = vld [vmem:[%s2585_s28 + $0x34] ss:$12 sps:$4 sm:$0xff]  }
  0x44   : > { %v2795_v46 = vld [vmem:[%s2585_s28 + $0x8] ss:$12 sps:$4 sm:$0xff]   ;;  %1321 = vmatpush1.bf16.msra.mxu1 %v2314_v44  ;;  %v2320_v49 = vld [vmem:[%s2585_s28 + $0x30] ss:$12 sps:$4 sm:$0xff]   ;;  %v2804_v51 = vld [vmem:[#allocation2] sm:$0xff] }
  0x45   : > { %1322 = vmatprep.subr.bf16.mxu1 %v2315_v45  ;;  %v2802_v50 = vld [vmem:[#allocation2 + $0x10] sm:$0xff]  ;;  %v2812_v56 = vld [vmem:[#allocation2 + $0x18] sm:$0xff]  ;;  %v2816_v57 = vld [vmem:[#allocation2 + $0x8] sm:$0xff] }
  0x46   : > { %v2322_v58 = vld [vmem:[%s2585_s28 + $0x4c] ss:$12 sps:$4 sm:$0xff]   ;;  %v2324_v61 = vld [vmem:[%s2585_s28 + $0x48] ss:$12 sps:$4 sm:$0xff]   ;;  %v2836_v1 = vld [vmem:[#allocation2 + $0x20] sm:$0xff] }
  0x47   : > { %2146 = vmatpush3.bf16.xpose.msra.mxu0 %v522_v6  ;;  %v2820_v59 = vld [vmem:[%s2585_s28 + $0x20] ss:$12 sps:$4 sm:$0xff]   ;;  %v2326_v2 = vld [vmem:[%s2585_s28 + $0x64] ss:$12 sps:$4 sm:$0xff]  }
  0x48   : > { %2225 = vmatprep.subr.msk.bf16.mxu0 %vm493_vm2, %v2298_v5  ;;  %1323 = vmatpush1.bf16.msra.mxu1 %v2317_v47  ;;  %v2840_v3 = vld [vmem:[%s2585_s28 + $0x38] ss:$12 sps:$4 sm:$0xff]   ;;  %v2328_v4 = vld [vmem:[%s2585_s28 + $0x60] ss:$12 sps:$4 sm:$0xff]   ;;  %v2897_v44 = vld [vmem:[#allocation2 + $0x50] sm:$0xff] }
  0x49   : > { %1324 = vmatprep.subr.bf16.mxu1 %v2318_v48  ;;  %v2846_v5 = vld [vmem:[#allocation2 + $0x28] sm:$0xff] }
  0x4a   : > { %v2338_v45 = vld [vmem:[%s2585_s28 + $0xac] ss:$12 sps:$4 sm:$0xff]  }
  0x4b   : > { %v2901_v47 = vld [vmem:[%s2585_s28 + $0x80] ss:$12 sps:$4 sm:$0xff]  }
  0x4c   : > { %1325 = vmatpush1.bf16.msra.mxu1 %v2320_v49  ;;  %v2340_v49 = vld [vmem:[%s2585_s28 + $0xa8] ss:$12 sps:$4 sm:$0xff]  }
  0x4d   : > { %1326 = vmatprep.subr.bf16.mxu1 %v2322_v58 }
  0x4f   : > { %2148 = vmatpush3.bf16.xpose.msra.mxu0 %v525_v9  ;;  %v2853_v9 = vld [vmem:[#allocation2 + $0x30] sm:$0xff] }
  0x50   : > { %2226 = vmatprep.subr.msk.bf16.mxu0 %vm493_vm2, %v2299_v8  ;;  %1327 = vmatpush1.bf16.msra.mxu1 %v2324_v61 }
  0x51   : > { %1328 = vmatprep.subr.bf16.mxu1 %v2326_v2  ;;  %v2925_v2 = vld [vmem:[%s2585_s28 + $0x98] ss:$12 sps:$4 sm:$0xff]  }
  0x54   : > { %1329 = vmatpush1.bf16.msra.mxu1 %v2328_v4 }
  0x57   : > { %2150 = vmatpush3.bf16.xpose.msra.mxu0 %v528_v11  ;;  %v2857_v11 = vld [vmem:[%s2585_s28 + $0x50] ss:$12 sps:$4 sm:$0xff]  }
  0x58   : > { %2227 = vmatprep.subr.msk.bf16.mxu0 %vm493_vm2, %v2300_v10  ;;  %v2330_v10 = vld [vmem:[%s2585_s28 + $0x7c] ss:$12 sps:$4 sm:$0xff]  }
  0x59   : > { %1330 = vmatprep.subr.bf16.mxu1 %v2330_v10 }
  0x5f   : > { %2152 = vmatpush3.bf16.xpose.msra.mxu0 %v531_v12 }
  0x60   : > { %2228 = vmatprep.subr.msk.bf16.mxu0 %vm493_vm2, %v2301_v13  ;;  %v2332_v13 = vld [vmem:[%s2585_s28 + $0x78] ss:$12 sps:$4 sm:$0xff]  }
  0x61   : > { %1331 = vmatpush1.bf16.msra.mxu1 %v2332_v13 }
  0x67   : > { %2154 = vmatpush3.bf16.xpose.msra.mxu0 %v534_v14  ;;  %v2866_v14 = vld [vmem:[#allocation2 + $0x38] sm:$0xff] }
  0x68   : > { %2229 = vmatprep.subr.msk.bf16.mxu0 %vm493_vm2, %v2302_v15 }
  0x6f   : > { %2156 = vmatpush3.bf16.xpose.msra.mxu0 %v537_v16 }
  0x70   : > { %2230 = vmatprep.subr.msk.bf16.mxu0 %vm493_vm2, %v2303_v17 }
  0x77   : > { %2158 = vmatpush3.bf16.xpose.msra.mxu0 %v540_v18  ;;  %v2875_v18 = vld [vmem:[#allocation2 + $0x40] sm:$0xff] }
  0x78   : > { %2175 = vmatprep.subr.bf16.mxu0 %v2795_v46 }
  0x7e   : > { %2160 = vmatmul.mubr.msk.bf16.vlgmr.msra.gmra.mrb[0].mxu0 %vm493_vm2, %v2305_v19  ;;  %v2334_v19 = vld [vmem:[%s2585_s28 + $0x94] ss:$12 sps:$4 sm:$0xff]  }
  0x7f   : > { %2163 = vmatprep.mubr.msk.bf16.mxu0 %vm493_vm2, %v2306_v20  ;;  %2176 = vmatpush3.bf16.msra.mxu0 %v2795_v46  ;;  %v2879_v20 = vld [vmem:[%s2585_s28 + $0x68] ss:$12 sps:$4 sm:$0xff]  }
  0x80   : > { %2177 = vmatprep.subr.bf16.mxu0 %v2820_v59  ;;  %1332 = vmatprep.subr.bf16.mxu1 %v2334_v19 }
  0x83   : > { %2178 = vmatpush3.bf16.msra.mxu0 %v2820_v59 }
  0x84   : > { %2179 = vmatprep.subr.bf16.mxu0 %v2840_v3 }
  0x86   : > { %2164 = vmatmul.mubr.msk.bf16.gmra.mrb[4].mxu0 %vm493_vm2, %v2307_v21 }
  0x87   : > { %2167 = vmatprep.mubr.msk.bf16.mxu0 %vm493_vm2, %v2308_v22  ;;  %2180 = vmatpush3.bf16.msra.mxu0 %v2840_v3  ;;  %v2336_v22 = vld [vmem:[%s2585_s28 + $0x90] ss:$12 sps:$4 sm:$0xff]  }
  0x88   : > { %2181 = vmatprep.subr.bf16.mxu0 %v2857_v11  ;;  %1333 = vmatpush1.bf16.msra.mxu1 %v2336_v22 }
  0x89   : > { %1334 = vmatprep.subr.bf16.mxu1 %v2338_v45 }
  0x8b   : > { %2182 = vmatpush3.bf16.msra.mxu0 %v2857_v11 }
  0x8c   : > { %2183 = vmatprep.subr.bf16.mxu0 %v2879_v20  ;;  %1335 = vmatpush1.bf16.msra.mxu1 %v2340_v49 }
  0x8d   : > { %2207 = vmatprep.subr.bf16.mxu1 %v2795_v46 }
  0x8e   : > { %2168 = vmatmul.mubr.msk.bf16.gmra.mrb[8].mxu0 %vm493_vm2, %v2309_v23  ;;  %v2888_v23 = vld [vmem:[#allocation2 + $0x58] sm:$0xff] }
  0x8f   : > { %2171 = vmatprep.mubr.msk.bf16.mxu0 %vm493_vm2, %v2310_v24  ;;  %2184 = vmatpush3.bf16.msra.mxu0 %v2879_v20 }
  0x90   : > { %2185 = vmatprep.subr.bf16.mxu0 %v2901_v47 }
  0x93   : > { %2186 = vmatpush3.bf16.msra.mxu0 %v2901_v47 }
  0x94   : > { %2187 = vmatprep.subr.bf16.mxu0 %v2925_v2 }
  0x96   : > { %2172 = vmatmul.mubr.msk.bf16.gmra.mrb[12].mxu0 %vm493_vm2, %v2311_v25 }
  0x97   : > { %2188 = vmatpush3.bf16.msra.mxu0 %v2925_v2 }
 0x151   : > { %v2740_v26 = vpop.f32.mrb[0].mxu0 }
 0x152   : > { %659 = vmax.xlane.f32.xlu1 %v2740_v26  ;;  %v2743_v27 = vpop.f32.mrb[1].mxu0 }
 0x153   : > { %655 = vmax.xlane.f32.xlu0 %v2743_v27  ;;  %v2746_v28 = vpop.f32.mrb[2].mxu0 }
 0x154   : > { %v2748_v29 = vpop.f32.mrb[3].mxu0 }
 0x156   : > { %661 = vmax.xlane.f32.xlu1 %v2746_v28 }
 0x157   : > { %657 = vmax.xlane.f32.xlu0 %v2748_v29 }
 0x159   : > { %v2752_v30 = vpop.f32.mrb[4].mxu0 }
 0x15a   : > { %v2754_v31 = vpop.f32.mrb[5].mxu0 }
 0x15b   : > { %v2756_v32 = vpop.f32.mrb[6].mxu0  ;;  %663 = vmax.xlane.f32.xlu0 %v2754_v31 }
 0x15c   : > { %v2759_v33 = vpop.f32.mrb[7].mxu0 }
 0x15d   : > { %665 = vmax.xlane.f32.xlu1 %v2759_v33 }
 0x15f   : > { %667 = vmax.xlane.f32.xlu0 %v2752_v30 }
 0x161   : > { %669 = vmax.xlane.f32.xlu1 %v2756_v32  ;;  %v2764_v34 = vpop.f32.mrb[8].mxu0 }
 0x162   : > { %v2766_v35 = vpop.f32.mrb[9].mxu0 }
 0x163   : > { %v2770_v37 = vpop.f32.mrb[10].mxu0  ;;  %671 = vmax.xlane.f32.xlu0 %v2766_v35 }
 0x164   : > { %v2774_v38 = vpop.f32.mrb[11].mxu0 }
 0x165   : > { %677 = vmax.xlane.f32.xlu1 %v2770_v37 }
 0x167   : > { %675 = vmax.xlane.f32.xlu0 %v2764_v34 }
 0x169   : > { %673 = vmax.xlane.f32.xlu1 %v2774_v38  ;;  %v2779_v39 = vpop.f32.mrb[12].mxu0 }
 0x16a   : > { %v2781_v40 = vpop.f32.mrb[13].mxu0 }
 0x16b   : > { %v2783_v41 = vpop.f32.mrb[14].mxu0  ;;  %683 = vmax.xlane.f32.xlu0 %v2779_v39 }
 0x16c   : > { %v2786_v42 = vpop.f32.mrb[15].mxu0 }
 0x16d   : > { %685 = vmax.xlane.f32.xlu1 %v2783_v41 }
 0x16f   : > { %679 = vmax.xlane.f32.xlu0 %v2781_v40 }
 0x171   : > { %681 = vmax.xlane.f32.xlu1 %v2786_v42 }
 0x1df   : > { %v660_v52 = vpop.xlane.xlu1 %659 }
 0x1e0   : > { %v2807_v53 = vmax.f32 %v2802_v50, %v660_v52  ;;  %v656_v54 = vpop.xlane.xlu0 %655  ;;  %v2910_v52 = vld [vmem:[#allocation2 + $0x48] sm:$0xff] }
 0x1e1   : > { %v2810_v55 = vmax.f32 %v2804_v51, %v656_v54 }
 0x1e2   : > { %1629 = vst.msk [vmem:[#allocation2 + $0x10] sm:$0xff] %vm959_vm3, %v2807_v53 }
 0x1e3   : > { %1627 = vst.msk [vmem:[#allocation2] sm:$0xff] %vm959_vm3, %v2810_v55  ;;  %v662_v60 = vpop.xlane.xlu1 %661  ;;  %753 = vperm.xlu0 %2294, %v2810_v55  }
 0x1e4   : > { %v2827_v62 = vmax.f32 %v2812_v56, %v662_v60  ;;  %v658_v63 = vpop.xlane.xlu0 %657  ;;  %v703_v60 = vsub.f32 %v2804_v51, %v2810_v55 }
 0x1e5   : > { %v2831_v0 = vmax.f32 %v2816_v57, %v658_v63  ;;  %v2921_v63 = vld [vmem:[#allocation2 + $0x70] sm:$0xff] }
 0x1e6   : > { %1630 = vst.msk [vmem:[#allocation2 + $0x18] sm:$0xff] %vm959_vm3, %v2827_v62  ;;  %v719_v55 = vmul.f32 1.442695, %v703_v60  ;;  %v706_v10 = vsub.f32 %v2812_v56, %v2827_v62 }
 0x1e7   : > { %1628 = vst.msk [vmem:[#allocation2 + $0x8] sm:$0xff] %vm959_vm3, %v2831_v0  ;;  %758 = vperm.xlu1 %2295, %v2831_v0  }
 0x1e8   : > { %v664_v6 = vpop.xlane.xlu0 %663  ;;  %2344 = vpow2.f32 %v719_v55  ;;  %v725_v45 = vmul.f32 1.442695, %v706_v10 }
 0x1e9   : > { %v2850_v7 = vmax.f32 %v2836_v1, %v664_v6  ;;  %v2933_v6 = vld [vmem:[#allocation2 + $0x78] sm:$0xff] }
 0x1ea   : > { %v666_v8 = vpop.xlane.xlu1 %665  ;;  %2346 = vpow2.f32 %v725_v45 }
 0x1eb   : > { %v2860_v12 = vmax.f32 %v2846_v5, %v666_v8  ;;  %1631 = vst.msk [vmem:[#allocation2 + $0x20] sm:$0xff] %vm959_vm3, %v2850_v7  ;;  %763 = vperm.xlu1 %2295, %v2807_v53  }
 0x1ec   : > { %v668_v15 = vpop.xlane.xlu0 %667 }
 0x1ed   : > { %1632 = vst.msk [vmem:[#allocation2 + $0x28] sm:$0xff] %vm959_vm3, %v2860_v12  ;;  %v2872_v16 = vmax.f32 %v2853_v9, %v668_v15  ;;  %v2945_v15 = vld [vmem:[#allocation2 + $0x60] sm:$0xff]  ;;  %v708_v49 = vsub.f32 %v2846_v5, %v2860_v12  ;;  %v705_v5 = vsub.f32 %v2802_v50, %v2807_v53 }
 0x1ee   : > { %v670_v17 = vpop.xlane.xlu1 %669 }
 0x1ef   : > { %v2882_v21 = vmax.f32 %v2866_v14, %v670_v17  ;;  %1633 = vst.msk [vmem:[#allocation2 + $0x30] sm:$0xff] %vm959_vm3, %v2872_v16  ;;  %768 = vperm.xlu1 %2295, %v2827_v62   ;;  %v2948_v17 = vld [vmem:[%s2585_s28 + $0xb0] ss:$12 sps:$4 sm:$0xff]  }
 0x1f0   : > { %v672_v24 = vpop.xlane.xlu0 %671  ;;  %2189 = vmatprep.subr.bf16.mxu0 %v2948_v17 }
 0x1f1   : > { %1634 = vst.msk [vmem:[#allocation2 + $0x38] sm:$0xff] %vm959_vm3, %v2882_v21  ;;  %v2894_v25 = vmax.f32 %v2875_v18, %v672_v24  ;;  %v652_v24 = vld [vmem:[#allocation2 + $0x68] sm:$0xff]  ;;  %2190 = vmatpush3.bf16.msra.mxu0 %v2948_v17  ;;  %v710_v55 = vsub.f32 %v2866_v14, %v2882_v21  ;;  %v707_v14 = vsub.f32 %v2836_v1, %v2850_v7 }
 0x1f2   : > { %v678_v43 = vpop.xlane.xlu1 %677 }
 0x1f3   : > { %v2904_v48 = vmax.f32 %v2888_v23, %v678_v43  ;;  %773 = vperm.xlu1 %2295, %v2850_v7   ;;  %1635 = vst.msk [vmem:[#allocation2 + $0x40] sm:$0xff] %vm959_vm3, %v2894_v25  ;;  %v733_v10 = vmul.f32 1.442695, %v710_v55 }
 0x1f4   : > { %v676_v54 = vpop.xlane.xlu0 %675 }
 0x1f5   : > { %1638 = vst.msk [vmem:[#allocation2 + $0x58] sm:$0xff] %vm959_vm3, %v2904_v48  ;;  %v2916_v58 = vmax.f32 %v2897_v44, %v676_v54 }
 0x1f6   : > { %v674_v61 = vpop.xlane.xlu1 %673 }
 0x1f7   : > { %v2928_v4 = vmax.f32 %v2910_v52, %v674_v61  ;;  %778 = vperm.xlu1 %2295, %v2860_v12   ;;  %1637 = vst.msk [vmem:[#allocation2 + $0x50] sm:$0xff] %vm959_vm3, %v2916_v58  ;;  %v704_v61 = vsub.f32 %v2816_v57, %v2831_v0  ;;  %v714_v57 = vsub.f32 %v2888_v23, %v2904_v48  ;;  %v2985_v0 = vpop.eup %2344 }
 0x1f8   : > { %v684_v8 = vpop.xlane.xlu0 %683  ;;  %v2995_v23 = vpop.eup %2346 }
 0x1f9   : > { %1636 = vst.msk [vmem:[#allocation2 + $0x48] sm:$0xff] %vm959_vm3, %v2928_v4  ;;  %798 = vperm.xlu0 %2294, %v2928_v4   ;;  %v2940_v51 = vmax.f32 %v2921_v63, %v684_v8  ;;  %v729_v8 = vmul.f32 1.442695, %v708_v49  ;;  %v721_v12 = vmul.f32 1.442695, %v704_v61  ;;  %v712_v53 = vsub.f32 %v2910_v52, %v2928_v4 }
 0x1fa   : > { %v686_v13 = vpop.xlane.xlu1 %685  ;;  %v741_v50 = vmul.f32 1.442695, %v714_v57 }
 0x1fb   : > { %v2951_v19 = vmax.f32 %v2933_v6, %v686_v13  ;;  %783 = vperm.xlu1 %2295, %v2872_v16   ;;  %v717_v22 = vsub.f32 %v2921_v63, %v2940_v51  ;;  %1641 = vst.msk [vmem:[#allocation2 + $0x70] sm:$0xff] %vm959_vm3, %v2940_v51  ;;  %2348 = vpow2.f32 %v729_v8  ;;  %v723_v13 = vmul.f32 1.442695, %v705_v5 }
 0x1fc   : > { %v680_v43 = vpop.xlane.xlu0 %679  ;;  %2350 = vpow2.f32 %v721_v12  ;;  %v737_v1 = vmul.f32 1.442695, %v712_v53 }
 0x1fd   : > { %v718_v56 = vsub.f32 %v2933_v6, %v2951_v19  ;;  %1642 = vst.msk [vmem:[#allocation2 + $0x78] sm:$0xff] %vm959_vm3, %v2951_v19  ;;  %808 = vperm.xlu0 %2294, %v2904_v48   ;;  %v2965_v62 = vmax.f32 %v2945_v15, %v680_v43  ;;  %2352 = vpow2.f32 %v733_v10  ;;  %v727_v48 = vmul.f32 1.442695, %v707_v14 }
 0x1fe   : > { %v682_v54 = vpop.xlane.xlu1 %681  ;;  %2354 = vpow2.f32 %v723_v13 }
 0x1ff   : > { %v700_v60 = vmax.f32 %v652_v24, %v682_v54  ;;  %788 = vperm.xlu1 %2295, %v2882_v21   ;;  %1639 = vst.msk [vmem:[#allocation2 + $0x60] sm:$0xff] %vm959_vm3, %v2965_v62  ;;  %v709_v21 = vsub.f32 %v2853_v9, %v2872_v16  ;;  %2356 = vpow2.f32 %v741_v50  ;;  %v713_v9 = vsub.f32 %v2897_v44, %v2916_v58 }
 0x200   : > { %2358 = vpow2.f32 %v727_v48 }
 0x201   : > { %1640 = vst.msk [vmem:[#allocation2 + $0x68] sm:$0xff] %vm959_vm3, %v700_v60  ;;  %818 = vperm.xlu0 %2294, %v700_v60   ;;  %v716_v43 = vsub.f32 %v652_v24, %v700_v60  ;;  %v731_v7 = vmul.f32 1.442695, %v709_v21  ;;  %2360 = vpow2.f32 %v737_v1  ;;  %v711_v24 = vsub.f32 %v2875_v18, %v2894_v25 }
 0x202   : > { %v739_v49 = vmul.f32 1.442695, %v713_v9  ;;  %v715_v60 = vsub.f32 %v2945_v15, %v2965_v62 }
 0x203   : > { %793 = vperm.xlu1 %2295, %v2894_v25   ;;  %v745_v16 = vmul.f32 1.442695, %v716_v43  ;;  %2362 = vpow2.f32 %v731_v7 }
 0x204   : > { %v743_v25 = vmul.f32 1.442695, %v715_v60 }
 0x205   : > { %828 = vperm.xlu0 %2294, %v2951_v19   ;;  %v2999_v45 = vpop.eup %2348  ;;  %2364 = vpow2.f32 %v745_v16 }
 0x206   : > { %v3004_v52 = vpop.eup %2350  ;;  %2366 = vpow2.f32 %v739_v49 }
 0x207   : > { %803 = vperm.xlu1 %2295, %v2916_v58   ;;  %v3007_v4 = vpop.eup %2352  ;;  %v735_v58 = vmul.f32 1.442695, %v711_v24 }
 0x208   : > { %v3012_v54 = vpop.eup %2354 }
 0x209   : > { %1026 = vperm.xlu0 %2294, %v2985_v0   ;;  %v3015_v44 = vpop.eup %2356  ;;  %2368 = vpow2.f32 %v735_v58 }
 0x20a   : > { %v3020_v61 = vpop.eup %2358  ;;  %2370 = vpow2.f32 %v743_v25 }
 0x20b   : > { %813 = vperm.xlu1 %2295, %v2965_v62   ;;  %v3023_v18 = vpop.eup %2360 }
 0x20d   : > { %1041 = vperm.xlu0 %2294, %v2995_v23   ;;  %v3025_v8 = vpop.eup %2362 }
 0x20f   : > { %823 = vperm.xlu1 %2295, %v2940_v51   ;;  %v3028_v55 = vpop.eup %2364 }
 0x210   : > { %v3032_v15 = vpop.eup %2366 }
 0x211   : > { %1051 = vperm.xlu0 %2294, %v2999_v45  }
 0x213   : > { %1031 = vperm.xlu1 %2295, %v3004_v52   ;;  %v3035_v62 = vpop.eup %2368 }
 0x214   : > { %v3038_v5 = vpop.eup %2370 }
 0x215   : > { %1061 = vperm.xlu0 %2294, %v3007_v4  }
 0x217   : > { %1036 = vperm.xlu1 %2295, %v3012_v54  }
 0x219   : > { %1081 = vperm.xlu0 %2294, %v3015_v44  }
 0x21b   : > { %1046 = vperm.xlu1 %2295, %v3020_v61  }
 0x21d   : > { %1071 = vperm.xlu0 %2294, %v3023_v18  }
 0x21f   : > { %1056 = vperm.xlu1 %2295, %v3025_v8  }
 0x221   : > { %1091 = vperm.xlu0 %2294, %v3028_v55  }
 0x223   : > { %1076 = vperm.xlu1 %2295, %v3032_v15  }
 0x227   : > { %1066 = vperm.xlu1 %2295, %v3035_v62  }
 0x22b   : > { %1086 = vperm.xlu1 %2295, %v3038_v5  }
 0x262   : > { %v754_v12 = vpop.permute.xlu0 %753 }
 0x263   : > { %v831_v10 = vsub.f32 %v2743_v27, %v754_v12 }
 0x265   : > { %v847_v57 = vmul.f32 1.442695, %v831_v10 }
 0x266   : > { %v759_v13 = vpop.permute.xlu1 %758 }
 0x267   : > { %2372 = vpow2.f32 %v847_v57  ;;  %v832_v14 = vsub.f32 %v2748_v29, %v759_v13 }
 0x269   : > { %v849_v50 = vmul.f32 1.442695, %v832_v14 }
 0x26a   : > { %v764_v53 = vpop.permute.xlu1 %763 }
 0x26b   : > { %2374 = vpow2.f32 %v849_v50  ;;  %v833_v21 = vsub.f32 %v2740_v26, %v764_v53 }
 0x26d   : > { %v851_v48 = vmul.f32 1.442695, %v833_v21 }
 0x26e   : > { %v769_v43 = vpop.permute.xlu1 %768 }
 0x26f   : > { %2376 = vpow2.f32 %v851_v48  ;;  %v834_v1 = vsub.f32 %v2746_v28, %v769_v43 }
 0x271   : > { %v2373_v7 = vpop.eup %2372  ;;  %v853_v9 = vmul.f32 1.442695, %v834_v1 }
 0x272   : > { %911 = vadd.xlane.f32.xlu1 %v2373_v7  ;;  %v774_v16 = vpop.permute.xlu1 %773 }
 0x273   : > { %2378 = vpow2.f32 %v853_v9  ;;  %v835_v27 = vsub.f32 %v2754_v31, %v774_v16 }
 0x275   : > { %v2375_v24 = vpop.eup %2374  ;;  %v855_v49 = vmul.f32 1.442695, %v835_v27 }
 0x276   : > { %v779_v29 = vpop.permute.xlu1 %778  ;;  %v1152_v58 = vpack.c.bf16 %v2375_v24, %v2373_v7 }
 0x277   : > { %v836_v60 = vsub.f32 %v2759_v33, %v779_v29  ;;  %2380 = vpow2.f32 %v855_v49 }
 0x278   : > { %v799_v25 = vpop.permute.xlu0 %798  ;;  %1353 = vmatmul.mubr.bf16.vlgmr.msra.gmra.mrb[0].mxu1 %v1152_v58  ;;  %2191 = vmatprep.mubr.bf16.mxu0 %v1152_v58 }
 0x279   : > { %v2377_v26 = vpop.eup %2376  ;;  %v857_v12 = vmul.f32 1.442695, %v836_v60  ;;  %2215 = vmatpush3.bf16.msra.mxu1 %v2795_v46  ;;  %1362 = vmatprep.mubr.bf16.mxu1 %v2500_v36  ;;  %v840_v13 = vsub.f32 %v2774_v38, %v799_v25 }
 0x27a   : > { %915 = vadd.xlane.f32.xlu0 %v2377_v26  ;;  %v784_v28 = vpop.permute.xlu1 %783  ;;  %2208 = vmatprep.subr.bf16.mxu1 %v2820_v59 }
 0x27b   : > { %2382 = vpow2.f32 %v857_v12  ;;  %v837_v31 = vsub.f32 %v2752_v30, %v784_v28 }
 0x27c   : > { %v809_v10 = vpop.permute.xlu0 %808 }
 0x27d   : > { %v2379_v57 = vpop.eup %2378  ;;  %v859_v33 = vmul.f32 1.442695, %v837_v31  ;;  %2216 = vmatpush3.bf16.msra.mxu1 %v2820_v59  ;;  %v865_v59 = vmul.f32 1.442695, %v840_v13  ;;  %v842_v38 = vsub.f32 %v2770_v37, %v809_v10 }
 0x27e   : > { %913 = vadd.xlane.f32.xlu0 %v2375_v24  ;;  %917 = vadd.xlane.f32.xlu1 %v2379_v57  ;;  %v789_v46 = vpop.permute.xlu1 %788  ;;  %v1153_v14 = vpack.c.bf16 %v2379_v57, %v2377_v26 }
 0x27f   : > { %2384 = vpow2.f32 %v859_v33  ;;  %v838_v50 = vsub.f32 %v2756_v32, %v789_v46  ;;  %2209 = vmatprep.subr.bf16.mxu1 %v2840_v3  ;;  %v869_v7 = vmul.f32 1.442695, %v842_v38 }
 0x280   : > { %1363 = vmatmul.mubr.bf16.gmra.mrb[4].mxu1 %v1153_v14  ;;  %2192 = vmatmul.mubr.bf16.vlgmr.msra.gmra.mrb[16].mxu0 %v1153_v14  ;;  %v819_v30 = vpop.permute.xlu0 %818  ;;  %v749_v14 = vmul.f32 1.442695, %v718_v56 }
 0x281   : > { %v861_v53 = vmul.f32 1.442695, %v838_v50  ;;  %1372 = vmatprep.mubr.bf16.mxu1 %v2500_v36  ;;  %2217 = vmatpush3.bf16.msra.mxu1 %v2840_v3  ;;  %v2381_v32 = vpop.eup %2380  ;;  %v844_v9 = vsub.f32 %v2786_v42, %v819_v30 }
 0x282   : > { %v794_v21 = vpop.permute.xlu1 %793  ;;  %2210 = vmatprep.subr.bf16.mxu1 %v2857_v11 }
 0x283   : > { %2386 = vpow2.f32 %v861_v53  ;;  %v839_v48 = vsub.f32 %v2766_v35, %v794_v21 }
 0x284   : > { %2388 = vpow2.f32 %v865_v59  ;;  %v829_v37 = vpop.permute.xlu0 %828 }
 0x285   : > { %v2383_v43 = vpop.eup %2382  ;;  %v863_v1 = vmul.f32 1.442695, %v839_v48  ;;  %2218 = vmatpush3.bf16.msra.mxu1 %v2857_v11  ;;  %v873_v11 = vmul.f32 1.442695, %v844_v9  ;;  %v846_v42 = vsub.f32 %v2783_v41, %v829_v37 }
 0x286   : > { %v804_v16 = vpop.permute.xlu1 %803  ;;  %v1154_v3 = vpack.c.bf16 %v2383_v43, %v2381_v32  ;;  %2211 = vmatprep.subr.bf16.mxu1 %v2879_v20 }
 0x287   : > { %2390 = vpow2.f32 %v863_v1  ;;  %v841_v27 = vsub.f32 %v2764_v34, %v804_v16  ;;  %v877_v60 = vmul.f32 1.442695, %v846_v42 }
 0x288   : > { %1373 = vmatmul.mubr.bf16.gmra.mrb[8].mxu1 %v1154_v3  ;;  %2195 = vmatprep.mubr.bf16.mxu0 %v1154_v3  ;;  %2392 = vpow2.f32 %v869_v7  ;;  %v3095_v51 = vpop.permute.xlu0 %1026  ;;  %v881_v3 = vld [vmem:[#allocation3 + $0x10] sm:$0xff] }
 0x289   : > { %v2385_v35 = vpop.eup %2384  ;;  %v867_v24 = vmul.f32 1.442695, %v841_v27  ;;  %1382 = vmatprep.mubr.bf16.mxu1 %v2500_v36  ;;  %2219 = vmatpush3.bf16.msra.mxu1 %v2879_v20  ;;  %v897_v37 = vmul.f32 %v3012_v54, %v881_v3  ;;  %v893_v3 = vld [vmem:[#allocation3 + $0x70] sm:$0xff] }
 0x28a   : > { %923 = vadd.xlane.f32.xlu0 %v2385_v35  ;;  %v814_v49 = vpop.permute.xlu1 %813  ;;  %2212 = vmatprep.subr.bf16.mxu1 %v2901_v47 }
 0x28b   : > { %2394 = vpow2.f32 %v867_v24  ;;  %v843_v29 = vsub.f32 %v2781_v40, %v814_v49  ;;  %v882_v24 = vld [vmem:[#allocation3 + $0x18] sm:$0xff] }
 0x28c   : > { %2396 = vpow2.f32 %v873_v11  ;;  %v3099_v19 = vpop.permute.xlu0 %1041  ;;  %v898_v49 = vmul.f32 %v2995_v23, %v882_v24 }
 0x28d   : > { %v2387_v34 = vpop.eup %2386  ;;  %v871_v58 = vmul.f32 1.442695, %v843_v29  ;;  %2220 = vmatpush3.bf16.msra.mxu1 %v2901_v47 }
 0x28e   : > { %919 = vadd.xlane.f32.xlu0 %v2381_v32  ;;  %925 = vadd.xlane.f32.xlu1 %v2387_v34  ;;  %v824_v20 = vpop.permute.xlu1 %823  ;;  %v1155_v25 = vpack.c.bf16 %v2387_v34, %v2385_v35  ;;  %v2389_v26 = vpop.eup %2388  ;;  %v879_v32 = vld [vmem:[#allocation3] sm:$0xff]  ;;  %v880_v35 = vld [vmem:[#allocation3 + $0x8] sm:$0xff] }
 0x28f   : > { %2398 = vpow2.f32 %v871_v58  ;;  %v845_v41 = vsub.f32 %v2779_v39, %v824_v20  ;;  %2213 = vmatprep.subr.bf16.mxu1 %v2925_v2  ;;  %v895_v1 = vmul.f32 %v2985_v0, %v879_v32  ;;  %v896_v42 = vmul.f32 %v3004_v52, %v880_v35 }
 0x290   : > { %1383 = vmatmul.mubr.bf16.gmra.mrb[12].mxu1 %v1155_v25  ;;  %2196 = vmatmul.mubr.bf16.gmra.mrb[20].mxu0 %v1155_v25  ;;  %2400 = vpow2.f32 %v877_v60  ;;  %v3103_v56 = vpop.permute.xlu0 %1051  ;;  %v885_v60 = vld [vmem:[#allocation3 + $0x30] sm:$0xff]  ;;  %v883_v25 = vld [vmem:[#allocation3 + $0x20] sm:$0xff] }
 0x291   : > { %v2391_v12 = vpop.eup %2390  ;;  %v875_v40 = vmul.f32 1.442695, %v845_v41  ;;  %1392 = vmatprep.mubr.bf16.mxu1 %v2500_v36  ;;  %2221 = vmatpush3.bf16.msra.mxu1 %v2925_v2  ;;  %v901_v54 = vmul.f32 %v3025_v8, %v885_v60  ;;  %v886_v41 = vld [vmem:[#allocation3 + $0x38] sm:$0xff]  ;;  %v899_v52 = vmul.f32 %v3020_v61, %v883_v25 }
 0x292   : > { %921 = vadd.xlane.f32.xlu1 %v2383_v43  ;;  %v1156_v47 = vpack.c.bf16 %v2389_v26, %v2391_v12  ;;  %2214 = vmatprep.subr.bf16.mxu1 %v2948_v17  ;;  %v2393_v28 = vpop.eup %2392  ;;  %v3091_v63 = vpop.permute.xlu1 %1031  ;;  %v902_v23 = vmul.f32 %v3007_v4, %v886_v41  ;;  %v980_v41 = vld [vmem:[#allocation4 + $0x20] sm:$0xff] }
 0x293   : > { %2402 = vpow2.f32 %v875_v40 }
 0x294   : > { %v3107_v59 = vpop.permute.xlu0 %1061 }
 0x295   : > { %v2395_v31 = vpop.eup %2394  ;;  %2222 = vmatpush3.bf16.msra.mxu1 %v2948_v17  ;;  %v747_v17 = vmul.f32 1.442695, %v717_v22 }
 0x296   : > { %933 = vadd.xlane.f32.xlu1 %v2393_v28  ;;  %931 = vadd.xlane.f32.xlu0 %v2395_v31  ;;  %v1157_v39 = vpack.c.bf16 %v2393_v28, %v2395_v31  ;;  %v2397_v10 = vpop.eup %2396  ;;  %v3093_v6 = vpop.permute.xlu1 %1036 }
 0x297   : > { %2404 = vpow2.f32 %v747_v17  ;;  %v888_v17 = vld [vmem:[#allocation3 + $0x48] sm:$0xff] }
 0x298   : > { %1393 = vmatmul.mubr.bf16.gmra.mrb[16].mxu1 %v1156_v47  ;;  %2406 = vpow2.f32 %v749_v14  ;;  %v3111_v21 = vpop.permute.xlu0 %1081 }
 0x299   : > { %v2399_v57 = vpop.eup %2398  ;;  %1402 = vmatprep.mubr.bf16.mxu1 %v2500_v36 }
 0x29a   : > { %929 = vadd.xlane.f32.xlu1 %v2389_v26  ;;  %927 = vadd.xlane.f32.xlu0 %v2391_v12  ;;  %v1158_v2 = vpack.c.bf16 %v2397_v10, %v2399_v57  ;;  %v2401_v33 = vpop.eup %2400 }
 0x29c   : > { %v3115_v43 = vpop.permute.xlu0 %1071 }
 0x29d   : > { %v2403_v13 = vpop.eup %2402 }
 0x29e   : > { %941 = vadd.xlane.f32.xlu1 %v2401_v33  ;;  %939 = vadd.xlane.f32.xlu0 %v2403_v13  ;;  %v1159_v46 = vpack.c.bf16 %v2401_v33, %v2403_v13 }
 0x2a0   : > { %1403 = vmatmul.mubr.bf16.gmra.mrb[20].mxu1 %v1157_v39  ;;  %v3119_v16 = vpop.permute.xlu0 %1091 }
 0x2a1   : > { %1412 = vmatprep.mubr.bf16.mxu1 %v2500_v36  ;;  %v3085_v50 = vpop.eup %2404 }
 0x2a2   : > { %937 = vadd.xlane.f32.xlu1 %v2397_v10  ;;  %935 = vadd.xlane.f32.xlu0 %v2399_v57  ;;  %v3088_v53 = vpop.eup %2406  ;;  %v889_v10 = vld [vmem:[#allocation3 + $0x50] sm:$0xff]  ;;  %v890_v57 = vld [vmem:[#allocation3 + $0x58] sm:$0xff] }
 0x2a3   : > { %v905_v61 = vmul.f32 %v3032_v15, %v889_v10  ;;  %v906_v4 = vmul.f32 %v3015_v44, %v890_v57  ;;  %v894_v15 = vld [vmem:[#allocation3 + $0x78] sm:$0xff]  ;;  %v984_v10 = vld [vmem:[#allocation4 + $0x40] sm:$0xff] }
 0x2a4   : > { %v910_v35 = vmul.f32 %v3088_v53, %v894_v15  ;;  %v983_v57 = vld [vmem:[#allocation4 + $0x38] sm:$0xff] }
 0x2a8   : > { %1413 = vmatmul.mubr.bf16.gmra.mrb[24].mxu1 %v1158_v2 }
 0x2a9   : > { %1422 = vmatprep.mubr.bf16.mxu1 %v2500_v36  ;;  %v3097_v36 = vpop.permute.xlu1 %1046 }
 0x2ad   : > { %v3101_v22 = vpop.permute.xlu1 %1056 }
 0x2b0   : > { %1423 = vmatmul.mubr.bf16.gmra.mrb[28].mxu1 %v1159_v46 }
 0x2b1   : > { %2199 = vmatprep.mubr.bf16.mxu1 %v1156_v47  ;;  %v3105_v30 = vpop.permute.xlu1 %1076  ;;  %v884_v47 = vld [vmem:[#allocation3 + $0x28] sm:$0xff] }
 0x2b2   : > { %v900_v8 = vmul.f32 %v2999_v45, %v884_v47  ;;  %v1108_v47 = vmul.f32 %v3091_v63, %v980_v41 }
 0x2b3   : > { %1096 = vperm.xlu1 %2295, %v3085_v50  }
 0x2b5   : > { %v3109_v38 = vpop.permute.xlu1 %1066 }
 0x2b8   : > { %1101 = vperm.xlu0 %2294, %v3088_v53   ;;  %2200 = vmatmul.mubr.bf16.vlgmr.msra.gmra.mrb[32].mxu1 %v1157_v39  ;;  %v976_v53 = vld [vmem:[#allocation4] sm:$0xff] }
 0x2b9   : > { %2203 = vmatprep.mubr.bf16.mxu1 %v1158_v2  ;;  %v3113_v48 = vpop.permute.xlu1 %1086  ;;  %v1104_v25 = vmul.f32 %v3095_v51, %v976_v53 }
 0x2c0   : > { %2204 = vmatmul.mubr.bf16.gmra.mrb[36].mxu1 %v1159_v46  ;;  %v887_v46 = vld [vmem:[#allocation3 + $0x40] sm:$0xff] }
 0x2c1   : > { %v903_v45 = vmul.f32 %v3035_v62, %v887_v46  ;;  %v892_v62 = vld [vmem:[#allocation3 + $0x68] sm:$0xff]  ;;  %v986_v46 = vld [vmem:[#allocation4 + $0x50] sm:$0xff] }
 0x2ff   : > { %v912_v7 = vpop.xlane.xlu1 %911 }
 0x300   : > { %v943_v9 = vadd.f32 %v912_v7, %v895_v1  ;;  %v904_v1 = vmul.f32 %v3023_v18, %v888_v17  ;;  %v981_v17 = vld [vmem:[#allocation4 + $0x28] sm:$0xff] }
 0x302   : > { %960 = vst.msk [vmem:[#allocation3] sm:$0xff] %vm959_vm3, %v943_v9 }
 0x307   : > { %v916_v27 = vpop.xlane.xlu0 %915 }
 0x308   : > { %v945_v11 = vadd.f32 %v916_v27, %v897_v37  ;;  %v909_v27 = vmul.f32 %v3085_v50, %v893_v3 }
 0x30a   : > { %962 = vst.msk [vmem:[#allocation3 + $0x10] sm:$0xff] %vm959_vm3, %v945_v11 }
 0x30b   : > { %v914_v0 = vpop.xlane.xlu0 %913  ;;  %v918_v29 = vpop.xlane.xlu1 %917 }
 0x30c   : > { %v944_v34 = vadd.f32 %v914_v0, %v896_v42  ;;  %v946_v58 = vadd.f32 %v918_v29, %v898_v49  ;;  %v891_v42 = vld [vmem:[#allocation3 + $0x60] sm:$0xff]  ;;  %v908_v29 = vmul.f32 %v3028_v55, %v892_v62  ;;  %v1109_v62 = vmul.f32 %v3091_v63, %v981_v17 }
 0x30d   : > { %v907_v0 = vmul.f32 %v3038_v5, %v891_v42  ;;  %v1114_v42 = vmul.f32 %v3099_v19, %v986_v46 }
 0x30e   : > { %961 = vst.msk [vmem:[#allocation3 + $0x8] sm:$0xff] %vm959_vm3, %v944_v34  ;;  %963 = vst.msk [vmem:[#allocation3 + $0x18] sm:$0xff] %vm959_vm3, %v946_v58 }
 0x317   : > { %v924_v20 = vpop.xlane.xlu0 %923 }
 0x318   : > { %v949_v26 = vadd.f32 %v924_v20, %v901_v54  ;;  %v977_v54 = vld [vmem:[#allocation4 + $0x8] sm:$0xff]  ;;  %v979_v20 = vld [vmem:[#allocation4 + $0x18] sm:$0xff] }
 0x319   : > { %v1107_v55 = vmul.f32 %v3091_v63, %v979_v20  ;;  %v991_v63 = vld [vmem:[#allocation4 + $0x78] sm:$0xff] }
 0x31a   : > { %966 = vst.msk [vmem:[#allocation3 + $0x30] sm:$0xff] %vm959_vm3, %v949_v26 }
 0x31b   : > { %v920_v12 = vpop.xlane.xlu0 %919  ;;  %v926_v40 = vpop.xlane.xlu1 %925 }
 0x31c   : > { %v947_v28 = vadd.f32 %v920_v12, %v899_v52  ;;  %v950_v31 = vadd.f32 %v926_v40, %v902_v23  ;;  %v1105_v52 = vmul.f32 %v3095_v51, %v977_v54 }
 0x31e   : > { %964 = vst.msk [vmem:[#allocation3 + $0x20] sm:$0xff] %vm959_vm3, %v947_v28  ;;  %967 = vst.msk [vmem:[#allocation3 + $0x38] sm:$0xff] %vm959_vm3, %v950_v31 }
 0x31f   : > { %v922_v39 = vpop.xlane.xlu1 %921 }
 0x320   : > { %v948_v2 = vadd.f32 %v922_v39, %v900_v8  ;;  %v982_v39 = vld [vmem:[#allocation4 + $0x30] sm:$0xff] }
 0x322   : > { %965 = vst.msk [vmem:[#allocation3 + $0x28] sm:$0xff] %vm959_vm3, %v948_v2  ;;  %v978_v2 = vld [vmem:[#allocation4 + $0x10] sm:$0xff] }
 0x323   : > { %v932_v33 = vpop.xlane.xlu0 %931  ;;  %v934_v13 = vpop.xlane.xlu1 %933 }
 0x324   : > { %v953_v14 = vadd.f32 %v932_v33, %v905_v61  ;;  %v954_v32 = vadd.f32 %v934_v13, %v906_v4  ;;  %v985_v61 = vld [vmem:[#allocation4 + $0x48] sm:$0xff]  ;;  %v987_v4 = vld [vmem:[#allocation4 + $0x58] sm:$0xff]  ;;  %v1110_v33 = vmul.f32 %v3093_v6, %v982_v39  ;;  %v1112_v13 = vmul.f32 %v3093_v6, %v984_v10 }
 0x326   : > { %970 = vst.msk [vmem:[#allocation3 + $0x50] sm:$0xff] %vm959_vm3, %v953_v14  ;;  %971 = vst.msk [vmem:[#allocation3 + $0x58] sm:$0xff] %vm959_vm3, %v954_v32 }
 0x327   : > { %v928_v7 = vpop.xlane.xlu0 %927  ;;  %v930_v9 = vpop.xlane.xlu1 %929 }
 0x328   : > { %v951_v37 = vadd.f32 %v928_v7, %v903_v45  ;;  %v952_v44 = vadd.f32 %v930_v9, %v904_v1  ;;  %v1111_v45 = vmul.f32 %v3093_v6, %v983_v57  ;;  %v1106_v1 = vmul.f32 %v3095_v51, %v978_v2  ;;  %v998_v57 = vld [vmem:[#allocation4 + $0xb0] sm:$0xff]  ;;  %v993_v2 = vld [vmem:[#allocation4 + $0x88] sm:$0xff] }
 0x32a   : > { %968 = vst.msk [vmem:[#allocation3 + $0x40] sm:$0xff] %vm959_vm3, %v951_v37  ;;  %969 = vst.msk [vmem:[#allocation3 + $0x48] sm:$0xff] %vm959_vm3, %v952_v44  ;;  %v1113_v37 = vmul.f32 %v3099_v19, %v985_v61  ;;  %v1115_v44 = vmul.f32 %v3099_v19, %v987_v4 }
 0x32b   : > { %v940_v24 = vpop.xlane.xlu0 %939  ;;  %v942_v11 = vpop.xlane.xlu1 %941 }
 0x32c   : > { %v957_v49 = vadd.f32 %v940_v24, %v909_v27  ;;  %v958_v18 = vadd.f32 %v942_v11, %v910_v35 }
 0x32e   : > { %974 = vst.msk [vmem:[#allocation3 + $0x70] sm:$0xff] %vm959_vm3, %v957_v49  ;;  %975 = vst.msk [vmem:[#allocation3 + $0x78] sm:$0xff] %vm959_vm3, %v958_v18 }
 0x32f   : > { %v936_v34 = vpop.xlane.xlu0 %935  ;;  %v938_v58 = vpop.xlane.xlu1 %937 }
 0x330   : > { %v955_v60 = vadd.f32 %v936_v34, %v907_v0  ;;  %v956_v50 = vadd.f32 %v938_v58, %v908_v29  ;;  %v988_v34 = vld [vmem:[#allocation4 + $0x60] sm:$0xff]  ;;  %v989_v58 = vld [vmem:[#allocation4 + $0x68] sm:$0xff] }
 0x331   : > { %v1116_v19 = vmul.f32 %v3097_v36, %v988_v34  ;;  %v1117_v53 = vmul.f32 %v3097_v36, %v989_v58 }
 0x332   : > { %972 = vst.msk [vmem:[#allocation3 + $0x60] sm:$0xff] %vm959_vm3, %v955_v60  ;;  %973 = vst.msk [vmem:[#allocation3 + $0x68] sm:$0xff] %vm959_vm3, %v956_v50  ;;  %v992_v60 = vld [vmem:[#allocation4 + $0x80] sm:$0xff] }
 0x34b   : > { %v1354_v26 = vpop.f32.mrb[0].mxu1 }
 0x34c   : > { %v1530_v5 = vadd.f32 %v1354_v26, %v1104_v25  ;;  %v1356_v23 = vpop.f32.mrb[1].mxu1  ;;  %v1119_v25 = vmul.f32 %v3103_v56, %v991_v63 }
 0x34d   : > { %v1531_v12 = vadd.f32 %v1356_v23, %v1105_v52  ;;  %v1358_v40 = vpop.f32.mrb[2].mxu1  ;;  %v1120_v52 = vmul.f32 %v3103_v56, %v992_v60 }
 0x34e   : > { %1578 = vst [vmem:[#allocation4] sm:$0xff] %v1530_v5  ;;  %v1533_v28 = vadd.f32 %v1358_v40, %v1107_v55  ;;  %v1360_v31 = vpop.f32.mrb[3].mxu1  ;;  %v996_v40 = vld [vmem:[#allocation4 + $0xa0] sm:$0xff] }
 0x34f   : > { %1579 = vst [vmem:[#allocation4 + $0x8] sm:$0xff] %v1531_v12  ;;  %v1534_v8 = vadd.f32 %v1360_v31, %v1108_v47  ;;  %v994_v12 = vld [vmem:[#allocation4 + $0x90] sm:$0xff]  ;;  %v995_v47 = vld [vmem:[#allocation4 + $0x98] sm:$0xff]  ;;  %v997_v31 = vld [vmem:[#allocation4 + $0xa8] sm:$0xff]  ;;  %v1124_v10 = vmul.f32 %v3101_v22, %v996_v40 }
 0x350   : > { %1582 = vst [vmem:[#allocation4 + $0x18] sm:$0xff] %v1533_v28  ;;  %v990_v28 = vld [vmem:[#allocation4 + $0x70] sm:$0xff]  ;;  %v1122_v39 = vmul.f32 %v3101_v22, %v994_v12 }
 0x351   : > { %1583 = vst [vmem:[#allocation4 + $0x20] sm:$0xff] %v1534_v8  ;;  %v999_v8 = vld [vmem:[#allocation4 + $0xb8] sm:$0xff] }
 0x353   : > { %v1364_v14 = vpop.f32.mrb[4].mxu1  ;;  %v2193_v32 = vpop.f32.mrb[16].mxu0 }
 0x354   : > { %v1536_v7 = vadd.f32 %v1364_v14, %v1110_v33  ;;  %v1538_v9 = vadd.f32 %v2193_v32, %v1112_v13  ;;  %v1366_v3 = vpop.f32.mrb[5].mxu1  ;;  %v1467_v15 = vpop.f32.mrb[17].mxu0  ;;  %v1123_v33 = vmul.f32 %v3101_v22, %v995_v47  ;;  %v1118_v13 = vmul.f32 %v3097_v36, %v990_v28 }
 0x355   : > { %v1537_v27 = vadd.f32 %v1366_v3, %v1111_v45  ;;  %v1532_v35 = vadd.f32 %v1467_v15, %v1106_v1  ;;  %v1368_v24 = vpop.f32.mrb[6].mxu1  ;;  %v2194_v11 = vpop.f32.mrb[18].mxu0  ;;  %v1125_v45 = vmul.f32 %v3107_v59, %v997_v31  ;;  %v1127_v1 = vmul.f32 %v3107_v59, %v999_v8 }
 0x356   : > { %1585 = vst [vmem:[#allocation4 + $0x30] sm:$0xff] %v1536_v7  ;;  %1587 = vst.msk [vmem:[#allocation4 + $0x40] sm:$0xff] %vm1580_vm4, %v1538_v9  ;;  %v1539_v6 = vadd.f32 %v1368_v24, %v1113_v37  ;;  %v1541_v51 = vadd.f32 %v2194_v11, %v1115_v44  ;;  %v1370_v49 = vpop.f32.mrb[7].mxu1  ;;  %v1470_v18 = vpop.f32.mrb[19].mxu0  ;;  %v1126_v37 = vmul.f32 %v3107_v59, %v998_v57  ;;  %v1015_v57 = vld [vmem:[#allocation4 + $0x138] sm:$0xff] }
 0x357   : > { %1586 = vst [vmem:[#allocation4 + $0x38] sm:$0xff] %v1537_v27  ;;  %1581 = vst.msk [vmem:[#allocation4 + $0x10] sm:$0xff] %vm1580_vm4, %v1532_v35  ;;  %v1540_v0 = vadd.f32 %v1370_v49, %v1114_v42  ;;  %v1535_v29 = vadd.f32 %v1470_v18, %v1109_v62  ;;  %v1121_v44 = vmul.f32 %v3103_v56, %v993_v2  ;;  %v1000_v42 = vld [vmem:[#allocation4 + $0xc0] sm:$0xff]  ;;  %v1001_v62 = vld [vmem:[#allocation4 + $0xc8] sm:$0xff] }
 0x358   : > { %1588 = vst [vmem:[#allocation4 + $0x48] sm:$0xff] %v1539_v6  ;;  %1590 = vst.msk [vmem:[#allocation4 + $0x58] sm:$0xff] %vm1580_vm4, %v1541_v51  ;;  %v1003_v56 = vld [vmem:[#allocation4 + $0xd8] sm:$0xff]  ;;  %v1128_v59 = vmul.f32 %v3109_v38, %v1000_v42  ;;  %v1004_v6 = vld [vmem:[#allocation4 + $0xe0] sm:$0xff]  ;;  %v1129_v49 = vmul.f32 %v3109_v38, %v1001_v62 }
 0x359   : > { %1589 = vst [vmem:[#allocation4 + $0x50] sm:$0xff] %v1540_v0  ;;  %1584 = vst.msk [vmem:[#allocation4 + $0x28] sm:$0xff] %vm1580_vm4, %v1535_v29  ;;  %v1131_v29 = vmul.f32 %v3115_v43, %v1003_v56  ;;  %v1132_v63 = vmul.f32 %v3115_v43, %v1004_v6 }
 0x35b   : > { %v1374_v50 = vpop.f32.mrb[8].mxu1 }
 0x35c   : > { %v1542_v54 = vadd.f32 %v1374_v50, %v1116_v19  ;;  %v1376_v20 = vpop.f32.mrb[9].mxu1 }
 0x35d   : > { %v1543_v41 = vadd.f32 %v1376_v20, %v1117_v53  ;;  %v1378_v26 = vpop.f32.mrb[10].mxu1  ;;  %v1006_v53 = vld [vmem:[#allocation4 + $0xf0] sm:$0xff]  ;;  %v1009_v20 = vld [vmem:[#allocation4 + $0x108] sm:$0xff] }
 0x35e   : > { %1591 = vst [vmem:[#allocation4 + $0x60] sm:$0xff] %v1542_v54  ;;  %v1545_v5 = vadd.f32 %v1378_v26, %v1119_v25  ;;  %v1380_v23 = vpop.f32.mrb[11].mxu1  ;;  %v1007_v54 = vld [vmem:[#allocation4 + $0xf8] sm:$0xff]  ;;  %v1134_v25 = vmul.f32 %v3105_v30, %v1006_v53 }
 0x35f   : > { %1592 = vst [vmem:[#allocation4 + $0x68] sm:$0xff] %v1543_v41  ;;  %v1546_v55 = vadd.f32 %v1380_v23, %v1120_v52  ;;  %v1010_v41 = vld [vmem:[#allocation4 + $0x110] sm:$0xff]  ;;  %v1135_v52 = vmul.f32 %v3105_v30, %v1007_v54 }
 0x360   : > { %1594 = vst [vmem:[#allocation4 + $0x78] sm:$0xff] %v1545_v5  ;;  %v1138_v47 = vmul.f32 %v3111_v21, %v1010_v41 }
 0x361   : > { %1595 = vst [vmem:[#allocation4 + $0x80] sm:$0xff] %v1546_v55  ;;  %v1137_v55 = vmul.f32 %v3111_v21, %v1009_v20 }
 0x363   : > { %v1384_v61 = vpop.f32.mrb[12].mxu1  ;;  %v2197_v4 = vpop.f32.mrb[20].mxu0 }
 0x364   : > { %v1548_v46 = vadd.f32 %v1384_v61, %v1122_v39  ;;  %v1550_v17 = vadd.f32 %v2197_v4, %v1124_v10  ;;  %v1386_v14 = vpop.f32.mrb[13].mxu1  ;;  %v1483_v32 = vpop.f32.mrb[21].mxu0  ;;  %v1012_v39 = vld [vmem:[#allocation4 + $0x120] sm:$0xff]  ;;  %v1013_v10 = vld [vmem:[#allocation4 + $0x128] sm:$0xff] }
 0x365   : > { %v1549_v7 = vadd.f32 %v1386_v14, %v1123_v33  ;;  %v1544_v9 = vadd.f32 %v1483_v32, %v1118_v13  ;;  %v1388_v3 = vpop.f32.mrb[14].mxu1  ;;  %v2198_v15 = vpop.f32.mrb[22].mxu0  ;;  %v1140_v2 = vmul.f32 %v3113_v48, %v1012_v39  ;;  %v1016_v61 = vld [vmem:[#allocation4 + $0x140] sm:$0xff]  ;;  %v1141_v33 = vmul.f32 %v3113_v48, %v1013_v10 }
 0x366   : > { %1597 = vst [vmem:[#allocation4 + $0x90] sm:$0xff] %v1548_v46  ;;  %1599 = vst.msk [vmem:[#allocation4 + $0xa0] sm:$0xff] %vm1580_vm4, %v1550_v17  ;;  %v1551_v36 = vadd.f32 %v1388_v3, %v1125_v45  ;;  %v1553_v22 = vadd.f32 %v2198_v15, %v1127_v1  ;;  %v1390_v27 = vpop.f32.mrb[15].mxu1  ;;  %v1486_v35 = vpop.f32.mrb[23].mxu0  ;;  %v1143_v17 = vmul.f32 %v3119_v16, %v1015_v57 }
 0x367   : > { %1598 = vst [vmem:[#allocation4 + $0x98] sm:$0xff] %v1549_v7  ;;  %1593 = vst.msk [vmem:[#allocation4 + $0x70] sm:$0xff] %vm1580_vm4, %v1544_v9  ;;  %v1552_v24 = vadd.f32 %v1390_v27, %v1126_v37  ;;  %v1547_v11 = vadd.f32 %v1486_v35, %v1121_v44  ;;  %v1144_v45 = vmul.f32 %v3119_v16, %v1016_v61  ;;  %v1018_v9 = vld [vmem:[#allocation4 + $0x150] sm:$0xff]  ;;  %v1097_v3 = vpop.permute.xlu1 %1096  ;;  %v1019_v37 = vld [vmem:[#allocation4 + $0x158] sm:$0xff] }
 0x368   : > { %1600 = vst [vmem:[#allocation4 + $0xa8] sm:$0xff] %v1551_v36  ;;  %1602 = vst.msk [vmem:[#allocation4 + $0xb8] sm:$0xff] %vm1580_vm4, %v1553_v22  ;;  %v1021_v44 = vld [vmem:[#allocation4 + $0x168] sm:$0xff]  ;;  %v1102_v36 = vpop.permute.xlu0 %1101  ;;  %v1146_v22 = vmul.f32 %v1097_v3, %v1018_v9  ;;  %v1022_v27 = vld [vmem:[#allocation4 + $0x170] sm:$0xff]  ;;  %v1147_v35 = vmul.f32 %v1097_v3, %v1019_v37 }
 0x369   : > { %1601 = vst [vmem:[#allocation4 + $0xb0] sm:$0xff] %v1552_v24  ;;  %1596 = vst.msk [vmem:[#allocation4 + $0x88] sm:$0xff] %vm1580_vm4, %v1547_v11  ;;  %v1149_v11 = vmul.f32 %v1102_v36, %v1021_v44  ;;  %v1150_v56 = vmul.f32 %v1102_v36, %v1022_v27  ;;  %v1695_v61 = vld [vmem:[#allocation3] sm:$0xff] (!%p2108_p10)  ;;  %v1705_v44 = vld [vmem:[#allocation3 + $0x50] sm:$0xff] (!%p2108_p10) }
 0x36a   : > { %v1703_v9 = vld [vmem:[#allocation3 + $0x40] sm:$0xff] (!%p2108_p10) }
 0x36b   : > { %v1394_v51 = vpop.f32.mrb[16].mxu1 }
 0x36c   : > { %v1554_v18 = vadd.f32 %v1394_v51, %v1128_v59  ;;  %v1396_v0 = vpop.f32.mrb[17].mxu1 }
 0x36d   : > { %v1555_v34 = vadd.f32 %v1396_v0, %v1129_v49  ;;  %v1398_v58 = vpop.f32.mrb[18].mxu1  ;;  %v1008_v0 = vld [vmem:[#allocation4 + $0x100] sm:$0xff] }
 0x36e   : > { %1603 = vst [vmem:[#allocation4 + $0xc0] sm:$0xff] %v1554_v18  ;;  %v1557_v19 = vadd.f32 %v1398_v58, %v1131_v29  ;;  %v1400_v60 = vpop.f32.mrb[19].mxu1  ;;  %v1002_v29 = vld [vmem:[#allocation4 + $0xd0] sm:$0xff]  ;;  %v1136_v58 = vmul.f32 %v3105_v30, %v1008_v0 }
 0x36f   : > { %1604 = vst [vmem:[#allocation4 + $0xc8] sm:$0xff] %v1555_v34  ;;  %v1558_v50 = vadd.f32 %v1400_v60, %v1132_v63  ;;  %v1011_v34 = vld [vmem:[#allocation4 + $0x118] sm:$0xff]  ;;  %v1005_v63 = vld [vmem:[#allocation4 + $0xe8] sm:$0xff]  ;;  %v1130_v60 = vmul.f32 %v3109_v38, %v1002_v29  ;;  %v1653_v29 = vld [vmem:[#allocation4 + $0x30] sm:$0xff] (!%p2108_p10) }
 0x370   : > { %1606 = vst [vmem:[#allocation4 + $0xd8] sm:$0xff] %v1557_v19  ;;  %v1139_v54 = vmul.f32 %v3111_v21, %v1011_v34  ;;  %v1133_v41 = vmul.f32 %v3115_v43, %v1005_v63  ;;  %v1023_v38 = vld [vmem:[#allocation4 + $0x178] sm:$0xff]  ;;  %v1017_v21 = vld [vmem:[#allocation4 + $0x148] sm:$0xff]  ;;  %v1647_v63 = vld [vmem:[#allocation4] sm:$0xff] (!%p2108_p10) }
 0x371   : > { %1607 = vst [vmem:[#allocation4 + $0xe0] sm:$0xff] %v1558_v50  ;;  %v1151_v43 = vmul.f32 %v1102_v36, %v1023_v38  ;;  %v1145_v39 = vmul.f32 %v3119_v16, %v1017_v21  ;;  %v1696_v16 = vld [vmem:[#allocation3 + $0x8] sm:$0xff] (!%p2108_p10)  ;;  %v1654_v34 = vld [vmem:[#allocation4 + $0x38] sm:$0xff] (!%p2108_p10) }
 0x372   : > { %v1650_v38 = vld [vmem:[#allocation4 + $0x18] sm:$0xff] (!%p2108_p10)  ;;  %v1652_v21 = vld [vmem:[#allocation4 + $0x28] sm:$0xff] (!%p2108_p10) }
 0x373   : > { %v1404_v26 = vpop.f32.mrb[20].mxu1 }
 0x374   : > { %v1560_v5 = vadd.f32 %v1404_v26, %v1134_v25  ;;  %v1406_v23 = vpop.f32.mrb[21].mxu1 }
 0x375   : > { %v1561_v12 = vadd.f32 %v1406_v23, %v1135_v52  ;;  %v1408_v40 = vpop.f32.mrb[22].mxu1  ;;  %v1014_v23 = vld [vmem:[#allocation4 + $0x130] sm:$0xff] }
 0x376   : > { %1609 = vst [vmem:[#allocation4 + $0xf0] sm:$0xff] %v1560_v5  ;;  %v1563_v28 = vadd.f32 %v1408_v40, %v1137_v55  ;;  %v1410_v31 = vpop.f32.mrb[23].mxu1  ;;  %v1020_v5 = vld [vmem:[#allocation4 + $0x160] sm:$0xff]  ;;  %v1142_v40 = vmul.f32 %v3113_v48, %v1014_v23  ;;  %v1697_v48 = vld [vmem:[#allocation3 + $0x10] sm:$0xff] (!%p2108_p10)  ;;  %v1658_v23 = vld [vmem:[#allocation4 + $0x58] sm:$0xff] (!%p2108_p10) }
 0x377   : > { %1610 = vst [vmem:[#allocation4 + $0xf8] sm:$0xff] %v1561_v12  ;;  %v1564_v8 = vadd.f32 %v1410_v31, %v1138_v47  ;;  %v1148_v55 = vmul.f32 %v1097_v3, %v1020_v5  ;;  %2410 = vrcp.f32 (!%p2108_p10), %v1697_v48  ;;  %v1656_v5 = vld [vmem:[#allocation4 + $0x48] sm:$0xff] (!%p2108_p10)  ;;  %v1659_v48 = vld [vmem:[#allocation4 + $0x60] sm:$0xff] (!%p2108_p10) }
 0x378   : > { %1612 = vst [vmem:[#allocation4 + $0x108] sm:$0xff] %v1563_v28  ;;  %2412 = vrcp.f32 (!%p2108_p10), %v1695_v61  ;;  %v1660_v61 = vld [vmem:[#allocation4 + $0x68] sm:$0xff] (!%p2108_p10) }
 0x379   : > { %1613 = vst [vmem:[#allocation4 + $0x110] sm:$0xff] %v1564_v8 }
 0x37b   : > { %v1414_v4 = vpop.f32.mrb[24].mxu1 }
 0x37c   : > { %v1566_v13 = vadd.f32 %v1414_v4, %v1140_v2  ;;  %v1416_v46 = vpop.f32.mrb[25].mxu1  ;;  %v1698_v4 = vld [vmem:[#allocation3 + $0x18] sm:$0xff] (!%p2108_p10) }
 0x37d   : > { %v1567_v14 = vadd.f32 %v1416_v46, %v1141_v33  ;;  %v1418_v32 = vpop.f32.mrb[26].mxu1  ;;  %v2501_v33 = vmov (!%p2108_p10), 0   ;;  %2414 = vrcp.f32 (!%p2108_p10), %v1698_v4  ;;  %v1699_v46 = vld [vmem:[#allocation3 + $0x20] sm:$0xff] (!%p2108_p10)  ;;  %v1661_v4 = vld [vmem:[#allocation4 + $0x70] sm:$0xff] (!%p2108_p10) }
 0x37e   : > { %1615 = vst [vmem:[#allocation4 + $0x120] sm:$0xff] %v1566_v13  ;;  %v1569_v1 = vadd.f32 %v1418_v32, %v1143_v17  ;;  %v1420_v7 = vpop.f32.mrb[27].mxu1  ;;  %2409 = vset.pattern.permute.xlu1 (!%p2108_p10), %v2501_v33  ;;  %2408 = vset.pattern.permute.xlu0 (!%p2108_p10), %v2501_v33  ;;  %2416 = vrcp.f32 (!%p2108_p10), %v1696_v16  ;;  %v1700_v13 = vld [vmem:[#allocation3 + $0x28] sm:$0xff] (!%p2108_p10)  ;;  %v1702_v17 = vld [vmem:[#allocation3 + $0x38] sm:$0xff] (!%p2108_p10) }
 0x37f   : > { %1616 = vst [vmem:[#allocation4 + $0x128] sm:$0xff] %v1567_v14  ;;  %v1570_v15 = vadd.f32 %v1420_v7, %v1144_v45  ;;  %2418 = vrcp.f32 (!%p2108_p10), %v1700_v13  ;;  %v1701_v14 = vld [vmem:[#allocation3 + $0x30] sm:$0xff] (!%p2108_p10) }
 0x380   : > { %1618 = vst [vmem:[#allocation4 + $0x138] sm:$0xff] %v1569_v1  ;;  %2420 = vrcp.f32 (!%p2108_p10), %v1699_v46  ;;  %v1704_v1 = vld [vmem:[#allocation3 + $0x48] sm:$0xff] (!%p2108_p10) }
 0x381   : > { %1619 = vst [vmem:[#allocation4 + $0x140] sm:$0xff] %v1570_v15  ;;  %v2411_v32 = vpop.eup (!%p2108_p10), %2410  ;;  %2422 = vrcp.f32 (!%p2108_p10), %v1702_v17  ;;  %v1706_v15 = vld [vmem:[#allocation3 + $0x58] sm:$0xff] (!%p2108_p10) }
 0x382   : > { %v2413_v45 = vpop.eup (!%p2108_p10), %2412  ;;  %1739 = vperm.xlu1 (!%p2108_p10), %2409, %v2411_v32   ;;  %2424 = vrcp.f32 (!%p2108_p10), %v1701_v14 }
 0x383   : > { %v1424_v24 = vpop.f32.mrb[28].mxu1  ;;  %1729 = vperm.xlu0 (!%p2108_p10), %2408, %v2413_v45   ;;  %2426 = vrcp.f32 (!%p2108_p10), %v1704_v1  ;;  %v1668_v1 = vld [vmem:[#allocation4 + $0xa8] sm:$0xff] (!%p2108_p10) }
 0x384   : > { %v1572_v42 = vadd.f32 %v1424_v24, %v1146_v22  ;;  %v1426_v62 = vpop.f32.mrb[29].mxu1  ;;  %2428 = vrcp.f32 (!%p2108_p10), %v1703_v9  ;;  %v1708_v22 = vld [vmem:[#allocation3 + $0x68] sm:$0xff] (!%p2108_p10)  ;;  %v1670_v9 = vld [vmem:[#allocation4 + $0xb8] sm:$0xff] (!%p2108_p10) }
 0x385   : > { %v1573_v59 = vadd.f32 %v1426_v62, %v1147_v35  ;;  %v1428_v6 = vpop.f32.mrb[30].mxu1  ;;  %2430 = vrcp.f32 (!%p2108_p10), %v1706_v15  ;;  %v1707_v35 = vld [vmem:[#allocation3 + $0x60] sm:$0xff] (!%p2108_p10)  ;;  %v1709_v62 = vld [vmem:[#allocation3 + $0x70] sm:$0xff] (!%p2108_p10)  ;;  %v1666_v15 = vld [vmem:[#allocation4 + $0x98] sm:$0xff] (!%p2108_p10) }
 0x386   : > { %1621 = vst [vmem:[#allocation4 + $0x150] sm:$0xff] %v1572_v42  ;;  %v1575_v51 = vadd.f32 %v1428_v6, %v1149_v11  ;;  %v1430_v49 = vpop.f32.mrb[31].mxu1  ;;  %2432 = vrcp.f32 (!%p2108_p10), %v1705_v44  ;;  %v1710_v11 = vld [vmem:[#allocation3 + $0x78] sm:$0xff] (!%p2108_p10) }
 0x387   : > { %1622 = vst [vmem:[#allocation4 + $0x158] sm:$0xff] %v1573_v59  ;;  %v1576_v18 = vadd.f32 %v1430_v49, %v1150_v56  ;;  %v2415_v7 = vpop.eup (!%p2108_p10), %2414  ;;  %2434 = vrcp.f32 (!%p2108_p10), %v1708_v22 }
 0x388   : > { %1624 = vst [vmem:[#allocation4 + $0x168] sm:$0xff] %v1575_v51  ;;  %v2417_v3 = vpop.eup (!%p2108_p10), %2416  ;;  %1744 = vperm.xlu1 (!%p2108_p10), %2409, %v2415_v7   ;;  %2436 = vrcp.f32 (!%p2108_p10), %v1707_v35  ;;  %v1669_v7 = vld [vmem:[#allocation4 + $0xb0] sm:$0xff] (!%p2108_p10) }
 0x389   : > { %1625 = vst [vmem:[#allocation4 + $0x170] sm:$0xff] %v1576_v18  ;;  %v2419_v37 = vpop.eup (!%p2108_p10), %2418  ;;  %1734 = vperm.xlu0 (!%p2108_p10), %2408, %v2417_v3   ;;  %2438 = vrcp.f32 (!%p2108_p10), %v1710_v11  ;;  %v1665_v3 = vld [vmem:[#allocation4 + $0x90] sm:$0xff] (!%p2108_p10) }
 0x38a   : > { %v2421_v36 = vpop.eup (!%p2108_p10), %2420  ;;  %2440 = vrcp.f32 (!%p2108_p10), %v1709_v62  ;;  %v1674_v62 = vld [vmem:[#allocation4 + $0xd8] sm:$0xff] (!%p2108_p10) }
 0x38b   : > { %v2201_v19 = vpop.f32.mrb[32].mxu1  ;;  %v2423_v27 = vpop.eup (!%p2108_p10), %2422 }
 0x38c   : > { %v1562_v50 = vadd.f32 %v2201_v19, %v1136_v58  ;;  %v1499_v53 = vpop.f32.mrb[33].mxu1  ;;  %1754 = vperm.xlu1 (!%p2108_p10), %2409, %v2419_v37   ;;  %v2425_v24 = vpop.eup (!%p2108_p10), %2424  ;;  %v1655_v58 = vld [vmem:[#allocation4 + $0x40] sm:$0xff] (!%p2108_p10)  ;;  %v1648_v19 = vld [vmem:[#allocation4 + $0x8] sm:$0xff] (!%p2108_p10) }
 0x38d   : > { %v1556_v20 = vadd.f32 %v1499_v53, %v1130_v60  ;;  %v2202_v25 = vpop.f32.mrb[34].mxu1  ;;  %1749 = vperm.xlu0 (!%p2108_p10), %2408, %v2421_v36   ;;  %v2427_v42 = vpop.eup (!%p2108_p10), %2426  ;;  %v1649_v60 = vld [vmem:[#allocation4 + $0x10] sm:$0xff] (!%p2108_p10)  ;;  %v1667_v37 = vld [vmem:[#allocation4 + $0xa0] sm:$0xff] (!%p2108_p10) }
 0x38e   : > { %1611 = vst.msk [vmem:[#allocation4 + $0x100] sm:$0xff] %vm1580_vm4, %v1562_v50  ;;  %v1565_v26 = vadd.f32 %v2202_v25, %v1139_v54  ;;  %v1502_v52 = vpop.f32.mrb[35].mxu1  ;;  %v2429_v56 = vpop.eup (!%p2108_p10), %2428 }
 0x38f   : > { %1605 = vst.msk [vmem:[#allocation4 + $0xd0] sm:$0xff] %vm1580_vm4, %v1556_v20  ;;  %v1559_v30 = vadd.f32 %v1502_v52, %v1133_v41  ;;  %v2431_v59 = vpop.eup (!%p2108_p10), %2430 }
 0x390   : > { %1614 = vst.msk [vmem:[#allocation4 + $0x118] sm:$0xff] %vm1580_vm4, %v1565_v26  ;;  %1764 = vperm.xlu1 (!%p2108_p10), %2409, %v2423_v27   ;;  %v2433_v6 = vpop.eup (!%p2108_p10), %2432 }
 0x391   : > { %1608 = vst.msk [vmem:[#allocation4 + $0xe8] sm:$0xff] %vm1580_vm4, %v1559_v30  ;;  %1759 = vperm.xlu0 (!%p2108_p10), %2408, %v2425_v24   ;;  %v2435_v51 = vpop.eup (!%p2108_p10), %2434  ;;  %v1657_v30 = vld [vmem:[#allocation4 + $0x50] sm:$0xff] (!%p2108_p10) }
 0x392   : > { %v2437_v49 = vpop.eup (!%p2108_p10), %2436 }
 0x393   : > { %v2205_v12 = vpop.f32.mrb[36].mxu1  ;;  %1646 = sbr.rel (%p2108_p10) target bundleno = 1061 (0x425), region = 40  ;;  %v2439_v18 = vpop.eup (!%p2108_p10), %2438 }
 0x394   : > { %v1574_v47 = vadd.f32 %v2205_v12, %v1148_v55  ;;  %v1515_v28 = vpop.f32.mrb[37].mxu1  ;;  %1774 = vperm.xlu1 (!%p2108_p10), %2409, %v2427_v42   ;;  %v2441_v0 = vpop.eup (!%p2108_p10), %2440  ;;  %v1651_v55 = vld [vmem:[#allocation4 + $0x20] sm:$0xff] (!%p2108_p10) }
 0x395   : > { %v1568_v31 = vadd.f32 %v1515_v28, %v1142_v40  ;;  %v2206_v8 = vpop.f32.mrb[38].mxu1  ;;  %1769 = vperm.xlu0 (!%p2108_p10), %2408, %v2429_v56   ;;  %v1675_v56 = vld [vmem:[#allocation4 + $0xe0] sm:$0xff] (!%p2108_p10) }
 0x396   : > { %1623 = vst.msk [vmem:[#allocation4 + $0x160] sm:$0xff] %vm1580_vm4, %v1574_v47  ;;  %v1577_v10 = vadd.f32 %v2206_v8, %v1151_v43  ;;  %v1518_v57 = vpop.f32.mrb[39].mxu1 }
 0x397   : > { %1617 = vst.msk [vmem:[#allocation4 + $0x130] sm:$0xff] %vm1580_vm4, %v1568_v31  ;;  %v1571_v2 = vadd.f32 %v1518_v57, %v1145_v39  ;;  %v1663_v57 = vld [vmem:[#allocation4 + $0x80] sm:$0xff] (!%p2108_p10) }
 0x398   : > { %1626 = vst.msk [vmem:[#allocation4 + $0x178] sm:$0xff] %vm1580_vm4, %v1577_v10  ;;  %1784 = vperm.xlu1 (!%p2108_p10), %2409, %v2431_v59   ;;  %v1662_v10 = vld [vmem:[#allocation4 + $0x78] sm:$0xff] (!%p2108_p10)  ;;  %v1676_v59 = vld [vmem:[#allocation4 + $0xe8] sm:$0xff] (!%p2108_p10) }
 0x399   : > { %1620 = vst.msk [vmem:[#allocation4 + $0x148] sm:$0xff] %vm1580_vm4, %v1571_v2  ;;  %1779 = vperm.xlu0 (!%p2108_p10), %2408, %v2433_v6   ;;  %v1664_v2 = vld [vmem:[#allocation4 + $0x88] sm:$0xff] (!%p2108_p10)  ;;  %v1671_v6 = vld [vmem:[#allocation4 + $0xc0] sm:$0xff] (!%p2108_p10) }
 0x39c   : > { %1794 = vperm.xlu1 %2409, %v2435_v51   ;;  %v1672_v51 = vld [vmem:[#allocation4 + $0xc8] sm:$0xff] }
 0x39d   : > { %1789 = vperm.xlu0 %2408, %v2437_v49   ;;  %v1673_v49 = vld [vmem:[#allocation4 + $0xd0] sm:$0xff] }
 0x3a0   : > { %1804 = vperm.xlu1 %2409, %v2439_v18  }
 0x3a1   : > { %1799 = vperm.xlu0 %2408, %v2441_v0  }
 0x401   : > { %v1740_v50 = vpop.permute.xlu1 %1739 }
 0x402   : > { %v1813_v53 = vmul.f32 %v1740_v50, %v1653_v29  ;;  %v1814_v54 = vmul.f32 %v1740_v50, %v1654_v34  ;;  %v1815_v20 = vmul.f32 %v1740_v50, %v1655_v58  ;;  %v1730_v25 = vpop.permute.xlu0 %1729  ;;  %v1680_v50 = vld [vmem:[#allocation4 + $0x108] sm:$0xff] }
 0x403   : > { %v1807_v41 = vmul.f32 %v1730_v25, %v1647_v63  ;;  %v1808_v26 = vmul.f32 %v1730_v25, %v1648_v19  ;;  %v1809_v52 = vmul.f32 %v1730_v25, %v1649_v60  ;;  %v1678_v25 = vld [vmem:[#allocation4 + $0xf8] sm:$0xff] }
 0x404   : > { %1861 = vst [vmem:[%s2580_s20 + $0x30] sm:$0xff] %v1813_v53  ;;  %1862 = vst [vmem:[%s2580_s20 + $0x38] sm:$0xff] %v1814_v54  ;;  %v1681_v53 = vld [vmem:[#allocation4 + $0x110] sm:$0xff]  ;;  %v1682_v54 = vld [vmem:[#allocation4 + $0x118] sm:$0xff] }
 0x405   : > { %1863 = vst.msk [vmem:[%s2580_s20 + $0x40] sm:$0xff] %vm1580_vm4, %v1815_v20  ;;  %1855 = vst [vmem:[%s2580_s20] sm:$0xff] %v1807_v41  ;;  %v1677_v20 = vld [vmem:[#allocation4 + $0xf0] sm:$0xff]  ;;  %v1679_v41 = vld [vmem:[#allocation4 + $0x100] sm:$0xff] }
 0x406   : > { %1856 = vst [vmem:[%s2580_s20 + $0x8] sm:$0xff] %v1808_v26  ;;  %1857 = vst.msk [vmem:[%s2580_s20 + $0x10] sm:$0xff] %vm1580_vm4, %v1809_v52 }
 0x407   : > { %v1745_v12 = vpop.permute.xlu1 %1744 }
 0x408   : > { %v1816_v40 = vmul.f32 %v1745_v12, %v1656_v5  ;;  %v1817_v43 = vmul.f32 %v1745_v12, %v1657_v30  ;;  %v1818_v47 = vmul.f32 %v1745_v12, %v1658_v23  ;;  %v1735_v28 = vpop.permute.xlu0 %1734  ;;  %v1686_v12 = vld [vmem:[#allocation4 + $0x138] sm:$0xff] }
 0x409   : > { %v1810_v31 = vmul.f32 %v1735_v28, %v1650_v38  ;;  %v1811_v8 = vmul.f32 %v1735_v28, %v1651_v55  ;;  %v1812_v39 = vmul.f32 %v1735_v28, %v1652_v21  ;;  %v1684_v28 = vld [vmem:[#allocation4 + $0x128] sm:$0xff] }
 0x40a   : > { %1864 = vst [vmem:[%s2580_s20 + $0x48] sm:$0xff] %v1816_v40  ;;  %1865 = vst [vmem:[%s2580_s20 + $0x50] sm:$0xff] %v1817_v43  ;;  %v1687_v40 = vld [vmem:[#allocation4 + $0x140] sm:$0xff]  ;;  %v1688_v43 = vld [vmem:[#allocation4 + $0x148] sm:$0xff] }
 0x40b   : > { %1866 = vst.msk [vmem:[%s2580_s20 + $0x58] sm:$0xff] %vm1580_vm4, %v1818_v47  ;;  %1858 = vst [vmem:[%s2580_s20 + $0x18] sm:$0xff] %v1810_v31  ;;  %v1755_v33 = vpop.permute.xlu1 %1754  ;;  %v1683_v47 = vld [vmem:[#allocation4 + $0x120] sm:$0xff]  ;;  %v1685_v31 = vld [vmem:[#allocation4 + $0x130] sm:$0xff] }
 0x40c   : > { %1859 = vst [vmem:[%s2580_s20 + $0x20] sm:$0xff] %v1811_v8  ;;  %1860 = vst.msk [vmem:[%s2580_s20 + $0x28] sm:$0xff] %vm1580_vm4, %v1812_v39  ;;  %v1822_v16 = vmul.f32 %v1755_v33, %v1662_v10  ;;  %v1823_v13 = vmul.f32 %v1755_v33, %v1663_v57  ;;  %v1824_v46 = vmul.f32 %v1755_v33, %v1664_v2  ;;  %v1750_v17 = vpop.permute.xlu0 %1749  ;;  %v1692_v33 = vld [vmem:[#allocation4 + $0x168] sm:$0xff] }
 0x40d   : > { %v1819_v14 = vmul.f32 %v1750_v17, %v1659_v48  ;;  %v1820_v32 = vmul.f32 %v1750_v17, %v1660_v61  ;;  %v1821_v45 = vmul.f32 %v1750_v17, %v1661_v4  ;;  %v1690_v17 = vld [vmem:[#allocation4 + $0x158] sm:$0xff] }
 0x40e   : > { %1870 = vst [vmem:[%s2580_s20 + $0x78] sm:$0xff] %v1822_v16  ;;  %1871 = vst [vmem:[%s2580_s20 + $0x80] sm:$0xff] %v1823_v13  ;;  %v1693_v16 = vld [vmem:[#allocation4 + $0x170] sm:$0xff]  ;;  %v1694_v13 = vld [vmem:[#allocation4 + $0x178] sm:$0xff] }
 0x40f   : > { %1872 = vst.msk [vmem:[%s2580_s20 + $0x88] sm:$0xff] %vm1580_vm4, %v1824_v46  ;;  %1867 = vst [vmem:[%s2580_s20 + $0x60] sm:$0xff] %v1819_v14  ;;  %v1765_v44 = vpop.permute.xlu1 %1764  ;;  %v1689_v46 = vld [vmem:[#allocation4 + $0x150] sm:$0xff]  ;;  %v1691_v14 = vld [vmem:[#allocation4 + $0x160] sm:$0xff] }
 0x410   : > { %1868 = vst [vmem:[%s2580_s20 + $0x68] sm:$0xff] %v1820_v32  ;;  %1869 = vst.msk [vmem:[%s2580_s20 + $0x70] sm:$0xff] %vm1580_vm4, %v1821_v45  ;;  %v1828_v36 = vmul.f32 %v1765_v44, %v1668_v1  ;;  %v1829_v22 = vmul.f32 %v1765_v44, %v1669_v7  ;;  %v1830_v27 = vmul.f32 %v1765_v44, %v1670_v9  ;;  %v1760_v35 = vpop.permute.xlu0 %1759 }
 0x411   : > { %v1825_v24 = vmul.f32 %v1760_v35, %v1665_v3  ;;  %v1826_v11 = vmul.f32 %v1760_v35, %v1666_v15  ;;  %v1827_v42 = vmul.f32 %v1760_v35, %v1667_v37 }
 0x412   : > { %1876 = vst [vmem:[%s2580_s20 + $0xa8] sm:$0xff] %v1828_v36  ;;  %1877 = vst [vmem:[%s2580_s20 + $0xb0] sm:$0xff] %v1829_v22 }
 0x413   : > { %1878 = vst.msk [vmem:[%s2580_s20 + $0xb8] sm:$0xff] %vm1580_vm4, %v1830_v27  ;;  %1873 = vst [vmem:[%s2580_s20 + $0x90] sm:$0xff] %v1825_v24  ;;  %v1775_v18 = vpop.permute.xlu1 %1774 }
 0x414   : > { %1874 = vst [vmem:[%s2580_s20 + $0x98] sm:$0xff] %v1826_v11  ;;  %1875 = vst.msk [vmem:[%s2580_s20 + $0xa0] sm:$0xff] %vm1580_vm4, %v1827_v42  ;;  %v1834_v0 = vmul.f32 %v1775_v18, %v1674_v62  ;;  %v1835_v29 = vmul.f32 %v1775_v18, %v1675_v56  ;;  %v1836_v34 = vmul.f32 %v1775_v18, %v1676_v59  ;;  %v1770_v58 = vpop.permute.xlu0 %1769 }
 0x415   : > { %v1831_v63 = vmul.f32 %v1770_v58, %v1671_v6  ;;  %v1832_v19 = vmul.f32 %v1770_v58, %v1672_v51  ;;  %v1833_v60 = vmul.f32 %v1770_v58, %v1673_v49 }
 0x416   : > { %1882 = vst [vmem:[%s2580_s20 + $0xd8] sm:$0xff] %v1834_v0  ;;  %1883 = vst [vmem:[%s2580_s20 + $0xe0] sm:$0xff] %v1835_v29 }
 0x417   : > { %1884 = vst.msk [vmem:[%s2580_s20 + $0xe8] sm:$0xff] %vm1580_vm4, %v1836_v34  ;;  %1879 = vst [vmem:[%s2580_s20 + $0xc0] sm:$0xff] %v1831_v63  ;;  %v1785_v26 = vpop.permute.xlu1 %1784 }
 0x418   : > { %1880 = vst [vmem:[%s2580_s20 + $0xc8] sm:$0xff] %v1832_v19  ;;  %1881 = vst.msk [vmem:[%s2580_s20 + $0xd0] sm:$0xff] %vm1580_vm4, %v1833_v60  ;;  %v1840_v52 = vmul.f32 %v1785_v26, %v1680_v50  ;;  %v1841_v5 = vmul.f32 %v1785_v26, %v1681_v53  ;;  %v1842_v30 = vmul.f32 %v1785_v26, %v1682_v54  ;;  %v1780_v23 = vpop.permute.xlu0 %1779 }
 0x419   : > { %v1837_v38 = vmul.f32 %v1780_v23, %v1677_v20  ;;  %v1838_v55 = vmul.f32 %v1780_v23, %v1678_v25  ;;  %v1839_v21 = vmul.f32 %v1780_v23, %v1679_v41 }
 0x41a   : > { %1888 = vst [vmem:[%s2580_s20 + $0x108] sm:$0xff] %v1840_v52  ;;  %1889 = vst [vmem:[%s2580_s20 + $0x110] sm:$0xff] %v1841_v5 }
 0x41b   : > { %1890 = vst.msk [vmem:[%s2580_s20 + $0x118] sm:$0xff] %vm1580_vm4, %v1842_v30  ;;  %1885 = vst [vmem:[%s2580_s20 + $0xf0] sm:$0xff] %v1837_v38  ;;  %v1795_v8 = vpop.permute.xlu1 %1794 }
 0x41c   : > { %1886 = vst [vmem:[%s2580_s20 + $0xf8] sm:$0xff] %v1838_v55  ;;  %1887 = vst.msk [vmem:[%s2580_s20 + $0x100] sm:$0xff] %vm1580_vm4, %v1839_v21  ;;  %v1846_v39 = vmul.f32 %v1795_v8, %v1686_v12  ;;  %v1847_v10 = vmul.f32 %v1795_v8, %v1687_v40  ;;  %v1848_v57 = vmul.f32 %v1795_v8, %v1688_v43  ;;  %v1790_v2 = vpop.permute.xlu0 %1789 }
 0x41d   : > { %v1843_v48 = vmul.f32 %v1790_v2, %v1683_v47  ;;  %v1844_v61 = vmul.f32 %v1790_v2, %v1684_v28  ;;  %v1845_v4 = vmul.f32 %v1790_v2, %v1685_v31 }
 0x41e   : > { %1894 = vst [vmem:[%s2580_s20 + $0x138] sm:$0xff] %v1846_v39  ;;  %1895 = vst [vmem:[%s2580_s20 + $0x140] sm:$0xff] %v1847_v10 }
 0x41f   : > { %1896 = vst.msk [vmem:[%s2580_s20 + $0x148] sm:$0xff] %vm1580_vm4, %v1848_v57  ;;  %1891 = vst [vmem:[%s2580_s20 + $0x120] sm:$0xff] %v1843_v48  ;;  %v1805_v32 = vpop.permute.xlu1 %1804 }
 0x420   : > { %1892 = vst [vmem:[%s2580_s20 + $0x128] sm:$0xff] %v1844_v61  ;;  %1893 = vst.msk [vmem:[%s2580_s20 + $0x130] sm:$0xff] %vm1580_vm4, %v1845_v4  ;;  %v1852_v45 = vmul.f32 %v1805_v32, %v1692_v33  ;;  %v1853_v1 = vmul.f32 %v1805_v32, %v1693_v16  ;;  %v1854_v7 = vmul.f32 %v1805_v32, %v1694_v13  ;;  %v1800_v9 = vpop.permute.xlu0 %1799 }
 0x421   : > { %v1849_v3 = vmul.f32 %v1800_v9, %v1689_v46  ;;  %v1850_v15 = vmul.f32 %v1800_v9, %v1690_v17  ;;  %v1851_v37 = vmul.f32 %v1800_v9, %v1691_v14 }
 0x422   : > { %1900 = vst [vmem:[%s2580_s20 + $0x168] sm:$0xff] %v1852_v45  ;;  %1901 = vst [vmem:[%s2580_s20 + $0x170] sm:$0xff] %v1853_v1 }
 0x423   : > { %1902 = vst.msk [vmem:[%s2580_s20 + $0x178] sm:$0xff] %vm1580_vm4, %v1854_v7  ;;  %1897 = vst [vmem:[%s2580_s20 + $0x150] sm:$0xff] %v1849_v3 }
 0x424   : > { %1898 = vst [vmem:[%s2580_s20 + $0x158] sm:$0xff] %v1850_v15  ;;  %1899 = vst.msk [vmem:[%s2580_s20 + $0x160] sm:$0xff] %vm1580_vm4, %v1851_v37 }
 0x425 PF: > { %s13_s18 = sadd.s32 1, %s2496_s18   ;;  %s3301_s21 = sld [smem:[#allocation5_spill]] }
 0x426   : > { %p10_p11 = scmp.ge.s32.totalorder %s13_s18, 10   ;;  %s3302_s23 = sld [smem:[#allocation6_spill]] }
 0x427   : > { %s3303_s12 = smov %s2484_s15  ;;  %s3304_s13 = smov %s2488_s16 }
 0x428   : > { %s3305_s14 = smov %s2492_s17  ;;  %s3306_s15 = smov %s3310_s19 }
 0x429   :  { %12 = sbr.rel (!%p10_p11) target bundleno = 4 (0x4), region = 76 }
 0x42b   : > { %s3307_s16 = smov %s3301_s21 }
 0x42c   : > { %s3308_s17 = smov %s3302_s23 }

// kernel: _attention_forward.7
= control target key start
LH: loop header
LB: loop body
LE: loop exit
PB: predicated region body
PF: predicated region fallthrough
CT: control target
= control target key end

     0   :  { %v2117_v1 = vmov 0   ;;  %s3015_s0 = inlined_call_operand.vmem [shape: bf16[512,288], index: 0, kind: input, shape index: {}]   ;;  %s3016_s1 = inlined_call_operand.vmem [shape: bf16[288,96], index: 1, kind: input, shape index: {}]   ;;  %s3017_s2 = inlined_call_operand.vmem [shape: f32[1,96], index: 2, kind: input, shape index: {}]   ;;  %s3018_s3 = inlined_call_operand.vmem [shape: f32[512,96], index: 3, kind: input, shape index: {}]   ;;  %s3019_s4 = inlined_call_operand.hbm [shape: f32[512,96], index: 4, kind: output, shape index: {}]  }
   0x1   :  { %v1947_v0 = vld [vmem:[%s3016_s1] sm:$0xff]   ;;  %875 = vmatprep.subr.bf16.mxu0 %v2117_v1  ;;  %1911 = vmatprep.subr.bf16.mxu1 %v2117_v1  ;;  %v1948_v2 = vld [vmem:[%s3016_s1 + $0x8] sm:$0xff]   ;;  %v1949_v3 = vld [vmem:[%s3016_s1 + $0x10] sm:$0xff]  }
   0x2   :  { %876 = vmatpush1.bf16.msra.mxu0 %v1947_v0  ;;  %1927 = vmatpush1.bf16.msra.mxu1 %v1947_v0  ;;  %v1950_v4 = vld [vmem:[%s3016_s1 + $0x18] sm:$0xff]   ;;  %v1951_v5 = vld [vmem:[%s3016_s1 + $0x20] sm:$0xff]   ;;  %v1952_v7 = vld [vmem:[%s3016_s1 + $0x28] sm:$0xff]  }
   0x3   :  { %877 = vmatprep.subr.bf16.mxu0 %v2117_v1  ;;  %1912 = vmatprep.subr.bf16.mxu1 %v2117_v1  ;;  %v1965_v6 = vld [vmem:[%s3015_s0 + $0x4] ss:$12 sps:$4 sm:$0xff]   ;;  %v1954_v10 = vld [vmem:[%s3016_s1 + $0x38] sm:$0xff]   ;;  %v1956_v12 = vld [vmem:[%s3016_s1 + $0x48] sm:$0xff]  }
   0x4   :  { %v1968_v8 = vld [vmem:[%s3015_s0 + $0x244] ss:$12 sps:$4 sm:$0xff]   ;;  %907 = vmatprep.mubr.bf16.mxu0 %v1965_v6  ;;  %v1958_v14 = vld [vmem:[%s3016_s1 + $0x58] sm:$0xff]   ;;  %v1960_v16 = vld [vmem:[%s3016_s1 + $0x68] sm:$0xff]  }
   0x5   :  { %1099 = vmatprep.mubr.bf16.mxu1 %v1968_v8  ;;  %v1953_v9 = vld [vmem:[%s3016_s1 + $0x30] sm:$0xff]   ;;  %v1955_v11 = vld [vmem:[%s3016_s1 + $0x40] sm:$0xff]   ;;  %v1962_v18 = vld [vmem:[%s3016_s1 + $0x78] sm:$0xff]  }
   0x6   :  { %878 = vmatpush1.bf16.msra.mxu0 %v1948_v2  ;;  %1928 = vmatpush1.bf16.msra.mxu1 %v1948_v2  ;;  %v1957_v13 = vld [vmem:[%s3016_s1 + $0x50] sm:$0xff]   ;;  %v1959_v15 = vld [vmem:[%s3016_s1 + $0x60] sm:$0xff]   ;;  %v1970_v22 = vld [vmem:[%s3015_s0 + $0x1c] ss:$12 sps:$4 sm:$0xff]  }
   0x7   :  { %879 = vmatprep.subr.bf16.mxu0 %v2117_v1  ;;  %1913 = vmatprep.subr.bf16.mxu1 %v2117_v1  ;;  %v1961_v17 = vld [vmem:[%s3016_s1 + $0x70] sm:$0xff]   ;;  %v1969_v19 = vld [vmem:[%s3016_s1 + $0x80] sm:$0xff]   ;;  %v1972_v23 = vld [vmem:[%s3015_s0 + $0x25c] ss:$12 sps:$4 sm:$0xff]  }
   0x8   :  { %v1963_v20 = vld [vmem:[%s3015_s0] ss:$12 sps:$4 sm:$0xff]   ;;  %v1974_v25 = vld [vmem:[%s3015_s0 + $0x18] ss:$12 sps:$4 sm:$0xff]   ;;  %v1980_v29 = vld [vmem:[%s3015_s0 + $0x30] ss:$12 sps:$4 sm:$0xff]  }
   0x9   :  { %v1966_v21 = vld [vmem:[%s3015_s0 + $0x240] ss:$12 sps:$4 sm:$0xff]   ;;  %v1975_v26 = vld [vmem:[%s3015_s0 + $0x258] ss:$12 sps:$4 sm:$0xff]   ;;  %v1981_v30 = vld [vmem:[%s3015_s0 + $0x270] ss:$12 sps:$4 sm:$0xff]  }
   0xa   :  { %880 = vmatpush1.bf16.msra.mxu0 %v1949_v3  ;;  %1929 = vmatpush1.bf16.msra.mxu1 %v1949_v3  ;;  %v1994_v24 = vld [vmem:[%s3016_s1 + $0x88] sm:$0xff]   ;;  %v1976_v27 = vld [vmem:[%s3015_s0 + $0x34] ss:$12 sps:$4 sm:$0xff]   ;;  %v1988_v35 = vld [vmem:[%s3015_s0 + $0x64] ss:$12 sps:$4 sm:$0xff]  }
   0xb   :  { %881 = vmatprep.subr.bf16.mxu0 %v2117_v1  ;;  %1914 = vmatprep.subr.bf16.mxu1 %v2117_v1  ;;  %v1978_v28 = vld [vmem:[%s3015_s0 + $0x274] ss:$12 sps:$4 sm:$0xff]   ;;  %v1982_v31 = vld [vmem:[%s3015_s0 + $0x4c] ss:$12 sps:$4 sm:$0xff]   ;;  %v1990_v36 = vld [vmem:[%s3015_s0 + $0x2a4] ss:$12 sps:$4 sm:$0xff]  }
   0xc   :  { %v1984_v32 = vld [vmem:[%s3015_s0 + $0x28c] ss:$12 sps:$4 sm:$0xff]   ;;  %v1986_v33 = vld [vmem:[%s3015_s0 + $0x48] ss:$12 sps:$4 sm:$0xff]  }
   0xd   :  { %v1987_v34 = vld [vmem:[%s3015_s0 + $0x288] ss:$12 sps:$4 sm:$0xff]  }
   0xe   :  { %882 = vmatpush1.bf16.msra.mxu0 %v1950_v4  ;;  %1930 = vmatpush1.bf16.msra.mxu1 %v1950_v4 }
   0xf   :  { %883 = vmatprep.subr.bf16.mxu0 %v2117_v1  ;;  %1915 = vmatprep.subr.bf16.mxu1 %v2117_v1 }
  0x12   :  { %884 = vmatpush1.bf16.msra.mxu0 %v1951_v5  ;;  %1931 = vmatpush1.bf16.msra.mxu1 %v1951_v5 }
  0x13   :  { %885 = vmatprep.subr.bf16.mxu0 %v2117_v1  ;;  %1916 = vmatprep.subr.bf16.mxu1 %v2117_v1 }
  0x16   :  { %886 = vmatpush1.bf16.msra.mxu0 %v1952_v7  ;;  %1932 = vmatpush1.bf16.msra.mxu1 %v1952_v7 }
  0x17   :  { %887 = vmatprep.subr.bf16.mxu0 %v2117_v1  ;;  %1917 = vmatprep.subr.bf16.mxu1 %v2117_v1 }
  0x1a   :  { %888 = vmatpush1.bf16.msra.mxu0 %v1953_v9  ;;  %1933 = vmatpush1.bf16.msra.mxu1 %v1953_v9 }
  0x1b   :  { %889 = vmatprep.subr.bf16.mxu0 %v2117_v1  ;;  %1918 = vmatprep.subr.bf16.mxu1 %v2117_v1 }
  0x1e   :  { %890 = vmatpush1.bf16.msra.mxu0 %v1954_v10  ;;  %1934 = vmatpush1.bf16.msra.mxu1 %v1954_v10 }
  0x1f   :  { %891 = vmatprep.subr.bf16.mxu0 %v2117_v1  ;;  %1919 = vmatprep.subr.bf16.mxu1 %v2117_v1 }
  0x22   :  { %892 = vmatpush1.bf16.msra.mxu0 %v1955_v11  ;;  %1935 = vmatpush1.bf16.msra.mxu1 %v1955_v11 }
  0x23   :  { %893 = vmatprep.subr.bf16.mxu0 %v2117_v1  ;;  %1920 = vmatprep.subr.bf16.mxu1 %v2117_v1 }
  0x26   :  { %894 = vmatpush1.bf16.msra.mxu0 %v1956_v12  ;;  %1936 = vmatpush1.bf16.msra.mxu1 %v1956_v12 }
  0x27   :  { %895 = vmatprep.subr.bf16.mxu0 %v2117_v1  ;;  %1921 = vmatprep.subr.bf16.mxu1 %v2117_v1 }
  0x2a   :  { %896 = vmatpush1.bf16.msra.mxu0 %v1957_v13  ;;  %1937 = vmatpush1.bf16.msra.mxu1 %v1957_v13 }
  0x2b   :  { %897 = vmatprep.subr.bf16.mxu0 %v2117_v1  ;;  %1922 = vmatprep.subr.bf16.mxu1 %v2117_v1 }
  0x2e   :  { %898 = vmatpush1.bf16.msra.mxu0 %v1958_v14  ;;  %1938 = vmatpush1.bf16.msra.mxu1 %v1958_v14 }
  0x2f   :  { %899 = vmatprep.subr.bf16.mxu0 %v2117_v1  ;;  %1923 = vmatprep.subr.bf16.mxu1 %v2117_v1 }
  0x32   :  { %900 = vmatpush1.bf16.msra.mxu0 %v1959_v15  ;;  %1939 = vmatpush1.bf16.msra.mxu1 %v1959_v15 }
  0x33   :  { %901 = vmatprep.subr.bf16.mxu0 %v2117_v1  ;;  %1924 = vmatprep.subr.bf16.mxu1 %v2117_v1 }
  0x36   :  { %902 = vmatpush1.bf16.msra.mxu0 %v1960_v16  ;;  %1940 = vmatpush1.bf16.msra.mxu1 %v1960_v16 }
  0x37   :  { %903 = vmatprep.subr.bf16.mxu0 %v2117_v1  ;;  %1925 = vmatprep.subr.bf16.mxu1 %v2117_v1 }
  0x3a   :  { %904 = vmatpush1.bf16.msra.mxu0 %v1961_v17  ;;  %1941 = vmatpush1.bf16.msra.mxu1 %v1961_v17 }
  0x3b   :  { %905 = vmatprep.subr.bf16.mxu0 %v2117_v1  ;;  %1926 = vmatprep.subr.bf16.mxu1 %v2117_v1 }
  0x3e   :  { %906 = vmatpush1.bf16.msra.mxu0 %v1962_v18  ;;  %1942 = vmatpush1.bf16.msra.mxu1 %v1962_v18 }
  0x3f   :  { %1843 = vmatprep.subr.bf16.mxu1 %v1969_v19 }
  0x41   :  { %908 = vmatmul.mubr.bf16.vlgmr.msra.gmra.mrb[0].mxu0 %v1963_v20  ;;  %1100 = vmatmul.mubr.bf16.vlgmr.msra.gmra.mrb[0].mxu1 %v1966_v21 }
  0x42   :  { %1844 = vmatpush3.bf16.msra.mxu1 %v1969_v19  ;;  %915 = vmatprep.mubr.bf16.mxu0 %v1970_v22 }
  0x43   :  { %1107 = vmatprep.mubr.bf16.mxu1 %v1972_v23  ;;  %1845 = vmatprep.subr.bf16.mxu1 %v1994_v24 }
  0x46   :  { %1846 = vmatpush3.bf16.msra.mxu1 %v1994_v24 }
  0x49   :  { %916 = vmatmul.mubr.bf16.gmra.mrb[4].mxu0 %v1974_v25  ;;  %1108 = vmatmul.mubr.bf16.gmra.mrb[4].mxu1 %v1975_v26 }
  0x4a   :  { %923 = vmatprep.mubr.bf16.mxu0 %v1976_v27  ;;  %1115 = vmatprep.mubr.bf16.mxu1 %v1978_v28 }
  0x51   :  { %924 = vmatmul.mubr.bf16.gmra.mrb[8].mxu0 %v1980_v29  ;;  %1116 = vmatmul.mubr.bf16.gmra.mrb[8].mxu1 %v1981_v30 }
  0x52   :  { %931 = vmatprep.mubr.bf16.mxu0 %v1982_v31  ;;  %1123 = vmatprep.mubr.bf16.mxu1 %v1984_v32 }
  0x53   :  { %9 = vsyncpa [#allocation3], 0  ;;  %v1992_v37 = vld [vmem:[%s3015_s0 + $0x60] ss:$12 sps:$4 sm:$0xff]   ;;  %v1995_v39 = vld [vmem:[%s3015_s0 + $0x7c] ss:$12 sps:$4 sm:$0xff]  }
  0x54   :  { %v1993_v38 = vld [vmem:[%s3015_s0 + $0x2a0] ss:$12 sps:$4 sm:$0xff]   ;;  %v1997_v40 = vld [vmem:[%s3015_s0 + $0x2bc] ss:$12 sps:$4 sm:$0xff]   ;;  %v1999_v41 = vld [vmem:[%s3015_s0 + $0x78] ss:$12 sps:$4 sm:$0xff]  }
  0x55   :  { %v2000_v42 = vld [vmem:[%s3015_s0 + $0x2b8] ss:$12 sps:$4 sm:$0xff]   ;;  %v2001_v43 = vld [vmem:[%s3015_s0 + $0x94] ss:$12 sps:$4 sm:$0xff]   ;;  %v2005_v45 = vld [vmem:[%s3015_s0 + $0x90] ss:$12 sps:$4 sm:$0xff]  }
  0x56   :  { %v2003_v44 = vld [vmem:[%s3015_s0 + $0x2d4] ss:$12 sps:$4 sm:$0xff]   ;;  %v2006_v46 = vld [vmem:[%s3015_s0 + $0x2d0] ss:$12 sps:$4 sm:$0xff]   ;;  %v2007_v47 = vld [vmem:[%s3015_s0 + $0xac] ss:$12 sps:$4 sm:$0xff]  }
  0x57   :  { %v2009_v48 = vld [vmem:[%s3015_s0 + $0x2ec] ss:$12 sps:$4 sm:$0xff]   ;;  %v2011_v49 = vld [vmem:[%s3015_s0 + $0xa8] ss:$12 sps:$4 sm:$0xff]   ;;  %v2013_v51 = vld [vmem:[%s3015_s0 + $0xc4] ss:$12 sps:$4 sm:$0xff]  }
  0x58   :  { %v2012_v50 = vld [vmem:[%s3015_s0 + $0x2e8] ss:$12 sps:$4 sm:$0xff]   ;;  %vm778_vm0 = vcmask 261120   ;;  %v2016_v53 = vld [vmem:[%s3015_s0 + $0xc0] ss:$12 sps:$4 sm:$0xff]   ;;  %vm1581_vm1 = vcmask 785408  }
  0x59   :  { %932 = vmatmul.mubr.bf16.gmra.mrb[12].mxu0 %v1986_v33  ;;  %1124 = vmatmul.mubr.bf16.gmra.mrb[12].mxu1 %v1987_v34  ;;  %v2015_v52 = vld [vmem:[%s3015_s0 + $0x8] ss:$12 sps:$4 sm:$0xff]   ;;  %v2017_v54 = vld [vmem:[%s3015_s0 + $0x20] ss:$12 sps:$4 sm:$0xff]   ;;  %v2020_v56 = vld [vmem:[%s3015_s0 + $0x38] ss:$12 sps:$4 sm:$0xff]  }
  0x5a   :  { %939 = vmatprep.mubr.bf16.mxu0 %v1988_v35  ;;  %1131 = vmatprep.mubr.bf16.mxu1 %v1990_v36  ;;  %v2018_v55 = vld [vmem:[%s3015_s0 + $0xdc] ss:$12 sps:$4 sm:$0xff]   ;;  %v2021_v57 = vld [vmem:[%s3015_s0 + $0xd8] ss:$12 sps:$4 sm:$0xff]   ;;  %v2023_v59 = vld [vmem:[%s3015_s0 + $0xf4] ss:$12 sps:$4 sm:$0xff]  }
  0x5b   :  { %v2022_v58 = vld [vmem:[%s3015_s0 + $0x50] ss:$12 sps:$4 sm:$0xff]   ;;  %v2025_v60 = vld [vmem:[%s3015_s0 + $0x68] ss:$12 sps:$4 sm:$0xff]   ;;  %v2027_v62 = vld [vmem:[%s3015_s0 + $0x80] ss:$12 sps:$4 sm:$0xff]  }
  0x5c   :  { %v2026_v61 = vld [vmem:[%s3015_s0 + $0xf0] ss:$12 sps:$4 sm:$0xff]   ;;  %v2028_v63 = vld [vmem:[%s3015_s0 + $0x10c] ss:$12 sps:$4 sm:$0xff]   ;;  %v2031_v1 = vld [vmem:[%s3015_s0 + $0x108] ss:$12 sps:$4 sm:$0xff]  }
  0x5d   :  { %v2030_v0 = vld [vmem:[%s3015_s0 + $0x98] ss:$12 sps:$4 sm:$0xff]   ;;  %v2032_v2 = vld [vmem:[%s3015_s0 + $0xb0] ss:$12 sps:$4 sm:$0xff]   ;;  %v2035_v4 = vld [vmem:[%s3015_s0 + $0xc8] ss:$12 sps:$4 sm:$0xff]  }
  0x5e   :  { %v2033_v3 = vld [vmem:[%s3015_s0 + $0x124] ss:$12 sps:$4 sm:$0xff]   ;;  %v2036_v5 = vld [vmem:[%s3015_s0 + $0x120] ss:$12 sps:$4 sm:$0xff]   ;;  %v2038_v7 = vld [vmem:[%s3015_s0 + $0x13c] ss:$12 sps:$4 sm:$0xff]  }
  0x5f   :  { %v2037_v6 = vld [vmem:[%s3015_s0 + $0xe0] ss:$12 sps:$4 sm:$0xff]   ;;  %v2040_v8 = vld [vmem:[%s3015_s0 + $0xf8] ss:$12 sps:$4 sm:$0xff]   ;;  %v2042_v10 = vld [vmem:[%s3015_s0 + $0x110] ss:$12 sps:$4 sm:$0xff]  }
  0x60   :  { %v2041_v9 = vld [vmem:[%s3015_s0 + $0x138] ss:$12 sps:$4 sm:$0xff]   ;;  %v2043_v11 = vld [vmem:[%s3015_s0 + $0x154] ss:$12 sps:$4 sm:$0xff]   ;;  %v2046_v13 = vld [vmem:[%s3015_s0 + $0x150] ss:$12 sps:$4 sm:$0xff]  }
  0x61   :  { %940 = vmatmul.mubr.bf16.gmra.mrb[16].mxu0 %v1992_v37  ;;  %1132 = vmatmul.mubr.bf16.gmra.mrb[16].mxu1 %v1993_v38  ;;  %v2045_v12 = vld [vmem:[%s3015_s0 + $0x128] ss:$12 sps:$4 sm:$0xff]   ;;  %v2047_v14 = vld [vmem:[%s3015_s0 + $0x140] ss:$12 sps:$4 sm:$0xff]   ;;  %v2050_v16 = vld [vmem:[%s3015_s0 + $0x158] ss:$12 sps:$4 sm:$0xff]  }
  0x62   :  { %947 = vmatprep.mubr.bf16.mxu0 %v1995_v39  ;;  %1139 = vmatprep.mubr.bf16.mxu1 %v1997_v40  ;;  %v2048_v15 = vld [vmem:[%s3015_s0 + $0x16c] ss:$12 sps:$4 sm:$0xff]   ;;  %v2051_v17 = vld [vmem:[%s3015_s0 + $0x168] ss:$12 sps:$4 sm:$0xff]   ;;  %v2052_v18 = vld [vmem:[%s3015_s0 + $0x170] ss:$12 sps:$4 sm:$0xff]  }
  0x63   :  { %v2053_v19 = vld [vmem:[%s3015_s0 + $0x184] ss:$12 sps:$4 sm:$0xff]   ;;  %v2055_v20 = vld [vmem:[%s3015_s0 + $0x188] ss:$12 sps:$4 sm:$0xff]   ;;  %v2056_v21 = vld [vmem:[%s3015_s0 + $0x180] ss:$12 sps:$4 sm:$0xff]  }
  0x64   :  { %v2057_v22 = vld [vmem:[%s3015_s0 + $0x1a0] ss:$12 sps:$4 sm:$0xff]   ;;  %v2058_v23 = vld [vmem:[%s3015_s0 + $0x19c] ss:$12 sps:$4 sm:$0xff]   ;;  %v2060_v24 = vld [vmem:[%s3015_s0 + $0x1b8] ss:$12 sps:$4 sm:$0xff]  }
  0x65   :  { %v2061_v25 = vld [vmem:[%s3015_s0 + $0x198] ss:$12 sps:$4 sm:$0xff]   ;;  %v2062_v26 = vld [vmem:[%s3015_s0 + $0x1d0] ss:$12 sps:$4 sm:$0xff]   ;;  %v2063_v27 = vld [vmem:[%s3015_s0 + $0x1b4] ss:$12 sps:$4 sm:$0xff]  }
  0x66   :  { %v2065_v28 = vld [vmem:[%s3015_s0 + $0x1e8] ss:$12 sps:$4 sm:$0xff]   ;;  %v2066_v29 = vld [vmem:[%s3015_s0 + $0x1b0] ss:$12 sps:$4 sm:$0xff]   ;;  %v2067_v30 = vld [vmem:[%s3015_s0 + $0x200] ss:$12 sps:$4 sm:$0xff]  }
  0x67   :  { %v2068_v31 = vld [vmem:[%s3015_s0 + $0x1cc] ss:$12 sps:$4 sm:$0xff]   ;;  %v2071_v33 = vld [vmem:[%s3015_s0 + $0x1c8] ss:$12 sps:$4 sm:$0xff]   ;;  %v2072_v34 = vld [vmem:[%s3015_s0 + $0x230] ss:$12 sps:$4 sm:$0xff]  }
  0x68   :  { %v2070_v32 = vld [vmem:[%s3015_s0 + $0x218] ss:$12 sps:$4 sm:$0xff]   ;;  %v2075_v36 = vld [vmem:[%s3015_s0 + $0x248] ss:$12 sps:$4 sm:$0xff]   ;;  %v2076_v37 = vld [vmem:[%s3015_s0 + $0x1e0] ss:$12 sps:$4 sm:$0xff]  }
  0x69   :  { %948 = vmatmul.mubr.bf16.gmra.mrb[20].mxu0 %v1999_v41  ;;  %1140 = vmatmul.mubr.bf16.gmra.mrb[20].mxu1 %v2000_v42  ;;  %v2073_v35 = vld [vmem:[%s3015_s0 + $0x1e4] ss:$12 sps:$4 sm:$0xff]   ;;  %v2077_v38 = vld [vmem:[%s3015_s0 + $0x260] ss:$12 sps:$4 sm:$0xff]   ;;  %v2078_v39 = vld [vmem:[%s3015_s0 + $0x1fc] ss:$12 sps:$4 sm:$0xff]  }
  0x6a   :  { %955 = vmatprep.mubr.bf16.mxu0 %v2001_v43  ;;  %1147 = vmatprep.mubr.bf16.mxu1 %v2003_v44  ;;  %v2080_v40 = vld [vmem:[%s3015_s0 + $0x278] ss:$12 sps:$4 sm:$0xff]   ;;  %v2082_v42 = vld [vmem:[%s3015_s0 + $0x290] ss:$12 sps:$4 sm:$0xff]   ;;  %v2083_v43 = vld [vmem:[%s3015_s0 + $0x214] ss:$12 sps:$4 sm:$0xff]  }
  0x6b   :  { %v2081_v41 = vld [vmem:[%s3015_s0 + $0x1f8] ss:$12 sps:$4 sm:$0xff]   ;;  %v2085_v44 = vld [vmem:[%s3015_s0 + $0x2a8] ss:$12 sps:$4 sm:$0xff]   ;;  %s2118_s12 = smov [#allocation2]  }
  0x6c   :  { %s1651_s13 = sshll.u32 %s2118_s12, 4  ;;  %s1652_s13 = int_to_ptr.vmem [resolvable:$true] %s1651_s13 }
  0x6d   :  { %p2098_p1 = scmp.lt.s32.totalorder %s1652_s13, %s1652_s13 }
  0x71   :  { %956 = vmatmul.mubr.bf16.gmra.mrb[24].mxu0 %v2005_v45  ;;  %1148 = vmatmul.mubr.bf16.gmra.mrb[24].mxu1 %v2006_v46  ;;  %v2086_v45 = vld [vmem:[%s3015_s0 + $0x210] ss:$12 sps:$4 sm:$0xff]   ;;  %v2087_v46 = vld [vmem:[%s3015_s0 + $0x2c0] ss:$12 sps:$4 sm:$0xff]  }
  0x72   :  { %963 = vmatprep.mubr.bf16.mxu0 %v2007_v47  ;;  %1155 = vmatprep.mubr.bf16.mxu1 %v2009_v48  ;;  %v2088_v47 = vld [vmem:[%s3015_s0 + $0x22c] ss:$12 sps:$4 sm:$0xff]  }
  0x73   :  { %v2090_v48 = vld [vmem:[%s3015_s0 + $0x2d8] ss:$12 sps:$4 sm:$0xff]  }
  0x79   :  { %964 = vmatmul.mubr.bf16.gmra.mrb[28].mxu0 %v2011_v49  ;;  %1156 = vmatmul.mubr.bf16.gmra.mrb[28].mxu1 %v2012_v50  ;;  %v2091_v49 = vld [vmem:[%s3015_s0 + $0x228] ss:$12 sps:$4 sm:$0xff]   ;;  %v2092_v50 = vld [vmem:[%s3015_s0 + $0x2f0] ss:$12 sps:$4 sm:$0xff]  }
  0x7a   :  { %971 = vmatprep.mubr.bf16.mxu0 %v2013_v51  ;;  %1847 = vmatprep.mubr.msk.bf16.mxu1 %vm778_vm0, %v2015_v52 }
  0x81   :  { %972 = vmatmul.mubr.bf16.gmra.mrb[32].mxu0 %v2016_v53  ;;  %1848 = vmatmul.mubr.msk.bf16.vlgmr.msra.gmra.mrb[32].mxu1 %vm778_vm0, %v2017_v54 }
  0x82   :  { %979 = vmatprep.mubr.bf16.mxu0 %v2018_v55  ;;  %1851 = vmatprep.mubr.msk.bf16.mxu1 %vm778_vm0, %v2020_v56 }
  0x89   :  { %980 = vmatmul.mubr.bf16.gmra.mrb[36].mxu0 %v2021_v57  ;;  %1852 = vmatmul.mubr.msk.bf16.gmra.mrb[36].mxu1 %vm778_vm0, %v2022_v58 }
  0x8a   :  { %987 = vmatprep.mubr.bf16.mxu0 %v2023_v59  ;;  %1855 = vmatprep.mubr.msk.bf16.mxu1 %vm778_vm0, %v2025_v60 }
  0x91   :  { %988 = vmatmul.mubr.bf16.gmra.mrb[40].mxu0 %v2026_v61  ;;  %1856 = vmatmul.mubr.msk.bf16.gmra.mrb[40].mxu1 %vm778_vm0, %v2027_v62 }
  0x92   :  { %995 = vmatprep.mubr.bf16.mxu0 %v2028_v63  ;;  %1859 = vmatprep.mubr.msk.bf16.mxu1 %vm778_vm0, %v2030_v0 }
  0x99   :  { %996 = vmatmul.mubr.bf16.gmra.mrb[44].mxu0 %v2031_v1  ;;  %1860 = vmatmul.mubr.msk.bf16.gmra.mrb[44].mxu1 %vm778_vm0, %v2032_v2 }
  0x9a   :  { %1003 = vmatprep.mubr.bf16.mxu0 %v2033_v3  ;;  %1863 = vmatprep.mubr.msk.bf16.mxu1 %vm778_vm0, %v2035_v4 }
  0xa1   :  { %1004 = vmatmul.mubr.bf16.gmra.mrb[48].mxu0 %v2036_v5  ;;  %1864 = vmatmul.mubr.msk.bf16.gmra.mrb[48].mxu1 %vm778_vm0, %v2037_v6 }
  0xa2   :  { %1011 = vmatprep.mubr.bf16.mxu0 %v2038_v7  ;;  %1867 = vmatprep.mubr.msk.bf16.mxu1 %vm778_vm0, %v2040_v8 }
  0xa9   :  { %1012 = vmatmul.mubr.bf16.gmra.mrb[52].mxu0 %v2041_v9  ;;  %1868 = vmatmul.mubr.msk.bf16.gmra.mrb[52].mxu1 %vm778_vm0, %v2042_v10 }
  0xaa   :  { %1019 = vmatprep.mubr.bf16.mxu0 %v2043_v11  ;;  %1871 = vmatprep.mubr.msk.bf16.mxu1 %vm778_vm0, %v2045_v12 }
  0xb1   :  { %1020 = vmatmul.mubr.bf16.gmra.mrb[56].mxu0 %v2046_v13  ;;  %1872 = vmatmul.mubr.msk.bf16.gmra.mrb[56].mxu1 %vm778_vm0, %v2047_v14 }
  0xb2   :  { %1027 = vmatprep.mubr.bf16.mxu0 %v2048_v15  ;;  %1875 = vmatprep.mubr.msk.bf16.mxu1 %vm778_vm0, %v2050_v16 }
  0xb9   :  { %1028 = vmatmul.mubr.bf16.gmra.mrb[60].mxu0 %v2051_v17  ;;  %1876 = vmatmul.mubr.msk.bf16.gmra.mrb[60].mxu1 %vm778_vm0, %v2052_v18 }
  0xba   :  { %1035 = vmatprep.mubr.bf16.mxu0 %v2053_v19  ;;  %1879 = vmatprep.mubr.msk.bf16.mxu1 %vm778_vm0, %v2055_v20 }
  0xc1   :  { %1036 = vmatmul.mubr.bf16.gmra.mrb[64].mxu0 %v2056_v21  ;;  %1880 = vmatmul.mubr.msk.bf16.gmra.mrb[64].mxu1 %vm778_vm0, %v2057_v22 }
  0xc2   :  { %1043 = vmatprep.mubr.bf16.mxu0 %v2058_v23  ;;  %1883 = vmatprep.mubr.msk.bf16.mxu1 %vm778_vm0, %v2060_v24 }
  0xc9   :  { %1044 = vmatmul.mubr.bf16.gmra.mrb[68].mxu0 %v2061_v25  ;;  %1884 = vmatmul.mubr.msk.bf16.gmra.mrb[68].mxu1 %vm778_vm0, %v2062_v26 }
  0xca   :  { %1051 = vmatprep.mubr.bf16.mxu0 %v2063_v27  ;;  %1887 = vmatprep.mubr.msk.bf16.mxu1 %vm778_vm0, %v2065_v28 }
  0xd1   :  { %1052 = vmatmul.mubr.bf16.gmra.mrb[72].mxu0 %v2066_v29  ;;  %1888 = vmatmul.mubr.msk.bf16.gmra.mrb[72].mxu1 %vm778_vm0, %v2067_v30 }
  0xd2   :  { %1059 = vmatprep.mubr.bf16.mxu0 %v2068_v31  ;;  %1891 = vmatprep.mubr.msk.bf16.mxu1 %vm778_vm0, %v2070_v32 }
  0xd9   :  { %1060 = vmatmul.mubr.bf16.gmra.mrb[76].mxu0 %v2071_v33  ;;  %1892 = vmatmul.mubr.msk.bf16.gmra.mrb[76].mxu1 %vm778_vm0, %v2072_v34 }
  0xda   :  { %1067 = vmatprep.mubr.bf16.mxu0 %v2073_v35  ;;  %1895 = vmatprep.mubr.msk.bf16.mxu1 %vm778_vm0, %v2075_v36 }
  0xe1   :  { %1068 = vmatmul.mubr.bf16.gmra.mrb[80].mxu0 %v2076_v37  ;;  %1896 = vmatmul.mubr.msk.bf16.gmra.mrb[80].mxu1 %vm778_vm0, %v2077_v38 }
  0xe2   :  { %1075 = vmatprep.mubr.bf16.mxu0 %v2078_v39  ;;  %1899 = vmatprep.mubr.msk.bf16.mxu1 %vm778_vm0, %v2080_v40 }
  0xe9   :  { %1076 = vmatmul.mubr.bf16.gmra.mrb[84].mxu0 %v2081_v41  ;;  %1900 = vmatmul.mubr.msk.bf16.gmra.mrb[84].mxu1 %vm778_vm0, %v2082_v42 }
  0xea   :  { %1083 = vmatprep.mubr.bf16.mxu0 %v2083_v43  ;;  %1903 = vmatprep.mubr.msk.bf16.mxu1 %vm778_vm0, %v2085_v44 }
  0xf1   :  { %1084 = vmatmul.mubr.bf16.gmra.mrb[88].mxu0 %v2086_v45  ;;  %1904 = vmatmul.mubr.msk.bf16.gmra.mrb[88].mxu1 %vm778_vm0, %v2087_v46 }
  0xf2   :  { %1091 = vmatprep.mubr.bf16.mxu0 %v2088_v47  ;;  %1907 = vmatprep.mubr.msk.bf16.mxu1 %vm778_vm0, %v2090_v48 }
  0xf9   :  { %1092 = vmatmul.mubr.bf16.gmra.mrb[92].mxu0 %v2091_v49  ;;  %1908 = vmatmul.mubr.msk.bf16.gmra.mrb[92].mxu1 %vm778_vm0, %v2092_v50 }
 0x114   :  { %v2552_v51 = vpop.f32.mrb[0].mxu0  ;;  %v2554_v52 = vpop.f32.mrb[0].mxu1 }
 0x115   :  { %v911_v53 = vpop.f32.mrb[1].mxu0  ;;  %v1103_v54 = vpop.f32.mrb[1].mxu1 }
 0x116   :  { %v2556_v55 = vpop.f32.mrb[2].mxu0  ;;  %v2558_v56 = vpop.f32.mrb[2].mxu1  ;;  %v2615_v53 = vld [vmem:[%s3017_s2] ss:$0 sm:$0xff] }
 0x117   :  { %v914_v57 = vpop.f32.mrb[3].mxu0  ;;  %v1106_v58 = vpop.f32.mrb[3].mxu1 }
 0x118   :  { %v910_v57 = vadd.f32 %v2615_v53, %v2552_v51 }
 0x11c   :  { %v917_v59 = vpop.f32.mrb[4].mxu0  ;;  %v2560_v60 = vpop.f32.mrb[4].mxu1 }
 0x11d   :  { %v919_v61 = vpop.f32.mrb[5].mxu0  ;;  %v1111_v62 = vpop.f32.mrb[5].mxu1  ;;  %v918_v54 = vadd.f32 %v2615_v53, %v917_v59  ;;  %v913_v59 = vadd.f32 %v2615_v53, %v2556_v55 }
 0x11e   :  { %v920_v63 = vpop.f32.mrb[6].mxu0  ;;  %v2562_v0 = vpop.f32.mrb[6].mxu1  ;;  %v1455_v62 = vld [vmem:[%s3018_s3 + $0x10] sm:$0xff] }
 0x11f   :  { %v922_v1 = vpop.f32.mrb[7].mxu0  ;;  %v1114_v2 = vpop.f32.mrb[7].mxu1 }
 0x120   :  { %v921_v1 = vadd.f32 %v2615_v53, %v920_v63 }
 0x124   :  { %v2564_v3 = vpop.f32.mrb[8].mxu0  ;;  %v2566_v4 = vpop.f32.mrb[8].mxu1 }
 0x125   :  { %v927_v5 = vpop.f32.mrb[9].mxu0  ;;  %v1119_v6 = vpop.f32.mrb[9].mxu1 }
 0x126   :  { %v2568_v7 = vpop.f32.mrb[10].mxu0  ;;  %v2570_v8 = vpop.f32.mrb[10].mxu1 }
 0x127   :  { %v930_v9 = vpop.f32.mrb[11].mxu0  ;;  %v1122_v10 = vpop.f32.mrb[11].mxu1 }
 0x128   :  { %v1453_v9 = vld [vmem:[%s3018_s3] sm:$0xff] }
 0x12c   :  { %v2572_v11 = vpop.f32.mrb[12].mxu0  ;;  %v2574_v12 = vpop.f32.mrb[12].mxu1 }
 0x12d   :  { %v935_v13 = vpop.f32.mrb[13].mxu0  ;;  %v1127_v14 = vpop.f32.mrb[13].mxu1 }
 0x12e   :  { %v2576_v15 = vpop.f32.mrb[14].mxu0  ;;  %v2578_v16 = vpop.f32.mrb[14].mxu1  ;;  %v1456_v14 = vld [vmem:[%s3018_s3 + $0x18] sm:$0xff] }
 0x12f   :  { %v938_v17 = vpop.f32.mrb[15].mxu0  ;;  %v1130_v18 = vpop.f32.mrb[15].mxu1 }
 0x134   :  { %v2580_v19 = vpop.f32.mrb[16].mxu0  ;;  %v2582_v20 = vpop.f32.mrb[16].mxu1 }
 0x135   :  { %v943_v21 = vpop.f32.mrb[17].mxu0  ;;  %v1135_v22 = vpop.f32.mrb[17].mxu1 }
 0x136   :  { %v2584_v23 = vpop.f32.mrb[18].mxu0  ;;  %v2586_v24 = vpop.f32.mrb[18].mxu1  ;;  %v1454_v22 = vld [vmem:[%s3018_s3 + $0x8] sm:$0xff] }
 0x137   :  { %v946_v25 = vpop.f32.mrb[19].mxu0  ;;  %v1138_v26 = vpop.f32.mrb[19].mxu1 }
 0x13c   :  { %v2588_v27 = vpop.f32.mrb[20].mxu0  ;;  %v2590_v28 = vpop.f32.mrb[20].mxu1 }
 0x13d   :  { %v951_v29 = vpop.f32.mrb[21].mxu0  ;;  %v1143_v30 = vpop.f32.mrb[21].mxu1 }
 0x13e   :  { %v2592_v31 = vpop.f32.mrb[22].mxu0  ;;  %v2594_v32 = vpop.f32.mrb[22].mxu1  ;;  %v934_v30 = vadd.f32 %v2615_v53, %v2572_v11 }
 0x13f   :  { %v954_v33 = vpop.f32.mrb[23].mxu0  ;;  %v1146_v34 = vpop.f32.mrb[23].mxu1 }
 0x140   :  { %v926_v33 = vadd.f32 %v2615_v53, %v2564_v3  ;;  %v929_v3 = vadd.f32 %v2615_v53, %v2568_v7 }
 0x144   :  { %v2596_v35 = vpop.f32.mrb[24].mxu0  ;;  %v2598_v36 = vpop.f32.mrb[24].mxu1 }
 0x145   :  { %v959_v37 = vpop.f32.mrb[25].mxu0  ;;  %v1151_v38 = vpop.f32.mrb[25].mxu1 }
 0x146   :  { %v2600_v39 = vpop.f32.mrb[26].mxu0  ;;  %v2602_v40 = vpop.f32.mrb[26].mxu1  ;;  %v1459_v38 = vld [vmem:[%s3018_s3 + $0x30] sm:$0xff] }
 0x147   :  { %v962_v41 = vpop.f32.mrb[27].mxu0  ;;  %v1154_v42 = vpop.f32.mrb[27].mxu1 }
 0x148   :  { %v937_v41 = vadd.f32 %v2615_v53, %v2576_v15 }
 0x14c   :  { %v2604_v43 = vpop.f32.mrb[28].mxu0  ;;  %v2606_v44 = vpop.f32.mrb[28].mxu1 }
 0x14d   :  { %v967_v45 = vpop.f32.mrb[29].mxu0  ;;  %v1159_v46 = vpop.f32.mrb[29].mxu1 }
 0x14e   :  { %v2608_v47 = vpop.f32.mrb[30].mxu0  ;;  %v2610_v48 = vpop.f32.mrb[30].mxu1  ;;  %v1457_v46 = vld [vmem:[%s3018_s3 + $0x20] sm:$0xff] }
 0x14f   :  { %v970_v49 = vpop.f32.mrb[31].mxu0  ;;  %v1162_v50 = vpop.f32.mrb[31].mxu1 }
 0x154   :  { %v2620_v58 = vpop.f32.mrb[32].mxu0  ;;  %v1849_v61 = vpop.f32.mrb[32].mxu1 }
 0x155   :  { %v1207_v2 = vadd.f32 %v1849_v61, %v918_v54  ;;  %v975_v5 = vpop.f32.mrb[33].mxu0  ;;  %v1198_v6 = vpop.f32.mrb[33].mxu1 }
 0x156   :  { %v1199_v51 = vadd.f32 %v1198_v6, %v910_v57  ;;  %v2631_v10 = vpop.f32.mrb[34].mxu0  ;;  %v1850_v13 = vpop.f32.mrb[34].mxu1  ;;  %v1460_v57 = vld [vmem:[%s3018_s3 + $0x38] sm:$0xff] }
 0x157   :  { %v1519_v63 = vadd.f32 %v1455_v62, %v1207_v2  ;;  %v1210_v17 = vadd.f32 %v1850_v13, %v921_v1  ;;  %v978_v18 = vpop.f32.mrb[35].mxu0  ;;  %v1201_v21 = vpop.f32.mrb[35].mxu1  ;;  %v1458_v2 = vld [vmem:[%s3018_s3 + $0x28] sm:$0xff] }
 0x158   :  { %v1517_v25 = vadd.f32 %v1453_v9, %v1199_v51  ;;  %v1202_v26 = vadd.f32 %v1201_v21, %v913_v59  ;;  %v950_v59 = vadd.f32 %v2615_v53, %v2588_v27  ;;  %v942_v51 = vadd.f32 %v2615_v53, %v2580_v19 }
 0x159   :  { %1584 = vst.msk [vmem:[#allocation2 + $0x10] sm:$0xff] %vm1581_vm1, %v1519_v63  ;;  %v1520_v55 = vadd.f32 %v1456_v14, %v1210_v17  ;;  %v1463_v63 = vld [vmem:[%s3018_s3 + $0x50] sm:$0xff]  ;;  %v953_v17 = vadd.f32 %v2615_v53, %v2592_v31  ;;  %v945_v19 = vadd.f32 %v2615_v53, %v2584_v23 }
 0x15a   :  { %1582 = vst.msk [vmem:[#allocation2] sm:$0xff] %vm1581_vm1, %v1517_v25  ;;  %v1518_v29 = vadd.f32 %v1454_v22, %v1202_v26  ;;  %v1461_v22 = vld [vmem:[%s3018_s3 + $0x40] sm:$0xff] }
 0x15b   :  { %1585 = vst.msk [vmem:[#allocation2 + $0x18] sm:$0xff] %vm1581_vm1, %v1520_v55 }
 0x15c   :  { %1583 = vst.msk [vmem:[#allocation2 + $0x8] sm:$0xff] %vm1581_vm1, %v1518_v29  ;;  %v2647_v34 = vpop.f32.mrb[36].mxu0  ;;  %v1853_v37 = vpop.f32.mrb[36].mxu1  ;;  %v1464_v29 = vld [vmem:[%s3018_s3 + $0x58] sm:$0xff] }
 0x15d   :  { %v1223_v42 = vadd.f32 %v1853_v37, %v934_v30  ;;  %v983_v45 = vpop.f32.mrb[37].mxu0  ;;  %v1214_v11 = vpop.f32.mrb[37].mxu1 }
 0x15e   :  { %v1215_v49 = vadd.f32 %v1214_v11, %v926_v33  ;;  %v2659_v50 = vpop.f32.mrb[38].mxu0  ;;  %v1854_v54 = vpop.f32.mrb[38].mxu1  ;;  %v966_v11 = vadd.f32 %v2615_v53, %v2604_v43  ;;  %v1465_v43 = vld [vmem:[%s3018_s3 + $0x60] sm:$0xff] }
 0x15f   :  { %v1523_v61 = vadd.f32 %v1459_v38, %v1223_v42  ;;  %v1226_v15 = vadd.f32 %v1854_v54, %v937_v41  ;;  %v986_v62 = vpop.f32.mrb[39].mxu0  ;;  %v1217_v1 = vpop.f32.mrb[39].mxu1  ;;  %v1462_v38 = vld [vmem:[%s3018_s3 + $0x48] sm:$0xff]  ;;  %v1467_v54 = vld [vmem:[%s3018_s3 + $0x70] sm:$0xff] }
 0x160   :  { %v1521_v5 = vadd.f32 %v1457_v46, %v1215_v49  ;;  %v1218_v6 = vadd.f32 %v1217_v1, %v929_v3  ;;  %v958_v46 = vadd.f32 %v2615_v53, %v2596_v35  ;;  %v961_v35 = vadd.f32 %v2615_v53, %v2600_v39 }
 0x161   :  { %1588 = vst.msk [vmem:[#allocation2 + $0x30] sm:$0xff] %vm1581_vm1, %v1523_v61  ;;  %v1524_v7 = vadd.f32 %v1460_v57, %v1226_v15  ;;  %v969_v57 = vadd.f32 %v2615_v53, %v2608_v47 }
 0x162   :  { %1586 = vst.msk [vmem:[#allocation2 + $0x20] sm:$0xff] %vm1581_vm1, %v1521_v5  ;;  %v1522_v9 = vadd.f32 %v1458_v2, %v1218_v6  ;;  %v1468_v6 = vld [vmem:[%s3018_s3 + $0x78] sm:$0xff] }
 0x163   :  { %1589 = vst.msk [vmem:[#allocation2 + $0x38] sm:$0xff] %vm1581_vm1, %v1524_v7 }
 0x164   :  { %1587 = vst.msk [vmem:[#allocation2 + $0x28] sm:$0xff] %vm1581_vm1, %v1522_v9  ;;  %v2675_v13 = vpop.f32.mrb[40].mxu0  ;;  %v1857_v14 = vpop.f32.mrb[40].mxu1 }
 0x165   :  { %v1239_v18 = vadd.f32 %v1857_v14, %v950_v59  ;;  %v991_v21 = vpop.f32.mrb[41].mxu0  ;;  %v1230_v27 = vpop.f32.mrb[41].mxu1 }
 0x166   :  { %v1231_v25 = vadd.f32 %v1230_v27, %v942_v51  ;;  %v2687_v26 = vpop.f32.mrb[42].mxu0  ;;  %v1858_v55 = vpop.f32.mrb[42].mxu1  ;;  %v1466_v51 = vld [vmem:[%s3018_s3 + $0x68] sm:$0xff]  ;;  %v974_v21 = vadd.f32 %v2615_v53, %v2620_v58  ;;  %v977_v58 = vadd.f32 %v2615_v53, %v2631_v10 }
 0x167   :  { %v1527_v30 = vadd.f32 %v1463_v63, %v1239_v18  ;;  %v1242_v31 = vadd.f32 %v1858_v55, %v953_v17  ;;  %v994_v33 = vpop.f32.mrb[43].mxu0  ;;  %v1233_v37 = vpop.f32.mrb[43].mxu1  ;;  %v982_v18 = vadd.f32 %v2615_v53, %v2647_v34  ;;  %v1469_v34 = vld [vmem:[%s3018_s3 + $0x80] sm:$0xff] }
 0x168   :  { %v1525_v41 = vadd.f32 %v1461_v22, %v1231_v25  ;;  %v1234_v42 = vadd.f32 %v1233_v37, %v945_v19  ;;  %v1471_v19 = vld [vmem:[%s3018_s3 + $0x90] sm:$0xff]  ;;  %v985_v25 = vadd.f32 %v2615_v53, %v2659_v50 }
 0x169   :  { %1592 = vst.msk [vmem:[#allocation2 + $0x50] sm:$0xff] %vm1581_vm1, %v1527_v30  ;;  %v1528_v23 = vadd.f32 %v1464_v29, %v1242_v31 }
 0x16a   :  { %1590 = vst.msk [vmem:[#allocation2 + $0x40] sm:$0xff] %vm1581_vm1, %v1525_v41  ;;  %v1526_v45 = vadd.f32 %v1462_v38, %v1234_v42  ;;  %v1472_v38 = vld [vmem:[%s3018_s3 + $0x98] sm:$0xff] }
 0x16b   :  { %1593 = vst.msk [vmem:[#allocation2 + $0x58] sm:$0xff] %vm1581_vm1, %v1528_v23 }
 0x16c   :  { %1591 = vst.msk [vmem:[#allocation2 + $0x48] sm:$0xff] %vm1581_vm1, %v1526_v45  ;;  %v997_v3 = vpop.f32.mrb[44].mxu0  ;;  %v1861_v49 = vpop.f32.mrb[44].mxu1  ;;  %v1470_v45 = vld [vmem:[%s3018_s3 + $0x88] sm:$0xff] }
 0x16d   :  { %v1255_v61 = vadd.f32 %v1861_v49, %v966_v11  ;;  %v999_v15 = vpop.f32.mrb[45].mxu0  ;;  %v1246_v62 = vpop.f32.mrb[45].mxu1 }
 0x16e   :  { %v1247_v1 = vadd.f32 %v1246_v62, %v958_v46  ;;  %v1000_v2 = vpop.f32.mrb[46].mxu0  ;;  %v1862_v5 = vpop.f32.mrb[46].mxu1  ;;  %v1475_v62 = vld [vmem:[%s3018_s3 + $0xb0] sm:$0xff] }
 0x16f   :  { %v1531_v7 = vadd.f32 %v1467_v54, %v1255_v61  ;;  %v1258_v9 = vadd.f32 %v1862_v5, %v969_v57  ;;  %v1002_v47 = vpop.f32.mrb[47].mxu0  ;;  %v1249_v59 = vpop.f32.mrb[47].mxu1  ;;  %v998_v54 = vadd.f32 %v2615_v53, %v997_v3  ;;  %v990_v57 = vadd.f32 %v2615_v53, %v2675_v13  ;;  %v1473_v3 = vld [vmem:[%s3018_s3 + $0xa0] sm:$0xff] }
 0x170   :  { %v1529_v14 = vadd.f32 %v1465_v43, %v1247_v1  ;;  %v1250_v63 = vadd.f32 %v1249_v59, %v961_v35  ;;  %v1001_v43 = vadd.f32 %v2615_v53, %v1000_v2  ;;  %v993_v13 = vadd.f32 %v2615_v53, %v2687_v26  ;;  %v1476_v47 = vld [vmem:[%s3018_s3 + $0xb8] sm:$0xff] }
 0x171   :  { %1596 = vst.msk [vmem:[#allocation2 + $0x70] sm:$0xff] %vm1581_vm1, %v1531_v7  ;;  %v1532_v39 = vadd.f32 %v1468_v6, %v1258_v9 }
 0x172   :  { %1594 = vst.msk [vmem:[#allocation2 + $0x60] sm:$0xff] %vm1581_vm1, %v1529_v14  ;;  %v1530_v17 = vadd.f32 %v1466_v51, %v1250_v63  ;;  %v1474_v63 = vld [vmem:[%s3018_s3 + $0xa8] sm:$0xff] }
 0x173   :  { %1597 = vst.msk [vmem:[#allocation2 + $0x78] sm:$0xff] %vm1581_vm1, %v1532_v39 }
 0x174   :  { %1595 = vst.msk [vmem:[#allocation2 + $0x68] sm:$0xff] %vm1581_vm1, %v1530_v17  ;;  %v1005_v27 = vpop.f32.mrb[48].mxu0  ;;  %v1865_v22 = vpop.f32.mrb[48].mxu1 }
 0x175   :  { %v1271_v55 = vadd.f32 %v1865_v22, %v982_v18  ;;  %v1007_v29 = vpop.f32.mrb[49].mxu0  ;;  %v1262_v30 = vpop.f32.mrb[49].mxu1  ;;  %v1006_v22 = vadd.f32 %v2615_v53, %v1005_v27 }
 0x176   :  { %v1263_v31 = vadd.f32 %v1262_v30, %v974_v21  ;;  %v1008_v33 = vpop.f32.mrb[50].mxu0  ;;  %v1866_v37 = vpop.f32.mrb[50].mxu1 }
 0x177   :  { %v1535_v41 = vadd.f32 %v1471_v19, %v1271_v55  ;;  %v1274_v42 = vadd.f32 %v1866_v37, %v985_v25  ;;  %v1010_v50 = vpop.f32.mrb[51].mxu0  ;;  %v1265_v23 = vpop.f32.mrb[51].mxu1  ;;  %v1479_v55 = vld [vmem:[%s3018_s3 + $0xd0] sm:$0xff]  ;;  %v1009_v37 = vadd.f32 %v2615_v53, %v1008_v33 }
 0x178   :  { %v1533_v11 = vadd.f32 %v1469_v34, %v1263_v31  ;;  %v1266_v46 = vadd.f32 %v1265_v23, %v977_v58  ;;  %v1477_v31 = vld [vmem:[%s3018_s3 + $0xc0] sm:$0xff] }
 0x179   :  { %1600 = vst.msk [vmem:[#allocation2 + $0x90] sm:$0xff] %vm1581_vm1, %v1535_v41  ;;  %v1536_v10 = vadd.f32 %v1472_v38, %v1274_v42  ;;  %v1480_v42 = vld [vmem:[%s3018_s3 + $0xd8] sm:$0xff] }
 0x17a   :  { %1598 = vst.msk [vmem:[#allocation2 + $0x80] sm:$0xff] %vm1581_vm1, %v1533_v11  ;;  %v1534_v49 = vadd.f32 %v1470_v45, %v1266_v46  ;;  %v1478_v46 = vld [vmem:[%s3018_s3 + $0xc8] sm:$0xff] }
 0x17b   :  { %1601 = vst.msk [vmem:[#allocation2 + $0x98] sm:$0xff] %vm1581_vm1, %v1536_v10 }
 0x17c   :  { %1599 = vst.msk [vmem:[#allocation2 + $0x88] sm:$0xff] %vm1581_vm1, %v1534_v49  ;;  %v1013_v61 = vpop.f32.mrb[52].mxu0  ;;  %v1869_v15 = vpop.f32.mrb[52].mxu1 }
 0x17d   :  { %v1287_v35 = vadd.f32 %v1869_v15, %v998_v54  ;;  %v1015_v1 = vpop.f32.mrb[53].mxu0  ;;  %v1278_v5 = vpop.f32.mrb[53].mxu1  ;;  %v1014_v21 = vadd.f32 %v2615_v53, %v1013_v61 }
 0x17e   :  { %v1279_v6 = vadd.f32 %v1278_v5, %v990_v57  ;;  %v1016_v7 = vpop.f32.mrb[54].mxu0  ;;  %v1870_v9 = vpop.f32.mrb[54].mxu1  ;;  %v1481_v1 = vld [vmem:[%s3018_s3 + $0xe0] sm:$0xff] }
 0x17f   :  { %v1539_v59 = vadd.f32 %v1475_v62, %v1287_v35  ;;  %v1290_v51 = vadd.f32 %v1870_v9, %v1001_v43  ;;  %v1018_v2 = vpop.f32.mrb[55].mxu0  ;;  %v1281_v14 = vpop.f32.mrb[55].mxu1  ;;  %v1017_v29 = vadd.f32 %v2615_v53, %v1016_v7 }
 0x180   :  { %v1537_v39 = vadd.f32 %v1473_v3, %v1279_v6  ;;  %v1282_v17 = vadd.f32 %v1281_v14, %v993_v13  ;;  %v1483_v3 = vld [vmem:[%s3018_s3 + $0xf0] sm:$0xff]  ;;  %v1482_v2 = vld [vmem:[%s3018_s3 + $0xe8] sm:$0xff] }
 0x181   :  { %1604 = vst.msk [vmem:[#allocation2 + $0xb0] sm:$0xff] %vm1581_vm1, %v1539_v59  ;;  %v1540_v26 = vadd.f32 %v1476_v47, %v1290_v51 }
 0x182   :  { %1602 = vst.msk [vmem:[#allocation2 + $0xa0] sm:$0xff] %vm1581_vm1, %v1537_v39  ;;  %v1538_v18 = vadd.f32 %v1474_v63, %v1282_v17  ;;  %v1484_v63 = vld [vmem:[%s3018_s3 + $0xf8] sm:$0xff] }
 0x183   :  { %1605 = vst.msk [vmem:[#allocation2 + $0xb8] sm:$0xff] %vm1581_vm1, %v1540_v26 }
 0x184   :  { %1603 = vst.msk [vmem:[#allocation2 + $0xa8] sm:$0xff] %vm1581_vm1, %v1538_v18  ;;  %v1021_v19 = vpop.f32.mrb[56].mxu0  ;;  %v1873_v25 = vpop.f32.mrb[56].mxu1 }
 0x185   :  { %v1303_v30 = vadd.f32 %v1873_v25, %v1014_v21  ;;  %v1023_v34 = vpop.f32.mrb[57].mxu0  ;;  %v1294_v58 = vpop.f32.mrb[57].mxu1  ;;  %v1022_v57 = vadd.f32 %v2615_v53, %v1021_v19 }
 0x186   :  { %v1295_v27 = vadd.f32 %v1294_v58, %v1006_v22  ;;  %v1024_v38 = vpop.f32.mrb[58].mxu0  ;;  %v1874_v41 = vpop.f32.mrb[58].mxu1 }
 0x187   :  { %v1543_v50 = vadd.f32 %v1479_v55, %v1303_v30  ;;  %v1306_v23 = vadd.f32 %v1874_v41, %v1017_v29  ;;  %v1026_v45 = vpop.f32.mrb[59].mxu0  ;;  %v1297_v11 = vpop.f32.mrb[59].mxu1  ;;  %v1025_v5 = vadd.f32 %v2615_v53, %v1024_v38  ;;  %v1485_v30 = vld [vmem:[%s3018_s3 + $0x100] sm:$0xff]  ;;  %v1486_v41 = vld [vmem:[%s3018_s3 + $0x108] sm:$0xff] }
 0x188   :  { %v1541_v10 = vadd.f32 %v1477_v31, %v1295_v27  ;;  %v1298_v49 = vadd.f32 %v1297_v11, %v1009_v37 }
 0x189   :  { %1608 = vst.msk [vmem:[#allocation2 + $0xd0] sm:$0xff] %vm1581_vm1, %v1543_v50  ;;  %v1544_v33 = vadd.f32 %v1480_v42, %v1306_v23 }
 0x18a   :  { %1606 = vst.msk [vmem:[#allocation2 + $0xc0] sm:$0xff] %vm1581_vm1, %v1541_v10  ;;  %v1542_v54 = vadd.f32 %v1478_v46, %v1298_v49 }
 0x18b   :  { %1609 = vst.msk [vmem:[#allocation2 + $0xd8] sm:$0xff] %vm1581_vm1, %v1544_v33  ;;  %v1487_v33 = vld [vmem:[%s3018_s3 + $0x110] sm:$0xff] }
 0x18c   :  { %1607 = vst.msk [vmem:[#allocation2 + $0xc8] sm:$0xff] %vm1581_vm1, %v1542_v54  ;;  %v1029_v61 = vpop.f32.mrb[60].mxu0  ;;  %v1877_v15 = vpop.f32.mrb[60].mxu1 }
 0x18d   :  { %v1030_v62 = vadd.f32 %v2615_v53, %v1029_v61  ;;  %v1031_v43 = vpop.f32.mrb[61].mxu0  ;;  %v1310_v35 = vpop.f32.mrb[61].mxu1 }
 0x18e   :  { %v1311_v13 = vadd.f32 %v1310_v35, %v1022_v57  ;;  %v1032_v6 = vpop.f32.mrb[62].mxu0  ;;  %v1878_v7 = vpop.f32.mrb[62].mxu1  ;;  %v1488_v35 = vld [vmem:[%s3018_s3 + $0x118] sm:$0xff] }
 0x18f   :  { %v1319_v9 = vadd.f32 %v1877_v15, %v1030_v62  ;;  %v1033_v47 = vadd.f32 %v2615_v53, %v1032_v6  ;;  %v1034_v59 = vpop.f32.mrb[63].mxu0  ;;  %v1313_v51 = vpop.f32.mrb[63].mxu1 }
 0x190   :  { %v1545_v14 = vadd.f32 %v1481_v1, %v1311_v13  ;;  %v1314_v39 = vadd.f32 %v1313_v51, %v1025_v5  ;;  %v1489_v59 = vld [vmem:[%s3018_s3 + $0x120] sm:$0xff] }
 0x191   :  { %v1547_v17 = vadd.f32 %v1483_v3, %v1319_v9  ;;  %v1322_v26 = vadd.f32 %v1878_v7, %v1033_v47 }
 0x192   :  { %1610 = vst.msk [vmem:[#allocation2 + $0xe0] sm:$0xff] %vm1581_vm1, %v1545_v14  ;;  %v1546_v18 = vadd.f32 %v1482_v2, %v1314_v39 }
 0x193   :  { %1612 = vst.msk [vmem:[#allocation2 + $0xf0] sm:$0xff] %vm1581_vm1, %v1547_v17  ;;  %v1548_v21 = vadd.f32 %v1484_v63, %v1322_v26  ;;  %v1490_v26 = vld [vmem:[%s3018_s3 + $0x128] sm:$0xff] }
 0x194   :  { %1611 = vst.msk [vmem:[#allocation2 + $0xe8] sm:$0xff] %vm1581_vm1, %v1546_v18  ;;  %v1037_v22 = vpop.f32.mrb[64].mxu0  ;;  %v1881_v19 = vpop.f32.mrb[64].mxu1 }
 0x195   :  { %1613 = vst.msk [vmem:[#allocation2 + $0xf8] sm:$0xff] %vm1581_vm1, %v1548_v21  ;;  %v1038_v25 = vadd.f32 %v2615_v53, %v1037_v22  ;;  %v1039_v55 = vpop.f32.mrb[65].mxu0  ;;  %v1326_v29 = vpop.f32.mrb[65].mxu1 }
 0x196   :  { %v1040_v34 = vpop.f32.mrb[66].mxu0  ;;  %v1882_v58 = vpop.f32.mrb[66].mxu1 }
 0x197   :  { %v1327_v31 = vadd.f32 %v1326_v29, %v1038_v25  ;;  %v1041_v37 = vadd.f32 %v2615_v53, %v1040_v34  ;;  %v1042_v27 = vpop.f32.mrb[67].mxu0  ;;  %v1329_v38 = vpop.f32.mrb[67].mxu1  ;;  %v1491_v34 = vld [vmem:[%s3018_s3 + $0x130] sm:$0xff] }
 0x199   :  { %v1549_v42 = vadd.f32 %v1485_v30, %v1327_v31  ;;  %v1330_v50 = vadd.f32 %v1329_v38, %v1041_v37 }
 0x19b   :  { %1614 = vst.msk [vmem:[#allocation2 + $0x100] sm:$0xff] %vm1581_vm1, %v1549_v42  ;;  %v1550_v23 = vadd.f32 %v1486_v41, %v1330_v50  ;;  %v1492_v42 = vld [vmem:[%s3018_s3 + $0x138] sm:$0xff] }
 0x19c   :  { %v1045_v45 = vpop.f32.mrb[68].mxu0  ;;  %v1885_v11 = vpop.f32.mrb[68].mxu1 }
 0x19d   :  { %1615 = vst.msk [vmem:[#allocation2 + $0x108] sm:$0xff] %vm1581_vm1, %v1550_v23  ;;  %v1046_v46 = vadd.f32 %v2615_v53, %v1045_v45  ;;  %v1047_v10 = vpop.f32.mrb[69].mxu0  ;;  %v1342_v49 = vpop.f32.mrb[69].mxu1  ;;  %v1110_v45 = vadd.f32 %v2615_v53, %v2560_v60 }
 0x19e   :  { %v1048_v54 = vpop.f32.mrb[70].mxu0  ;;  %v1886_v57 = vpop.f32.mrb[70].mxu1 }
 0x19f   :  { %v1335_v61 = vadd.f32 %v1881_v19, %v1046_v46  ;;  %v1049_v15 = vadd.f32 %v2615_v53, %v1048_v54  ;;  %v1050_v62 = vpop.f32.mrb[71].mxu0  ;;  %v1345_v43 = vpop.f32.mrb[71].mxu1  ;;  %v1113_v54 = vadd.f32 %v2615_v53, %v2562_v0 }
 0x1a0   :  { %v1105_v62 = vadd.f32 %v2615_v53, %v2558_v56  ;;  %v1502_v56 = vld [vmem:[%s3018_s3 + $0x188] sm:$0xff] }
 0x1a1   :  { %v1551_v1 = vadd.f32 %v1487_v33, %v1335_v61  ;;  %v1338_v5 = vadd.f32 %v1882_v58, %v1049_v15  ;;  %v1503_v33 = vld [vmem:[%s3018_s3 + $0x190] sm:$0xff] }
 0x1a3   :  { %1616 = vst.msk [vmem:[#allocation2 + $0x110] sm:$0xff] %vm1581_vm1, %v1551_v1  ;;  %v1552_v3 = vadd.f32 %v1488_v35, %v1338_v5  ;;  %v1504_v5 = vld [vmem:[%s3018_s3 + $0x198] sm:$0xff] }
 0x1a4   :  { %v1053_v13 = vpop.f32.mrb[72].mxu0  ;;  %v2828_v6 = vpop.f32.mrb[72].mxu1 }
 0x1a5   :  { %1617 = vst.msk [vmem:[#allocation2 + $0x118] sm:$0xff] %vm1581_vm1, %v1552_v3  ;;  %v1054_v7 = vadd.f32 %v2615_v53, %v1053_v13  ;;  %v1055_v9 = vpop.f32.mrb[73].mxu0  ;;  %v1358_v47 = vpop.f32.mrb[73].mxu1 }
 0x1a6   :  { %v1056_v51 = vpop.f32.mrb[74].mxu0  ;;  %v2835_v2 = vpop.f32.mrb[74].mxu1 }
 0x1a7   :  { %v1343_v14 = vadd.f32 %v1342_v49, %v1054_v7  ;;  %v1057_v63 = vadd.f32 %v2615_v53, %v1056_v51  ;;  %v1058_v39 = vpop.f32.mrb[75].mxu0  ;;  %v1361_v17 = vpop.f32.mrb[75].mxu1 }
 0x1a9   :  { %v1553_v18 = vadd.f32 %v1489_v59, %v1343_v14  ;;  %v1346_v21 = vadd.f32 %v1345_v43, %v1057_v63  ;;  %v1493_v43 = vld [vmem:[%s3018_s3 + $0x140] sm:$0xff]  ;;  %v1494_v63 = vld [vmem:[%s3018_s3 + $0x148] sm:$0xff] }
 0x1ab   :  { %1618 = vst.msk [vmem:[#allocation2 + $0x120] sm:$0xff] %vm1581_vm1, %v1553_v18  ;;  %v1554_v22 = vadd.f32 %v1490_v26, %v1346_v21 }
 0x1ac   :  { %v1061_v19 = vpop.f32.mrb[76].mxu0  ;;  %v2842_v25 = vpop.f32.mrb[76].mxu1 }
 0x1ad   :  { %1619 = vst.msk [vmem:[#allocation2 + $0x128] sm:$0xff] %vm1581_vm1, %v1554_v22  ;;  %v1062_v55 = vadd.f32 %v2615_v53, %v1061_v19  ;;  %v1063_v29 = vpop.f32.mrb[77].mxu0  ;;  %v2846_v30 = vpop.f32.mrb[77].mxu1  ;;  %v1126_v22 = vadd.f32 %v2615_v53, %v2574_v12 }
 0x1ae   :  { %v1064_v58 = vpop.f32.mrb[78].mxu0  ;;  %v2851_v31 = vpop.f32.mrb[78].mxu1 }
 0x1af   :  { %v1351_v37 = vadd.f32 %v1885_v11, %v1062_v55  ;;  %v1065_v27 = vadd.f32 %v2615_v53, %v1064_v58  ;;  %v1066_v38 = vpop.f32.mrb[79].mxu0  ;;  %v2854_v41 = vpop.f32.mrb[79].mxu1  ;;  %v1102_v11 = vadd.f32 %v2615_v53, %v2554_v52  ;;  %v1501_v52 = vld [vmem:[%s3018_s3 + $0x180] sm:$0xff]  ;;  %v1118_v55 = vadd.f32 %v2615_v53, %v2566_v4 }
 0x1b0   :  { %v1129_v58 = vadd.f32 %v2615_v53, %v2578_v16  ;;  %v1505_v4 = vld [vmem:[%s3018_s3 + $0x1a0] sm:$0xff] }
 0x1b1   :  { %v1555_v50 = vadd.f32 %v1491_v34, %v1351_v37  ;;  %v1354_v23 = vadd.f32 %v1886_v57, %v1065_v27 }
 0x1b3   :  { %1620 = vst.msk [vmem:[#allocation2 + $0x130] sm:$0xff] %vm1581_vm1, %v1555_v50  ;;  %v1556_v46 = vadd.f32 %v1492_v42, %v1354_v23  ;;  %v1121_v42 = vadd.f32 %v2615_v53, %v2570_v8  ;;  %v1495_v50 = vld [vmem:[%s3018_s3 + $0x150] sm:$0xff]  ;;  %v1506_v8 = vld [vmem:[%s3018_s3 + $0x1a8] sm:$0xff] }
 0x1b4   :  { %v1069_v10 = vpop.f32.mrb[80].mxu0  ;;  %v1897_v49 = vpop.f32.mrb[80].mxu1 }
 0x1b5   :  { %1621 = vst.msk [vmem:[#allocation2 + $0x138] sm:$0xff] %vm1581_vm1, %v1556_v46  ;;  %v1070_v57 = vadd.f32 %v2615_v53, %v1069_v10  ;;  %v1399_v60 = vadd.f32 %v1897_v49, %v1110_v45  ;;  %v1071_v61 = vpop.f32.mrb[81].mxu0  ;;  %v1390_v15 = vpop.f32.mrb[81].mxu1  ;;  %v1508_v46 = vld [vmem:[%s3018_s3 + $0x1b8] sm:$0xff] }
 0x1b6   :  { %v1391_v35 = vadd.f32 %v1390_v15, %v1102_v11  ;;  %v1072_v0 = vpop.f32.mrb[82].mxu0  ;;  %v1898_v1 = vpop.f32.mrb[82].mxu1  ;;  %v1496_v61 = vld [vmem:[%s3018_s3 + $0x158] sm:$0xff] }
 0x1b7   :  { %v1359_v3 = vadd.f32 %v1358_v47, %v1070_v57  ;;  %v1567_v13 = vadd.f32 %v1503_v33, %v1399_v60  ;;  %v1073_v7 = vadd.f32 %v2615_v53, %v1072_v0  ;;  %v1402_v9 = vadd.f32 %v1898_v1, %v1113_v54  ;;  %v1074_v59 = vpop.f32.mrb[83].mxu0  ;;  %v1393_v51 = vpop.f32.mrb[83].mxu1 }
 0x1b8   :  { %v1565_v14 = vadd.f32 %v1501_v52, %v1391_v35  ;;  %v1394_v39 = vadd.f32 %v1393_v51, %v1105_v62  ;;  %v1142_v35 = vadd.f32 %v2615_v53, %v2590_v28  ;;  %v1134_v1 = vadd.f32 %v2615_v53, %v2582_v20  ;;  %v1509_v20 = vld [vmem:[%s3018_s3 + $0x1c0] sm:$0xff] }
 0x1b9   :  { %v1557_v26 = vadd.f32 %v1493_v43, %v1359_v3  ;;  %1632 = vst.msk [vmem:[#allocation2 + $0x190] sm:$0xff] %vm1581_vm1, %v1567_v13  ;;  %v1362_v47 = vadd.f32 %v1361_v17, %v1073_v7  ;;  %v1568_v18 = vadd.f32 %v1504_v5, %v1402_v9  ;;  %v1507_v17 = vld [vmem:[%s3018_s3 + $0x1b0] sm:$0xff]  ;;  %v1145_v13 = vadd.f32 %v2615_v53, %v2594_v32 }
 0x1ba   :  { %1630 = vst.msk [vmem:[#allocation2 + $0x180] sm:$0xff] %vm1581_vm1, %v1565_v14  ;;  %v1566_v21 = vadd.f32 %v1502_v56, %v1394_v39  ;;  %v1137_v51 = vadd.f32 %v2615_v53, %v2586_v24  ;;  %v1497_v56 = vld [vmem:[%s3018_s3 + $0x160] sm:$0xff]  ;;  %v1512_v39 = vld [vmem:[%s3018_s3 + $0x1d8] sm:$0xff]  ;;  %v1510_v24 = vld [vmem:[%s3018_s3 + $0x1c8] sm:$0xff] }
 0x1bb   :  { %1622 = vst.msk [vmem:[#allocation2 + $0x140] sm:$0xff] %vm1581_vm1, %v1557_v26  ;;  %v1558_v19 = vadd.f32 %v1494_v63, %v1362_v47  ;;  %1633 = vst.msk [vmem:[#allocation2 + $0x198] sm:$0xff] %vm1581_vm1, %v1568_v18 }
 0x1bc   :  { %1631 = vst.msk [vmem:[#allocation2 + $0x188] sm:$0xff] %vm1581_vm1, %v1566_v21  ;;  %v1077_v29 = vpop.f32.mrb[84].mxu0  ;;  %v1901_v34 = vpop.f32.mrb[84].mxu1 }
 0x1bd   :  { %1623 = vst.msk [vmem:[#allocation2 + $0x148] sm:$0xff] %vm1581_vm1, %v1558_v19  ;;  %v1078_v12 = vadd.f32 %v2615_v53, %v1077_v29  ;;  %v1415_v37 = vadd.f32 %v1901_v34, %v1126_v22  ;;  %v1079_v27 = vpop.f32.mrb[85].mxu0  ;;  %v1406_v38 = vpop.f32.mrb[85].mxu1  ;;  %v1498_v29 = vld [vmem:[%s3018_s3 + $0x168] sm:$0xff] }
 0x1be   :  { %v1407_v23 = vadd.f32 %v1406_v38, %v1118_v55  ;;  %v1080_v16 = vpop.f32.mrb[86].mxu0  ;;  %v1902_v45 = vpop.f32.mrb[86].mxu1  ;;  %v1150_v38 = vadd.f32 %v2615_v53, %v2598_v36  ;;  %v1513_v36 = vld [vmem:[%s3018_s3 + $0x1e0] sm:$0xff] }
 0x1bf   :  { %v1367_v11 = vadd.f32 %v2828_v6, %v1078_v12  ;;  %v1571_v10 = vadd.f32 %v1507_v17, %v1415_v37  ;;  %v1081_v49 = vadd.f32 %v2615_v53, %v1080_v16  ;;  %v1418_v33 = vadd.f32 %v1902_v45, %v1129_v58  ;;  %v1082_v54 = vpop.f32.mrb[87].mxu0  ;;  %v1409_v57 = vpop.f32.mrb[87].mxu1 }
 0x1c0   :  { %v1569_v60 = vadd.f32 %v1505_v4, %v1407_v23  ;;  %v1410_v15 = vadd.f32 %v1409_v57, %v1121_v42  ;;  %v1158_v37 = vadd.f32 %v2615_v53, %v2606_v44 }
 0x1c1   :  { %v1559_v52 = vadd.f32 %v1495_v50, %v1367_v11  ;;  %1636 = vst.msk [vmem:[#allocation2 + $0x1b0] sm:$0xff] %vm1581_vm1, %v1571_v10  ;;  %v1370_v6 = vadd.f32 %v2835_v2, %v1081_v49  ;;  %v1572_v62 = vadd.f32 %v1508_v46, %v1418_v33  ;;  %v1511_v2 = vld [vmem:[%s3018_s3 + $0x1d0] sm:$0xff]  ;;  %v1161_v50 = vadd.f32 %v2615_v53, %v2610_v48  ;;  %v1516_v33 = vld [vmem:[%s3018_s3 + $0x1f8] sm:$0xff] }
 0x1c2   :  { %1634 = vst.msk [vmem:[#allocation2 + $0x1a0] sm:$0xff] %vm1581_vm1, %v1569_v60  ;;  %v1570_v43 = vadd.f32 %v1506_v8, %v1410_v15  ;;  %v1153_v46 = vadd.f32 %v2615_v53, %v2602_v40  ;;  %v1499_v11 = vld [vmem:[%s3018_s3 + $0x170] sm:$0xff]  ;;  %v1514_v40 = vld [vmem:[%s3018_s3 + $0x1e8] sm:$0xff] }
 0x1c3   :  { %1624 = vst.msk [vmem:[#allocation2 + $0x150] sm:$0xff] %vm1581_vm1, %v1559_v52  ;;  %v1560_v0 = vadd.f32 %v1496_v61, %v1370_v6  ;;  %1637 = vst.msk [vmem:[#allocation2 + $0x1b8] sm:$0xff] %vm1581_vm1, %v1572_v62  ;;  %v1500_v6 = vld [vmem:[%s3018_s3 + $0x178] sm:$0xff] }
 0x1c4   :  { %1635 = vst.msk [vmem:[#allocation2 + $0x1a8] sm:$0xff] %vm1581_vm1, %v1570_v43  ;;  %v1085_v5 = vpop.f32.mrb[88].mxu0  ;;  %v1905_v3 = vpop.f32.mrb[88].mxu1 }
 0x1c5   :  { %1625 = vst.msk [vmem:[#allocation2 + $0x158] sm:$0xff] %vm1581_vm1, %v1560_v0  ;;  %v1086_v28 = vadd.f32 %v2615_v53, %v1085_v5  ;;  %v1431_v7 = vadd.f32 %v1905_v3, %v1142_v35  ;;  %v1087_v9 = vpop.f32.mrb[89].mxu0  ;;  %v1422_v59 = vpop.f32.mrb[89].mxu1 }
 0x1c6   :  { %v1423_v14 = vadd.f32 %v1422_v59, %v1134_v1  ;;  %v1088_v32 = vpop.f32.mrb[90].mxu0  ;;  %v1906_v63 = vpop.f32.mrb[90].mxu1 }
 0x1c7   :  { %v1375_v26 = vadd.f32 %v2846_v30, %v1086_v28  ;;  %v1575_v47 = vadd.f32 %v1511_v2, %v1431_v7  ;;  %v1089_v18 = vadd.f32 %v2615_v53, %v1088_v32  ;;  %v1434_v21 = vadd.f32 %v1906_v63, %v1145_v13  ;;  %v1090_v22 = vpop.f32.mrb[91].mxu0  ;;  %v1425_v19 = vpop.f32.mrb[91].mxu1 }
 0x1c8   :  { %v1573_v55 = vadd.f32 %v1509_v20, %v1423_v14  ;;  %v1426_v34 = vadd.f32 %v1425_v19, %v1137_v51 }
 0x1c9   :  { %v1561_v17 = vadd.f32 %v1497_v56, %v1375_v26  ;;  %1640 = vst.msk [vmem:[#allocation2 + $0x1d0] sm:$0xff] %vm1581_vm1, %v1575_v47  ;;  %v1378_v30 = vadd.f32 %v2854_v41, %v1089_v18  ;;  %v1576_v58 = vadd.f32 %v1512_v39, %v1434_v21  ;;  %v1515_v41 = vld [vmem:[%s3018_s3 + $0x1f0] sm:$0xff]  ;;  %s2093_s3 = scalar_lea.vmem %s1652_s13, 8192 }
 0x1ca   :  { %1638 = vst.msk [vmem:[#allocation2 + $0x1c0] sm:$0xff] %vm1581_vm1, %v1573_v55  ;;  %v1574_v12 = vadd.f32 %v1510_v24, %v1426_v34  ;;  %p2094_p0 = scmp.ne.s32.totalorder %s1652_s13, %s2093_s3  ;;  %p2099_p2 = scmp.lt.s32.totalorder %s2093_s3, %s2093_s3 }
 0x1cb   :  { %1626 = vst.msk [vmem:[#allocation2 + $0x160] sm:$0xff] %vm1581_vm1, %v1561_v17  ;;  %v1562_v27 = vadd.f32 %v1498_v29, %v1378_v30  ;;  %1641 = vst.msk [vmem:[#allocation2 + $0x1d8] sm:$0xff] %vm1581_vm1, %v1576_v58 }
 0x1cc   :  { %1639 = vst.msk [vmem:[#allocation2 + $0x1c8] sm:$0xff] %vm1581_vm1, %v1574_v12  ;;  %v1093_v4 = vpop.f32.mrb[92].mxu0  ;;  %v1909_v42 = vpop.f32.mrb[92].mxu1  ;;  %p2100_p3 = por %p2099_p2, %p2098_p1 }
 0x1cd   :  { %1627 = vst.msk [vmem:[#allocation2 + $0x168] sm:$0xff] %vm1581_vm1, %v1562_v27  ;;  %v1094_v44 = vadd.f32 %v2615_v53, %v1093_v4  ;;  %v1447_v23 = vadd.f32 %v1909_v42, %v1158_v37  ;;  %v1095_v16 = vpop.f32.mrb[93].mxu0  ;;  %v1438_v45 = vpop.f32.mrb[93].mxu1 }
 0x1ce   :  { %v1439_v10 = vadd.f32 %v1438_v45, %v1150_v38  ;;  %v1096_v48 = vpop.f32.mrb[94].mxu0  ;;  %v1910_v49 = vpop.f32.mrb[94].mxu1  ;;  %p2101_p4 = pnand %p2100_p3, %p2094_p0 }
 0x1cf   :  { %v1383_v54 = vadd.f32 %v2842_v25, %v1094_v44  ;;  %v1579_v57 = vadd.f32 %v1515_v41, %v1447_v23  ;;  %v1097_v8 = vadd.f32 %v2615_v53, %v1096_v48  ;;  %v1450_v60 = vadd.f32 %v1910_v49, %v1161_v50  ;;  %v1098_v61 = vpop.f32.mrb[95].mxu0  ;;  %v1441_v15 = vpop.f32.mrb[95].mxu1 }
 0x1d0   :  { %v1577_v52 = vadd.f32 %v1513_v36, %v1439_v10  ;;  %v1442_v62 = vadd.f32 %v1441_v15, %v1153_v46 }
 0x1d1   :  { %v1563_v43 = vadd.f32 %v1499_v11, %v1383_v54  ;;  %1644 = vst.msk [vmem:[#allocation2 + $0x1f0] sm:$0xff] %vm1581_vm1, %v1579_v57  ;;  %v1386_v53 = vadd.f32 %v2851_v31, %v1097_v8  ;;  %v1580_v25 = vadd.f32 %v1516_v33, %v1450_v60 }
 0x1d2   :  { %1642 = vst.msk [vmem:[#allocation2 + $0x1e0] sm:$0xff] %vm1581_vm1, %v1577_v52  ;;  %v1578_v35 = vadd.f32 %v1514_v40, %v1442_v62 }
 0x1d3   :  { %1628 = vst.msk [vmem:[#allocation2 + $0x170] sm:$0xff] %vm1581_vm1, %v1563_v43  ;;  %v1564_v0 = vadd.f32 %v1500_v6, %v1386_v53  ;;  %1645 = vst.msk [vmem:[#allocation2 + $0x1f8] sm:$0xff] %vm1581_vm1, %v1580_v25 }
 0x1d4   :  { %1643 = vst.msk [vmem:[#allocation2 + $0x1e8] sm:$0xff] %vm1581_vm1, %v1578_v35 }
 0x1d5   :  { %1629 = vst.msk [vmem:[#allocation2 + $0x178] sm:$0xff] %vm1581_vm1, %v1564_v0 }
 0x1d6   :  { %2104 = shalt.err (!%p2101_p4)
}
 0x1d7   :  { %s2105_s1 = scalar_lea.hbm %s3019_s4, 8192 }
 0x1d8   :  { %p2106_p5 = scmp.ne.s32.totalorder %s3019_s4, %s2105_s1  ;;  %p2109_p6 = scmp.lt.u32.totalorder %s2105_s1, %s3019_s4 }
 0x1da   :  { %p2111_p7 = pnand %p2109_p6, %p2106_p5 }
 0x1dc   :  { %2114 = shalt.err (!%p2111_p7)
}
 0x1dd   :  { %s2119_s22 = smov 128   ;;  %s2120_s23 = smov 8  }
 0x1de   :  { %1657 = dma.vmem_to_hbm [thread:$0]  %s1652_s13, 8192, %s3019_s4, [#allocation3], %s2119_s22, %s2119_s22, %s2120_s23  }
 0x1df   :  { %2115 = dma.done.wait [#allocation3], 8192  }
 0x1e0   :  { %2116 = vsyncadd [#allocation3], 4294959104 }
 0x1e1   :  { %1661 = vsyncpa [#allocation3], 1 }

</bundles_post_ra>
